<compile_context>
chip_gen: v7x
topology: tpu7x:2x2x1
jax: 0.10.0
libtpu: 0.0.40
codegen_flags: <defaults>
</compile_context>

<pallas_src>
import functools

import jax
import jax.numpy as jnp
from jax.experimental import pallas as pl
from jax.experimental.pallas import tpu as pltpu  # noqa: F401  (kept per template)

_BN_EPS = 1e-5
_CONV_LANES = 128   # conv Cout zero-padded to the full 128-lane width


# ----------------------------------------------------------------------------- helpers
def _full_spec(shape):
    # whole-array block (block_shape == array shape, so no (8,128) constraint)
    return pl.BlockSpec(shape, lambda: (0,) * len(shape))


def _round_up(n, m):
    return ((n + m - 1) // m) * m


def _batch_stats(h, n_valid):
    """Biased per-column mean/var over the first n_valid rows of h (f32)."""
    if n_valid == h.shape[0]:
        mean = jnp.mean(h, axis=0, keepdims=True)
        var = jnp.mean(jnp.square(h - mean), axis=0, keepdims=True)
    else:  # exclude zero-padded rows from the statistics
        rows = jax.lax.broadcasted_iota(jnp.int32, h.shape, 0)
        msk = (rows < n_valid).astype(jnp.float32)
        inv_cnt = 1.0 / float(n_valid)
        mean = jnp.sum(h * msk, axis=0, keepdims=True) * inv_cnt
        var = jnp.sum(jnp.square(h - mean) * msk, axis=0, keepdims=True) * inv_cnt
    return mean, var


# ----------------------------------------------------------------------------- kernels
def _conv_fused_kernel(p_ref, w_ref, b_ref, g_ref, be_ref, o_ref, *, m_valid):
    """[Mp,K]bf16 @ [K,N]bf16 (f32 acc) + bias + ReLU + BatchNorm (batch stats
    over the first m_valid rows, biased var, eps=1e-5). Output f32 [Mp,N]."""
    acc = jnp.dot(p_ref[...], w_ref[...], preferred_element_type=jnp.float32)
    h = jnp.maximum(acc + b_ref[...], 0.0)
    mean, var = _batch_stats(h, m_valid)
    inv_std = jax.lax.rsqrt(var + _BN_EPS)
    o_ref[...] = (h - mean) * inv_std * g_ref[...] + be_ref[...]


def _head_kernel(x_ref, w1_ref, b1_ref, g_ref, be_ref, w2_ref, b2_ref, o_ref,
                 *, b_valid):
    """fc1 + bias + ReLU + BatchNorm1d (stats over first b_valid rows)
    + fc2 + bias + softmax(dim=1), fully fused in one kernel."""
    h = jnp.dot(x_ref[...], w1_ref[...], preferred_element_type=jnp.float32)
    h = jnp.maximum(h + b1_ref[...], 0.0)
    mean, var = _batch_stats(h, b_valid)
    h = (h - mean) * jax.lax.rsqrt(var + _BN_EPS) * g_ref[...] + be_ref[...]
    logits = jnp.dot(h.astype(w2_ref.dtype), w2_ref[...],
                     preferred_element_type=jnp.float32) + b2_ref[...]
    m = jnp.max(logits, axis=-1, keepdims=True)
    e = jnp.exp(logits - m)
    denom = jnp.sum(e, axis=-1, keepdims=True)
    o_ref[...] = e * pl.reciprocal(denom, approx=True)


# ----------------------------------------------------------------------------- glue (im2col)
def im2col(x_nhwc, k, s):
    """x: [B, H, W, C] -> patches [B*Ho*Wo, k*k*C] (row order: kh, kw, cin)."""
    B, H, W, C = x_nhwc.shape
    Ho = (H - k) // s + 1
    Wo = (W - k) // s + 1
    cols = []
    for i in range(k):
        for j in range(k):
            cols.append(x_nhwc[:, i:i + s * Ho:s, j:j + s * Wo:s, :])  # [B,Ho,Wo,C]
    patches = jnp.stack(cols, axis=-2)                                 # [B,Ho,Wo,k*k,C]
    return patches.reshape(B * Ho * Wo, k * k * C), (B, Ho, Wo)


# ----------------------------------------------------------------------------- layer wrappers
def conv_layer_fused(x_nhwc, w, b, g, beta, *, k, s, cout):
    patches, (B, Ho, Wo) = im2col(x_nhwc, k, s)
    m = patches.shape[0]
    mp = _round_up(m, 8)                       # sublane-align the row count
    if mp != m:
        patches = jnp.pad(patches, ((0, mp - m), (0, 0)))
    patches = patches.astype(jnp.bfloat16)
    kk = patches.shape[1]
    n = w.shape[1]                             # 128 (lane-padded Cout)
    out = pl.pallas_call(
        functools.partial(_conv_fused_kernel, m_valid=m),
        out_shape=jax.ShapeDtypeStruct((mp, n), jnp.float32),
        in_specs=[_full_spec((mp, kk)), _full_spec((kk, n)),
                  _full_spec((1, n)), _full_spec((1, n)), _full_spec((1, n))],
        out_specs=_full_spec((mp, n)),
    )(patches, w, b, g, beta)
    # drop row padding and zero channel padding, restore NHWC
    return out[:m, :cout].reshape(B, Ho, Wo, cout)


def head_fused(flat, wf1, bf1, g4, be4, wf2, bf2):
    bsz, kin = flat.shape
    bp = _round_up(bsz, 8)
    if bp != bsz:
        flat = jnp.pad(flat, ((0, bp - bsz), (0, 0)))
    flat = flat.astype(jnp.bfloat16)
    hdim = wf1.shape[1]
    a = wf2.shape[1]
    out = pl.pallas_call(
        functools.partial(_head_kernel, b_valid=bsz),
        out_shape=jax.ShapeDtypeStruct((bp, a), jnp.float32),
        in_specs=[_full_spec((bp, kin)), _full_spec((kin, hdim)),
                  _full_spec((1, hdim)), _full_spec((1, hdim)), _full_spec((1, hdim)),
                  _full_spec((hdim, a)), _full_spec((1, a))],
        out_specs=_full_spec((bp, a)),
    )(flat, wf1, bf1, g4, be4, wf2, bf2)
    return out[:bsz]


# ----------------------------------------------------------------------------- params
def init_params(key, obs_size, action_size):
    ks = jax.random.split(key, 5)

    def conv_params(k, cin, cout, ksz):
        fan_in = cin * ksz * ksz
        w = jax.random.normal(k, (ksz, ksz, cin, cout), jnp.float32) / jnp.sqrt(fan_in)
        w = w.reshape(ksz * ksz * cin, cout)     # matmul layout, rows = (kh, kw, cin)
        # zero-pad Cout -> 128 lanes; pad channels stay exactly 0 through
        # bias(0)/ReLU/BN(gamma=1, beta=0) and are sliced off afterwards.
        wp = jnp.zeros((ksz * ksz * cin, _CONV_LANES), jnp.float32).at[:, :cout].set(w)
        return {
            "w": wp.astype(jnp.bfloat16),
            "b": jnp.zeros((1, _CONV_LANES), jnp.float32),
            "g": jnp.ones((1, _CONV_LANES), jnp.float32),
            "beta": jnp.zeros((1, _CONV_LANES), jnp.float32),
        }

    def fc_params(k, fin, fout):
        w = jax.random.normal(k, (fin, fout), jnp.float32) / jnp.sqrt(fin)
        return w.astype(jnp.bfloat16), jnp.zeros((1, fout), jnp.float32)

    wf1, bf1 = fc_params(ks[3], 64 * 7 * 7, 512)
    wf2, bf2 = fc_params(ks[4], 512, action_size)
    return {
        "c1": conv_params(ks[0], obs_size, 32, 8),
        "c2": conv_params(ks[1], 32, 64, 4),
        "c3": conv_params(ks[2], 64, 64, 3),
        "wf1": wf1, "bf1": bf1,
        "g4": jnp.ones((1, 512), jnp.float32),
        "be4": jnp.zeros((1, 512), jnp.float32),
        "wf2": wf2, "bf2": bf2,
    }


# ----------------------------------------------------------------------------- forward
@jax.jit
def net_forward(params, x_nchw):
    x = jnp.transpose(x_nchw, (0, 2, 3, 1)).astype(jnp.float32)   # NCHW -> NHWC
    B = x.shape[0]

    c1, c2, c3 = params["c1"], params["c2"], params["c3"]
    # conv1 (k=8,s=4) + ReLU + BN1   -- one fused pallas_call
    x = conv_layer_fused(x, c1["w"], c1["b"], c1["g"], c1["beta"], k=8, s=4, cout=32)
    # conv2 (k=4,s=2) + ReLU + BN2
    x = conv_layer_fused(x, c2["w"], c2["b"], c2["g"], c2["beta"], k=4, s=2, cout=64)
    # conv3 (k=3,s=1) + ReLU + BN3
    x = conv_layer_fused(x, c3["w"], c3["b"], c3["g"], c3["beta"], k=3, s=1, cout=64)

    # PyTorch x.view(B, -1) flattens the NCHW tensor in (C, H, W) order.
    flat = jnp.transpose(x, (0, 3, 1, 2)).reshape(B, 64 * 7 * 7)

    # fc1 + ReLU + BN4 + fc2 + softmax -- one fused pallas_call
    return head_fused(flat, params["wf1"], params["bf1"],
                      params["g4"], params["be4"],
                      params["wf2"], params["bf2"])


# ----------------------------------------------------------------------------- main
if __name__ == "__main__":
    key = jax.random.PRNGKey(0)
    k_param, k_x = jax.random.split(key)

    batch, obs_size, action_size = 2, 4, 6
    # spatial must be 84x84 so the conv stack yields 64*7*7 = fc1 input
    x = jax.random.normal(k_x, (batch, obs_size, 84, 84), dtype=jnp.float32)

    params = init_params(k_param, obs_size, action_size)
    probs = net_forward(params, x)
    probs = jax.block_until_ready(probs)

    assert probs.shape == (batch, action_size)
    assert bool(jnp.all(jnp.isfinite(probs)))
    # approx-reciprocal softmax denominator -> rows sum to 1 within ~1e-3
    assert bool(jnp.allclose(jnp.sum(probs, axis=1), 1.0, atol=1e-2))
    print("KERNEL_OK")
</pallas_src>

<mosaic_0001>
module attributes {stable_mosaic.version = 11 : i64} {
  func.func @_conv_fused_kernel(%arg0: memref<800x256xbf16, #tpu.memory_space<vmem>>, %arg1: memref<256x128xbf16, #tpu.memory_space<vmem>>, %arg2: memref<1x128xf32, #tpu.memory_space<vmem>>, %arg3: memref<1x128xf32, #tpu.memory_space<vmem>>, %arg4: memref<1x128xf32, #tpu.memory_space<vmem>>, %arg5: memref<800x128xf32, #tpu.memory_space<vmem>>) attributes {dimension_semantics = [], scalar_prefetch = 0 : i64, scratch_operands = 0 : i64, tpu.core_type = #tpu.core_type<tc>} {
    %c0 = arith.constant 0 : index
    %c0_0 = arith.constant 0 : index
    %0 = vector.load %arg0[%c0, %c0_0] : memref<800x256xbf16, #tpu.memory_space<vmem>>, vector<800x256xbf16>
    %c0_1 = arith.constant 0 : index
    %c0_2 = arith.constant 0 : index
    %1 = vector.load %arg1[%c0_1, %c0_2] : memref<256x128xbf16, #tpu.memory_space<vmem>>, vector<256x128xbf16>
    %cst = arith.constant dense<0.000000e+00> : vector<800x128xf32>
    %2 = tpu.matmul %0, %1, %cst {dimension_numbers = #tpu.dot_dimension_numbers<[1], [0], [0], [1], [0, 0, 1, 1], [], []>} : vector<800x256xbf16>, vector<256x128xbf16>, vector<800x128xf32> -> vector<800x128xf32>
    %c0_3 = arith.constant 0 : index
    %c0_4 = arith.constant 0 : index
    %3 = vector.load %arg2[%c0_3, %c0_4] : memref<1x128xf32, #tpu.memory_space<vmem>>, vector<1x128xf32>
    %4 = vector.broadcast %3 : vector<1x128xf32> to vector<800x128xf32>
    %5 = arith.addf %2, %4 : vector<800x128xf32>
    %cst_5 = arith.constant 0.000000e+00 : f32
    %6 = vector.broadcast %cst_5 : f32 to vector<800x128xf32>
    %7 = arith.maximumf %5, %6 : vector<800x128xf32>
    %cst_6 = arith.constant dense<0.000000e+00> : vector<128xf32>
    %8 = vector.multi_reduction <add>, %7, %cst_6 [0] : vector<800x128xf32> to vector<128xf32>
    %9 = vector.shape_cast %8 : vector<128xf32> to vector<1x128xf32>
    %cst_7 = arith.constant 8.000000e+02 : f32
    %10 = vector.broadcast %cst_7 : f32 to vector<1x128xf32>
    %11 = arith.divf %9, %10 : vector<1x128xf32>
    %12 = vector.broadcast %11 : vector<1x128xf32> to vector<800x128xf32>
    %13 = arith.subf %7, %12 : vector<800x128xf32>
    %14 = arith.mulf %13, %13 : vector<800x128xf32>
    %cst_8 = arith.constant dense<0.000000e+00> : vector<128xf32>
    %15 = vector.multi_reduction <add>, %14, %cst_8 [0] : vector<800x128xf32> to vector<128xf32>
    %16 = vector.shape_cast %15 : vector<128xf32> to vector<1x128xf32>
    %cst_9 = arith.constant 8.000000e+02 : f32
    %17 = vector.broadcast %cst_9 : f32 to vector<1x128xf32>
    %18 = arith.divf %16, %17 : vector<1x128xf32>
    %cst_10 = arith.constant 9.99999974E-6 : f32
    %19 = vector.broadcast %cst_10 : f32 to vector<1x128xf32>
    %20 = arith.addf %18, %19 : vector<1x128xf32>
    %21 = math.rsqrt %20 : vector<1x128xf32>
    %22 = vector.broadcast %11 : vector<1x128xf32> to vector<800x128xf32>
    %23 = arith.subf %7, %22 : vector<800x128xf32>
    %24 = vector.broadcast %21 : vector<1x128xf32> to vector<800x128xf32>
    %25 = arith.mulf %23, %24 : vector<800x128xf32>
    %c0_11 = arith.constant 0 : index
    %c0_12 = arith.constant 0 : index
    %26 = vector.load %arg3[%c0_11, %c0_12] : memref<1x128xf32, #tpu.memory_space<vmem>>, vector<1x128xf32>
    %27 = vector.broadcast %26 : vector<1x128xf32> to vector<800x128xf32>
    %28 = arith.mulf %25, %27 : vector<800x128xf32>
    %c0_13 = arith.constant 0 : index
    %c0_14 = arith.constant 0 : index
    %29 = vector.load %arg4[%c0_13, %c0_14] : memref<1x128xf32, #tpu.memory_space<vmem>>, vector<1x128xf32>
    %30 = vector.broadcast %29 : vector<1x128xf32> to vector<800x128xf32>
    %31 = arith.addf %28, %30 : vector<800x128xf32>
    %c0_15 = arith.constant 0 : index
    %c0_16 = arith.constant 0 : index
    %32 = vector.load %arg5[%c0_15, %c0_16] : memref<800x128xf32, #tpu.memory_space<vmem>>, vector<800x128xf32>
    tpu.vector_store %arg5[%c0_15, %c0_16], %31 {strides = array<i32>} : memref<800x128xf32, #tpu.memory_space<vmem>>, vector<800x128xf32>,
    return
  }
}

module attributes {stable_mosaic.version = 11 : i64} {
  func.func @_conv_fused_kernel(%arg0: memref<168x512xbf16, #tpu.memory_space<vmem>>, %arg1: memref<512x128xbf16, #tpu.memory_space<vmem>>, %arg2: memref<1x128xf32, #tpu.memory_space<vmem>>, %arg3: memref<1x128xf32, #tpu.memory_space<vmem>>, %arg4: memref<1x128xf32, #tpu.memory_space<vmem>>, %arg5: memref<168x128xf32, #tpu.memory_space<vmem>>) attributes {dimension_semantics = [], scalar_prefetch = 0 : i64, scratch_operands = 0 : i64, tpu.core_type = #tpu.core_type<tc>} {
    %c0 = arith.constant 0 : index
    %c0_0 = arith.constant 0 : index
    %0 = vector.load %arg0[%c0, %c0_0] : memref<168x512xbf16, #tpu.memory_space<vmem>>, vector<168x512xbf16>
    %c0_1 = arith.constant 0 : index
    %c0_2 = arith.constant 0 : index
    %1 = vector.load %arg1[%c0_1, %c0_2] : memref<512x128xbf16, #tpu.memory_space<vmem>>, vector<512x128xbf16>
    %cst = arith.constant dense<0.000000e+00> : vector<168x128xf32>
    %2 = tpu.matmul %0, %1, %cst {dimension_numbers = #tpu.dot_dimension_numbers<[1], [0], [0], [1], [0, 0, 1, 1], [], []>} : vector<168x512xbf16>, vector<512x128xbf16>, vector<168x128xf32> -> vector<168x128xf32>
    %c0_3 = arith.constant 0 : index
    %c0_4 = arith.constant 0 : index
    %3 = vector.load %arg2[%c0_3, %c0_4] : memref<1x128xf32, #tpu.memory_space<vmem>>, vector<1x128xf32>
    %4 = vector.broadcast %3 : vector<1x128xf32> to vector<168x128xf32>
    %5 = arith.addf %2, %4 : vector<168x128xf32>
    %cst_5 = arith.constant 0.000000e+00 : f32
    %6 = vector.broadcast %cst_5 : f32 to vector<168x128xf32>
    %7 = arith.maximumf %5, %6 : vector<168x128xf32>
    %8 = tpu.iota {dimensions = array<i32: 0>} : vector<168x128xi32>
    %c162_i32 = arith.constant 162 : i32
    %9 = vector.broadcast %c162_i32 : i32 to vector<168x128xi32>
    %10 = arith.cmpi slt, %8, %9 : vector<168x128xi32>
    %11 = arith.extui %10 : vector<168x128xi1> to vector<168x128xi32>
    %12 = arith.sitofp %11 : vector<168x128xi32> to vector<168x128xf32>
    %13 = arith.mulf %7, %12 : vector<168x128xf32>
    %cst_6 = arith.constant dense<0.000000e+00> : vector<128xf32>
    %14 = vector.multi_reduction <add>, %13, %cst_6 [0] : vector<168x128xf32> to vector<128xf32>
    %15 = vector.shape_cast %14 : vector<128xf32> to vector<1x128xf32>
    %cst_7 = arith.constant 0.00617283955 : f32
    %16 = vector.broadcast %cst_7 : f32 to vector<1x128xf32>
    %17 = arith.mulf %15, %16 : vector<1x128xf32>
    %18 = vector.broadcast %17 : vector<1x128xf32> to vector<168x128xf32>
    %19 = arith.subf %7, %18 : vector<168x128xf32>
    %20 = arith.mulf %19, %19 : vector<168x128xf32>
    %21 = arith.mulf %20, %12 : vector<168x128xf32>
    %cst_8 = arith.constant dense<0.000000e+00> : vector<128xf32>
    %22 = vector.multi_reduction <add>, %21, %cst_8 [0] : vector<168x128xf32> to vector<128xf32>
    %23 = vector.shape_cast %22 : vector<128xf32> to vector<1x128xf32>
    %cst_9 = arith.constant 0.00617283955 : f32
    %24 = vector.broadcast %cst_9 : f32 to vector<1x128xf32>
    %25 = arith.mulf %23, %24 : vector<1x128xf32>
    %cst_10 = arith.constant 9.99999974E-6 : f32
    %26 = vector.broadcast %cst_10 : f32 to vector<1x128xf32>
    %27 = arith.addf %25, %26 : vector<1x128xf32>
    %28 = math.rsqrt %27 : vector<1x128xf32>
    %29 = vector.broadcast %17 : vector<1x128xf32> to vector<168x128xf32>
    %30 = arith.subf %7, %29 : vector<168x128xf32>
    %31 = vector.broadcast %28 : vector<1x128xf32> to vector<168x128xf32>
    %32 = arith.mulf %30, %31 : vector<168x128xf32>
    %c0_11 = arith.constant 0 : index
    %c0_12 = arith.constant 0 : index
    %33 = vector.load %arg3[%c0_11, %c0_12] : memref<1x128xf32, #tpu.memory_space<vmem>>, vector<1x128xf32>
    %34 = vector.broadcast %33 : vector<1x128xf32> to vector<168x128xf32>
    %35 = arith.mulf %32, %34 : vector<168x128xf32>
    %c0_13 = arith.constant 0 : index
    %c0_14 = arith.constant 0 : index
    %36 = vector.load %arg4[%c0_13, %c0_14] : memref<1x128xf32, #tpu.memory_space<vmem>>, vector<1x128xf32>
    %37 = vector.broadcast %36 : vector<1x128xf32> to vector<168x128xf32>
    %38 = arith.addf %35, %37 : vector<168x128xf32>
    %c0_15 = arith.constant 0 : index
    %c0_16 = arith.constant 0 : index
    %39 = vector.load %arg5[%c0_15, %c0_16] : memref<168x128xf32, #tpu.memory_space<vmem>>, vector<168x128xf32>
    tpu.vector_store %arg5[%c0_15, %c0_16], %38 {strides = array<i32>} : memref<168x128xf32, #tpu.memory_space<vmem>>, vector<168x128xf32>,
    return
  }
}

module attributes {stable_mosaic.version = 11 : i64} {
  func.func @_conv_fused_kernel(%arg0: memref<104x576xbf16, #tpu.memory_space<vmem>>, %arg1: memref<576x128xbf16, #tpu.memory_space<vmem>>, %arg2: memref<1x128xf32, #tpu.memory_space<vmem>>, %arg3: memref<1x128xf32, #tpu.memory_space<vmem>>, %arg4: memref<1x128xf32, #tpu.memory_space<vmem>>, %arg5: memref<104x128xf32, #tpu.memory_space<vmem>>) attributes {dimension_semantics = [], scalar_prefetch = 0 : i64, scratch_operands = 0 : i64, tpu.core_type = #tpu.core_type<tc>} {
    %c0 = arith.constant 0 : index
    %c0_0 = arith.constant 0 : index
    %0 = vector.load %arg0[%c0, %c0_0] : memref<104x576xbf16, #tpu.memory_space<vmem>>, vector<104x576xbf16>
    %c0_1 = arith.constant 0 : index
    %c0_2 = arith.constant 0 : index
    %1 = vector.load %arg1[%c0_1, %c0_2] : memref<576x128xbf16, #tpu.memory_space<vmem>>, vector<576x128xbf16>
    %cst = arith.constant dense<0.000000e+00> : vector<104x128xf32>
    %2 = tpu.matmul %0, %1, %cst {dimension_numbers = #tpu.dot_dimension_numbers<[1], [0], [0], [1], [0, 0, 1, 1], [], []>} : vector<104x576xbf16>, vector<576x128xbf16>, vector<104x128xf32> -> vector<104x128xf32>
    %c0_3 = arith.constant 0 : index
    %c0_4 = arith.constant 0 : index
    %3 = vector.load %arg2[%c0_3, %c0_4] : memref<1x128xf32, #tpu.memory_space<vmem>>, vector<1x128xf32>
    %4 = vector.broadcast %3 : vector<1x128xf32> to vector<104x128xf32>
    %5 = arith.addf %2, %4 : vector<104x128xf32>
    %cst_5 = arith.constant 0.000000e+00 : f32
    %6 = vector.broadcast %cst_5 : f32 to vector<104x128xf32>
    %7 = arith.maximumf %5, %6 : vector<104x128xf32>
    %8 = tpu.iota {dimensions = array<i32: 0>} : vector<104x128xi32>
    %c98_i32 = arith.constant 98 : i32
    %9 = vector.broadcast %c98_i32 : i32 to vector<104x128xi32>
    %10 = arith.cmpi slt, %8, %9 : vector<104x128xi32>
    %11 = arith.extui %10 : vector<104x128xi1> to vector<104x128xi32>
    %12 = arith.sitofp %11 : vector<104x128xi32> to vector<104x128xf32>
    %13 = arith.mulf %7, %12 : vector<104x128xf32>
    %cst_6 = arith.constant dense<0.000000e+00> : vector<128xf32>
    %14 = vector.multi_reduction <add>, %13, %cst_6 [0] : vector<104x128xf32> to vector<128xf32>
    %15 = vector.shape_cast %14 : vector<128xf32> to vector<1x128xf32>
    %cst_7 = arith.constant 0.0102040814 : f32
    %16 = vector.broadcast %cst_7 : f32 to vector<1x128xf32>
    %17 = arith.mulf %15, %16 : vector<1x128xf32>
    %18 = vector.broadcast %17 : vector<1x128xf32> to vector<104x128xf32>
    %19 = arith.subf %7, %18 : vector<104x128xf32>
    %20 = arith.mulf %19, %19 : vector<104x128xf32>
    %21 = arith.mulf %20, %12 : vector<104x128xf32>
    %cst_8 = arith.constant dense<0.000000e+00> : vector<128xf32>
    %22 = vector.multi_reduction <add>, %21, %cst_8 [0] : vector<104x128xf32> to vector<128xf32>
    %23 = vector.shape_cast %22 : vector<128xf32> to vector<1x128xf32>
    %cst_9 = arith.constant 0.0102040814 : f32
    %24 = vector.broadcast %cst_9 : f32 to vector<1x128xf32>
    %25 = arith.mulf %23, %24 : vector<1x128xf32>
    %cst_10 = arith.constant 9.99999974E-6 : f32
    %26 = vector.broadcast %cst_10 : f32 to vector<1x128xf32>
    %27 = arith.addf %25, %26 : vector<1x128xf32>
    %28 = math.rsqrt %27 : vector<1x128xf32>
    %29 = vector.broadcast %17 : vector<1x128xf32> to vector<104x128xf32>
    %30 = arith.subf %7, %29 : vector<104x128xf32>
    %31 = vector.broadcast %28 : vector<1x128xf32> to vector<104x128xf32>
    %32 = arith.mulf %30, %31 : vector<104x128xf32>
    %c0_11 = arith.constant 0 : index
    %c0_12 = arith.constant 0 : index
    %33 = vector.load %arg3[%c0_11, %c0_12] : memref<1x128xf32, #tpu.memory_space<vmem>>, vector<1x128xf32>
    %34 = vector.broadcast %33 : vector<1x128xf32> to vector<104x128xf32>
    %35 = arith.mulf %32, %34 : vector<104x128xf32>
    %c0_13 = arith.constant 0 : index
    %c0_14 = arith.constant 0 : index
    %36 = vector.load %arg4[%c0_13, %c0_14] : memref<1x128xf32, #tpu.memory_space<vmem>>, vector<1x128xf32>
    %37 = vector.broadcast %36 : vector<1x128xf32> to vector<104x128xf32>
    %38 = arith.addf %35, %37 : vector<104x128xf32>
    %c0_15 = arith.constant 0 : index
    %c0_16 = arith.constant 0 : index
    %39 = vector.load %arg5[%c0_15, %c0_16] : memref<104x128xf32, #tpu.memory_space<vmem>>, vector<104x128xf32>
    tpu.vector_store %arg5[%c0_15, %c0_16], %38 {strides = array<i32>} : memref<104x128xf32, #tpu.memory_space<vmem>>, vector<104x128xf32>,
    return
  }
}

module attributes {stable_mosaic.version = 11 : i64} {
  func.func @_head_kernel(%arg0: memref<8x3136xbf16, #tpu.memory_space<vmem>>, %arg1: memref<3136x512xbf16, #tpu.memory_space<vmem>>, %arg2: memref<1x512xf32, #tpu.memory_space<vmem>>, %arg3: memref<1x512xf32, #tpu.memory_space<vmem>>, %arg4: memref<1x512xf32, #tpu.memory_space<vmem>>, %arg5: memref<512x6xbf16, #tpu.memory_space<vmem>>, %arg6: memref<1x6xf32, #tpu.memory_space<vmem>>, %arg7: memref<8x6xf32, #tpu.memory_space<vmem>>) attributes {dimension_semantics = [], scalar_prefetch = 0 : i64, scratch_operands = 0 : i64, tpu.core_type = #tpu.core_type<tc>} {
    %c0 = arith.constant 0 : index
    %c0_0 = arith.constant 0 : index
    %0 = vector.load %arg0[%c0, %c0_0] : memref<8x3136xbf16, #tpu.memory_space<vmem>>, vector<8x3136xbf16>
    %c0_1 = arith.constant 0 : index
    %c0_2 = arith.constant 0 : index
    %1 = vector.load %arg1[%c0_1, %c0_2] : memref<3136x512xbf16, #tpu.memory_space<vmem>>, vector<3136x512xbf16>
    %cst = arith.constant dense<0.000000e+00> : vector<8x512xf32>
    %2 = tpu.matmul %0, %1, %cst {dimension_numbers = #tpu.dot_dimension_numbers<[1], [0], [0], [1], [0, 0, 1, 1], [], []>} : vector<8x3136xbf16>, vector<3136x512xbf16>, vector<8x512xf32> -> vector<8x512xf32>
    %c0_3 = arith.constant 0 : index
    %c0_4 = arith.constant 0 : index
    %3 = vector.load %arg2[%c0_3, %c0_4] : memref<1x512xf32, #tpu.memory_space<vmem>>, vector<1x512xf32>
    %4 = vector.broadcast %3 : vector<1x512xf32> to vector<8x512xf32>
    %5 = arith.addf %2, %4 : vector<8x512xf32>
    %cst_5 = arith.constant 0.000000e+00 : f32
    %6 = vector.broadcast %cst_5 : f32 to vector<8x512xf32>
    %7 = arith.maximumf %5, %6 : vector<8x512xf32>
    %8 = tpu.iota {dimensions = array<i32: 0>} : vector<8x512xi32>
    %c2_i32 = arith.constant 2 : i32
    %9 = vector.broadcast %c2_i32 : i32 to vector<8x512xi32>
    %10 = arith.cmpi slt, %8, %9 : vector<8x512xi32>
    %11 = arith.extui %10 : vector<8x512xi1> to vector<8x512xi32>
    %12 = arith.sitofp %11 : vector<8x512xi32> to vector<8x512xf32>
    %13 = arith.mulf %7, %12 : vector<8x512xf32>
    %cst_6 = arith.constant dense<0.000000e+00> : vector<512xf32>
    %14 = vector.multi_reduction <add>, %13, %cst_6 [0] : vector<8x512xf32> to vector<512xf32>
    %15 = vector.shape_cast %14 : vector<512xf32> to vector<1x512xf32>
    %cst_7 = arith.constant 5.000000e-01 : f32
    %16 = vector.broadcast %cst_7 : f32 to vector<1x512xf32>
    %17 = arith.mulf %15, %16 : vector<1x512xf32>
    %18 = vector.broadcast %17 : vector<1x512xf32> to vector<8x512xf32>
    %19 = arith.subf %7, %18 : vector<8x512xf32>
    %20 = arith.mulf %19, %19 : vector<8x512xf32>
    %21 = arith.mulf %20, %12 : vector<8x512xf32>
    %cst_8 = arith.constant dense<0.000000e+00> : vector<512xf32>
    %22 = vector.multi_reduction <add>, %21, %cst_8 [0] : vector<8x512xf32> to vector<512xf32>
    %23 = vector.shape_cast %22 : vector<512xf32> to vector<1x512xf32>
    %cst_9 = arith.constant 5.000000e-01 : f32
    %24 = vector.broadcast %cst_9 : f32 to vector<1x512xf32>
    %25 = arith.mulf %23, %24 : vector<1x512xf32>
    %26 = vector.broadcast %17 : vector<1x512xf32> to vector<8x512xf32>
    %27 = arith.subf %7, %26 : vector<8x512xf32>
    %cst_10 = arith.constant 9.99999974E-6 : f32
    %28 = vector.broadcast %cst_10 : f32 to vector<1x512xf32>
    %29 = arith.addf %25, %28 : vector<1x512xf32>
    %30 = math.rsqrt %29 : vector<1x512xf32>
    %31 = vector.broadcast %30 : vector<1x512xf32> to vector<8x512xf32>
    %32 = arith.mulf %27, %31 : vector<8x512xf32>
    %c0_11 = arith.constant 0 : index
    %c0_12 = arith.constant 0 : index
    %33 = vector.load %arg3[%c0_11, %c0_12] : memref<1x512xf32, #tpu.memory_space<vmem>>, vector<1x512xf32>
    %34 = vector.broadcast %33 : vector<1x512xf32> to vector<8x512xf32>
    %35 = arith.mulf %32, %34 : vector<8x512xf32>
    %c0_13 = arith.constant 0 : index
    %c0_14 = arith.constant 0 : index
    %36 = vector.load %arg4[%c0_13, %c0_14] : memref<1x512xf32, #tpu.memory_space<vmem>>, vector<1x512xf32>
    %37 = vector.broadcast %36 : vector<1x512xf32> to vector<8x512xf32>
    %38 = arith.addf %35, %37 : vector<8x512xf32>
    %39 = arith.truncf %38 : vector<8x512xf32> to vector<8x512xbf16>
    %c0_15 = arith.constant 0 : index
    %c0_16 = arith.constant 0 : index
    %40 = vector.load %arg5[%c0_15, %c0_16] : memref<512x6xbf16, #tpu.memory_space<vmem>>, vector<512x6xbf16>
    %cst_17 = arith.constant dense<0.000000e+00> : vector<8x6xf32>
    %41 = tpu.matmul %39, %40, %cst_17 {dimension_numbers = #tpu.dot_dimension_numbers<[1], [0], [0], [1], [0, 0, 1, 1], [], []>} : vector<8x512xbf16>, vector<512x6xbf16>, vector<8x6xf32> -> vector<8x6xf32>
    %c0_18 = arith.constant 0 : index
    %c0_19 = arith.constant 0 : index
    %42 = vector.load %arg6[%c0_18, %c0_19] : memref<1x6xf32, #tpu.memory_space<vmem>>, vector<1x6xf32>
    %43 = vector.broadcast %42 : vector<1x6xf32> to vector<8x6xf32>
    %44 = arith.addf %41, %43 : vector<8x6xf32>
    %cst_20 = arith.constant dense<0xFF800000> : vector<8xf32>
    %45 = vector.multi_reduction <maximumf>, %44, %cst_20 [1] : vector<8x6xf32> to vector<8xf32>
    %46 = vector.shape_cast %45 : vector<8xf32> to vector<8x1xf32>
    %47 = vector.broadcast %46 : vector<8x1xf32> to vector<8x6xf32>
    %48 = arith.subf %44, %47 : vector<8x6xf32>
    %49 = math.exp %48 : vector<8x6xf32>
    %cst_21 = arith.constant dense<0.000000e+00> : vector<8xf32>
    %50 = vector.multi_reduction <add>, %49, %cst_21 [1] : vector<8x6xf32> to vector<8xf32>
    %51 = vector.shape_cast %50 : vector<8xf32> to vector<8x1xf32>
    %52 = tpu.reciprocal %51 {approx = true} : vector<8x1xf32> -> vector<8x1xf32>
    %53 = vector.broadcast %52 : vector<8x1xf32> to vector<8x6xf32>
    %54 = arith.mulf %49, %53 : vector<8x6xf32>
    %c0_22 = arith.constant 0 : index
    %c0_23 = arith.constant 0 : index
    %55 = vector.load %arg7[%c0_22, %c0_23] : memref<8x6xf32, #tpu.memory_space<vmem>>, vector<8x6xf32>
    tpu.vector_store %arg7[%c0_22, %c0_23], %54 {strides = array<i32>} : memref<8x6xf32, #tpu.memory_space<vmem>>, vector<8x6xf32>,
    return
  }
}

</mosaic_0001>

<bundles_post_ra>
// kernel: net_forward.4
= control target key start
LH: loop header
LB: loop body
LE: loop exit
PB: predicated region body
PF: predicated region fallthrough
CT: control target
= control target key end

     0   :  { %v2442_v0 = vmov 0   ;;  %s5545_s1 = inlined_call_operand.vmem [shape: bf16[256,128], index: 1, kind: input, shape index: {}]   ;;  %s5546_s0 = inlined_call_operand.vmem [shape: bf16[800,256], index: 0, kind: input, shape index: {}]   ;;  %s5547_s2 = inlined_call_operand.vmem [shape: f32[1,128], index: 2, kind: input, shape index: {}]   ;;  %s5548_s3 = inlined_call_operand.vmem [shape: f32[1,128], index: 3, kind: input, shape index: {}]   ;;  %s5549_s4 = inlined_call_operand.vmem [shape: f32[1,128], index: 4, kind: input, shape index: {}]   ;;  %s5550_s5 = inlined_call_operand.vmem [shape: f32[800,128], index: 5, kind: output, shape index: {}]  }
   0x1   :  { %756 = vmatprep.subr.bf16.mxu0 %v2442_v0  ;;  %v2274_v1 = vld [vmem:[%s5545_s1] sm:$0xff]   ;;  %2241 = vmatprep.subr.bf16.mxu1 %v2442_v0  ;;  %v2275_v2 = vld [vmem:[%s5545_s1 + $0x8] sm:$0xff]   ;;  %v2276_v3 = vld [vmem:[%s5545_s1 + $0x10] sm:$0xff]  }
   0x2   :  { %757 = vmatpush1.bf16.msra.mxu0 %v2274_v1  ;;  %2257 = vmatpush1.bf16.msra.mxu1 %v2274_v1  ;;  %v2277_v4 = vld [vmem:[%s5545_s1 + $0x18] sm:$0xff]   ;;  %v2278_v5 = vld [vmem:[%s5545_s1 + $0x20] sm:$0xff]   ;;  %v2279_v7 = vld [vmem:[%s5545_s1 + $0x28] sm:$0xff]  }
   0x3   :  { %758 = vmatprep.subr.bf16.mxu0 %v2442_v0  ;;  %2242 = vmatprep.subr.bf16.mxu1 %v2442_v0  ;;  %v2292_v6 = vld [vmem:[%s5546_s0 + $0x4] ss:$8 sps:$4 sm:$0xff]   ;;  %v2280_v8 = vld [vmem:[%s5545_s1 + $0x30] sm:$0xff]   ;;  %v2281_v9 = vld [vmem:[%s5545_s1 + $0x38] sm:$0xff]  }
   0x4   :  { %788 = vmatprep.mubr.bf16.mxu0 %v2292_v6  ;;  %v2282_v10 = vld [vmem:[%s5545_s1 + $0x40] sm:$0xff]   ;;  %v2283_v11 = vld [vmem:[%s5545_s1 + $0x48] sm:$0xff]   ;;  %v2331_v12 = vld [vmem:[%s5546_s0 + $0x194] ss:$8 sps:$4 sm:$0xff]  }
   0x5   :  { %v2284_v13 = vld [vmem:[%s5545_s1 + $0x50] sm:$0xff]   ;;  %988 = vmatprep.mubr.bf16.mxu1 %v2331_v12  ;;  %v2285_v14 = vld [vmem:[%s5545_s1 + $0x58] sm:$0xff]   ;;  %v2286_v15 = vld [vmem:[%s5545_s1 + $0x60] sm:$0xff]  }
   0x6   :  { %759 = vmatpush1.bf16.msra.mxu0 %v2275_v2  ;;  %2258 = vmatpush1.bf16.msra.mxu1 %v2275_v2  ;;  %v2287_v16 = vld [vmem:[%s5545_s1 + $0x68] sm:$0xff]   ;;  %v2288_v17 = vld [vmem:[%s5545_s1 + $0x70] sm:$0xff]   ;;  %v2289_v18 = vld [vmem:[%s5545_s1 + $0x78] sm:$0xff]  }
   0x7   :  { %760 = vmatprep.subr.bf16.mxu0 %v2442_v0  ;;  %2243 = vmatprep.subr.bf16.mxu1 %v2442_v0  ;;  %v2290_v19 = vld [vmem:[%s5546_s0] ss:$8 sps:$4 sm:$0xff]   ;;  %v2329_v20 = vld [vmem:[%s5546_s0 + $0x190] ss:$8 sps:$4 sm:$0xff]   ;;  %v2293_v21 = vld [vmem:[%s5546_s0 + $0x14] ss:$8 sps:$4 sm:$0xff]  }
   0x8   :  { %v2335_v22 = vld [vmem:[%s5546_s0 + $0x1a4] ss:$8 sps:$4 sm:$0xff]   ;;  %v2295_v23 = vld [vmem:[%s5546_s0 + $0x10] ss:$8 sps:$4 sm:$0xff]   ;;  %v2337_v24 = vld [vmem:[%s5546_s0 + $0x1a0] ss:$8 sps:$4 sm:$0xff]  }
   0x9   :  { %v2296_v25 = vld [vmem:[%s5546_s0 + $0x24] ss:$8 sps:$4 sm:$0xff]   ;;  %v2341_v26 = vld [vmem:[%s5546_s0 + $0x1b4] ss:$8 sps:$4 sm:$0xff]   ;;  %v2298_v27 = vld [vmem:[%s5546_s0 + $0x20] ss:$8 sps:$4 sm:$0xff]  }
   0xa   :  { %761 = vmatpush1.bf16.msra.mxu0 %v2276_v3  ;;  %2259 = vmatpush1.bf16.msra.mxu1 %v2276_v3  ;;  %v2343_v28 = vld [vmem:[%s5546_s0 + $0x1b0] ss:$8 sps:$4 sm:$0xff]   ;;  %v2299_v29 = vld [vmem:[%s5546_s0 + $0x34] ss:$8 sps:$4 sm:$0xff]   ;;  %v2347_v30 = vld [vmem:[%s5546_s0 + $0x1c4] ss:$8 sps:$4 sm:$0xff]  }
   0xb   :  { %762 = vmatprep.subr.bf16.mxu0 %v2442_v0  ;;  %2244 = vmatprep.subr.bf16.mxu1 %v2442_v0  ;;  %v2301_v31 = vld [vmem:[%s5546_s0 + $0x30] ss:$8 sps:$4 sm:$0xff]   ;;  %v2349_v32 = vld [vmem:[%s5546_s0 + $0x1c0] ss:$8 sps:$4 sm:$0xff]   ;;  %v2302_v33 = vld [vmem:[%s5546_s0 + $0x44] ss:$8 sps:$4 sm:$0xff]  }
   0xc   :  { %v2353_v34 = vld [vmem:[%s5546_s0 + $0x1d4] ss:$8 sps:$4 sm:$0xff]   ;;  %v2304_v35 = vld [vmem:[%s5546_s0 + $0x40] ss:$8 sps:$4 sm:$0xff]   ;;  %v2355_v36 = vld [vmem:[%s5546_s0 + $0x1d0] ss:$8 sps:$4 sm:$0xff]  }
   0xd   :  { %v2305_v37 = vld [vmem:[%s5546_s0 + $0x54] ss:$8 sps:$4 sm:$0xff]   ;;  %v2359_v38 = vld [vmem:[%s5546_s0 + $0x1e4] ss:$8 sps:$4 sm:$0xff]   ;;  %v2307_v39 = vld [vmem:[%s5546_s0 + $0x50] ss:$8 sps:$4 sm:$0xff]  }
   0xe   :  { %763 = vmatpush1.bf16.msra.mxu0 %v2277_v4  ;;  %2260 = vmatpush1.bf16.msra.mxu1 %v2277_v4  ;;  %v2361_v40 = vld [vmem:[%s5546_s0 + $0x1e0] ss:$8 sps:$4 sm:$0xff]   ;;  %v2308_v41 = vld [vmem:[%s5546_s0 + $0x64] ss:$8 sps:$4 sm:$0xff]   ;;  %v2365_v42 = vld [vmem:[%s5546_s0 + $0x1f4] ss:$8 sps:$4 sm:$0xff]  }
   0xf   :  { %764 = vmatprep.subr.bf16.mxu0 %v2442_v0  ;;  %2245 = vmatprep.subr.bf16.mxu1 %v2442_v0  ;;  %v2310_v43 = vld [vmem:[%s5546_s0 + $0x60] ss:$8 sps:$4 sm:$0xff]   ;;  %v2367_v44 = vld [vmem:[%s5546_s0 + $0x1f0] ss:$8 sps:$4 sm:$0xff]   ;;  %v2311_v45 = vld [vmem:[%s5546_s0 + $0x74] ss:$8 sps:$4 sm:$0xff]  }
  0x10   :  { %v2371_v46 = vld [vmem:[%s5546_s0 + $0x204] ss:$8 sps:$4 sm:$0xff]   ;;  %v2313_v47 = vld [vmem:[%s5546_s0 + $0x70] ss:$8 sps:$4 sm:$0xff]   ;;  %v2373_v48 = vld [vmem:[%s5546_s0 + $0x200] ss:$8 sps:$4 sm:$0xff]  }
  0x11   :  { %v2314_v49 = vld [vmem:[%s5546_s0 + $0x84] ss:$8 sps:$4 sm:$0xff]   ;;  %v2377_v50 = vld [vmem:[%s5546_s0 + $0x214] ss:$8 sps:$4 sm:$0xff]   ;;  %v2316_v51 = vld [vmem:[%s5546_s0 + $0x80] ss:$8 sps:$4 sm:$0xff]  }
  0x12   :  { %765 = vmatpush1.bf16.msra.mxu0 %v2278_v5  ;;  %2261 = vmatpush1.bf16.msra.mxu1 %v2278_v5  ;;  %v2379_v52 = vld [vmem:[%s5546_s0 + $0x210] ss:$8 sps:$4 sm:$0xff]   ;;  %v2317_v53 = vld [vmem:[%s5546_s0 + $0x94] ss:$8 sps:$4 sm:$0xff]   ;;  %v2383_v54 = vld [vmem:[%s5546_s0 + $0x224] ss:$8 sps:$4 sm:$0xff]  }
  0x13   :  { %766 = vmatprep.subr.bf16.mxu0 %v2442_v0  ;;  %2246 = vmatprep.subr.bf16.mxu1 %v2442_v0  ;;  %v2319_v55 = vld [vmem:[%s5546_s0 + $0x90] ss:$8 sps:$4 sm:$0xff]   ;;  %v2385_v56 = vld [vmem:[%s5546_s0 + $0x220] ss:$8 sps:$4 sm:$0xff]   ;;  %v2320_v57 = vld [vmem:[%s5546_s0 + $0xa4] ss:$8 sps:$4 sm:$0xff]  }
  0x14   :  { %v2389_v58 = vld [vmem:[%s5546_s0 + $0x234] ss:$8 sps:$4 sm:$0xff]   ;;  %v2322_v59 = vld [vmem:[%s5546_s0 + $0xa0] ss:$8 sps:$4 sm:$0xff]   ;;  %v2391_v60 = vld [vmem:[%s5546_s0 + $0x230] ss:$8 sps:$4 sm:$0xff]  }
  0x15   :  { %v2323_v61 = vld [vmem:[%s5546_s0 + $0xb4] ss:$8 sps:$4 sm:$0xff]   ;;  %v2395_v62 = vld [vmem:[%s5546_s0 + $0x244] ss:$8 sps:$4 sm:$0xff]   ;;  %v2325_v63 = vld [vmem:[%s5546_s0 + $0xb0] ss:$8 sps:$4 sm:$0xff]  }
  0x16   :  { %767 = vmatpush1.bf16.msra.mxu0 %v2279_v7  ;;  %2262 = vmatpush1.bf16.msra.mxu1 %v2279_v7  ;;  %v2326_v1 = vld [vmem:[%s5546_s0 + $0xc4] ss:$8 sps:$4 sm:$0xff]   ;;  %v2401_v2 = vld [vmem:[%s5546_s0 + $0x254] ss:$8 sps:$4 sm:$0xff]   ;;  %v2328_v3 = vld [vmem:[%s5546_s0 + $0xc0] ss:$8 sps:$4 sm:$0xff]  }
  0x17   :  { %768 = vmatprep.subr.bf16.mxu0 %v2442_v0  ;;  %2247 = vmatprep.subr.bf16.mxu1 %v2442_v0  ;;  %v2403_v4 = vld [vmem:[%s5546_s0 + $0x250] ss:$8 sps:$4 sm:$0xff]   ;;  %v2332_v5 = vld [vmem:[%s5546_s0 + $0xd4] ss:$8 sps:$4 sm:$0xff]   ;;  %v2404_v6 = vld [vmem:[%s5546_s0 + $0x264] ss:$8 sps:$4 sm:$0xff]  }
  0x18   :  { %v2334_v7 = vld [vmem:[%s5546_s0 + $0xd0] ss:$8 sps:$4 sm:$0xff]  }
  0x19   :  { %v2409_v12 = vld [vmem:[%s5546_s0 + $0x270] ss:$8 sps:$4 sm:$0xff]  }
  0x1a   :  { %769 = vmatpush1.bf16.msra.mxu0 %v2280_v8  ;;  %2263 = vmatpush1.bf16.msra.mxu1 %v2280_v8  ;;  %v2406_v8 = vld [vmem:[%s5546_s0 + $0x260] ss:$8 sps:$4 sm:$0xff]  }
  0x1b   :  { %770 = vmatprep.subr.bf16.mxu0 %v2442_v0  ;;  %2248 = vmatprep.subr.bf16.mxu1 %v2442_v0 }
  0x1e   :  { %771 = vmatpush1.bf16.msra.mxu0 %v2281_v9  ;;  %2264 = vmatpush1.bf16.msra.mxu1 %v2281_v9  ;;  %v2338_v9 = vld [vmem:[%s5546_s0 + $0xe4] ss:$8 sps:$4 sm:$0xff]  }
  0x1f   :  { %772 = vmatprep.subr.bf16.mxu0 %v2442_v0  ;;  %2249 = vmatprep.subr.bf16.mxu1 %v2442_v0 }
  0x22   :  { %773 = vmatpush1.bf16.msra.mxu0 %v2282_v10  ;;  %2265 = vmatpush1.bf16.msra.mxu1 %v2282_v10  ;;  %v2407_v10 = vld [vmem:[%s5546_s0 + $0x274] ss:$8 sps:$4 sm:$0xff]  }
  0x23   :  { %774 = vmatprep.subr.bf16.mxu0 %v2442_v0  ;;  %2250 = vmatprep.subr.bf16.mxu1 %v2442_v0 }
  0x26   :  { %775 = vmatpush1.bf16.msra.mxu0 %v2283_v11  ;;  %2266 = vmatpush1.bf16.msra.mxu1 %v2283_v11  ;;  %v2340_v11 = vld [vmem:[%s5546_s0 + $0xe0] ss:$8 sps:$4 sm:$0xff]  }
  0x27   :  { %776 = vmatprep.subr.bf16.mxu0 %v2442_v0  ;;  %2251 = vmatprep.subr.bf16.mxu1 %v2442_v0 }
  0x2a   :  { %777 = vmatpush1.bf16.msra.mxu0 %v2284_v13  ;;  %2267 = vmatpush1.bf16.msra.mxu1 %v2284_v13  ;;  %v2344_v13 = vld [vmem:[%s5546_s0 + $0xf4] ss:$8 sps:$4 sm:$0xff]  }
  0x2b   :  { %778 = vmatprep.subr.bf16.mxu0 %v2442_v0  ;;  %2252 = vmatprep.subr.bf16.mxu1 %v2442_v0 }
  0x2e   :  { %779 = vmatpush1.bf16.msra.mxu0 %v2285_v14  ;;  %2268 = vmatpush1.bf16.msra.mxu1 %v2285_v14  ;;  %v2410_v14 = vld [vmem:[%s5546_s0 + $0x284] ss:$8 sps:$4 sm:$0xff]  }
  0x2f   :  { %780 = vmatprep.subr.bf16.mxu0 %v2442_v0  ;;  %2253 = vmatprep.subr.bf16.mxu1 %v2442_v0 }
  0x32   :  { %781 = vmatpush1.bf16.msra.mxu0 %v2286_v15  ;;  %2269 = vmatpush1.bf16.msra.mxu1 %v2286_v15  ;;  %v2346_v15 = vld [vmem:[%s5546_s0 + $0xf0] ss:$8 sps:$4 sm:$0xff]  }
  0x33   :  { %782 = vmatprep.subr.bf16.mxu0 %v2442_v0  ;;  %2254 = vmatprep.subr.bf16.mxu1 %v2442_v0 }
  0x36   :  { %783 = vmatpush1.bf16.msra.mxu0 %v2287_v16  ;;  %2270 = vmatpush1.bf16.msra.mxu1 %v2287_v16  ;;  %v2412_v16 = vld [vmem:[%s5546_s0 + $0x280] ss:$8 sps:$4 sm:$0xff]  }
  0x37   :  { %784 = vmatprep.subr.bf16.mxu0 %v2442_v0  ;;  %2255 = vmatprep.subr.bf16.mxu1 %v2442_v0 }
  0x3a   :  { %785 = vmatpush1.bf16.msra.mxu0 %v2288_v17  ;;  %2271 = vmatpush1.bf16.msra.mxu1 %v2288_v17  ;;  %v2350_v17 = vld [vmem:[%s5546_s0 + $0x104] ss:$8 sps:$4 sm:$0xff]  }
  0x3b   :  { %786 = vmatprep.subr.bf16.mxu0 %v2442_v0  ;;  %2256 = vmatprep.subr.bf16.mxu1 %v2442_v0  ;;  %v2397_v0 = vld [vmem:[%s5546_s0 + $0x240] ss:$8 sps:$4 sm:$0xff]  }
  0x3e   :  { %787 = vmatpush1.bf16.msra.mxu0 %v2289_v18  ;;  %2272 = vmatpush1.bf16.msra.mxu1 %v2289_v18  ;;  %v2413_v18 = vld [vmem:[%s5546_s0 + $0x294] ss:$8 sps:$4 sm:$0xff]  }
  0x41   :  { %789 = vmatmul.mubr.bf16.vlgmr.msra.gmra.mrb[0].mxu0 %v2290_v19  ;;  %989 = vmatmul.mubr.bf16.vlgmr.msra.gmra.mrb[0].mxu1 %v2329_v20  ;;  %v2352_v19 = vld [vmem:[%s5546_s0 + $0x100] ss:$8 sps:$4 sm:$0xff]   ;;  %v2415_v20 = vld [vmem:[%s5546_s0 + $0x290] ss:$8 sps:$4 sm:$0xff]  }
  0x42   :  { %796 = vmatprep.mubr.bf16.mxu0 %v2293_v21  ;;  %996 = vmatprep.mubr.bf16.mxu1 %v2335_v22  ;;  %v2356_v21 = vld [vmem:[%s5546_s0 + $0x114] ss:$8 sps:$4 sm:$0xff]   ;;  %v2416_v22 = vld [vmem:[%s5546_s0 + $0x2a4] ss:$8 sps:$4 sm:$0xff]  }
  0x49   :  { %797 = vmatmul.mubr.bf16.gmra.mrb[4].mxu0 %v2295_v23  ;;  %997 = vmatmul.mubr.bf16.gmra.mrb[4].mxu1 %v2337_v24  ;;  %v2358_v23 = vld [vmem:[%s5546_s0 + $0x110] ss:$8 sps:$4 sm:$0xff]   ;;  %v2418_v24 = vld [vmem:[%s5546_s0 + $0x2a0] ss:$8 sps:$4 sm:$0xff]  }
  0x4a   :  { %804 = vmatprep.mubr.bf16.mxu0 %v2296_v25  ;;  %1004 = vmatprep.mubr.bf16.mxu1 %v2341_v26  ;;  %v2362_v25 = vld [vmem:[%s5546_s0 + $0x124] ss:$8 sps:$4 sm:$0xff]   ;;  %v2419_v26 = vld [vmem:[%s5546_s0 + $0x2b4] ss:$8 sps:$4 sm:$0xff]  }
  0x51   :  { %805 = vmatmul.mubr.bf16.gmra.mrb[8].mxu0 %v2298_v27  ;;  %1005 = vmatmul.mubr.bf16.gmra.mrb[8].mxu1 %v2343_v28  ;;  %v2364_v27 = vld [vmem:[%s5546_s0 + $0x120] ss:$8 sps:$4 sm:$0xff]   ;;  %v2421_v28 = vld [vmem:[%s5546_s0 + $0x2b0] ss:$8 sps:$4 sm:$0xff]  }
  0x52   :  { %812 = vmatprep.mubr.bf16.mxu0 %v2299_v29  ;;  %1012 = vmatprep.mubr.bf16.mxu1 %v2347_v30  ;;  %v2368_v29 = vld [vmem:[%s5546_s0 + $0x134] ss:$8 sps:$4 sm:$0xff]   ;;  %v2422_v30 = vld [vmem:[%s5546_s0 + $0x2c4] ss:$8 sps:$4 sm:$0xff]  }
  0x59   :  { %813 = vmatmul.mubr.bf16.gmra.mrb[12].mxu0 %v2301_v31  ;;  %1013 = vmatmul.mubr.bf16.gmra.mrb[12].mxu1 %v2349_v32  ;;  %v2370_v31 = vld [vmem:[%s5546_s0 + $0x130] ss:$8 sps:$4 sm:$0xff]   ;;  %v2424_v32 = vld [vmem:[%s5546_s0 + $0x2c0] ss:$8 sps:$4 sm:$0xff]  }
  0x5a   :  { %820 = vmatprep.mubr.bf16.mxu0 %v2302_v33  ;;  %1020 = vmatprep.mubr.bf16.mxu1 %v2353_v34  ;;  %v2374_v33 = vld [vmem:[%s5546_s0 + $0x144] ss:$8 sps:$4 sm:$0xff]   ;;  %v2425_v34 = vld [vmem:[%s5546_s0 + $0x2d4] ss:$8 sps:$4 sm:$0xff]  }
  0x61   :  { %821 = vmatmul.mubr.bf16.gmra.mrb[16].mxu0 %v2304_v35  ;;  %1021 = vmatmul.mubr.bf16.gmra.mrb[16].mxu1 %v2355_v36  ;;  %v2376_v35 = vld [vmem:[%s5546_s0 + $0x140] ss:$8 sps:$4 sm:$0xff]   ;;  %v2427_v36 = vld [vmem:[%s5546_s0 + $0x2d0] ss:$8 sps:$4 sm:$0xff]  }
  0x62   :  { %828 = vmatprep.mubr.bf16.mxu0 %v2305_v37  ;;  %1028 = vmatprep.mubr.bf16.mxu1 %v2359_v38  ;;  %v2380_v37 = vld [vmem:[%s5546_s0 + $0x154] ss:$8 sps:$4 sm:$0xff]   ;;  %v2428_v38 = vld [vmem:[%s5546_s0 + $0x2e4] ss:$8 sps:$4 sm:$0xff]  }
  0x69   :  { %829 = vmatmul.mubr.bf16.gmra.mrb[20].mxu0 %v2307_v39  ;;  %1029 = vmatmul.mubr.bf16.gmra.mrb[20].mxu1 %v2361_v40  ;;  %v2382_v39 = vld [vmem:[%s5546_s0 + $0x150] ss:$8 sps:$4 sm:$0xff]   ;;  %v2430_v40 = vld [vmem:[%s5546_s0 + $0x2e0] ss:$8 sps:$4 sm:$0xff]  }
  0x6a   :  { %836 = vmatprep.mubr.bf16.mxu0 %v2308_v41  ;;  %1036 = vmatprep.mubr.bf16.mxu1 %v2365_v42  ;;  %v2386_v41 = vld [vmem:[%s5546_s0 + $0x164] ss:$8 sps:$4 sm:$0xff]   ;;  %v2431_v42 = vld [vmem:[%s5546_s0 + $0x2f4] ss:$8 sps:$4 sm:$0xff]  }
  0x71   :  { %837 = vmatmul.mubr.bf16.gmra.mrb[24].mxu0 %v2310_v43  ;;  %1037 = vmatmul.mubr.bf16.gmra.mrb[24].mxu1 %v2367_v44  ;;  %v2388_v43 = vld [vmem:[%s5546_s0 + $0x160] ss:$8 sps:$4 sm:$0xff]   ;;  %v2433_v44 = vld [vmem:[%s5546_s0 + $0x2f0] ss:$8 sps:$4 sm:$0xff]  }
  0x72   :  { %844 = vmatprep.mubr.bf16.mxu0 %v2311_v45  ;;  %1044 = vmatprep.mubr.bf16.mxu1 %v2371_v46  ;;  %v2392_v45 = vld [vmem:[%s5546_s0 + $0x174] ss:$8 sps:$4 sm:$0xff]   ;;  %v2434_v46 = vld [vmem:[%s5546_s0 + $0x304] ss:$8 sps:$4 sm:$0xff]  }
  0x79   :  { %845 = vmatmul.mubr.bf16.gmra.mrb[28].mxu0 %v2313_v47  ;;  %1045 = vmatmul.mubr.bf16.gmra.mrb[28].mxu1 %v2373_v48  ;;  %v2394_v47 = vld [vmem:[%s5546_s0 + $0x170] ss:$8 sps:$4 sm:$0xff]   ;;  %v2436_v48 = vld [vmem:[%s5546_s0 + $0x300] ss:$8 sps:$4 sm:$0xff]  }
  0x7a   :  { %852 = vmatprep.mubr.bf16.mxu0 %v2314_v49  ;;  %1052 = vmatprep.mubr.bf16.mxu1 %v2377_v50  ;;  %v2398_v49 = vld [vmem:[%s5546_s0 + $0x184] ss:$8 sps:$4 sm:$0xff]   ;;  %v2437_v50 = vld [vmem:[%s5546_s0 + $0x314] ss:$8 sps:$4 sm:$0xff]  }
  0x81   :  { %853 = vmatmul.mubr.bf16.gmra.mrb[32].mxu0 %v2316_v51  ;;  %1053 = vmatmul.mubr.bf16.gmra.mrb[32].mxu1 %v2379_v52  ;;  %v2400_v51 = vld [vmem:[%s5546_s0 + $0x180] ss:$8 sps:$4 sm:$0xff]   ;;  %v2439_v52 = vld [vmem:[%s5546_s0 + $0x310] ss:$8 sps:$4 sm:$0xff]  }
  0x82   :  { %860 = vmatprep.mubr.bf16.mxu0 %v2317_v53  ;;  %1060 = vmatprep.mubr.bf16.mxu1 %v2383_v54 }
  0x89   :  { %861 = vmatmul.mubr.bf16.gmra.mrb[36].mxu0 %v2319_v55  ;;  %1061 = vmatmul.mubr.bf16.gmra.mrb[36].mxu1 %v2385_v56 }
  0x8a   :  { %868 = vmatprep.mubr.bf16.mxu0 %v2320_v57  ;;  %1068 = vmatprep.mubr.bf16.mxu1 %v2389_v58 }
  0x91   :  { %869 = vmatmul.mubr.bf16.gmra.mrb[40].mxu0 %v2322_v59  ;;  %1069 = vmatmul.mubr.bf16.gmra.mrb[40].mxu1 %v2391_v60 }
  0x92   :  { %876 = vmatprep.mubr.bf16.mxu0 %v2323_v61  ;;  %1076 = vmatprep.mubr.bf16.mxu1 %v2395_v62 }
  0x99   :  { %877 = vmatmul.mubr.bf16.gmra.mrb[44].mxu0 %v2325_v63  ;;  %1077 = vmatmul.mubr.bf16.gmra.mrb[44].mxu1 %v2397_v0 }
  0x9a   :  { %884 = vmatprep.mubr.bf16.mxu0 %v2326_v1  ;;  %1084 = vmatprep.mubr.bf16.mxu1 %v2401_v2 }
  0xa1   :  { %885 = vmatmul.mubr.bf16.gmra.mrb[48].mxu0 %v2328_v3  ;;  %1085 = vmatmul.mubr.bf16.gmra.mrb[48].mxu1 %v2403_v4 }
  0xa2   :  { %892 = vmatprep.mubr.bf16.mxu0 %v2332_v5  ;;  %1092 = vmatprep.mubr.bf16.mxu1 %v2404_v6 }
  0xa9   :  { %893 = vmatmul.mubr.bf16.gmra.mrb[52].mxu0 %v2334_v7  ;;  %1093 = vmatmul.mubr.bf16.gmra.mrb[52].mxu1 %v2406_v8 }
  0xaa   :  { %900 = vmatprep.mubr.bf16.mxu0 %v2338_v9  ;;  %1100 = vmatprep.mubr.bf16.mxu1 %v2407_v10 }
  0xb1   :  { %901 = vmatmul.mubr.bf16.gmra.mrb[56].mxu0 %v2340_v11  ;;  %1101 = vmatmul.mubr.bf16.gmra.mrb[56].mxu1 %v2409_v12 }
  0xb2   :  { %908 = vmatprep.mubr.bf16.mxu0 %v2344_v13  ;;  %1108 = vmatprep.mubr.bf16.mxu1 %v2410_v14 }
  0xb9   :  { %909 = vmatmul.mubr.bf16.gmra.mrb[60].mxu0 %v2346_v15  ;;  %1109 = vmatmul.mubr.bf16.gmra.mrb[60].mxu1 %v2412_v16 }
  0xba   :  { %916 = vmatprep.mubr.bf16.mxu0 %v2350_v17  ;;  %1116 = vmatprep.mubr.bf16.mxu1 %v2413_v18 }
  0xc1   :  { %917 = vmatmul.mubr.bf16.gmra.mrb[64].mxu0 %v2352_v19  ;;  %1117 = vmatmul.mubr.bf16.gmra.mrb[64].mxu1 %v2415_v20 }
  0xc2   :  { %924 = vmatprep.mubr.bf16.mxu0 %v2356_v21  ;;  %1124 = vmatprep.mubr.bf16.mxu1 %v2416_v22 }
  0xc9   :  { %925 = vmatmul.mubr.bf16.gmra.mrb[68].mxu0 %v2358_v23  ;;  %1125 = vmatmul.mubr.bf16.gmra.mrb[68].mxu1 %v2418_v24 }
  0xca   :  { %932 = vmatprep.mubr.bf16.mxu0 %v2362_v25  ;;  %1132 = vmatprep.mubr.bf16.mxu1 %v2419_v26 }
  0xd1   :  { %933 = vmatmul.mubr.bf16.gmra.mrb[72].mxu0 %v2364_v27  ;;  %1133 = vmatmul.mubr.bf16.gmra.mrb[72].mxu1 %v2421_v28 }
  0xd2   :  { %940 = vmatprep.mubr.bf16.mxu0 %v2368_v29  ;;  %1140 = vmatprep.mubr.bf16.mxu1 %v2422_v30 }
  0xd9   :  { %941 = vmatmul.mubr.bf16.gmra.mrb[76].mxu0 %v2370_v31  ;;  %1141 = vmatmul.mubr.bf16.gmra.mrb[76].mxu1 %v2424_v32 }
  0xda   :  { %948 = vmatprep.mubr.bf16.mxu0 %v2374_v33  ;;  %1148 = vmatprep.mubr.bf16.mxu1 %v2425_v34 }
  0xe1   :  { %949 = vmatmul.mubr.bf16.gmra.mrb[80].mxu0 %v2376_v35  ;;  %1149 = vmatmul.mubr.bf16.gmra.mrb[80].mxu1 %v2427_v36 }
  0xe2   :  { %956 = vmatprep.mubr.bf16.mxu0 %v2380_v37  ;;  %1156 = vmatprep.mubr.bf16.mxu1 %v2428_v38  ;;  %v2886_v37 = vld [vmem:[%s5547_s2] ss:$0 sm:$0xff] }
  0xe9   :  { %957 = vmatmul.mubr.bf16.gmra.mrb[84].mxu0 %v2382_v39  ;;  %1157 = vmatmul.mubr.bf16.gmra.mrb[84].mxu1 %v2430_v40 }
  0xea   :  { %964 = vmatprep.mubr.bf16.mxu0 %v2386_v41  ;;  %1164 = vmatprep.mubr.bf16.mxu1 %v2431_v42 }
  0xf1   :  { %965 = vmatmul.mubr.bf16.gmra.mrb[88].mxu0 %v2388_v43  ;;  %1165 = vmatmul.mubr.bf16.gmra.mrb[88].mxu1 %v2433_v44 }
  0xf2   :  { %972 = vmatprep.mubr.bf16.mxu0 %v2392_v45  ;;  %1172 = vmatprep.mubr.bf16.mxu1 %v2434_v46 }
  0xf9   :  { %973 = vmatmul.mubr.bf16.gmra.mrb[92].mxu0 %v2394_v47  ;;  %1173 = vmatmul.mubr.bf16.gmra.mrb[92].mxu1 %v2436_v48 }
  0xfa   :  { %980 = vmatprep.mubr.bf16.mxu0 %v2398_v49  ;;  %1180 = vmatprep.mubr.bf16.mxu1 %v2437_v50 }
 0x101   :  { %981 = vmatmul.mubr.bf16.gmra.mrb[96].mxu0 %v2400_v51  ;;  %1181 = vmatmul.mubr.bf16.gmra.mrb[96].mxu1 %v2439_v52 }
 0x114   :  { %v790_v53 = vpop.f32.mrb[0].mxu0  ;;  %v2853_v54 = vpop.f32.mrb[0].mxu1 }
 0x115   :  { %v792_v55 = vpop.f32.mrb[1].mxu0  ;;  %v992_v56 = vpop.f32.mrb[1].mxu1  ;;  %v2900_v45 = vadd.f32 %v2886_v37, %v790_v53 }
 0x116   :  { %v793_v57 = vpop.f32.mrb[2].mxu0  ;;  %v2855_v58 = vpop.f32.mrb[2].mxu1 }
 0x117   :  { %v795_v59 = vpop.f32.mrb[3].mxu0  ;;  %v995_v60 = vpop.f32.mrb[3].mxu1  ;;  %v2893_v40 = vadd.f32 %v2886_v37, %v793_v57  ;;  %5748 = vst [vmem:[#allocation3_spill] sm:$0xff] %v2900_v45  ;;  %v5565_v50 = vmax.f32 %v2900_v45, 0.0 }
 0x119   :  { %5747 = vst [vmem:[#allocation2_spill] sm:$0xff] %v2893_v40  ;;  %v5562_v49 = vmax.f32 %v2893_v40, 0.0 }
 0x11b   :  { %v1289_v53 = vadd.f32 %v5562_v49, %v5565_v50 }
 0x11c   :  { %v798_v61 = vpop.f32.mrb[4].mxu0  ;;  %v2857_v62 = vpop.f32.mrb[4].mxu1 }
 0x11d   :  { %v800_v63 = vpop.f32.mrb[5].mxu0  ;;  %v1000_v0 = vpop.f32.mrb[5].mxu1  ;;  %v2903_v46 = vadd.f32 %v2886_v37, %v798_v61 }
 0x11e   :  { %v801_v1 = vpop.f32.mrb[6].mxu0  ;;  %v2859_v2 = vpop.f32.mrb[6].mxu1 }
 0x11f   :  { %v803_v3 = vpop.f32.mrb[7].mxu0  ;;  %v1003_v4 = vpop.f32.mrb[7].mxu1  ;;  %5749 = vst [vmem:[#allocation4_spill] sm:$0xff] %v2903_v46  ;;  %v5561_v51 = vmax.f32 %v2903_v46, 0.0  ;;  %v2909_v52 = vadd.f32 %v2886_v37, %v801_v1 }
 0x121   :  { %5750 = vst [vmem:[#allocation5_spill] sm:$0xff] %v2909_v52  ;;  %v1290_v0 = vadd.f32 %v1289_v53, %v5561_v51  ;;  %v5560_v1 = vmax.f32 %v2909_v52, 0.0 }
 0x124   :  { %v806_v5 = vpop.f32.mrb[8].mxu0  ;;  %v2861_v6 = vpop.f32.mrb[8].mxu1 }
 0x125   :  { %v808_v7 = vpop.f32.mrb[9].mxu0  ;;  %v1008_v8 = vpop.f32.mrb[9].mxu1  ;;  %v2920_v57 = vadd.f32 %v2886_v37, %v806_v5  ;;  %v1291_v5 = vadd.f32 %v1290_v0, %v5560_v1 }
 0x126   :  { %v809_v9 = vpop.f32.mrb[10].mxu0  ;;  %v2863_v10 = vpop.f32.mrb[10].mxu1 }
 0x127   :  { %v811_v11 = vpop.f32.mrb[11].mxu0  ;;  %v1011_v12 = vpop.f32.mrb[11].mxu1  ;;  %5751 = vst [vmem:[#allocation6_spill] sm:$0xff] %v2920_v57  ;;  %v5558_v7 = vmax.f32 %v2920_v57, 0.0  ;;  %v2931_v8 = vadd.f32 %v2886_v37, %v809_v9 }
 0x129   :  { %5752 = vst [vmem:[#allocation7_spill] sm:$0xff] %v2931_v8 }
 0x12c   :  { %v814_v13 = vpop.f32.mrb[12].mxu0  ;;  %v2865_v14 = vpop.f32.mrb[12].mxu1 }
 0x12d   :  { %v816_v15 = vpop.f32.mrb[13].mxu0  ;;  %v1016_v16 = vpop.f32.mrb[13].mxu1  ;;  %v2936_v11 = vadd.f32 %v2886_v37, %v814_v13 }
 0x12e   :  { %v817_v17 = vpop.f32.mrb[14].mxu0  ;;  %v2867_v18 = vpop.f32.mrb[14].mxu1  ;;  %v1292_v16 = vadd.f32 %v1291_v5, %v5558_v7 }
 0x12f   :  { %v819_v19 = vpop.f32.mrb[15].mxu0  ;;  %v1019_v20 = vpop.f32.mrb[15].mxu1  ;;  %5753 = vst [vmem:[#allocation8_spill] sm:$0xff] %v2936_v11  ;;  %v5555_v9 = vmax.f32 %v2936_v11, 0.0 }
 0x130   :  { %v5556_v19 = vmax.f32 %v2931_v8, 0.0 }
 0x134   :  { %v822_v21 = vpop.f32.mrb[16].mxu0  ;;  %v2869_v22 = vpop.f32.mrb[16].mxu1 }
 0x135   :  { %v824_v23 = vpop.f32.mrb[17].mxu0  ;;  %v1024_v24 = vpop.f32.mrb[17].mxu1 }
 0x136   :  { %v2871_v25 = vpop.f32.mrb[18].mxu0  ;;  %v2873_v26 = vpop.f32.mrb[18].mxu1 }
 0x137   :  { %v827_v27 = vpop.f32.mrb[19].mxu0  ;;  %v1027_v28 = vpop.f32.mrb[19].mxu1 }
 0x138   :  { %v2947_v28 = vadd.f32 %v2886_v37, %v817_v17  ;;  %v2962_v17 = vadd.f32 %v2886_v37, %v2871_v25 }
 0x13a   :  { %5754 = vst [vmem:[#allocation9_spill] sm:$0xff] %v2947_v28  ;;  %5756 = vst [vmem:[#allocation11_spill] sm:$0xff] %v2962_v17  ;;  %v5553_v25 = vmax.f32 %v2962_v17, 0.0 }
 0x13c   :  { %v2875_v29 = vpop.f32.mrb[20].mxu0  ;;  %v2877_v30 = vpop.f32.mrb[20].mxu1 }
 0x13d   :  { %v832_v31 = vpop.f32.mrb[21].mxu0  ;;  %v1032_v32 = vpop.f32.mrb[21].mxu1 }
 0x13e   :  { %v2879_v33 = vpop.f32.mrb[22].mxu0  ;;  %v2881_v34 = vpop.f32.mrb[22].mxu1  ;;  %v1293_v32 = vadd.f32 %v1292_v16, %v5556_v19 }
 0x13f   :  { %v835_v35 = vpop.f32.mrb[23].mxu0  ;;  %v1035_v36 = vpop.f32.mrb[23].mxu1 }
 0x140   :  { %v2952_v35 = vadd.f32 %v2886_v37, %v822_v21  ;;  %v1294_v36 = vadd.f32 %v1293_v32, %v5555_v9 }
 0x142   :  { %5755 = vst [vmem:[#allocation10_spill] sm:$0xff] %v2952_v35 }
 0x144   :  { %v2888_v38 = vpop.f32.mrb[24].mxu0  ;;  %v2890_v39 = vpop.f32.mrb[24].mxu1 }
 0x145   :  { %v840_v41 = vpop.f32.mrb[25].mxu0  ;;  %v1040_v42 = vpop.f32.mrb[25].mxu1  ;;  %v2986_v32 = vadd.f32 %v2886_v37, %v2888_v38 }
 0x146   :  { %v2895_v43 = vpop.f32.mrb[26].mxu0  ;;  %v2897_v44 = vpop.f32.mrb[26].mxu1  ;;  %v5552_v41 = vmax.f32 %v2947_v28, 0.0 }
 0x147   :  { %v843_v47 = vpop.f32.mrb[27].mxu0  ;;  %v1043_v48 = vpop.f32.mrb[27].mxu1  ;;  %5759 = vst [vmem:[#allocation14_spill] sm:$0xff] %v2986_v32 }
 0x148   :  { %v5551_v48 = vmax.f32 %v2952_v35, 0.0  ;;  %v1295_v21 = vadd.f32 %v1294_v36, %v5552_v41  ;;  %v5559_v41 = vmax.f32 %v2986_v32, 0.0 }
 0x14a   :  { %v1296_v16 = vadd.f32 %v1295_v21, %v5551_v48 }
 0x14c   :  { %v2911_v55 = vpop.f32.mrb[28].mxu0  ;;  %v2913_v56 = vpop.f32.mrb[28].mxu1 }
 0x14d   :  { %v848_v59 = vpop.f32.mrb[29].mxu0  ;;  %v1048_v60 = vpop.f32.mrb[29].mxu1 }
 0x14e   :  { %v2922_v61 = vpop.f32.mrb[30].mxu0  ;;  %v2924_v63 = vpop.f32.mrb[30].mxu1 }
 0x14f   :  { %v851_v3 = vpop.f32.mrb[31].mxu0  ;;  %v1051_v4 = vpop.f32.mrb[31].mxu1 }
 0x150   :  { %v2970_v3 = vadd.f32 %v2886_v37, %v2875_v29  ;;  %v1297_v29 = vadd.f32 %v1296_v16, %v5553_v25  ;;  %v2996_v16 = vadd.f32 %v2886_v37, %v2895_v43 }
 0x152   :  { %5757 = vst [vmem:[#allocation12_spill] sm:$0xff] %v2970_v3  ;;  %5760 = vst [vmem:[#allocation15_spill] sm:$0xff] %v2996_v16 }
 0x154   :  { %v854_v12 = vpop.f32.mrb[32].mxu0  ;;  %v2938_v15 = vpop.f32.mrb[32].mxu1 }
 0x155   :  { %v856_v20 = vpop.f32.mrb[33].mxu0  ;;  %v1056_v23 = vpop.f32.mrb[33].mxu1 }
 0x156   :  { %v857_v24 = vpop.f32.mrb[34].mxu0  ;;  %v2943_v27 = vpop.f32.mrb[34].mxu1  ;;  %v5554_v20 = vmax.f32 %v2970_v3, 0.0  ;;  %v2978_v23 = vadd.f32 %v2886_v37, %v2879_v33 }
 0x157   :  { %v859_v13 = vpop.f32.mrb[35].mxu0  ;;  %v1059_v31 = vpop.f32.mrb[35].mxu1 }
 0x158   :  { %5758 = vst [vmem:[#allocation13_spill] sm:$0xff] %v2978_v23  ;;  %v5557_v33 = vmax.f32 %v2978_v23, 0.0 }
 0x15c   :  { %v862_v42 = vpop.f32.mrb[36].mxu0  ;;  %v2957_v47 = vpop.f32.mrb[36].mxu1 }
 0x15d   :  { %v864_v53 = vpop.f32.mrb[37].mxu0  ;;  %v1064_v59 = vpop.f32.mrb[37].mxu1 }
 0x15e   :  { %v865_v60 = vpop.f32.mrb[38].mxu0  ;;  %v2964_v0 = vpop.f32.mrb[38].mxu1 }
 0x15f   :  { %v867_v4 = vpop.f32.mrb[39].mxu0  ;;  %v1067_v5 = vpop.f32.mrb[39].mxu1 }
 0x160   :  { %v1298_v4 = vadd.f32 %v1297_v29, %v5554_v20 }
 0x162   :  { %v1299_v38 = vadd.f32 %v1298_v4, %v5557_v33  ;;  %v3014_v4 = vadd.f32 %v2886_v37, %v2922_v61  ;;  %v3028_v61 = vadd.f32 %v2886_v37, %v857_v24 }
 0x164   :  { %v870_v13 = vpop.f32.mrb[40].mxu0  ;;  %v2980_v31 = vpop.f32.mrb[40].mxu1  ;;  %v1300_v29 = vadd.f32 %v1299_v38, %v5559_v41  ;;  %5762 = vst [vmem:[#allocation17_spill] sm:$0xff] %v3014_v4  ;;  %v3019_v38 = vadd.f32 %v2886_v37, %v854_v12  ;;  %5764 = vst [vmem:[#allocation19_spill] sm:$0xff] %v3028_v61 }
 0x165   :  { %v872_v36 = vpop.f32.mrb[41].mxu0  ;;  %v1072_v53 = vpop.f32.mrb[41].mxu1 }
 0x166   :  { %v873_v59 = vpop.f32.mrb[42].mxu0  ;;  %v2988_v21 = vpop.f32.mrb[42].mxu1  ;;  %v3002_v36 = vadd.f32 %v2886_v37, %v2911_v55  ;;  %5763 = vst [vmem:[#allocation18_spill] sm:$0xff] %v3019_v38  ;;  %v5569_v51 = vmax.f32 %v3019_v38, 0.0 }
 0x167   :  { %v875_v5 = vpop.f32.mrb[43].mxu0  ;;  %v1075_v48 = vpop.f32.mrb[43].mxu1 }
 0x168   :  { %5761 = vst [vmem:[#allocation16_spill] sm:$0xff] %v3002_v36  ;;  %v5564_v48 = vmax.f32 %v2996_v16, 0.0  ;;  %v5563_v19 = vmax.f32 %v3002_v36, 0.0  ;;  %v5575_v36 = vmax.f32 %v3028_v61, 0.0  ;;  %v3058_v61 = vadd.f32 %v2886_v37, %v873_v59 }
 0x16a   :  { %v1301_v7 = vadd.f32 %v1300_v29, %v5564_v48  ;;  %5768 = vst [vmem:[#allocation23_spill] sm:$0xff] %v3058_v61 }
 0x16c   :  { %v878_v53 = vpop.f32.mrb[44].mxu0  ;;  %v3004_v25 = vpop.f32.mrb[44].mxu1 }
 0x16d   :  { %v880_v5 = vpop.f32.mrb[45].mxu0  ;;  %v1080_v20 = vpop.f32.mrb[45].mxu1 }
 0x16e   :  { %v881_v9 = vpop.f32.mrb[46].mxu0  ;;  %v3009_v43 = vpop.f32.mrb[46].mxu1  ;;  %v1302_v20 = vadd.f32 %v1301_v7, %v5563_v19  ;;  %v5568_v5 = vmax.f32 %v3014_v4, 0.0  ;;  %v3035_v7 = vadd.f32 %v2886_v37, %v862_v42  ;;  %v3049_v42 = vadd.f32 %v2886_v37, %v870_v13 }
 0x16f   :  { %v883_v55 = vpop.f32.mrb[47].mxu0  ;;  %v1083_v33 = vpop.f32.mrb[47].mxu1  ;;  %v3063_v13 = vadd.f32 %v2886_v37, %v878_v53 }
 0x170   :  { %v1303_v12 = vadd.f32 %v1302_v20, %v5568_v5  ;;  %5765 = vst [vmem:[#allocation20_spill] sm:$0xff] %v3035_v7  ;;  %v5574_v24 = vmax.f32 %v3035_v7, 0.0  ;;  %5767 = vst [vmem:[#allocation22_spill] sm:$0xff] %v3049_v42  ;;  %v5580_v32 = vmax.f32 %v3049_v42, 0.0 }
 0x171   :  { %5769 = vst [vmem:[#allocation24_spill] sm:$0xff] %v3063_v13  ;;  %v5583_v59 = vmax.f32 %v3063_v13, 0.0 }
 0x172   :  { %v1304_v50 = vadd.f32 %v1303_v12, %v5569_v51 }
 0x174   :  { %v886_v41 = vpop.f32.mrb[48].mxu0  ;;  %v3024_v1 = vpop.f32.mrb[48].mxu1  ;;  %v1305_v20 = vadd.f32 %v1304_v50, %v5575_v36 }
 0x175   :  { %v888_v33 = vpop.f32.mrb[49].mxu0  ;;  %v1088_v55 = vpop.f32.mrb[49].mxu1  ;;  %v3079_v42 = vadd.f32 %v2886_v37, %v886_v41 }
 0x176   :  { %v889_v49 = vpop.f32.mrb[50].mxu0  ;;  %v3030_v29 = vpop.f32.mrb[50].mxu1  ;;  %v3042_v33 = vadd.f32 %v2886_v37, %v865_v60  ;;  %v1306_v51 = vadd.f32 %v1305_v20, %v5574_v24 }
 0x177   :  { %v891_v19 = vpop.f32.mrb[51].mxu0  ;;  %v1091_v48 = vpop.f32.mrb[51].mxu1  ;;  %5771 = vst [vmem:[#allocation26_spill] sm:$0xff] %v3079_v42  ;;  %v5589_v23 = vmax.f32 %v3079_v42, 0.0 }
 0x178   :  { %5766 = vst [vmem:[#allocation21_spill] sm:$0xff] %v3042_v33  ;;  %v5577_v60 = vmax.f32 %v3042_v33, 0.0 }
 0x17a   :  { %v1307_v50 = vadd.f32 %v1306_v51, %v5577_v60  ;;  %v3074_v51 = vadd.f32 %v2886_v37, %v881_v9  ;;  %v3088_v9 = vadd.f32 %v2886_v37, %v889_v49 }
 0x17c   :  { %v894_v55 = vpop.f32.mrb[52].mxu0  ;;  %v3044_v16 = vpop.f32.mrb[52].mxu1  ;;  %v1308_v20 = vadd.f32 %v1307_v50, %v5580_v32  ;;  %5770 = vst [vmem:[#allocation25_spill] sm:$0xff] %v3074_v51  ;;  %5772 = vst [vmem:[#allocation27_spill] sm:$0xff] %v3088_v9  ;;  %v5595_v3 = vmax.f32 %v3088_v9, 0.0 }
 0x17d   :  { %v896_v19 = vpop.f32.mrb[53].mxu0  ;;  %v1096_v48 = vpop.f32.mrb[53].mxu1 }
 0x17e   :  { %v897_v5 = vpop.f32.mrb[54].mxu0  ;;  %v3051_v12 = vpop.f32.mrb[54].mxu1 }
 0x17f   :  { %v899_v38 = vpop.f32.mrb[55].mxu0  ;;  %v1099_v4 = vpop.f32.mrb[55].mxu1 }
 0x180   :  { %v5584_v38 = vmax.f32 %v3058_v61, 0.0 }
 0x182   :  { %v1309_v33 = vadd.f32 %v1308_v20, %v5584_v38 }
 0x184   :  { %v902_v19 = vpop.f32.mrb[56].mxu0  ;;  %v3065_v48 = vpop.f32.mrb[56].mxu1  ;;  %v1310_v50 = vadd.f32 %v1309_v33, %v5583_v59  ;;  %v3095_v33 = vadd.f32 %v2886_v37, %v894_v55 }
 0x185   :  { %v904_v4 = vpop.f32.mrb[57].mxu0  ;;  %v1104_v24 = vpop.f32.mrb[57].mxu1  ;;  %v3109_v55 = vadd.f32 %v2886_v37, %v902_v19 }
 0x186   :  { %v905_v36 = vpop.f32.mrb[58].mxu0  ;;  %v3070_v7 = vpop.f32.mrb[58].mxu1  ;;  %v5588_v24 = vmax.f32 %v3074_v51, 0.0  ;;  %5773 = vst [vmem:[#allocation28_spill] sm:$0xff] %v3095_v33  ;;  %v5594_v49 = vmax.f32 %v3095_v33, 0.0 }
 0x187   :  { %v907_v53 = vpop.f32.mrb[59].mxu0  ;;  %v1107_v60 = vpop.f32.mrb[59].mxu1  ;;  %5775 = vst [vmem:[#allocation30_spill] sm:$0xff] %v3109_v55  ;;  %v5600_v35 = vmax.f32 %v3109_v55, 0.0  ;;  %v3118_v9 = vadd.f32 %v2886_v37, %v905_v36 }
 0x188   :  { %v1311_v41 = vadd.f32 %v1310_v50, %v5588_v24 }
 0x189   :  { %5776 = vst [vmem:[#allocation31_spill] sm:$0xff] %v3118_v9 }
 0x18a   :  { %v1312_v13 = vadd.f32 %v1311_v41, %v5589_v23 }
 0x18c   :  { %v910_v4 = vpop.f32.mrb[60].mxu0  ;;  %v3084_v32 = vpop.f32.mrb[60].mxu1  ;;  %v1313_v50 = vadd.f32 %v1312_v13, %v5595_v3 }
 0x18d   :  { %v912_v60 = vpop.f32.mrb[61].mxu0  ;;  %v1112_v53 = vpop.f32.mrb[61].mxu1  ;;  %v3123_v19 = vadd.f32 %v2886_v37, %v910_v4 }
 0x18e   :  { %v913_v61 = vpop.f32.mrb[62].mxu0  ;;  %v3090_v20 = vpop.f32.mrb[62].mxu1  ;;  %v3102_v60 = vadd.f32 %v2886_v37, %v897_v5  ;;  %v1314_v23 = vadd.f32 %v1313_v50, %v5594_v49 }
 0x18f   :  { %v915_v59 = vpop.f32.mrb[63].mxu0  ;;  %v1115_v38 = vpop.f32.mrb[63].mxu1  ;;  %5777 = vst [vmem:[#allocation32_spill] sm:$0xff] %v3123_v19  ;;  %v5603_v36 = vmax.f32 %v3123_v19, 0.0 }
 0x190   :  { %5774 = vst [vmem:[#allocation29_spill] sm:$0xff] %v3102_v60  ;;  %v5597_v5 = vmax.f32 %v3102_v60, 0.0 }
 0x192   :  { %v1315_v13 = vadd.f32 %v1314_v23, %v5597_v5  ;;  %v3134_v23 = vadd.f32 %v2886_v37, %v913_v61 }
 0x194   :  { %v918_v53 = vpop.f32.mrb[64].mxu0  ;;  %v3104_v17 = vpop.f32.mrb[64].mxu1  ;;  %v1316_v50 = vadd.f32 %v1315_v13, %v5600_v35  ;;  %5778 = vst [vmem:[#allocation33_spill] sm:$0xff] %v3134_v23 }
 0x195   :  { %v920_v38 = vpop.f32.mrb[65].mxu0  ;;  %v1120_v59 = vpop.f32.mrb[65].mxu1  ;;  %v3139_v55 = vadd.f32 %v2886_v37, %v918_v53 }
 0x196   :  { %v921_v24 = vpop.f32.mrb[66].mxu0  ;;  %v3111_v41 = vpop.f32.mrb[66].mxu1 }
 0x197   :  { %v923_v42 = vpop.f32.mrb[67].mxu0  ;;  %v1123_v51 = vpop.f32.mrb[67].mxu1  ;;  %5779 = vst [vmem:[#allocation34_spill] sm:$0xff] %v3139_v55  ;;  %v5609_v28 = vmax.f32 %v3139_v55, 0.0  ;;  %v3148_v61 = vadd.f32 %v2886_v37, %v921_v24 }
 0x198   :  { %v5604_v42 = vmax.f32 %v3118_v9, 0.0 }
 0x199   :  { %5780 = vst [vmem:[#allocation35_spill] sm:$0xff] %v3148_v61  ;;  %v5615_v11 = vmax.f32 %v3148_v61, 0.0 }
 0x19a   :  { %v1317_v60 = vadd.f32 %v1316_v50, %v5604_v42 }
 0x19c   :  { %v926_v38 = vpop.f32.mrb[68].mxu0  ;;  %v3125_v59 = vpop.f32.mrb[68].mxu1  ;;  %v1318_v13 = vadd.f32 %v1317_v60, %v5603_v36 }
 0x19d   :  { %v928_v51 = vpop.f32.mrb[69].mxu0  ;;  %v1128_v49 = vpop.f32.mrb[69].mxu1  ;;  %v3155_v60 = vadd.f32 %v2886_v37, %v926_v38 }
 0x19e   :  { %v929_v3 = vpop.f32.mrb[70].mxu0  ;;  %v3130_v33 = vpop.f32.mrb[70].mxu1  ;;  %v5608_v49 = vmax.f32 %v3134_v23, 0.0 }
 0x19f   :  { %v931_v4 = vpop.f32.mrb[71].mxu0  ;;  %v1131_v5 = vpop.f32.mrb[71].mxu1  ;;  %5781 = vst [vmem:[#allocation36_spill] sm:$0xff] %v3155_v60  ;;  %v5614_v24 = vmax.f32 %v3155_v60, 0.0 }
 0x1a0   :  { %v1319_v53 = vadd.f32 %v1318_v13, %v5608_v49 }
 0x1a2   :  { %v1320_v19 = vadd.f32 %v1319_v53, %v5609_v28 }
 0x1a4   :  { %v934_v51 = vpop.f32.mrb[72].mxu0  ;;  %v3144_v35 = vpop.f32.mrb[72].mxu1  ;;  %v1321_v13 = vadd.f32 %v1320_v19, %v5615_v11 }
 0x1a5   :  { %v936_v5 = vpop.f32.mrb[73].mxu0  ;;  %v1136_v4 = vpop.f32.mrb[73].mxu1  ;;  %v3169_v38 = vadd.f32 %v2886_v37, %v934_v51 }
 0x1a6   :  { %v937_v9 = vpop.f32.mrb[74].mxu0  ;;  %v3150_v50 = vpop.f32.mrb[74].mxu1  ;;  %v3162_v5 = vadd.f32 %v2886_v37, %v929_v3  ;;  %v1322_v28 = vadd.f32 %v1321_v13, %v5614_v24 }
 0x1a7   :  { %v939_v36 = vpop.f32.mrb[75].mxu0  ;;  %v1139_v42 = vpop.f32.mrb[75].mxu1  ;;  %5783 = vst [vmem:[#allocation38_spill] sm:$0xff] %v3169_v38  ;;  %v5620_v57 = vmax.f32 %v3169_v38, 0.0  ;;  %v3178_v61 = vadd.f32 %v2886_v37, %v937_v9 }
 0x1a8   :  { %5782 = vst [vmem:[#allocation37_spill] sm:$0xff] %v3162_v5  ;;  %v5617_v3 = vmax.f32 %v3162_v5, 0.0 }
 0x1a9   :  { %5784 = vst [vmem:[#allocation39_spill] sm:$0xff] %v3178_v61 }
 0x1aa   :  { %v1323_v19 = vadd.f32 %v1322_v28, %v5617_v3 }
 0x1ac   :  { %v942_v4 = vpop.f32.mrb[76].mxu0  ;;  %v3164_v8 = vpop.f32.mrb[76].mxu1  ;;  %v1324_v13 = vadd.f32 %v1323_v19, %v5620_v57 }
 0x1ad   :  { %v944_v42 = vpop.f32.mrb[77].mxu0  ;;  %v1144_v36 = vpop.f32.mrb[77].mxu1  ;;  %v3183_v51 = vadd.f32 %v2886_v37, %v942_v4 }
 0x1ae   :  { %v945_v49 = vpop.f32.mrb[78].mxu0  ;;  %v3171_v53 = vpop.f32.mrb[78].mxu1 }
 0x1af   :  { %v947_v55 = vpop.f32.mrb[79].mxu0  ;;  %v1147_v23 = vpop.f32.mrb[79].mxu1  ;;  %5785 = vst [vmem:[#allocation40_spill] sm:$0xff] %v3183_v51  ;;  %v5623_v9 = vmax.f32 %v3183_v51, 0.0  ;;  %v3194_v28 = vadd.f32 %v2886_v37, %v945_v49 }
 0x1b0   :  { %v5624_v55 = vmax.f32 %v3178_v61, 0.0 }
 0x1b1   :  { %5786 = vst [vmem:[#allocation41_spill] sm:$0xff] %v3194_v28 }
 0x1b2   :  { %v1325_v5 = vadd.f32 %v1324_v13, %v5624_v55 }
 0x1b4   :  { %v950_v42 = vpop.f32.mrb[80].mxu0  ;;  %v3185_v36 = vpop.f32.mrb[80].mxu1  ;;  %v1326_v19 = vadd.f32 %v1325_v5, %v5623_v9 }
 0x1b5   :  { %v952_v23 = vpop.f32.mrb[81].mxu0  ;;  %v1152_v24 = vpop.f32.mrb[81].mxu1  ;;  %v3199_v38 = vadd.f32 %v2886_v37, %v950_v42 }
 0x1b6   :  { %v953_v11 = vpop.f32.mrb[82].mxu0  ;;  %v3190_v60 = vpop.f32.mrb[82].mxu1  ;;  %v5628_v24 = vmax.f32 %v3194_v28, 0.0 }
 0x1b7   :  { %v955_v4 = vpop.f32.mrb[83].mxu0  ;;  %v1155_v3 = vpop.f32.mrb[83].mxu1  ;;  %5787 = vst [vmem:[#allocation42_spill] sm:$0xff] %v3199_v38  ;;  %v5629_v52 = vmax.f32 %v3199_v38, 0.0  ;;  %v3208_v49 = vadd.f32 %v2886_v37, %v953_v11 }
 0x1b8   :  { %v1327_v42 = vadd.f32 %v1326_v19, %v5628_v24 }
 0x1b9   :  { %5788 = vst [vmem:[#allocation43_spill] sm:$0xff] %v3208_v49  ;;  %v5635_v46 = vmax.f32 %v3208_v49, 0.0 }
 0x1ba   :  { %v1328_v51 = vadd.f32 %v1327_v42, %v5629_v52 }
 0x1bc   :  { %v958_v23 = vpop.f32.mrb[84].mxu0  ;;  %v3204_v57 = vpop.f32.mrb[84].mxu1  ;;  %v1329_v19 = vadd.f32 %v1328_v51, %v5635_v46 }
 0x1bd   :  { %v960_v3 = vpop.f32.mrb[85].mxu0  ;;  %v1160_v4 = vpop.f32.mrb[85].mxu1  ;;  %v3215_v5 = vadd.f32 %v2886_v37, %v958_v23 }
 0x1be   :  { %v961_v61 = vpop.f32.mrb[86].mxu0  ;;  %v3210_v13 = vpop.f32.mrb[86].mxu1 }
 0x1bf   :  { %5789 = vst [vmem:[#allocation44_spill] sm:$0xff] %v3215_v5  ;;  %v963_v9 = vpop.f32.mrb[87].mxu0  ;;  %v1163_v55 = vpop.f32.mrb[87].mxu1  ;;  %v5634_v11 = vmax.f32 %v3215_v5, 0.0  ;;  %v3222_v3 = vadd.f32 %v2886_v37, %v961_v61 }
 0x1c1   :  { %5790 = vst [vmem:[#allocation45_spill] sm:$0xff] %v3222_v3  ;;  %v1330_v52 = vadd.f32 %v1329_v19, %v5634_v11  ;;  %v5637_v61 = vmax.f32 %v3222_v3, 0.0 }
 0x1c3   :  { %v1331_v51 = vadd.f32 %v1330_v52, %v5637_v61 }
 0x1c4   :  { %v966_v4 = vpop.f32.mrb[88].mxu0  ;;  %v3224_v40 = vpop.f32.mrb[88].mxu1 }
 0x1c5   :  { %v3229_v23 = vadd.f32 %v2886_v37, %v966_v4  ;;  %v968_v55 = vpop.f32.mrb[89].mxu0  ;;  %v1168_v9 = vpop.f32.mrb[89].mxu1 }
 0x1c6   :  { %v969_v24 = vpop.f32.mrb[90].mxu0  ;;  %v3231_v42 = vpop.f32.mrb[90].mxu1 }
 0x1c7   :  { %5791 = vst [vmem:[#allocation46_spill] sm:$0xff] %v3229_v23  ;;  %5792 = vst [vmem:[#allocation47_spill] sm:$0xff] %v3231_v42  ;;  %v971_v38 = vpop.f32.mrb[91].mxu0  ;;  %v1171_v28 = vpop.f32.mrb[91].mxu1  ;;  %v5639_v45 = vmax.f32 %v3229_v23, 0.0  ;;  %v3238_v49 = vadd.f32 %v2886_v37, %v969_v24 }
 0x1c9   :  { %v1332_v9 = vadd.f32 %v1331_v51, %v5639_v45  ;;  %v5642_v19 = vmax.f32 %v3238_v49, 0.0 }
 0x1cb   :  { %v1333_v51 = vadd.f32 %v1332_v9, %v5642_v19 }
 0x1cc   :  { %v974_v4 = vpop.f32.mrb[92].mxu0  ;;  %v3242_v55 = vpop.f32.mrb[92].mxu1 }
 0x1cd   :  { %5793 = vst [vmem:[#allocation48_spill] sm:$0xff] %v3242_v55  ;;  %v3248_v11 = vadd.f32 %v2886_v37, %v974_v4  ;;  %v976_v38 = vpop.f32.mrb[93].mxu0  ;;  %v1176_v28 = vpop.f32.mrb[93].mxu1 }
 0x1ce   :  { %v977_v46 = vpop.f32.mrb[94].mxu0  ;;  %v3250_v5 = vpop.f32.mrb[94].mxu1 }
 0x1cf   :  { %5794 = vst [vmem:[#allocation49_spill] sm:$0xff] %v3250_v5  ;;  %v5641_v24 = vmax.f32 %v3248_v11, 0.0  ;;  %v3254_v52 = vadd.f32 %v2886_v37, %v977_v46  ;;  %v979_v61 = vpop.f32.mrb[95].mxu0  ;;  %v1179_v3 = vpop.f32.mrb[95].mxu1 }
 0x1d0   :  { %v3270_v3 = vadd.f32 %v2886_v37, %v2853_v54 }
 0x1d1   :  { %v1334_v45 = vadd.f32 %v1333_v51, %v5641_v24  ;;  %v5679_v4 = vmax.f32 %v3254_v52, 0.0 }
 0x1d2   :  { %v5645_v19 = vmax.f32 %v3270_v3, 0.0 }
 0x1d3   :  { %v1335_v61 = vadd.f32 %v1334_v45, %v5679_v4  ;;  %v3288_v45 = vadd.f32 %v2886_v37, %v2857_v62 }
 0x1d4   :  { %v982_v38 = vpop.f32.mrb[96].mxu0  ;;  %v3261_v28 = vpop.f32.mrb[96].mxu1 }
 0x1d5   :  { %v3264_v23 = vadd.f32 %v2886_v37, %v982_v38  ;;  %v984_v5 = vpop.f32.mrb[97].mxu0  ;;  %v1184_v55 = vpop.f32.mrb[97].mxu1 }
 0x1d6   :  { %v985_v46 = vpop.f32.mrb[98].mxu0  ;;  %v3266_v42 = vpop.f32.mrb[98].mxu1  ;;  %v3280_v5 = vadd.f32 %v2886_v37, %v2855_v58  ;;  %v3295_v58 = vadd.f32 %v2886_v37, %v2859_v2 }
 0x1d7   :  { %v5643_v9 = vmax.f32 %v3264_v23, 0.0  ;;  %v3276_v51 = vadd.f32 %v2886_v37, %v985_v46  ;;  %v987_v24 = vpop.f32.mrb[99].mxu0  ;;  %v1187_v38 = vpop.f32.mrb[99].mxu1 }
 0x1d8   :  { %v5646_v24 = vmax.f32 %v3280_v5, 0.0  ;;  %v5647_v38 = vmax.f32 %v3288_v45, 0.0 }
 0x1d9   :  { %v1336_v55 = vadd.f32 %v1335_v61, %v5643_v9  ;;  %v5644_v54 = vmax.f32 %v3276_v51, 0.0  ;;  %v3302_v9 = vadd.f32 %v2886_v37, %v2861_v6 }
 0x1db   :  { %v1337_v46 = vadd.f32 %v1336_v55, %v5644_v54  ;;  %v5648_v55 = vmax.f32 %v3295_v58, 0.0  ;;  %v3309_v54 = vadd.f32 %v2886_v37, %v2863_v10 }
 0x1dd   :  { %v1338_v61 = vadd.f32 %v1337_v46, %v5645_v19  ;;  %v5649_v46 = vmax.f32 %v3302_v9, 0.0  ;;  %v3316_v19 = vadd.f32 %v2886_v37, %v2865_v14 }
 0x1df   :  { %v1339_v62 = vadd.f32 %v1338_v61, %v5646_v24  ;;  %v5650_v61 = vmax.f32 %v3309_v54, 0.0  ;;  %v3323_v24 = vadd.f32 %v2886_v37, %v2867_v18 }
 0x1e1   :  { %v1340_v2 = vadd.f32 %v1339_v62, %v5647_v38  ;;  %v5651_v62 = vmax.f32 %v3316_v19, 0.0  ;;  %v3330_v38 = vadd.f32 %v2886_v37, %v2869_v22 }
 0x1e3   :  { %v1341_v6 = vadd.f32 %v1340_v2, %v5648_v55  ;;  %v5652_v2 = vmax.f32 %v3323_v24, 0.0  ;;  %v3337_v55 = vadd.f32 %v2886_v37, %v2873_v26 }
 0x1e5   :  { %v1342_v10 = vadd.f32 %v1341_v6, %v5649_v46  ;;  %v5653_v6 = vmax.f32 %v3330_v38, 0.0  ;;  %v3344_v46 = vadd.f32 %v2886_v37, %v2877_v30 }
 0x1e7   :  { %v1343_v14 = vadd.f32 %v1342_v10, %v5650_v61  ;;  %v5654_v10 = vmax.f32 %v3337_v55, 0.0  ;;  %v3351_v61 = vadd.f32 %v2886_v37, %v2881_v34 }
 0x1e9   :  { %v1344_v18 = vadd.f32 %v1343_v14, %v5651_v62  ;;  %v5655_v14 = vmax.f32 %v3344_v46, 0.0  ;;  %v3358_v62 = vadd.f32 %v2886_v37, %v2890_v39 }
 0x1eb   :  { %v1345_v22 = vadd.f32 %v1344_v18, %v5652_v2  ;;  %v5656_v18 = vmax.f32 %v3351_v61, 0.0  ;;  %v3365_v2 = vadd.f32 %v2886_v37, %v2897_v44 }
 0x1ed   :  { %v1346_v26 = vadd.f32 %v1345_v22, %v5653_v6  ;;  %v5657_v22 = vmax.f32 %v3358_v62, 0.0  ;;  %v3372_v6 = vadd.f32 %v2886_v37, %v2913_v56 }
 0x1ef   :  { %v1347_v30 = vadd.f32 %v1346_v26, %v5654_v10  ;;  %v5658_v26 = vmax.f32 %v3365_v2, 0.0  ;;  %v3379_v10 = vadd.f32 %v2886_v37, %v2924_v63 }
 0x1f1   :  { %v1348_v34 = vadd.f32 %v1347_v30, %v5655_v14  ;;  %v5659_v30 = vmax.f32 %v3372_v6, 0.0  ;;  %v3386_v14 = vadd.f32 %v2886_v37, %v2938_v15 }
 0x1f3   :  { %v1349_v39 = vadd.f32 %v1348_v34, %v5656_v18  ;;  %v5660_v34 = vmax.f32 %v3379_v10, 0.0  ;;  %v3393_v18 = vadd.f32 %v2886_v37, %v2943_v27 }
 0x1f5   :  { %v1350_v44 = vadd.f32 %v1349_v39, %v5657_v22  ;;  %v5661_v39 = vmax.f32 %v3386_v14, 0.0  ;;  %v3400_v22 = vadd.f32 %v2886_v37, %v2957_v47 }
 0x1f7   :  { %v1351_v56 = vadd.f32 %v1350_v44, %v5658_v26  ;;  %v5662_v44 = vmax.f32 %v3393_v18, 0.0  ;;  %v3407_v26 = vadd.f32 %v2886_v37, %v2964_v0 }
 0x1f9   :  { %v1352_v63 = vadd.f32 %v1351_v56, %v5659_v30  ;;  %v5663_v56 = vmax.f32 %v3400_v22, 0.0  ;;  %v3414_v30 = vadd.f32 %v2886_v37, %v2980_v31 }
 0x1fb   :  { %v1353_v15 = vadd.f32 %v1352_v63, %v5660_v34  ;;  %v5664_v63 = vmax.f32 %v3407_v26, 0.0  ;;  %v3421_v34 = vadd.f32 %v2886_v37, %v2988_v21 }
 0x1fd   :  { %v1354_v27 = vadd.f32 %v1353_v15, %v5661_v39  ;;  %v5665_v15 = vmax.f32 %v3414_v30, 0.0  ;;  %v3428_v39 = vadd.f32 %v2886_v37, %v3004_v25 }
 0x1ff   :  { %v1355_v47 = vadd.f32 %v1354_v27, %v5662_v44  ;;  %v5666_v27 = vmax.f32 %v3421_v34, 0.0  ;;  %v3435_v44 = vadd.f32 %v2886_v37, %v3009_v43 }
 0x201   :  { %v1356_v0 = vadd.f32 %v1355_v47, %v5663_v56  ;;  %v5667_v47 = vmax.f32 %v3428_v39, 0.0  ;;  %v3442_v56 = vadd.f32 %v2886_v37, %v3024_v1  ;;  %v3458_v1 = vadd.f32 %v2886_v37, %v3044_v16 }
 0x203   :  { %v1357_v31 = vadd.f32 %v1356_v0, %v5664_v63  ;;  %v5668_v0 = vmax.f32 %v3435_v44, 0.0  ;;  %v3449_v63 = vadd.f32 %v2886_v37, %v3030_v29  ;;  %5796 = vst [vmem:[#allocation51_spill] sm:$0xff] %v3458_v1  ;;  %v3465_v29 = vadd.f32 %v2886_v37, %v3051_v12 }
 0x205   :  { %v1358_v21 = vadd.f32 %v1357_v31, %v5665_v15  ;;  %5795 = vst [vmem:[#allocation50_spill] sm:$0xff] %v3449_v63  ;;  %v5676_v31 = vmax.f32 %v3442_v56, 0.0  ;;  %5797 = vst [vmem:[#allocation52_spill] sm:$0xff] %v3465_v29 }
 0x207   :  { %v1359_v25 = vadd.f32 %v1358_v21, %v5666_v27  ;;  %v5669_v21 = vmax.f32 %v3449_v63, 0.0 }
 0x209   :  { %v1360_v43 = vadd.f32 %v1359_v25, %v5667_v47  ;;  %v5670_v47 = vmax.f32 %v3458_v1, 0.0 }
 0x20b   :  { %v1361_v15 = vadd.f32 %v1360_v43, %v5668_v0  ;;  %v3472_v43 = vadd.f32 %v2886_v37, %v3065_v48  ;;  %v5671_v0 = vmax.f32 %v3465_v29, 0.0 }
 0x20d   :  { %v1362_v27 = vadd.f32 %v1361_v15, %v5676_v31  ;;  %5798 = vst [vmem:[#allocation53_spill] sm:$0xff] %v3472_v43  ;;  %v3479_v15 = vadd.f32 %v2886_v37, %v3070_v7 }
 0x20f   :  { %v1363_v25 = vadd.f32 %v1362_v27, %v5669_v21  ;;  %5799 = vst [vmem:[#allocation54_spill] sm:$0xff] %v3479_v15  ;;  %v5672_v27 = vmax.f32 %v3472_v43, 0.0  ;;  %v3486_v21 = vadd.f32 %v2886_v37, %v3084_v32 }
 0x211   :  { %v1364_v16 = vadd.f32 %v1363_v25, %v5670_v47  ;;  %5800 = vst [vmem:[#allocation55_spill] sm:$0xff] %v3486_v21  ;;  %v5673_v25 = vmax.f32 %v3479_v15, 0.0  ;;  %v3493_v47 = vadd.f32 %v2886_v37, %v3090_v20 }
 0x213   :  { %v1365_v12 = vadd.f32 %v1364_v16, %v5671_v0  ;;  %5801 = vst [vmem:[#allocation56_spill] sm:$0xff] %v3493_v47  ;;  %v5674_v16 = vmax.f32 %v3486_v21, 0.0  ;;  %v3500_v0 = vadd.f32 %v2886_v37, %v3104_v17 }
 0x215   :  { %v1366_v48 = vadd.f32 %v1365_v12, %v5672_v27  ;;  %5802 = vst [vmem:[#allocation57_spill] sm:$0xff] %v3500_v0  ;;  %v5675_v12 = vmax.f32 %v3493_v47, 0.0  ;;  %v3507_v27 = vadd.f32 %v2886_v37, %v3111_v41  ;;  %v5808_v47 = vld [vmem:[#allocation49_spill] sm:$0xff] }
 0x217   :  { %v1367_v7 = vadd.f32 %v1366_v48, %v5673_v25  ;;  %5803 = vst [vmem:[#allocation58_spill] sm:$0xff] %v3507_v27  ;;  %v5677_v48 = vmax.f32 %v3500_v0, 0.0  ;;  %v3514_v25 = vadd.f32 %v2886_v37, %v3125_v59 }
 0x219   :  { %v1368_v32 = vadd.f32 %v1367_v7, %v5674_v16  ;;  %5804 = vst [vmem:[#allocation59_spill] sm:$0xff] %v3514_v25  ;;  %v5678_v7 = vmax.f32 %v3507_v27, 0.0  ;;  %v3521_v16 = vadd.f32 %v2886_v37, %v3130_v33 }
 0x21b   :  { %v1369_v20 = vadd.f32 %v1368_v32, %v5675_v12  ;;  %5805 = vst [vmem:[#allocation60_spill] sm:$0xff] %v3521_v16  ;;  %v5682_v32 = vmax.f32 %v3514_v25, 0.0  ;;  %v1135_v12 = vadd.f32 %v2886_v37, %v3144_v35  ;;  %v5684_v31 = vmax.f32 %v3521_v16, 0.0  ;;  %v5807_v16 = vld [vmem:[#allocation48_spill] sm:$0xff] }
 0x21c   :  { %v1146_v35 = vadd.f32 %v2886_v37, %v3171_v53  ;;  %v1162_v53 = vadd.f32 %v2886_v37, %v3210_v13  ;;  %v1178_v13 = vadd.f32 %v2886_v37, %v5808_v47 }
 0x21d   :  { %v1370_v17 = vadd.f32 %v1369_v20, %v5677_v48  ;;  %v1138_v20 = vadd.f32 %v2886_v37, %v3150_v50  ;;  %v1275_v48 = vmax.f32 %v1135_v12, 0.0  ;;  %v1154_v50 = vadd.f32 %v2886_v37, %v3190_v60 }
 0x21e   :  { %v1278_v0 = vmax.f32 %v1146_v35, 0.0  ;;  %v1282_v35 = vmax.f32 %v1162_v53, 0.0  ;;  %v1286_v53 = vmax.f32 %v1178_v13, 0.0 }
 0x21f   :  { %v1371_v41 = vadd.f32 %v1370_v17, %v5678_v7  ;;  %v1143_v17 = vadd.f32 %v2886_v37, %v3164_v8  ;;  %v1276_v4 = vmax.f32 %v1138_v20, 0.0  ;;  %v1159_v8 = vadd.f32 %v2886_v37, %v3204_v57 }
 0x220   :  { %v1280_v20 = vmax.f32 %v1154_v50, 0.0  ;;  %v1175_v57 = vadd.f32 %v2886_v37, %v5807_v16 }
 0x221   :  { %v1372_v59 = vadd.f32 %v1371_v41, %v5682_v32  ;;  %v1277_v25 = vmax.f32 %v1143_v17, 0.0  ;;  %v1151_v41 = vadd.f32 %v2886_v37, %v3185_v36  ;;  %v1281_v17 = vmax.f32 %v1159_v8, 0.0 }
 0x222   :  { %v1167_v36 = vadd.f32 %v2886_v37, %v3224_v40  ;;  %v1183_v8 = vadd.f32 %v2886_v37, %v3261_v28  ;;  %v1285_v40 = vmax.f32 %v1175_v57, 0.0 }
 0x223   :  { %v1373_v33 = vadd.f32 %v1372_v59, %v5684_v31  ;;  %v1279_v12 = vmax.f32 %v1151_v41, 0.0  ;;  %v5806_v31 = vld [vmem:[#allocation47_spill] sm:$0xff] }
 0x224   :  { %v1170_v60 = vadd.f32 %v2886_v37, %v5806_v31  ;;  %v1283_v41 = vmax.f32 %v1167_v36, 0.0  ;;  %v1287_v21 = vmax.f32 %v1183_v8, 0.0  ;;  %v1186_v31 = vadd.f32 %v2886_v37, %v3266_v42 }
 0x225   :  { %v1374_v7 = vadd.f32 %v1373_v33, %v1275_v48 }
 0x226   :  { %v1284_v50 = vmax.f32 %v1170_v60, 0.0  ;;  %v1288_v15 = vmax.f32 %v1186_v31, 0.0 }
 0x227   :  { %v1375_v27 = vadd.f32 %v1374_v7, %v1276_v4 }
 0x229   :  { %v1376_v32 = vadd.f32 %v1375_v27, %v1277_v25 }
 0x22b   :  { %v1377_v59 = vadd.f32 %v1376_v32, %v1278_v0 }
 0x22d   :  { %v1378_v33 = vadd.f32 %v1377_v59, %v1279_v12 }
 0x22f   :  { %v1379_v7 = vadd.f32 %v1378_v33, %v1280_v20 }
 0x231   :  { %v1380_v27 = vadd.f32 %v1379_v7, %v1281_v17 }
 0x233   :  { %v1381_v32 = vadd.f32 %v1380_v27, %v1282_v35 }
 0x235   :  { %v1382_v59 = vadd.f32 %v1381_v32, %v1283_v41 }
 0x237   :  { %v1383_v33 = vadd.f32 %v1382_v59, %v1284_v50 }
 0x239   :  { %v1384_v7 = vadd.f32 %v1383_v33, %v1285_v40  ;;  %v5818_v33 = vld [vmem:[#allocation4_spill] sm:$0xff] }
 0x23b   :  { %v1385_v36 = vadd.f32 %v1384_v7, %v1286_v53 }
 0x23d   :  { %v1386_v27 = vadd.f32 %v1385_v36, %v1287_v21 }
 0x23f   :  { %v1387_v16 = vadd.f32 %v1386_v27, %v1288_v15  ;;  %v5824_v27 = vld [vmem:[#allocation6_spill] sm:$0xff] }
 0x241   :  { %v1388_v32 = vrot.slane %v1387_v16, 4 }
 0x243   :  { %v1389_v60 = vadd.f32 %v1388_v32, %v1387_v16  ;;  %v5825_v16 = vmax.f32 %v5824_v27, 0.0 }
 0x245   :  { %v1390_v43 = vrot.slane %v1389_v60, 2 }
 0x247   :  { %v1391_v29 = vadd.f32 %v1390_v43, %v1389_v60 }
 0x249   :  { %v1392_v47 = vrot.slane %v1391_v29, 1 }
 0x24b   :  { %v1393_v1 = vadd.f32 %v1392_v47, %v1391_v29 }
 0x24d   :  { %v3559_v63 = vmul.f32 0.00125, %v1393_v1 }
 0x24f   :  { %v3562_v28 = vsub.f32 %v1275_v48, %v3559_v63  ;;  %v3565_v57 = vsub.f32 %v1276_v4, %v3559_v63  ;;  %v3568_v37 = vsub.f32 %v1277_v25, %v3559_v63  ;;  %v3571_v42 = vsub.f32 %v1278_v0, %v3559_v63 }
 0x250   :  { %v3574_v59 = vsub.f32 %v1279_v12, %v3559_v63  ;;  %v3577_v43 = vsub.f32 %v1280_v20, %v3559_v63  ;;  %v3580_v1 = vsub.f32 %v1281_v17, %v3559_v63  ;;  %v3583_v29 = vsub.f32 %v1282_v35, %v3559_v63  ;;  %v5814_v17 = vld [vmem:[#allocation3_spill] sm:$0xff] }
 0x251   :  { %v3586_v4 = vsub.f32 %v1283_v41, %v3559_v63  ;;  %v3589_v25 = vsub.f32 %v1284_v50, %v3559_v63  ;;  %v3592_v0 = vsub.f32 %v1285_v40, %v3559_v63  ;;  %v3595_v48 = vsub.f32 %v1286_v53, %v3559_v63  ;;  %v5816_v50 = vld [vmem:[#allocation2_spill] sm:$0xff]  ;;  %v5821_v53 = vld [vmem:[#allocation5_spill] sm:$0xff] }
 0x252   :  { %5809 = vst [vmem:[#allocation47_spill] sm:$0xff] %v3583_v29  ;;  %v3598_v12 = vsub.f32 %v1287_v21, %v3559_v63  ;;  %v3601_v20 = vsub.f32 %v1288_v15, %v3559_v63  ;;  %v5815_v35 = vmax.f32 %v5814_v17, 0.0  ;;  %v5817_v13 = vmax.f32 %v5816_v50, 0.0  ;;  %v5827_v17 = vld [vmem:[#allocation7_spill] sm:$0xff] }
 0x253   :  { %5810 = vst [vmem:[#allocation48_spill] sm:$0xff] %v3586_v4  ;;  %5811 = vst [vmem:[#allocation49_spill] sm:$0xff] %v3589_v25  ;;  %v5819_v40 = vmax.f32 %v5818_v33, 0.0  ;;  %v5822_v31 = vmax.f32 %v5821_v53, 0.0  ;;  %v3630_v32 = vsub.f32 %v5825_v16, %v3559_v63 }
 0x254   :  { %5812 = vst [vmem:[#allocation61_spill] sm:$0xff] %v3592_v0  ;;  %5813 = vst [vmem:[#allocation62_spill] sm:$0xff] %v3595_v48  ;;  %v3606_v41 = vsub.f32 %v5815_v35, %v3559_v63  ;;  %v3611_v8 = vsub.f32 %v5817_v13, %v3559_v63  ;;  %v5828_v35 = vmax.f32 %v5827_v17, 0.0 }
 0x255   :  { %v3616_v7 = vsub.f32 %v5819_v40, %v3559_v63  ;;  %v3625_v36 = vsub.f32 %v5822_v31, %v3559_v63  ;;  %5826 = vst [vmem:[#allocation4_spill] sm:$0xff] %v3630_v32  ;;  %v5830_v40 = vld [vmem:[#allocation8_spill] sm:$0xff]  ;;  %v1500_v27 = vmul.f32 %v3630_v32, %v3630_v32 }
 0x256   :  { %v1496_v21 = vmul.f32 %v3606_v41, %v3606_v41  ;;  %v1497_v15 = vmul.f32 %v3611_v8, %v3611_v8  ;;  %v3637_v50 = vsub.f32 %v5828_v35, %v3559_v63  ;;  %v5831_v53 = vmax.f32 %v5830_v40, 0.0 }
 0x257   :  { %5820 = vst [vmem:[#allocation3_spill] sm:$0xff] %v3616_v7  ;;  %5823 = vst [vmem:[#allocation2_spill] sm:$0xff] %v3625_v36  ;;  %v1498_v60 = vmul.f32 %v3616_v7, %v3616_v7  ;;  %v1499_v13 = vmul.f32 %v3625_v36, %v3625_v36 }
 0x258   :  { %v1596_v47 = vadd.f32 %v1497_v15, %v1496_v21  ;;  %5829 = vst [vmem:[#allocation5_spill] sm:$0xff] %v3637_v50  ;;  %v3644_v31 = vsub.f32 %v5831_v53, %v3559_v63  ;;  %v5833_v21 = vld [vmem:[#allocation9_spill] sm:$0xff]  ;;  %v1501_v17 = vmul.f32 %v3637_v50, %v3637_v50 }
 0x259   :  { %v5834_v15 = vmax.f32 %v5833_v21, 0.0 }
 0x25a   :  { %v1597_v33 = vadd.f32 %v1596_v47, %v1498_v60  ;;  %5832 = vst [vmem:[#allocation6_spill] sm:$0xff] %v3644_v31  ;;  %v5836_v60 = vld [vmem:[#allocation10_spill] sm:$0xff]  ;;  %v1502_v40 = vmul.f32 %v3644_v31, %v3644_v31 }
 0x25b   :  { %v3651_v7 = vsub.f32 %v5834_v15, %v3559_v63  ;;  %v5837_v47 = vmax.f32 %v5836_v60, 0.0 }
 0x25c   :  { %v1598_v16 = vadd.f32 %v1597_v33, %v1499_v13  ;;  %v5839_v13 = vld [vmem:[#allocation11_spill] sm:$0xff] }
 0x25d   :  { %5835 = vst [vmem:[#allocation7_spill] sm:$0xff] %v3651_v7  ;;  %v3658_v36 = vsub.f32 %v5837_v47, %v3559_v63  ;;  %v5840_v33 = vmax.f32 %v5839_v13, 0.0  ;;  %v1503_v21 = vmul.f32 %v3651_v7, %v3651_v7 }
 0x25e   :  { %v1599_v35 = vadd.f32 %v1598_v16, %v1500_v27  ;;  %v5842_v27 = vld [vmem:[#allocation12_spill] sm:$0xff] }
 0x25f   :  { %5838 = vst [vmem:[#allocation8_spill] sm:$0xff] %v3658_v36  ;;  %v3665_v32 = vsub.f32 %v5840_v33, %v3559_v63  ;;  %v5843_v16 = vmax.f32 %v5842_v27, 0.0  ;;  %v1504_v60 = vmul.f32 %v3658_v36, %v3658_v36 }
 0x260   :  { %v1600_v53 = vadd.f32 %v1599_v35, %v1501_v17  ;;  %v5845_v17 = vld [vmem:[#allocation13_spill] sm:$0xff] }
 0x261   :  { %5841 = vst [vmem:[#allocation9_spill] sm:$0xff] %v3665_v32  ;;  %v3672_v50 = vsub.f32 %v5843_v16, %v3559_v63  ;;  %v5846_v35 = vmax.f32 %v5845_v17, 0.0  ;;  %v1505_v13 = vmul.f32 %v3665_v32, %v3665_v32 }
 0x262   :  { %v1601_v15 = vadd.f32 %v1600_v53, %v1502_v40  ;;  %v5848_v40 = vld [vmem:[#allocation14_spill] sm:$0xff] }
 0x263   :  { %5844 = vst [vmem:[#allocation10_spill] sm:$0xff] %v3672_v50  ;;  %v3679_v31 = vsub.f32 %v5846_v35, %v3559_v63  ;;  %v5849_v53 = vmax.f32 %v5848_v40, 0.0  ;;  %v1506_v27 = vmul.f32 %v3672_v50, %v3672_v50 }
 0x264   :  { %v1602_v47 = vadd.f32 %v1601_v15, %v1503_v21  ;;  %v5851_v21 = vld [vmem:[#allocation15_spill] sm:$0xff] }
 0x265   :  { %5847 = vst [vmem:[#allocation11_spill] sm:$0xff] %v3679_v31  ;;  %v3686_v7 = vsub.f32 %v5849_v53, %v3559_v63  ;;  %v5852_v15 = vmax.f32 %v5851_v21, 0.0  ;;  %v1507_v17 = vmul.f32 %v3679_v31, %v3679_v31 }
 0x266   :  { %v1603_v33 = vadd.f32 %v1602_v47, %v1504_v60  ;;  %v5854_v60 = vld [vmem:[#allocation16_spill] sm:$0xff] }
 0x267   :  { %5850 = vst [vmem:[#allocation12_spill] sm:$0xff] %v3686_v7  ;;  %v3693_v36 = vsub.f32 %v5852_v15, %v3559_v63  ;;  %v5855_v47 = vmax.f32 %v5854_v60, 0.0  ;;  %v1508_v40 = vmul.f32 %v3686_v7, %v3686_v7 }
 0x268   :  { %v1604_v16 = vadd.f32 %v1603_v33, %v1505_v13  ;;  %v5857_v13 = vld [vmem:[#allocation17_spill] sm:$0xff] }
 0x269   :  { %5853 = vst [vmem:[#allocation13_spill] sm:$0xff] %v3693_v36  ;;  %v3700_v32 = vsub.f32 %v5855_v47, %v3559_v63  ;;  %v5858_v33 = vmax.f32 %v5857_v13, 0.0  ;;  %v1509_v21 = vmul.f32 %v3693_v36, %v3693_v36 }
 0x26a   :  { %v1605_v35 = vadd.f32 %v1604_v16, %v1506_v27  ;;  %v5860_v27 = vld [vmem:[#allocation18_spill] sm:$0xff] }
 0x26b   :  { %5856 = vst [vmem:[#allocation14_spill] sm:$0xff] %v3700_v32  ;;  %v3707_v50 = vsub.f32 %v5858_v33, %v3559_v63  ;;  %v5861_v16 = vmax.f32 %v5860_v27, 0.0  ;;  %v1510_v60 = vmul.f32 %v3700_v32, %v3700_v32 }
 0x26c   :  { %v1606_v53 = vadd.f32 %v1605_v35, %v1507_v17  ;;  %v5863_v17 = vld [vmem:[#allocation19_spill] sm:$0xff] }
 0x26d   :  { %5859 = vst [vmem:[#allocation15_spill] sm:$0xff] %v3707_v50  ;;  %v3714_v31 = vsub.f32 %v5861_v16, %v3559_v63  ;;  %v5864_v35 = vmax.f32 %v5863_v17, 0.0  ;;  %v1511_v13 = vmul.f32 %v3707_v50, %v3707_v50 }
 0x26e   :  { %v1607_v15 = vadd.f32 %v1606_v53, %v1508_v40  ;;  %v5866_v40 = vld [vmem:[#allocation20_spill] sm:$0xff] }
 0x26f   :  { %5862 = vst [vmem:[#allocation16_spill] sm:$0xff] %v3714_v31  ;;  %v3721_v7 = vsub.f32 %v5864_v35, %v3559_v63  ;;  %v5867_v53 = vmax.f32 %v5866_v40, 0.0  ;;  %v1512_v27 = vmul.f32 %v3714_v31, %v3714_v31 }
 0x270   :  { %v1608_v47 = vadd.f32 %v1607_v15, %v1509_v21  ;;  %v5869_v21 = vld [vmem:[#allocation21_spill] sm:$0xff] }
 0x271   :  { %5865 = vst [vmem:[#allocation17_spill] sm:$0xff] %v3721_v7  ;;  %v3728_v36 = vsub.f32 %v5867_v53, %v3559_v63  ;;  %v5870_v15 = vmax.f32 %v5869_v21, 0.0  ;;  %v1513_v17 = vmul.f32 %v3721_v7, %v3721_v7 }
 0x272   :  { %v1609_v33 = vadd.f32 %v1608_v47, %v1510_v60  ;;  %v5872_v60 = vld [vmem:[#allocation22_spill] sm:$0xff] }
 0x273   :  { %5868 = vst [vmem:[#allocation18_spill] sm:$0xff] %v3728_v36  ;;  %v3735_v32 = vsub.f32 %v5870_v15, %v3559_v63  ;;  %v5873_v47 = vmax.f32 %v5872_v60, 0.0  ;;  %v1514_v40 = vmul.f32 %v3728_v36, %v3728_v36 }
 0x274   :  { %v1610_v16 = vadd.f32 %v1609_v33, %v1511_v13  ;;  %v5875_v13 = vld [vmem:[#allocation23_spill] sm:$0xff] }
 0x275   :  { %5871 = vst [vmem:[#allocation19_spill] sm:$0xff] %v3735_v32  ;;  %v3742_v50 = vsub.f32 %v5873_v47, %v3559_v63  ;;  %v5876_v33 = vmax.f32 %v5875_v13, 0.0  ;;  %v1515_v21 = vmul.f32 %v3735_v32, %v3735_v32 }
 0x276   :  { %v1611_v35 = vadd.f32 %v1610_v16, %v1512_v27  ;;  %v5878_v27 = vld [vmem:[#allocation24_spill] sm:$0xff] }
 0x277   :  { %5874 = vst [vmem:[#allocation20_spill] sm:$0xff] %v3742_v50  ;;  %v3749_v31 = vsub.f32 %v5876_v33, %v3559_v63  ;;  %v5879_v16 = vmax.f32 %v5878_v27, 0.0  ;;  %v1516_v60 = vmul.f32 %v3742_v50, %v3742_v50 }
 0x278   :  { %v1612_v53 = vadd.f32 %v1611_v35, %v1513_v17  ;;  %v5881_v17 = vld [vmem:[#allocation25_spill] sm:$0xff] }
 0x279   :  { %5877 = vst [vmem:[#allocation21_spill] sm:$0xff] %v3749_v31  ;;  %v3756_v7 = vsub.f32 %v5879_v16, %v3559_v63  ;;  %v5882_v35 = vmax.f32 %v5881_v17, 0.0  ;;  %v1517_v13 = vmul.f32 %v3749_v31, %v3749_v31 }
 0x27a   :  { %v1613_v15 = vadd.f32 %v1612_v53, %v1514_v40  ;;  %v5884_v40 = vld [vmem:[#allocation26_spill] sm:$0xff] }
 0x27b   :  { %5880 = vst [vmem:[#allocation22_spill] sm:$0xff] %v3756_v7  ;;  %v3763_v36 = vsub.f32 %v5882_v35, %v3559_v63  ;;  %v5885_v53 = vmax.f32 %v5884_v40, 0.0  ;;  %v1518_v27 = vmul.f32 %v3756_v7, %v3756_v7 }
 0x27c   :  { %v1614_v47 = vadd.f32 %v1613_v15, %v1515_v21  ;;  %v5887_v21 = vld [vmem:[#allocation27_spill] sm:$0xff] }
 0x27d   :  { %5883 = vst [vmem:[#allocation23_spill] sm:$0xff] %v3763_v36  ;;  %v3770_v32 = vsub.f32 %v5885_v53, %v3559_v63  ;;  %v5888_v15 = vmax.f32 %v5887_v21, 0.0  ;;  %v1519_v17 = vmul.f32 %v3763_v36, %v3763_v36 }
 0x27e   :  { %v1615_v33 = vadd.f32 %v1614_v47, %v1516_v60  ;;  %v5890_v60 = vld [vmem:[#allocation28_spill] sm:$0xff] }
 0x27f   :  { %5886 = vst [vmem:[#allocation24_spill] sm:$0xff] %v3770_v32  ;;  %v3777_v50 = vsub.f32 %v5888_v15, %v3559_v63  ;;  %v5891_v47 = vmax.f32 %v5890_v60, 0.0  ;;  %v1520_v40 = vmul.f32 %v3770_v32, %v3770_v32 }
 0x280   :  { %v1616_v16 = vadd.f32 %v1615_v33, %v1517_v13  ;;  %v5893_v13 = vld [vmem:[#allocation29_spill] sm:$0xff] }
 0x281   :  { %5889 = vst [vmem:[#allocation25_spill] sm:$0xff] %v3777_v50  ;;  %v3784_v31 = vsub.f32 %v5891_v47, %v3559_v63  ;;  %v5894_v33 = vmax.f32 %v5893_v13, 0.0  ;;  %v1521_v21 = vmul.f32 %v3777_v50, %v3777_v50 }
 0x282   :  { %v1617_v35 = vadd.f32 %v1616_v16, %v1518_v27  ;;  %v5896_v27 = vld [vmem:[#allocation30_spill] sm:$0xff] }
 0x283   :  { %5892 = vst [vmem:[#allocation26_spill] sm:$0xff] %v3784_v31  ;;  %v3791_v7 = vsub.f32 %v5894_v33, %v3559_v63  ;;  %v5897_v16 = vmax.f32 %v5896_v27, 0.0  ;;  %v1522_v60 = vmul.f32 %v3784_v31, %v3784_v31 }
 0x284   :  { %v1618_v53 = vadd.f32 %v1617_v35, %v1519_v17  ;;  %v5899_v17 = vld [vmem:[#allocation31_spill] sm:$0xff] }
 0x285   :  { %5895 = vst [vmem:[#allocation27_spill] sm:$0xff] %v3791_v7  ;;  %v3798_v36 = vsub.f32 %v5897_v16, %v3559_v63  ;;  %v5900_v35 = vmax.f32 %v5899_v17, 0.0  ;;  %v1523_v13 = vmul.f32 %v3791_v7, %v3791_v7 }
 0x286   :  { %v1619_v15 = vadd.f32 %v1618_v53, %v1520_v40  ;;  %v5902_v40 = vld [vmem:[#allocation32_spill] sm:$0xff] }
 0x287   :  { %5898 = vst [vmem:[#allocation28_spill] sm:$0xff] %v3798_v36  ;;  %v3805_v32 = vsub.f32 %v5900_v35, %v3559_v63  ;;  %v5903_v53 = vmax.f32 %v5902_v40, 0.0  ;;  %v1524_v27 = vmul.f32 %v3798_v36, %v3798_v36 }
 0x288   :  { %v1620_v47 = vadd.f32 %v1619_v15, %v1521_v21  ;;  %v5905_v21 = vld [vmem:[#allocation33_spill] sm:$0xff] }
 0x289   :  { %5901 = vst [vmem:[#allocation29_spill] sm:$0xff] %v3805_v32  ;;  %v3812_v50 = vsub.f32 %v5903_v53, %v3559_v63  ;;  %v5906_v15 = vmax.f32 %v5905_v21, 0.0  ;;  %v1525_v17 = vmul.f32 %v3805_v32, %v3805_v32 }
 0x28a   :  { %v1621_v33 = vadd.f32 %v1620_v47, %v1522_v60  ;;  %v5908_v60 = vld [vmem:[#allocation34_spill] sm:$0xff] }
 0x28b   :  { %5904 = vst [vmem:[#allocation30_spill] sm:$0xff] %v3812_v50  ;;  %v3819_v31 = vsub.f32 %v5906_v15, %v3559_v63  ;;  %v5909_v47 = vmax.f32 %v5908_v60, 0.0  ;;  %v1526_v40 = vmul.f32 %v3812_v50, %v3812_v50 }
 0x28c   :  { %v1622_v16 = vadd.f32 %v1621_v33, %v1523_v13  ;;  %v5911_v13 = vld [vmem:[#allocation35_spill] sm:$0xff] }
 0x28d   :  { %5907 = vst [vmem:[#allocation31_spill] sm:$0xff] %v3819_v31  ;;  %v3826_v7 = vsub.f32 %v5909_v47, %v3559_v63  ;;  %v5912_v33 = vmax.f32 %v5911_v13, 0.0  ;;  %v1527_v21 = vmul.f32 %v3819_v31, %v3819_v31 }
 0x28e   :  { %v1623_v35 = vadd.f32 %v1622_v16, %v1524_v27  ;;  %v5914_v27 = vld [vmem:[#allocation36_spill] sm:$0xff] }
 0x28f   :  { %5910 = vst [vmem:[#allocation32_spill] sm:$0xff] %v3826_v7  ;;  %v3833_v36 = vsub.f32 %v5912_v33, %v3559_v63  ;;  %v5915_v16 = vmax.f32 %v5914_v27, 0.0  ;;  %v1528_v60 = vmul.f32 %v3826_v7, %v3826_v7 }
 0x290   :  { %v1624_v53 = vadd.f32 %v1623_v35, %v1525_v17  ;;  %v5917_v17 = vld [vmem:[#allocation37_spill] sm:$0xff] }
 0x291   :  { %5913 = vst [vmem:[#allocation33_spill] sm:$0xff] %v3833_v36  ;;  %v3840_v32 = vsub.f32 %v5915_v16, %v3559_v63  ;;  %v5918_v35 = vmax.f32 %v5917_v17, 0.0  ;;  %v1529_v13 = vmul.f32 %v3833_v36, %v3833_v36 }
 0x292   :  { %v1625_v15 = vadd.f32 %v1624_v53, %v1526_v40  ;;  %v5920_v40 = vld [vmem:[#allocation38_spill] sm:$0xff] }
 0x293   :  { %5916 = vst [vmem:[#allocation34_spill] sm:$0xff] %v3840_v32  ;;  %v3847_v50 = vsub.f32 %v5918_v35, %v3559_v63  ;;  %v5921_v53 = vmax.f32 %v5920_v40, 0.0  ;;  %v1530_v27 = vmul.f32 %v3840_v32, %v3840_v32 }
 0x294   :  { %v1626_v47 = vadd.f32 %v1625_v15, %v1527_v21  ;;  %v5923_v21 = vld [vmem:[#allocation39_spill] sm:$0xff] }
 0x295   :  { %5919 = vst [vmem:[#allocation35_spill] sm:$0xff] %v3847_v50  ;;  %v3854_v31 = vsub.f32 %v5921_v53, %v3559_v63  ;;  %v5924_v15 = vmax.f32 %v5923_v21, 0.0  ;;  %v1531_v17 = vmul.f32 %v3847_v50, %v3847_v50 }
 0x296   :  { %v1627_v33 = vadd.f32 %v1626_v47, %v1528_v60  ;;  %v5926_v60 = vld [vmem:[#allocation40_spill] sm:$0xff] }
 0x297   :  { %5922 = vst [vmem:[#allocation36_spill] sm:$0xff] %v3854_v31  ;;  %v3861_v7 = vsub.f32 %v5924_v15, %v3559_v63  ;;  %v5927_v47 = vmax.f32 %v5926_v60, 0.0  ;;  %v1532_v40 = vmul.f32 %v3854_v31, %v3854_v31 }
 0x298   :  { %v1628_v16 = vadd.f32 %v1627_v33, %v1529_v13  ;;  %v5929_v13 = vld [vmem:[#allocation41_spill] sm:$0xff] }
 0x299   :  { %5925 = vst [vmem:[#allocation37_spill] sm:$0xff] %v3861_v7  ;;  %v3868_v36 = vsub.f32 %v5927_v47, %v3559_v63  ;;  %v5930_v33 = vmax.f32 %v5929_v13, 0.0  ;;  %v1533_v21 = vmul.f32 %v3861_v7, %v3861_v7 }
 0x29a   :  { %v1629_v35 = vadd.f32 %v1628_v16, %v1530_v27  ;;  %v5932_v27 = vld [vmem:[#allocation42_spill] sm:$0xff] }
 0x29b   :  { %5928 = vst [vmem:[#allocation38_spill] sm:$0xff] %v3868_v36  ;;  %v3875_v32 = vsub.f32 %v5930_v33, %v3559_v63  ;;  %v5933_v16 = vmax.f32 %v5932_v27, 0.0  ;;  %v1534_v60 = vmul.f32 %v3868_v36, %v3868_v36 }
 0x29c   :  { %v1630_v53 = vadd.f32 %v1629_v35, %v1531_v17  ;;  %v5934_v17 = vld [vmem:[#allocation43_spill] sm:$0xff] }
 0x29d   :  { %5931 = vst [vmem:[#allocation39_spill] sm:$0xff] %v3875_v32  ;;  %v3882_v50 = vsub.f32 %v5933_v16, %v3559_v63  ;;  %v5935_v35 = vmax.f32 %v5934_v17, 0.0  ;;  %v1535_v13 = vmul.f32 %v3875_v32, %v3875_v32 }
 0x29e   :  { %v1631_v15 = vadd.f32 %v1630_v53, %v1532_v40  ;;  %v5936_v40 = vld [vmem:[#allocation44_spill] sm:$0xff] }
 0x29f   :  { %v3889_v31 = vsub.f32 %v5935_v35, %v3559_v63  ;;  %v5937_v53 = vmax.f32 %v5936_v40, 0.0  ;;  %v1536_v27 = vmul.f32 %v3882_v50, %v3882_v50 }
 0x2a0   :  { %v1632_v47 = vadd.f32 %v1631_v15, %v1533_v21  ;;  %v5938_v21 = vld [vmem:[#allocation45_spill] sm:$0xff] }
 0x2a1   :  { %v3896_v7 = vsub.f32 %v5937_v53, %v3559_v63  ;;  %v5939_v15 = vmax.f32 %v5938_v21, 0.0  ;;  %v1537_v17 = vmul.f32 %v3889_v31, %v3889_v31 }
 0x2a2   :  { %v1633_v33 = vadd.f32 %v1632_v47, %v1534_v60  ;;  %v5940_v60 = vld [vmem:[#allocation46_spill] sm:$0xff] }
 0x2a3   :  { %v3903_v36 = vsub.f32 %v5939_v15, %v3559_v63  ;;  %v5941_v47 = vmax.f32 %v5940_v60, 0.0  ;;  %v1538_v40 = vmul.f32 %v3896_v7, %v3896_v7 }
 0x2a4   :  { %v1634_v16 = vadd.f32 %v1633_v33, %v1535_v13  ;;  %v5942_v13 = vmax.f32 %v3238_v49, 0.0 }
 0x2a5   :  { %v3910_v32 = vsub.f32 %v5941_v47, %v3559_v63  ;;  %v1539_v21 = vmul.f32 %v3903_v36, %v3903_v36 }
 0x2a6   :  { %v1635_v35 = vadd.f32 %v1634_v16, %v1536_v27  ;;  %v3917_v33 = vsub.f32 %v5942_v13, %v3559_v63  ;;  %v5943_v27 = vmax.f32 %v3248_v11, 0.0 }
 0x2a7   :  { %v1540_v60 = vmul.f32 %v3910_v32, %v3910_v32 }
 0x2a8   :  { %v1636_v53 = vadd.f32 %v1635_v35, %v1537_v17  ;;  %v3924_v16 = vsub.f32 %v5943_v27, %v3559_v63  ;;  %v5944_v17 = vmax.f32 %v3254_v52, 0.0  ;;  %v1541_v49 = vmul.f32 %v3917_v33, %v3917_v33 }
 0x2aa   :  { %v1637_v15 = vadd.f32 %v1636_v53, %v1538_v40  ;;  %v3931_v35 = vsub.f32 %v5944_v17, %v3559_v63  ;;  %v5945_v40 = vmax.f32 %v3264_v23, 0.0  ;;  %v1542_v11 = vmul.f32 %v3924_v16, %v3924_v16 }
 0x2ac   :  { %v1638_v47 = vadd.f32 %v1637_v15, %v1539_v21  ;;  %v3938_v53 = vsub.f32 %v5945_v40, %v3559_v63  ;;  %v5946_v21 = vmax.f32 %v3276_v51, 0.0  ;;  %v1543_v52 = vmul.f32 %v3931_v35, %v3931_v35 }
 0x2ae   :  { %v1639_v13 = vadd.f32 %v1638_v47, %v1540_v60  ;;  %v3945_v15 = vsub.f32 %v5946_v21, %v3559_v63  ;;  %v5947_v60 = vmax.f32 %v3270_v3, 0.0  ;;  %v1544_v23 = vmul.f32 %v3938_v53, %v3938_v53 }
 0x2b0   :  { %v1640_v27 = vadd.f32 %v1639_v13, %v1541_v49  ;;  %v3952_v47 = vsub.f32 %v5947_v60, %v3559_v63  ;;  %v5948_v49 = vmax.f32 %v3280_v5, 0.0  ;;  %v1545_v51 = vmul.f32 %v3945_v15, %v3945_v15 }
 0x2b2   :  { %v1641_v17 = vadd.f32 %v1640_v27, %v1542_v11  ;;  %v3959_v13 = vsub.f32 %v5948_v49, %v3559_v63  ;;  %v5949_v11 = vmax.f32 %v3288_v45, 0.0  ;;  %v1546_v3 = vmul.f32 %v3952_v47, %v3952_v47 }
 0x2b4   :  { %v1642_v40 = vadd.f32 %v1641_v17, %v1543_v52  ;;  %v3966_v27 = vsub.f32 %v5949_v11, %v3559_v63  ;;  %v5950_v52 = vmax.f32 %v3295_v58, 0.0  ;;  %v1547_v5 = vmul.f32 %v3959_v13, %v3959_v13 }
 0x2b6   :  { %v1643_v21 = vadd.f32 %v1642_v40, %v1544_v23  ;;  %v3973_v17 = vsub.f32 %v5950_v52, %v3559_v63  ;;  %v5951_v23 = vmax.f32 %v3302_v9, 0.0  ;;  %v1548_v45 = vmul.f32 %v3966_v27, %v3966_v27 }
 0x2b8   :  { %v1644_v60 = vadd.f32 %v1643_v21, %v1545_v51  ;;  %v3980_v40 = vsub.f32 %v5951_v23, %v3559_v63  ;;  %v5952_v51 = vmax.f32 %v3309_v54, 0.0  ;;  %v1549_v58 = vmul.f32 %v3973_v17, %v3973_v17 }
 0x2ba   :  { %v1645_v49 = vadd.f32 %v1644_v60, %v1546_v3  ;;  %v3987_v21 = vsub.f32 %v5952_v51, %v3559_v63  ;;  %v5953_v3 = vmax.f32 %v3316_v19, 0.0  ;;  %v1550_v9 = vmul.f32 %v3980_v40, %v3980_v40 }
 0x2bc   :  { %v1646_v11 = vadd.f32 %v1645_v49, %v1547_v5  ;;  %v3994_v60 = vsub.f32 %v5953_v3, %v3559_v63  ;;  %v5954_v5 = vmax.f32 %v3323_v24, 0.0  ;;  %v1551_v54 = vmul.f32 %v3987_v21, %v3987_v21 }
 0x2be   :  { %v1647_v52 = vadd.f32 %v1646_v11, %v1548_v45  ;;  %v4001_v49 = vsub.f32 %v5954_v5, %v3559_v63  ;;  %v5955_v45 = vmax.f32 %v3330_v38, 0.0  ;;  %v1552_v19 = vmul.f32 %v3994_v60, %v3994_v60 }
 0x2c0   :  { %v1648_v23 = vadd.f32 %v1647_v52, %v1549_v58  ;;  %v4008_v11 = vsub.f32 %v5955_v45, %v3559_v63  ;;  %v5956_v58 = vmax.f32 %v3337_v55, 0.0  ;;  %v1553_v24 = vmul.f32 %v4001_v49, %v4001_v49 }
 0x2c2   :  { %v1649_v51 = vadd.f32 %v1648_v23, %v1550_v9  ;;  %v4015_v52 = vsub.f32 %v5956_v58, %v3559_v63  ;;  %v5957_v9 = vmax.f32 %v3344_v46, 0.0  ;;  %v1554_v38 = vmul.f32 %v4008_v11, %v4008_v11 }
 0x2c4   :  { %v1650_v3 = vadd.f32 %v1649_v51, %v1551_v54  ;;  %v4022_v23 = vsub.f32 %v5957_v9, %v3559_v63  ;;  %v5958_v54 = vmax.f32 %v3351_v61, 0.0  ;;  %v1555_v55 = vmul.f32 %v4015_v52, %v4015_v52 }
 0x2c6   :  { %v1651_v5 = vadd.f32 %v1650_v3, %v1552_v19  ;;  %v4029_v51 = vsub.f32 %v5958_v54, %v3559_v63  ;;  %v5959_v19 = vmax.f32 %v3358_v62, 0.0  ;;  %v1556_v46 = vmul.f32 %v4022_v23, %v4022_v23 }
 0x2c8   :  { %v1652_v45 = vadd.f32 %v1651_v5, %v1553_v24  ;;  %v4036_v3 = vsub.f32 %v5959_v19, %v3559_v63  ;;  %v5960_v24 = vmax.f32 %v3365_v2, 0.0  ;;  %v1557_v61 = vmul.f32 %v4029_v51, %v4029_v51 }
 0x2ca   :  { %v1653_v58 = vadd.f32 %v1652_v45, %v1554_v38  ;;  %v4043_v5 = vsub.f32 %v5960_v24, %v3559_v63  ;;  %v5961_v38 = vmax.f32 %v3372_v6, 0.0  ;;  %v1558_v62 = vmul.f32 %v4036_v3, %v4036_v3 }
 0x2cc   :  { %v1654_v9 = vadd.f32 %v1653_v58, %v1555_v55  ;;  %v4050_v45 = vsub.f32 %v5961_v38, %v3559_v63  ;;  %v5962_v55 = vmax.f32 %v3379_v10, 0.0  ;;  %v1559_v2 = vmul.f32 %v4043_v5, %v4043_v5 }
 0x2ce   :  { %v1655_v54 = vadd.f32 %v1654_v9, %v1556_v46  ;;  %v4057_v58 = vsub.f32 %v5962_v55, %v3559_v63  ;;  %v5963_v46 = vmax.f32 %v3386_v14, 0.0  ;;  %v1560_v6 = vmul.f32 %v4050_v45, %v4050_v45 }
 0x2d0   :  { %v1656_v19 = vadd.f32 %v1655_v54, %v1557_v61  ;;  %v4064_v9 = vsub.f32 %v5963_v46, %v3559_v63  ;;  %v5964_v61 = vmax.f32 %v3393_v18, 0.0  ;;  %v1561_v10 = vmul.f32 %v4057_v58, %v4057_v58 }
 0x2d2   :  { %v1657_v24 = vadd.f32 %v1656_v19, %v1558_v62  ;;  %v4071_v54 = vsub.f32 %v5964_v61, %v3559_v63  ;;  %v5965_v62 = vmax.f32 %v3400_v22, 0.0  ;;  %v1562_v14 = vmul.f32 %v4064_v9, %v4064_v9 }
 0x2d4   :  { %v1658_v38 = vadd.f32 %v1657_v24, %v1559_v2  ;;  %v4078_v19 = vsub.f32 %v5965_v62, %v3559_v63  ;;  %v5966_v2 = vmax.f32 %v3407_v26, 0.0  ;;  %v1563_v18 = vmul.f32 %v4071_v54, %v4071_v54 }
 0x2d6   :  { %v1659_v55 = vadd.f32 %v1658_v38, %v1560_v6  ;;  %v4085_v24 = vsub.f32 %v5966_v2, %v3559_v63  ;;  %v5967_v6 = vmax.f32 %v3414_v30, 0.0  ;;  %v1564_v22 = vmul.f32 %v4078_v19, %v4078_v19 }
 0x2d8   :  { %v1660_v46 = vadd.f32 %v1659_v55, %v1561_v10  ;;  %v4092_v38 = vsub.f32 %v5967_v6, %v3559_v63  ;;  %v5969_v10 = vmax.f32 %v3421_v34, 0.0  ;;  %v1565_v26 = vmul.f32 %v4085_v24, %v4085_v24 }
 0x2da   :  { %v1661_v61 = vadd.f32 %v1660_v46, %v1562_v14  ;;  %5968 = vst [vmem:[#allocation40_spill] sm:$0xff] %v4092_v38  ;;  %v4099_v55 = vsub.f32 %v5969_v10, %v3559_v63  ;;  %v5971_v14 = vmax.f32 %v3428_v39, 0.0  ;;  %v1566_v30 = vmul.f32 %v4092_v38, %v4092_v38 }
 0x2dc   :  { %v1662_v62 = vadd.f32 %v1661_v61, %v1563_v18  ;;  %5970 = vst [vmem:[#allocation41_spill] sm:$0xff] %v4099_v55  ;;  %v4106_v46 = vsub.f32 %v5971_v14, %v3559_v63  ;;  %v5973_v18 = vmax.f32 %v3435_v44, 0.0  ;;  %v1567_v34 = vmul.f32 %v4099_v55, %v4099_v55 }
 0x2de   :  { %v1663_v2 = vadd.f32 %v1662_v62, %v1564_v22  ;;  %5972 = vst [vmem:[#allocation42_spill] sm:$0xff] %v4106_v46  ;;  %v4113_v61 = vsub.f32 %v5973_v18, %v3559_v63  ;;  %v5975_v22 = vmax.f32 %v3442_v56, 0.0  ;;  %v1568_v39 = vmul.f32 %v4106_v46, %v4106_v46 }
 0x2e0   :  { %v1664_v6 = vadd.f32 %v1663_v2, %v1565_v26  ;;  %5974 = vst [vmem:[#allocation43_spill] sm:$0xff] %v4113_v61  ;;  %v4120_v62 = vsub.f32 %v5975_v22, %v3559_v63  ;;  %v5977_v26 = vld [vmem:[#allocation50_spill] sm:$0xff]  ;;  %v1569_v44 = vmul.f32 %v4113_v61, %v4113_v61 }
 0x2e1   :  { %v5978_v2 = vmax.f32 %v5977_v26, 0.0 }
 0x2e2   :  { %v1665_v10 = vadd.f32 %v1664_v6, %v1566_v30  ;;  %5976 = vst [vmem:[#allocation44_spill] sm:$0xff] %v4120_v62  ;;  %v5980_v30 = vld [vmem:[#allocation51_spill] sm:$0xff]  ;;  %v1570_v56 = vmul.f32 %v4120_v62, %v4120_v62 }
 0x2e3   :  { %v4127_v38 = vsub.f32 %v5978_v2, %v3559_v63  ;;  %v5981_v6 = vmax.f32 %v5980_v30, 0.0 }
 0x2e4   :  { %v1666_v14 = vadd.f32 %v1665_v10, %v1567_v34  ;;  %v5983_v34 = vld [vmem:[#allocation52_spill] sm:$0xff] }
 0x2e5   :  { %5979 = vst [vmem:[#allocation45_spill] sm:$0xff] %v4127_v38  ;;  %v4134_v55 = vsub.f32 %v5981_v6, %v3559_v63  ;;  %v5984_v10 = vmax.f32 %v5983_v34, 0.0  ;;  %v1571_v26 = vmul.f32 %v4127_v38, %v4127_v38 }
 0x2e6   :  { %v1667_v18 = vadd.f32 %v1666_v14, %v1568_v39  ;;  %v5986_v39 = vld [vmem:[#allocation53_spill] sm:$0xff] }
 0x2e7   :  { %5982 = vst [vmem:[#allocation46_spill] sm:$0xff] %v4134_v55  ;;  %v4141_v46 = vsub.f32 %v5984_v10, %v3559_v63  ;;  %v5987_v14 = vmax.f32 %v5986_v39, 0.0  ;;  %v1572_v30 = vmul.f32 %v4134_v55, %v4134_v55 }
 0x2e8   :  { %v1668_v22 = vadd.f32 %v1667_v18, %v1569_v44  ;;  %v5989_v44 = vld [vmem:[#allocation54_spill] sm:$0xff] }
 0x2e9   :  { %5985 = vst [vmem:[#allocation50_spill] sm:$0xff] %v4141_v46  ;;  %v4148_v61 = vsub.f32 %v5987_v14, %v3559_v63  ;;  %v5990_v18 = vmax.f32 %v5989_v44, 0.0  ;;  %v1573_v34 = vmul.f32 %v4141_v46, %v4141_v46 }
 0x2ea   :  { %v1669_v2 = vadd.f32 %v1668_v22, %v1570_v56  ;;  %v5992_v56 = vld [vmem:[#allocation55_spill] sm:$0xff] }
 0x2eb   :  { %5988 = vst [vmem:[#allocation51_spill] sm:$0xff] %v4148_v61  ;;  %v4155_v62 = vsub.f32 %v5990_v18, %v3559_v63  ;;  %v5993_v22 = vmax.f32 %v5992_v56, 0.0  ;;  %v1574_v39 = vmul.f32 %v4148_v61, %v4148_v61 }
 0x2ec   :  { %v1670_v6 = vadd.f32 %v1669_v2, %v1571_v26  ;;  %v5995_v26 = vld [vmem:[#allocation56_spill] sm:$0xff] }
 0x2ed   :  { %5991 = vst [vmem:[#allocation52_spill] sm:$0xff] %v4155_v62  ;;  %v4162_v38 = vsub.f32 %v5993_v22, %v3559_v63  ;;  %v5996_v2 = vmax.f32 %v5995_v26, 0.0  ;;  %v1575_v44 = vmul.f32 %v4155_v62, %v4155_v62 }
 0x2ee   :  { %v1671_v10 = vadd.f32 %v1670_v6, %v1572_v30  ;;  %v5997_v30 = vld [vmem:[#allocation57_spill] sm:$0xff] }
 0x2ef   :  { %5994 = vst [vmem:[#allocation53_spill] sm:$0xff] %v4162_v38  ;;  %v4169_v55 = vsub.f32 %v5996_v2, %v3559_v63  ;;  %v5998_v6 = vmax.f32 %v5997_v30, 0.0  ;;  %v1576_v56 = vmul.f32 %v4162_v38, %v4162_v38 }
 0x2f0   :  { %v1672_v14 = vadd.f32 %v1671_v10, %v1573_v34  ;;  %v5999_v34 = vld [vmem:[#allocation58_spill] sm:$0xff] }
 0x2f1   :  { %v4176_v46 = vsub.f32 %v5998_v6, %v3559_v63  ;;  %v6000_v10 = vmax.f32 %v5999_v34, 0.0  ;;  %v1577_v26 = vmul.f32 %v4169_v55, %v4169_v55 }
 0x2f2   :  { %v1673_v18 = vadd.f32 %v1672_v14, %v1574_v39  ;;  %v6001_v39 = vld [vmem:[#allocation59_spill] sm:$0xff] }
 0x2f3   :  { %v4183_v61 = vsub.f32 %v6000_v10, %v3559_v63  ;;  %v6002_v14 = vmax.f32 %v6001_v39, 0.0  ;;  %v1578_v30 = vmul.f32 %v4176_v46, %v4176_v46 }
 0x2f4   :  { %v1674_v22 = vadd.f32 %v1673_v18, %v1575_v44  ;;  %v6003_v44 = vld [vmem:[#allocation60_spill] sm:$0xff] }
 0x2f5   :  { %v4190_v62 = vsub.f32 %v6002_v14, %v3559_v63  ;;  %v6004_v18 = vmax.f32 %v6003_v44, 0.0  ;;  %v1579_v34 = vmul.f32 %v4183_v61, %v4183_v61 }
 0x2f6   :  { %v1675_v2 = vadd.f32 %v1674_v22, %v1576_v56 }
 0x2f7   :  { %v4197_v38 = vsub.f32 %v6004_v18, %v3559_v63  ;;  %v1580_v56 = vmul.f32 %v4190_v62, %v4190_v62  ;;  %v1583_v63 = vmul.f32 %v3565_v57, %v3565_v57  ;;  %v1584_v18 = vmul.f32 %v3568_v37, %v3568_v37 }
 0x2f8   :  { %v1676_v6 = vadd.f32 %v1675_v2, %v1577_v26  ;;  %v1582_v26 = vmul.f32 %v3562_v28, %v3562_v28 }
 0x2f9   :  { %v1581_v39 = vmul.f32 %v4197_v38, %v4197_v38 }
 0x2fa   :  { %v1677_v10 = vadd.f32 %v1676_v6, %v1578_v30  ;;  %v1585_v6 = vmul.f32 %v3571_v42, %v3571_v42 }
 0x2fc   :  { %v1678_v22 = vadd.f32 %v1677_v10, %v1579_v34  ;;  %v1586_v10 = vmul.f32 %v3574_v59, %v3574_v59 }
 0x2fe   :  { %v1679_v14 = vadd.f32 %v1678_v22, %v1580_v56  ;;  %v1587_v22 = vmul.f32 %v3577_v43, %v3577_v43 }
 0x300   :  { %v1680_v2 = vadd.f32 %v1679_v14, %v1581_v39  ;;  %v1588_v14 = vmul.f32 %v3580_v1, %v3580_v1 }
 0x302   :  { %v1681_v44 = vadd.f32 %v1680_v2, %v1582_v26  ;;  %v1589_v2 = vmul.f32 %v3583_v29, %v3583_v29 }
 0x304   :  { %v1682_v30 = vadd.f32 %v1681_v44, %v1583_v63  ;;  %v1590_v44 = vmul.f32 %v3586_v4, %v3586_v4 }
 0x306   :  { %v1683_v34 = vadd.f32 %v1682_v30, %v1584_v18  ;;  %v1591_v30 = vmul.f32 %v3589_v25, %v3589_v25 }
 0x308   :  { %v1684_v56 = vadd.f32 %v1683_v34, %v1585_v6  ;;  %v1592_v34 = vmul.f32 %v3592_v0, %v3592_v0 }
 0x30a   :  { %v1685_v39 = vadd.f32 %v1684_v56, %v1586_v10  ;;  %v1593_v56 = vmul.f32 %v3595_v48, %v3595_v48 }
 0x30c   :  { %v1686_v26 = vadd.f32 %v1685_v39, %v1587_v22  ;;  %v1594_v39 = vmul.f32 %v3598_v12, %v3598_v12 }
 0x30e   :  { %v1687_v63 = vadd.f32 %v1686_v26, %v1588_v14  ;;  %v1595_v26 = vmul.f32 %v3601_v20, %v3601_v20 }
 0x310   :  { %v1688_v18 = vadd.f32 %v1687_v63, %v1589_v2 }
 0x312   :  { %v1689_v6 = vadd.f32 %v1688_v18, %v1590_v44 }
 0x314   :  { %v1690_v10 = vadd.f32 %v1689_v6, %v1591_v30 }
 0x316   :  { %v1691_v22 = vadd.f32 %v1690_v10, %v1592_v34 }
 0x318   :  { %v1692_v14 = vadd.f32 %v1691_v22, %v1593_v56  ;;  %v6005_v56 = vld [vmem:[#allocation3_spill] sm:$0xff] }
 0x31a   :  { %v1693_v2 = vadd.f32 %v1692_v14, %v1594_v39  ;;  %v6008_v39 = vld [vmem:[#allocation5_spill] sm:$0xff]  ;;  %v6009_v14 = vld [vmem:[#allocation6_spill] sm:$0xff] }
 0x31c   :  { %v1694_v63 = vadd.f32 %v1693_v2, %v1595_v26  ;;  %v6010_v26 = vld [vmem:[#allocation7_spill] sm:$0xff] }
 0x31e   :  { %v1695_v4 = vrot.slane %v1694_v63, 4 }
 0x320   :  { %v1696_v25 = vadd.f32 %v1695_v4, %v1694_v63  ;;  %v6011_v63 = vld [vmem:[#allocation8_spill] sm:$0xff] }
 0x322   :  { %v1697_v44 = vrot.slane %v1696_v25, 2 }
 0x324   :  { %v1698_v18 = vadd.f32 %v1697_v44, %v1696_v25  ;;  %v6006_v25 = vld [vmem:[#allocation2_spill] sm:$0xff] }
 0x326   :  { %v1699_v29 = vrot.slane %v1698_v18, 1 }
 0x328   :  { %v1700_v0 = vadd.f32 %v1699_v29, %v1698_v18  ;;  %v6013_v18 = vld [vmem:[#allocation9_spill] sm:$0xff] }
 0x32a   :  { %v1701_v30 = vmul.f32 0.00125, %v1700_v0  ;;  %v6007_v0 = vld [vmem:[#allocation4_spill] sm:$0xff] }
 0x32c   :  { %v1702_v6 = vadd.f32 1e-05, %v1701_v30 }
 0x32e   :  { %2440 = vrsqrt.f32 %v1702_v6  ;;  %v6015_v6 = vld [vmem:[#allocation10_spill] sm:$0xff] }
 0x338   :  { %v4233_v48 = vpop.eup %2440 }
 0x339   :  { %v4237_v34 = vmul.f32 %v4233_v48, %v3606_v41  ;;  %v4241_v10 = vmul.f32 %v4233_v48, %v3611_v8  ;;  %v4245_v4 = vmul.f32 %v4233_v48, %v6005_v56  ;;  %v4249_v29 = vmul.f32 %v4233_v48, %v6006_v25  ;;  %v6017_v25 = vld [vmem:[#allocation11_spill] sm:$0xff] }
 0x33a   :  { %v4253_v22 = vmul.f32 %v4233_v48, %v6007_v0  ;;  %v4257_v41 = vmul.f32 %v4233_v48, %v6008_v39  ;;  %v4261_v8 = vmul.f32 %v4233_v48, %v6009_v14  ;;  %v4265_v2 = vmul.f32 %v4233_v48, %v6010_v26  ;;  %v6019_v39 = vld [vmem:[#allocation12_spill] sm:$0xff]  ;;  %v6021_v26 = vld [vmem:[#allocation13_spill] sm:$0xff] }
 0x33b   :  { %v4269_v44 = vmul.f32 %v4233_v48, %v6011_v63  ;;  %v4273_v30 = vmul.f32 %v4233_v48, %v6013_v18  ;;  %v4277_v56 = vmul.f32 %v4233_v48, %v6015_v6  ;;  %v4281_v0 = vmul.f32 %v4233_v48, %v6017_v25 }
 0x33c   :  { %v4285_v14 = vmul.f32 %v4233_v48, %v6019_v39  ;;  %v4289_v63 = vmul.f32 %v4233_v48, %v6021_v26 }
 0x33d   :  { %6012 = vst [vmem:[#allocation54_spill] sm:$0xff] %v4269_v44  ;;  %6014 = vst [vmem:[#allocation55_spill] sm:$0xff] %v4273_v30  ;;  %v6023_v44 = vld [vmem:[#allocation14_spill] sm:$0xff]  ;;  %v6025_v30 = vld [vmem:[#allocation15_spill] sm:$0xff] }
 0x33e   :  { %6016 = vst [vmem:[#allocation56_spill] sm:$0xff] %v4277_v56  ;;  %6018 = vst [vmem:[#allocation57_spill] sm:$0xff] %v4281_v0  ;;  %v4293_v18 = vmul.f32 %v4233_v48, %v6023_v44  ;;  %v4297_v6 = vmul.f32 %v4233_v48, %v6025_v30  ;;  %v6027_v56 = vld [vmem:[#allocation16_spill] sm:$0xff]  ;;  %v6029_v0 = vld [vmem:[#allocation17_spill] sm:$0xff] }
 0x33f   :  { %6020 = vst [vmem:[#allocation58_spill] sm:$0xff] %v4285_v14  ;;  %6022 = vst [vmem:[#allocation59_spill] sm:$0xff] %v4289_v63  ;;  %v4301_v25 = vmul.f32 %v4233_v48, %v6027_v56  ;;  %v4305_v39 = vmul.f32 %v4233_v48, %v6029_v0  ;;  %v6031_v14 = vld [vmem:[#allocation18_spill] sm:$0xff]  ;;  %v6033_v63 = vld [vmem:[#allocation19_spill] sm:$0xff] }
 0x340   :  { %6024 = vst [vmem:[#allocation60_spill] sm:$0xff] %v4293_v18  ;;  %6026 = vst [vmem:[#allocation3_spill] sm:$0xff] %v4297_v6  ;;  %v4309_v26 = vmul.f32 %v4233_v48, %v6031_v14  ;;  %v4313_v44 = vmul.f32 %v4233_v48, %v6033_v63  ;;  %v6035_v18 = vld [vmem:[#allocation20_spill] sm:$0xff]  ;;  %v6037_v6 = vld [vmem:[#allocation21_spill] sm:$0xff] }
 0x341   :  { %6028 = vst [vmem:[#allocation2_spill] sm:$0xff] %v4301_v25  ;;  %6030 = vst [vmem:[#allocation4_spill] sm:$0xff] %v4305_v39  ;;  %v4317_v30 = vmul.f32 %v4233_v48, %v6035_v18  ;;  %v4321_v56 = vmul.f32 %v4233_v48, %v6037_v6  ;;  %v6039_v25 = vld [vmem:[#allocation22_spill] sm:$0xff]  ;;  %v6041_v39 = vld [vmem:[#allocation23_spill] sm:$0xff] }
 0x342   :  { %6032 = vst [vmem:[#allocation5_spill] sm:$0xff] %v4309_v26  ;;  %6034 = vst [vmem:[#allocation6_spill] sm:$0xff] %v4313_v44  ;;  %v4325_v0 = vmul.f32 %v4233_v48, %v6039_v25  ;;  %v4329_v14 = vmul.f32 %v4233_v48, %v6041_v39  ;;  %v6043_v26 = vld [vmem:[#allocation24_spill] sm:$0xff]  ;;  %v6045_v44 = vld [vmem:[#allocation25_spill] sm:$0xff] }
 0x343   :  { %6036 = vst [vmem:[#allocation7_spill] sm:$0xff] %v4317_v30  ;;  %6038 = vst [vmem:[#allocation8_spill] sm:$0xff] %v4321_v56  ;;  %v4333_v63 = vmul.f32 %v4233_v48, %v6043_v26  ;;  %v4337_v18 = vmul.f32 %v4233_v48, %v6045_v44  ;;  %v6047_v30 = vld [vmem:[#allocation26_spill] sm:$0xff]  ;;  %v6049_v56 = vld [vmem:[#allocation27_spill] sm:$0xff] }
 0x344   :  { %6040 = vst [vmem:[#allocation9_spill] sm:$0xff] %v4325_v0  ;;  %6042 = vst [vmem:[#allocation10_spill] sm:$0xff] %v4329_v14  ;;  %v4341_v6 = vmul.f32 %v4233_v48, %v6047_v30  ;;  %v4345_v25 = vmul.f32 %v4233_v48, %v6049_v56  ;;  %v6051_v0 = vld [vmem:[#allocation28_spill] sm:$0xff]  ;;  %v6053_v14 = vld [vmem:[#allocation29_spill] sm:$0xff] }
 0x345   :  { %6044 = vst [vmem:[#allocation11_spill] sm:$0xff] %v4333_v63  ;;  %6046 = vst [vmem:[#allocation12_spill] sm:$0xff] %v4337_v18  ;;  %v4349_v39 = vmul.f32 %v4233_v48, %v6051_v0  ;;  %v4353_v26 = vmul.f32 %v4233_v48, %v6053_v14  ;;  %v6055_v63 = vld [vmem:[#allocation30_spill] sm:$0xff]  ;;  %v6057_v18 = vld [vmem:[#allocation31_spill] sm:$0xff] }
 0x346   :  { %6048 = vst [vmem:[#allocation13_spill] sm:$0xff] %v4341_v6  ;;  %6050 = vst [vmem:[#allocation14_spill] sm:$0xff] %v4345_v25  ;;  %v4357_v44 = vmul.f32 %v4233_v48, %v6055_v63  ;;  %v4361_v30 = vmul.f32 %v4233_v48, %v6057_v18  ;;  %v6059_v6 = vld [vmem:[#allocation32_spill] sm:$0xff]  ;;  %v6061_v25 = vld [vmem:[#allocation33_spill] sm:$0xff] }
 0x347   :  { %6052 = vst [vmem:[#allocation15_spill] sm:$0xff] %v4349_v39  ;;  %6054 = vst [vmem:[#allocation16_spill] sm:$0xff] %v4353_v26  ;;  %v4365_v56 = vmul.f32 %v4233_v48, %v6059_v6  ;;  %v4369_v0 = vmul.f32 %v4233_v48, %v6061_v25  ;;  %v6063_v39 = vld [vmem:[#allocation34_spill] sm:$0xff]  ;;  %v6064_v26 = vld [vmem:[#allocation35_spill] sm:$0xff] }
 0x348   :  { %6056 = vst [vmem:[#allocation17_spill] sm:$0xff] %v4357_v44  ;;  %6058 = vst [vmem:[#allocation18_spill] sm:$0xff] %v4361_v30  ;;  %v4373_v14 = vmul.f32 %v4233_v48, %v6063_v39  ;;  %v4377_v63 = vmul.f32 %v4233_v48, %v6064_v26  ;;  %v6065_v44 = vld [vmem:[#allocation36_spill] sm:$0xff]  ;;  %v6066_v30 = vld [vmem:[#allocation37_spill] sm:$0xff]  ;;  %v4397_v26 = vmul.f32 %v4233_v48, %v3882_v50 }
 0x349   :  { %6060 = vst [vmem:[#allocation19_spill] sm:$0xff] %v4365_v56  ;;  %6062 = vst [vmem:[#allocation20_spill] sm:$0xff] %v4369_v0  ;;  %v4381_v18 = vmul.f32 %v4233_v48, %v6065_v44  ;;  %v4385_v6 = vmul.f32 %v4233_v48, %v6066_v30  ;;  %v6067_v56 = vld [vmem:[#allocation38_spill] sm:$0xff]  ;;  %v6068_v0 = vld [vmem:[#allocation39_spill] sm:$0xff]  ;;  %v4401_v44 = vmul.f32 %v4233_v48, %v3889_v31 }
 0x34a   :  { %v4389_v25 = vmul.f32 %v4233_v48, %v6067_v56  ;;  %v4393_v39 = vmul.f32 %v4233_v48, %v6068_v0  ;;  %v4405_v30 = vmul.f32 %v4233_v48, %v3896_v7  ;;  %v4409_v56 = vmul.f32 %v4233_v48, %v3903_v36 }
 0x34b   :  { %v4413_v0 = vmul.f32 %v4233_v48, %v3910_v32  ;;  %v4417_v50 = vmul.f32 %v4233_v48, %v3917_v33  ;;  %v4421_v31 = vmul.f32 %v4233_v48, %v3924_v16  ;;  %v4425_v7 = vmul.f32 %v4233_v48, %v3931_v35 }
 0x34c   :  { %v4429_v36 = vmul.f32 %v4233_v48, %v3938_v53  ;;  %v4433_v32 = vmul.f32 %v4233_v48, %v3945_v15  ;;  %v4437_v33 = vmul.f32 %v4233_v48, %v3952_v47  ;;  %v4441_v16 = vmul.f32 %v4233_v48, %v3959_v13 }
 0x34d   :  { %v4445_v35 = vmul.f32 %v4233_v48, %v3966_v27  ;;  %v4449_v53 = vmul.f32 %v4233_v48, %v3973_v17  ;;  %v4453_v15 = vmul.f32 %v4233_v48, %v3980_v40  ;;  %v4457_v47 = vmul.f32 %v4233_v48, %v3987_v21 }
 0x34e   :  { %v4461_v13 = vmul.f32 %v4233_v48, %v3994_v60  ;;  %v4465_v27 = vmul.f32 %v4233_v48, %v4001_v49  ;;  %v4469_v17 = vmul.f32 %v4233_v48, %v4008_v11  ;;  %v4473_v40 = vmul.f32 %v4233_v48, %v4015_v52 }
 0x34f   :  { %v4477_v21 = vmul.f32 %v4233_v48, %v4022_v23  ;;  %v4481_v60 = vmul.f32 %v4233_v48, %v4029_v51  ;;  %v4485_v49 = vmul.f32 %v4233_v48, %v4036_v3  ;;  %v4489_v11 = vmul.f32 %v4233_v48, %v4043_v5 }
 0x350   :  { %v4493_v52 = vmul.f32 %v4233_v48, %v4050_v45  ;;  %v4497_v23 = vmul.f32 %v4233_v48, %v4057_v58  ;;  %v4501_v51 = vmul.f32 %v4233_v48, %v4064_v9  ;;  %v4505_v3 = vmul.f32 %v4233_v48, %v4071_v54 }
 0x351   :  { %v4509_v5 = vmul.f32 %v4233_v48, %v4078_v19  ;;  %v4513_v45 = vmul.f32 %v4233_v48, %v4085_v24 }
 0x352   :  { %6069 = vst [vmem:[#allocation21_spill] sm:$0xff] %v4493_v52  ;;  %6070 = vst [vmem:[#allocation22_spill] sm:$0xff] %v4497_v23  ;;  %v6075_v52 = vld [vmem:[#allocation40_spill] sm:$0xff]  ;;  %v6077_v23 = vld [vmem:[#allocation41_spill] sm:$0xff] }
 0x353   :  { %6071 = vst [vmem:[#allocation23_spill] sm:$0xff] %v4501_v51  ;;  %6072 = vst [vmem:[#allocation24_spill] sm:$0xff] %v4505_v3  ;;  %v4517_v58 = vmul.f32 %v4233_v48, %v6075_v52  ;;  %v4521_v9 = vmul.f32 %v4233_v48, %v6077_v23  ;;  %v6079_v51 = vld [vmem:[#allocation42_spill] sm:$0xff]  ;;  %v6081_v3 = vld [vmem:[#allocation43_spill] sm:$0xff] }
 0x354   :  { %6073 = vst [vmem:[#allocation25_spill] sm:$0xff] %v4509_v5  ;;  %6074 = vst [vmem:[#allocation26_spill] sm:$0xff] %v4513_v45  ;;  %v4525_v54 = vmul.f32 %v4233_v48, %v6079_v51  ;;  %v4529_v19 = vmul.f32 %v4233_v48, %v6081_v3  ;;  %v6083_v5 = vld [vmem:[#allocation44_spill] sm:$0xff]  ;;  %v6085_v45 = vld [vmem:[#allocation45_spill] sm:$0xff] }
 0x355   :  { %6076 = vst [vmem:[#allocation27_spill] sm:$0xff] %v4517_v58  ;;  %6078 = vst [vmem:[#allocation28_spill] sm:$0xff] %v4521_v9  ;;  %v4533_v24 = vmul.f32 %v4233_v48, %v6083_v5  ;;  %v4537_v52 = vmul.f32 %v4233_v48, %v6085_v45  ;;  %v6086_v58 = vld [vmem:[#allocation46_spill] sm:$0xff] }
 0x356   :  { %6080 = vst [vmem:[#allocation29_spill] sm:$0xff] %v4525_v54  ;;  %6082 = vst [vmem:[#allocation30_spill] sm:$0xff] %v4529_v19  ;;  %v4541_v23 = vmul.f32 %v4233_v48, %v6086_v58  ;;  %v6087_v9 = vld [vmem:[#allocation50_spill] sm:$0xff]  ;;  %v6088_v54 = vld [vmem:[#allocation51_spill] sm:$0xff]  ;;  %v4561_v58 = vmul.f32 %v4233_v48, %v4169_v55  ;;  %v4581_v55 = vmul.f32 %v4233_v48, %v3562_v28 }
 0x357   :  { %6084 = vst [vmem:[#allocation31_spill] sm:$0xff] %v4533_v24  ;;  %v4545_v51 = vmul.f32 %v4233_v48, %v6087_v9  ;;  %v4549_v3 = vmul.f32 %v4233_v48, %v6088_v54  ;;  %v6089_v19 = vld [vmem:[#allocation52_spill] sm:$0xff]  ;;  %v6090_v24 = vld [vmem:[#allocation53_spill] sm:$0xff]  ;;  %v4565_v9 = vmul.f32 %v4233_v48, %v4176_v46  ;;  %v4569_v54 = vmul.f32 %v4233_v48, %v4183_v61 }
 0x358   :  { %v4553_v5 = vmul.f32 %v4233_v48, %v6089_v19  ;;  %v4557_v45 = vmul.f32 %v4233_v48, %v6090_v24  ;;  %v4573_v19 = vmul.f32 %v4233_v48, %v4190_v62  ;;  %v4577_v24 = vmul.f32 %v4233_v48, %v4197_v38  ;;  %6091 = vst [vmem:[#allocation32_spill] sm:$0xff] %v4581_v55  ;;  %v6101_v55 = vld [vmem:[#allocation62_spill] sm:$0xff] }
 0x359   :  { %v4585_v46 = vmul.f32 %v4233_v48, %v3565_v57  ;;  %v4589_v61 = vmul.f32 %v4233_v48, %v3568_v37  ;;  %v4593_v62 = vmul.f32 %v4233_v48, %v3571_v42  ;;  %v4597_v38 = vmul.f32 %v4233_v48, %v3574_v59  ;;  %v4606_v57 = vld [vmem:[%s5548_s3] ss:$0 sm:$0xff] }
 0x35a   :  { %v4601_v28 = vmul.f32 %v4233_v48, %v3577_v43  ;;  %v4610_v37 = vmul.f32 %v4233_v48, %v3580_v1  ;;  %v4630_v1 = vmul.f32 %v4233_v48, %v6101_v55  ;;  %v4650_v55 = vmul.f32 %v4606_v57, %v4245_v4  ;;  %v6107_v4 = vld [vmem:[#allocation54_spill] sm:$0xff] }
 0x35b   :  { %6092 = vst [vmem:[#allocation33_spill] sm:$0xff] %v4585_v46  ;;  %6093 = vst [vmem:[#allocation34_spill] sm:$0xff] %v4589_v61  ;;  %v6097_v61 = vld [vmem:[#allocation47_spill] sm:$0xff] }
 0x35c   :  { %6094 = vst [vmem:[#allocation35_spill] sm:$0xff] %v4593_v62  ;;  %6095 = vst [vmem:[#allocation36_spill] sm:$0xff] %v4597_v38  ;;  %v4614_v42 = vmul.f32 %v4233_v48, %v6097_v61  ;;  %v6098_v62 = vld [vmem:[#allocation48_spill] sm:$0xff]  ;;  %v6099_v38 = vld [vmem:[#allocation49_spill] sm:$0xff]  ;;  %v4634_v61 = vmul.f32 %v4233_v48, %v3598_v12  ;;  %v4654_v12 = vmul.f32 %v4606_v57, %v4249_v29 }
 0x35d   :  { %6096 = vst [vmem:[#allocation37_spill] sm:$0xff] %v4601_v28  ;;  %v4618_v59 = vmul.f32 %v4233_v48, %v6098_v62  ;;  %v4622_v43 = vmul.f32 %v4233_v48, %v6099_v38  ;;  %v6100_v28 = vld [vmem:[#allocation61_spill] sm:$0xff]  ;;  %v4638_v62 = vmul.f32 %v4233_v48, %v3601_v20  ;;  %v4642_v38 = vmul.f32 %v4606_v57, %v4237_v34 }
 0x35e   :  { %v4626_v46 = vmul.f32 %v4233_v48, %v6100_v28  ;;  %v4646_v28 = vmul.f32 %v4606_v57, %v4241_v10  ;;  %6102 = vst [vmem:[#allocation38_spill] sm:$0xff] %v4654_v12  ;;  %v4658_v48 = vmul.f32 %v4606_v57, %v4253_v22  ;;  %v4662_v20 = vmul.f32 %v4606_v57, %v4257_v41  ;;  %v6109_v12 = vld [vmem:[#allocation55_spill] sm:$0xff] }
 0x35f   :  { %v4666_v34 = vmul.f32 %v4606_v57, %v4261_v8  ;;  %v4670_v10 = vmul.f32 %v4606_v57, %v4265_v2  ;;  %v4674_v29 = vmul.f32 %v4606_v57, %v6107_v4  ;;  %v4678_v22 = vmul.f32 %v4606_v57, %v6109_v12 }
 0x360   :  { %6103 = vst [vmem:[#allocation39_spill] sm:$0xff] %v4658_v48  ;;  %6104 = vst [vmem:[#allocation40_spill] sm:$0xff] %v4662_v20  ;;  %v6111_v48 = vld [vmem:[#allocation56_spill] sm:$0xff]  ;;  %v6113_v20 = vld [vmem:[#allocation57_spill] sm:$0xff] }
 0x361   :  { %6105 = vst [vmem:[#allocation41_spill] sm:$0xff] %v4666_v34  ;;  %6106 = vst [vmem:[#allocation42_spill] sm:$0xff] %v4670_v10  ;;  %v4682_v41 = vmul.f32 %v4606_v57, %v6111_v48  ;;  %v4686_v8 = vmul.f32 %v4606_v57, %v6113_v20  ;;  %v6115_v34 = vld [vmem:[#allocation58_spill] sm:$0xff]  ;;  %v6117_v10 = vld [vmem:[#allocation59_spill] sm:$0xff] }
 0x362   :  { %6108 = vst [vmem:[#allocation43_spill] sm:$0xff] %v4674_v29  ;;  %6110 = vst [vmem:[#allocation44_spill] sm:$0xff] %v4678_v22  ;;  %v4690_v2 = vmul.f32 %v4606_v57, %v6115_v34  ;;  %v4694_v4 = vmul.f32 %v4606_v57, %v6117_v10  ;;  %v6119_v29 = vld [vmem:[#allocation60_spill] sm:$0xff]  ;;  %v6121_v22 = vld [vmem:[#allocation3_spill] sm:$0xff] }
 0x363   :  { %6112 = vst [vmem:[#allocation45_spill] sm:$0xff] %v4682_v41  ;;  %6114 = vst [vmem:[#allocation46_spill] sm:$0xff] %v4686_v8  ;;  %v4698_v12 = vmul.f32 %v4606_v57, %v6119_v29  ;;  %v4702_v48 = vmul.f32 %v4606_v57, %v6121_v22  ;;  %v6123_v41 = vld [vmem:[#allocation2_spill] sm:$0xff]  ;;  %v6125_v8 = vld [vmem:[#allocation4_spill] sm:$0xff] }
 0x364   :  { %6116 = vst [vmem:[#allocation50_spill] sm:$0xff] %v4690_v2  ;;  %6118 = vst [vmem:[#allocation51_spill] sm:$0xff] %v4694_v4  ;;  %v4706_v20 = vmul.f32 %v4606_v57, %v6123_v41  ;;  %v4710_v34 = vmul.f32 %v4606_v57, %v6125_v8  ;;  %v6127_v2 = vld [vmem:[#allocation5_spill] sm:$0xff]  ;;  %v6129_v4 = vld [vmem:[#allocation6_spill] sm:$0xff] }
 0x365   :  { %6120 = vst [vmem:[#allocation52_spill] sm:$0xff] %v4698_v12  ;;  %6122 = vst [vmem:[#allocation53_spill] sm:$0xff] %v4702_v48  ;;  %v4714_v10 = vmul.f32 %v4606_v57, %v6127_v2  ;;  %v4718_v29 = vmul.f32 %v4606_v57, %v6129_v4  ;;  %v6131_v12 = vld [vmem:[#allocation7_spill] sm:$0xff]  ;;  %v6133_v48 = vld [vmem:[#allocation8_spill] sm:$0xff] }
 0x366   :  { %6124 = vst [vmem:[#allocation47_spill] sm:$0xff] %v4706_v20  ;;  %6126 = vst [vmem:[#allocation48_spill] sm:$0xff] %v4710_v34  ;;  %v4722_v22 = vmul.f32 %v4606_v57, %v6131_v12  ;;  %v4726_v41 = vmul.f32 %v4606_v57, %v6133_v48  ;;  %v6135_v20 = vld [vmem:[#allocation9_spill] sm:$0xff]  ;;  %v6137_v34 = vld [vmem:[#allocation10_spill] sm:$0xff] }
 0x367   :  { %6128 = vst [vmem:[#allocation49_spill] sm:$0xff] %v4714_v10  ;;  %6130 = vst [vmem:[#allocation61_spill] sm:$0xff] %v4718_v29  ;;  %v4730_v8 = vmul.f32 %v4606_v57, %v6135_v20  ;;  %v4734_v2 = vmul.f32 %v4606_v57, %v6137_v34  ;;  %v6139_v10 = vld [vmem:[#allocation11_spill] sm:$0xff]  ;;  %v6141_v29 = vld [vmem:[#allocation12_spill] sm:$0xff] }
 0x368   :  { %6132 = vst [vmem:[#allocation62_spill] sm:$0xff] %v4722_v22  ;;  %6134 = vst [vmem:[#allocation54_spill] sm:$0xff] %v4726_v41  ;;  %v4738_v4 = vmul.f32 %v4606_v57, %v6139_v10  ;;  %v4742_v12 = vmul.f32 %v4606_v57, %v6141_v29  ;;  %v6143_v22 = vld [vmem:[#allocation13_spill] sm:$0xff]  ;;  %v6145_v41 = vld [vmem:[#allocation14_spill] sm:$0xff] }
 0x369   :  { %6136 = vst [vmem:[#allocation55_spill] sm:$0xff] %v4730_v8  ;;  %6138 = vst [vmem:[#allocation56_spill] sm:$0xff] %v4734_v2  ;;  %v4746_v48 = vmul.f32 %v4606_v57, %v6143_v22  ;;  %v4750_v20 = vmul.f32 %v4606_v57, %v6145_v41  ;;  %v6147_v8 = vld [vmem:[#allocation15_spill] sm:$0xff]  ;;  %v6148_v2 = vld [vmem:[#allocation16_spill] sm:$0xff] }
 0x36a   :  { %6140 = vst [vmem:[#allocation57_spill] sm:$0xff] %v4738_v4  ;;  %6142 = vst [vmem:[#allocation58_spill] sm:$0xff] %v4742_v12  ;;  %v4754_v34 = vmul.f32 %v4606_v57, %v6147_v8  ;;  %v4758_v10 = vmul.f32 %v4606_v57, %v6148_v2  ;;  %v6149_v4 = vld [vmem:[#allocation17_spill] sm:$0xff]  ;;  %v6150_v12 = vld [vmem:[#allocation18_spill] sm:$0xff]  ;;  %v4778_v2 = vmul.f32 %v4606_v57, %v4373_v14 }
 0x36b   :  { %6144 = vst [vmem:[#allocation59_spill] sm:$0xff] %v4746_v48  ;;  %6146 = vst [vmem:[#allocation60_spill] sm:$0xff] %v4750_v20  ;;  %v4762_v29 = vmul.f32 %v4606_v57, %v6149_v4  ;;  %v4766_v22 = vmul.f32 %v4606_v57, %v6150_v12  ;;  %v6151_v48 = vld [vmem:[#allocation19_spill] sm:$0xff]  ;;  %v6152_v20 = vld [vmem:[#allocation20_spill] sm:$0xff]  ;;  %v4782_v4 = vmul.f32 %v4606_v57, %v4377_v63 }
 0x36c   :  { %v4770_v41 = vmul.f32 %v4606_v57, %v6151_v48  ;;  %v4774_v8 = vmul.f32 %v4606_v57, %v6152_v20  ;;  %v4786_v12 = vmul.f32 %v4606_v57, %v4381_v18  ;;  %v4790_v48 = vmul.f32 %v4606_v57, %v4385_v6 }
 0x36d   :  { %v4794_v20 = vmul.f32 %v4606_v57, %v4389_v25  ;;  %v4798_v14 = vmul.f32 %v4606_v57, %v4393_v39  ;;  %v4802_v63 = vmul.f32 %v4606_v57, %v4397_v26  ;;  %v4806_v18 = vmul.f32 %v4606_v57, %v4401_v44 }
 0x36e   :  { %v4810_v6 = vmul.f32 %v4606_v57, %v4405_v30  ;;  %v4814_v25 = vmul.f32 %v4606_v57, %v4409_v56  ;;  %v4818_v39 = vmul.f32 %v4606_v57, %v4413_v0  ;;  %v4822_v26 = vmul.f32 %v4606_v57, %v4417_v50 }
 0x36f   :  { %v4826_v44 = vmul.f32 %v4606_v57, %v4421_v31  ;;  %v4830_v30 = vmul.f32 %v4606_v57, %v4425_v7  ;;  %v4834_v56 = vmul.f32 %v4606_v57, %v4429_v36  ;;  %v4838_v0 = vmul.f32 %v4606_v57, %v4433_v32 }
 0x370   :  { %v4842_v50 = vmul.f32 %v4606_v57, %v4437_v33  ;;  %v4846_v31 = vmul.f32 %v4606_v57, %v4441_v16  ;;  %v4850_v7 = vmul.f32 %v4606_v57, %v4445_v35  ;;  %v4854_v36 = vmul.f32 %v4606_v57, %v4449_v53 }
 0x371   :  { %v4858_v32 = vmul.f32 %v4606_v57, %v4453_v15  ;;  %v4862_v33 = vmul.f32 %v4606_v57, %v4457_v47  ;;  %v4866_v16 = vmul.f32 %v4606_v57, %v4461_v13  ;;  %v4870_v35 = vmul.f32 %v4606_v57, %v4465_v27 }
 0x372   :  { %v4874_v53 = vmul.f32 %v4606_v57, %v4469_v17  ;;  %v4878_v15 = vmul.f32 %v4606_v57, %v4473_v40  ;;  %v4882_v47 = vmul.f32 %v4606_v57, %v4477_v21  ;;  %v4886_v13 = vmul.f32 %v4606_v57, %v4481_v60 }
 0x373   :  { %v4890_v27 = vmul.f32 %v4606_v57, %v4485_v49  ;;  %v4894_v17 = vmul.f32 %v4606_v57, %v4489_v11 }
 0x374   :  { %6153 = vst [vmem:[#allocation3_spill] sm:$0xff] %v4874_v53  ;;  %6154 = vst [vmem:[#allocation2_spill] sm:$0xff] %v4878_v15  ;;  %v6159_v53 = vld [vmem:[#allocation21_spill] sm:$0xff]  ;;  %v6161_v15 = vld [vmem:[#allocation22_spill] sm:$0xff] }
 0x375   :  { %6155 = vst [vmem:[#allocation4_spill] sm:$0xff] %v4882_v47  ;;  %6156 = vst [vmem:[#allocation5_spill] sm:$0xff] %v4886_v13  ;;  %v4898_v40 = vmul.f32 %v4606_v57, %v6159_v53  ;;  %v4902_v21 = vmul.f32 %v4606_v57, %v6161_v15  ;;  %v6163_v47 = vld [vmem:[#allocation23_spill] sm:$0xff]  ;;  %v6165_v13 = vld [vmem:[#allocation24_spill] sm:$0xff] }
 0x376   :  { %6157 = vst [vmem:[#allocation6_spill] sm:$0xff] %v4890_v27  ;;  %6158 = vst [vmem:[#allocation7_spill] sm:$0xff] %v4894_v17  ;;  %v4906_v60 = vmul.f32 %v4606_v57, %v6163_v47  ;;  %v4910_v49 = vmul.f32 %v4606_v57, %v6165_v13  ;;  %v6167_v27 = vld [vmem:[#allocation25_spill] sm:$0xff]  ;;  %v6169_v17 = vld [vmem:[#allocation26_spill] sm:$0xff] }
 0x377   :  { %6160 = vst [vmem:[#allocation8_spill] sm:$0xff] %v4898_v40  ;;  %6162 = vst [vmem:[#allocation9_spill] sm:$0xff] %v4902_v21  ;;  %v4914_v11 = vmul.f32 %v4606_v57, %v6167_v27  ;;  %v4918_v53 = vmul.f32 %v4606_v57, %v6169_v17  ;;  %v6170_v40 = vld [vmem:[#allocation27_spill] sm:$0xff]  ;;  %v6171_v21 = vld [vmem:[#allocation28_spill] sm:$0xff] }
 0x378   :  { %6164 = vst [vmem:[#allocation10_spill] sm:$0xff] %v4906_v60  ;;  %6166 = vst [vmem:[#allocation11_spill] sm:$0xff] %v4910_v49  ;;  %v4922_v15 = vmul.f32 %v4606_v57, %v6170_v40  ;;  %v4926_v47 = vmul.f32 %v4606_v57, %v6171_v21  ;;  %v6172_v60 = vld [vmem:[#allocation29_spill] sm:$0xff]  ;;  %v6173_v49 = vld [vmem:[#allocation30_spill] sm:$0xff]  ;;  %v4942_v40 = vmul.f32 %v4606_v57, %v4537_v52 }
 0x379   :  { %6168 = vst [vmem:[#allocation12_spill] sm:$0xff] %v4914_v11  ;;  %v4930_v13 = vmul.f32 %v4606_v57, %v6172_v60  ;;  %v4934_v27 = vmul.f32 %v4606_v57, %v6173_v49  ;;  %v6174_v11 = vld [vmem:[#allocation31_spill] sm:$0xff]  ;;  %v4946_v21 = vmul.f32 %v4606_v57, %v4541_v23  ;;  %v4950_v60 = vmul.f32 %v4606_v57, %v4545_v51 }
 0x37a   :  { %v4938_v17 = vmul.f32 %v4606_v57, %v6174_v11  ;;  %v4954_v49 = vmul.f32 %v4606_v57, %v4549_v3  ;;  %v4958_v11 = vmul.f32 %v4606_v57, %v4553_v5  ;;  %v4962_v52 = vmul.f32 %v4606_v57, %v4557_v45 }
 0x37b   :  { %v4966_v23 = vmul.f32 %v4606_v57, %v4561_v58  ;;  %v4970_v51 = vmul.f32 %v4606_v57, %v4565_v9  ;;  %v4974_v3 = vmul.f32 %v4606_v57, %v4569_v54  ;;  %v4978_v5 = vmul.f32 %v4606_v57, %v4573_v19 }
 0x37c   :  { %6175 = vst [vmem:[#allocation13_spill] sm:$0xff] %v4962_v52  ;;  %v4982_v45 = vmul.f32 %v4606_v57, %v4577_v24  ;;  %v6181_v52 = vld [vmem:[#allocation32_spill] sm:$0xff] }
 0x37d   :  { %6176 = vst [vmem:[#allocation14_spill] sm:$0xff] %v4966_v23  ;;  %6177 = vst [vmem:[#allocation15_spill] sm:$0xff] %v4970_v51  ;;  %v4986_v58 = vmul.f32 %v4606_v57, %v6181_v52  ;;  %v6182_v23 = vld [vmem:[#allocation33_spill] sm:$0xff]  ;;  %v6183_v51 = vld [vmem:[#allocation34_spill] sm:$0xff] }
 0x37e   :  { %6178 = vst [vmem:[#allocation16_spill] sm:$0xff] %v4974_v3  ;;  %6179 = vst [vmem:[#allocation17_spill] sm:$0xff] %v4978_v5  ;;  %v4990_v9 = vmul.f32 %v4606_v57, %v6182_v23  ;;  %v4994_v54 = vmul.f32 %v4606_v57, %v6183_v51  ;;  %v6184_v3 = vld [vmem:[#allocation35_spill] sm:$0xff]  ;;  %v6186_v5 = vld [vmem:[#allocation36_spill] sm:$0xff]  ;;  %v5015_v51 = vmul.f32 %v4606_v57, %v4610_v37 }
 0x37f   :  { %6180 = vst [vmem:[#allocation18_spill] sm:$0xff] %v4982_v45  ;;  %v4998_v19 = vmul.f32 %v4606_v57, %v6184_v3  ;;  %v5002_v24 = vmul.f32 %v4606_v57, %v6186_v5  ;;  %v6188_v45 = vld [vmem:[#allocation37_spill] sm:$0xff]  ;;  %v5011_v23 = vld [vmem:[%s5549_s4] ss:$0 sm:$0xff]  ;;  %v5019_v3 = vmul.f32 %v4606_v57, %v4614_v42  ;;  %v5023_v5 = vmul.f32 %v4606_v57, %v4618_v59 }
 0x380   :  { %v5006_v52 = vmul.f32 %v4606_v57, %v6188_v45  ;;  %6190 = vst [vmem:[#allocation22_spill] sm:$0xff] %v5015_v51  ;;  %v5027_v45 = vmul.f32 %v4606_v57, %v4622_v43  ;;  %v5035_v37 = vmul.f32 %v4606_v57, %v4630_v1  ;;  %v5039_v42 = vmul.f32 %v4606_v57, %v4634_v61  ;;  %v6204_v51 = vld [vmem:[#allocation44_spill] sm:$0xff] }
 0x381   :  { %6185 = vst [vmem:[#allocation19_spill] sm:$0xff] %v4998_v19  ;;  %6187 = vst [vmem:[#allocation20_spill] sm:$0xff] %v5002_v24  ;;  %v5043_v59 = vmul.f32 %v4606_v57, %v4638_v62  ;;  %v1918_v43 = vadd.f32 %v5011_v23, %v4642_v38  ;;  %v6205_v24 = vld [vmem:[#allocation45_spill] sm:$0xff]  ;;  %v6206_v19 = vld [vmem:[#allocation46_spill] sm:$0xff] }
 0x382   :  { %6189 = vst [vmem:[#allocation21_spill] sm:$0xff] %v5006_v52  ;;  %6191 = vst [vmem:[#allocation23_spill] sm:$0xff] %v5019_v3  ;;  %v5031_v52 = vmul.f32 %v4606_v57, %v4626_v46  ;;  %v1920_v46 = vadd.f32 %v5011_v23, %v4650_v55  ;;  %v6201_v57 = vld [vmem:[#allocation41_spill] sm:$0xff]  ;;  %v6203_v3 = vld [vmem:[#allocation43_spill] sm:$0xff]  ;;  %v1927_v55 = vadd.f32 %v5011_v23, %v6204_v51 }
 0x383   :  { %6192 = vst [vmem:[#allocation24_spill] sm:$0xff] %v5023_v5  ;;  %6193 = vst [vmem:[#allocation25_spill] sm:$0xff] %v5027_v45  ;;  %v1919_v45 = vadd.f32 %v5011_v23, %v4646_v28  ;;  %v1924_v62 = vadd.f32 %v5011_v23, %v6201_v57  ;;  %v1926_v28 = vadd.f32 %v5011_v23, %v6203_v3  ;;  %v6212_v57 = vld [vmem:[#allocation48_spill] sm:$0xff] }
 0x384   :  { %6194 = vst [vmem:[#allocation26_spill] sm:$0xff] %v5031_v52  ;;  %6195 = vst [vmem:[#allocation27_spill] sm:$0xff] %v5035_v37  ;;  %v6198_v52 = vld [vmem:[#allocation38_spill] sm:$0xff]  ;;  %v6199_v37 = vld [vmem:[#allocation39_spill] sm:$0xff] }
 0x385   :  { %6196 = vst [vmem:[#allocation28_spill] sm:$0xff] %v5039_v42  ;;  %6197 = vst [vmem:[#allocation29_spill] sm:$0xff] %v5043_v59  ;;  %v1921_v1 = vadd.f32 %v5011_v23, %v6198_v52  ;;  %v1922_v61 = vadd.f32 %v5011_v23, %v6199_v37  ;;  %v6200_v42 = vld [vmem:[#allocation40_spill] sm:$0xff]  ;;  %v6202_v59 = vld [vmem:[#allocation42_spill] sm:$0xff]  ;;  %v1928_v52 = vadd.f32 %v5011_v23, %v6205_v24 }
 0x386   :  { %v1923_v5 = vadd.f32 %v5011_v23, %v6200_v42  ;;  %v1925_v38 = vadd.f32 %v5011_v23, %v6202_v59  ;;  %v1929_v37 = vadd.f32 %v5011_v23, %v6206_v19  ;;  %2018 = vst [vmem:[%s5550_s5] sm:$0xff] %v1918_v43  ;;  %2019 = vst [vmem:[%s5550_s5 + $0x8] sm:$0xff] %v1919_v45  ;;  %v6207_v24 = vld [vmem:[#allocation50_spill] sm:$0xff]  ;;  %v6208_v19 = vld [vmem:[#allocation51_spill] sm:$0xff] }
 0x387   :  { %2020 = vst [vmem:[%s5550_s5 + $0x10] sm:$0xff] %v1920_v46  ;;  %2021 = vst [vmem:[%s5550_s5 + $0x18] sm:$0xff] %v1921_v1  ;;  %v1930_v51 = vadd.f32 %v5011_v23, %v6207_v24  ;;  %v1931_v3 = vadd.f32 %v5011_v23, %v6208_v19  ;;  %v6209_v42 = vld [vmem:[#allocation52_spill] sm:$0xff]  ;;  %v6210_v43 = vld [vmem:[#allocation53_spill] sm:$0xff]  ;;  %v1935_v24 = vadd.f32 %v5011_v23, %v6212_v57 }
 0x388   :  { %v1932_v59 = vadd.f32 %v5011_v23, %v6209_v42  ;;  %v1933_v45 = vadd.f32 %v5011_v23, %v6210_v43  ;;  %2022 = vst [vmem:[%s5550_s5 + $0x20] sm:$0xff] %v1922_v61  ;;  %2023 = vst [vmem:[%s5550_s5 + $0x28] sm:$0xff] %v1923_v5  ;;  %v6211_v46 = vld [vmem:[#allocation47_spill] sm:$0xff]  ;;  %v6213_v19 = vld [vmem:[#allocation49_spill] sm:$0xff] }
 0x389   :  { %2024 = vst [vmem:[%s5550_s5 + $0x30] sm:$0xff] %v1924_v62  ;;  %2025 = vst [vmem:[%s5550_s5 + $0x38] sm:$0xff] %v1925_v38  ;;  %v1934_v1 = vadd.f32 %v5011_v23, %v6211_v46  ;;  %v1936_v61 = vadd.f32 %v5011_v23, %v6213_v19  ;;  %v6214_v42 = vld [vmem:[#allocation61_spill] sm:$0xff]  ;;  %v6215_v62 = vld [vmem:[#allocation62_spill] sm:$0xff] }
 0x38a   :  { %v1937_v5 = vadd.f32 %v5011_v23, %v6214_v42  ;;  %2026 = vst [vmem:[%s5550_s5 + $0x40] sm:$0xff] %v1926_v28  ;;  %2027 = vst [vmem:[%s5550_s5 + $0x48] sm:$0xff] %v1927_v55  ;;  %v1938_v38 = vadd.f32 %v5011_v23, %v6215_v62  ;;  %v6216_v43 = vld [vmem:[#allocation54_spill] sm:$0xff]  ;;  %v6217_v57 = vld [vmem:[#allocation55_spill] sm:$0xff] }
 0x38b   :  { %2028 = vst [vmem:[%s5550_s5 + $0x50] sm:$0xff] %v1928_v52  ;;  %2029 = vst [vmem:[%s5550_s5 + $0x58] sm:$0xff] %v1929_v37  ;;  %v1939_v46 = vadd.f32 %v5011_v23, %v6216_v43  ;;  %v1940_v28 = vadd.f32 %v5011_v23, %v6217_v57  ;;  %v6218_v19 = vld [vmem:[#allocation56_spill] sm:$0xff]  ;;  %v6219_v52 = vld [vmem:[#allocation57_spill] sm:$0xff] }
 0x38c   :  { %v1941_v55 = vadd.f32 %v5011_v23, %v6218_v19  ;;  %2030 = vst [vmem:[%s5550_s5 + $0x60] sm:$0xff] %v1930_v51  ;;  %2031 = vst [vmem:[%s5550_s5 + $0x68] sm:$0xff] %v1931_v3  ;;  %v1942_v37 = vadd.f32 %v5011_v23, %v6219_v52  ;;  %v6220_v42 = vld [vmem:[#allocation58_spill] sm:$0xff]  ;;  %v6221_v43 = vld [vmem:[#allocation59_spill] sm:$0xff] }
 0x38d   :  { %2032 = vst [vmem:[%s5550_s5 + $0x70] sm:$0xff] %v1932_v59  ;;  %2033 = vst [vmem:[%s5550_s5 + $0x78] sm:$0xff] %v1933_v45  ;;  %v1943_v62 = vadd.f32 %v5011_v23, %v6220_v42  ;;  %v1944_v51 = vadd.f32 %v5011_v23, %v6221_v43  ;;  %v6222_v57 = vld [vmem:[#allocation60_spill] sm:$0xff]  ;;  %v1946_v59 = vadd.f32 %v5011_v23, %v4754_v34 }
 0x38e   :  { %v1945_v3 = vadd.f32 %v5011_v23, %v6222_v57  ;;  %2034 = vst [vmem:[%s5550_s5 + $0x80] sm:$0xff] %v1934_v1  ;;  %2035 = vst [vmem:[%s5550_s5 + $0x88] sm:$0xff] %v1935_v24  ;;  %v1947_v45 = vadd.f32 %v5011_v23, %v4758_v10  ;;  %v1948_v1 = vadd.f32 %v5011_v23, %v4762_v29 }
 0x38f   :  { %2036 = vst [vmem:[%s5550_s5 + $0x90] sm:$0xff] %v1936_v61  ;;  %2037 = vst [vmem:[%s5550_s5 + $0x98] sm:$0xff] %v1937_v5  ;;  %v1949_v24 = vadd.f32 %v5011_v23, %v4766_v22  ;;  %v1950_v34 = vadd.f32 %v5011_v23, %v4770_v41  ;;  %v1951_v10 = vadd.f32 %v5011_v23, %v4774_v8  ;;  %v6224_v61 = vld [vmem:[#allocation2_spill] sm:$0xff] }
 0x390   :  { %2038 = vst [vmem:[%s5550_s5 + $0xa0] sm:$0xff] %v1938_v38  ;;  %2039 = vst [vmem:[%s5550_s5 + $0xa8] sm:$0xff] %v1939_v46  ;;  %v1952_v29 = vadd.f32 %v5011_v23, %v4778_v2  ;;  %v1953_v22 = vadd.f32 %v5011_v23, %v4782_v4  ;;  %v1954_v41 = vadd.f32 %v5011_v23, %v4786_v12  ;;  %v6226_v38 = vld [vmem:[#allocation5_spill] sm:$0xff] }
 0x391   :  { %2040 = vst [vmem:[%s5550_s5 + $0xb0] sm:$0xff] %v1940_v28  ;;  %2041 = vst [vmem:[%s5550_s5 + $0xb8] sm:$0xff] %v1941_v55  ;;  %v1955_v8 = vadd.f32 %v5011_v23, %v4790_v48  ;;  %v1956_v2 = vadd.f32 %v5011_v23, %v4794_v20  ;;  %v1957_v4 = vadd.f32 %v5011_v23, %v4798_v14  ;;  %v6227_v28 = vld [vmem:[#allocation6_spill] sm:$0xff]  ;;  %v6228_v55 = vld [vmem:[#allocation7_spill] sm:$0xff] }
 0x392   :  { %2042 = vst [vmem:[%s5550_s5 + $0xc0] sm:$0xff] %v1942_v37  ;;  %2043 = vst [vmem:[%s5550_s5 + $0xc8] sm:$0xff] %v1943_v62  ;;  %v1958_v12 = vadd.f32 %v5011_v23, %v4802_v63  ;;  %v1959_v48 = vadd.f32 %v5011_v23, %v4806_v18  ;;  %v1960_v20 = vadd.f32 %v5011_v23, %v4810_v6  ;;  %v6229_v37 = vld [vmem:[#allocation8_spill] sm:$0xff]  ;;  %v6230_v62 = vld [vmem:[#allocation9_spill] sm:$0xff] }
 0x393   :  { %2044 = vst [vmem:[%s5550_s5 + $0xd0] sm:$0xff] %v1944_v51  ;;  %2045 = vst [vmem:[%s5550_s5 + $0xd8] sm:$0xff] %v1945_v3  ;;  %v1961_v14 = vadd.f32 %v5011_v23, %v4814_v25  ;;  %v1962_v63 = vadd.f32 %v5011_v23, %v4818_v39  ;;  %v1963_v18 = vadd.f32 %v5011_v23, %v4822_v26  ;;  %v6231_v51 = vld [vmem:[#allocation10_spill] sm:$0xff]  ;;  %v6232_v3 = vld [vmem:[#allocation11_spill] sm:$0xff] }
 0x394   :  { %2046 = vst [vmem:[%s5550_s5 + $0xe0] sm:$0xff] %v1946_v59  ;;  %2047 = vst [vmem:[%s5550_s5 + $0xe8] sm:$0xff] %v1947_v45  ;;  %v1964_v6 = vadd.f32 %v5011_v23, %v4826_v44  ;;  %v1965_v25 = vadd.f32 %v5011_v23, %v4830_v30  ;;  %v1966_v39 = vadd.f32 %v5011_v23, %v4834_v56  ;;  %v6233_v45 = vld [vmem:[#allocation12_spill] sm:$0xff] }
 0x395   :  { %2048 = vst [vmem:[%s5550_s5 + $0xf0] sm:$0xff] %v1948_v1  ;;  %2049 = vst [vmem:[%s5550_s5 + $0xf8] sm:$0xff] %v1949_v24  ;;  %v1967_v26 = vadd.f32 %v5011_v23, %v4838_v0  ;;  %v1968_v44 = vadd.f32 %v5011_v23, %v4842_v50  ;;  %v1969_v30 = vadd.f32 %v5011_v23, %v4846_v31 }
 0x396   :  { %2050 = vst [vmem:[%s5550_s5 + $0x100] sm:$0xff] %v1950_v34  ;;  %2051 = vst [vmem:[%s5550_s5 + $0x108] sm:$0xff] %v1951_v10  ;;  %v1970_v56 = vadd.f32 %v5011_v23, %v4850_v7  ;;  %v1971_v0 = vadd.f32 %v5011_v23, %v4854_v36  ;;  %v1972_v50 = vadd.f32 %v5011_v23, %v4858_v32  ;;  %v6223_v32 = vld [vmem:[#allocation3_spill] sm:$0xff] }
 0x397   :  { %2052 = vst [vmem:[%s5550_s5 + $0x110] sm:$0xff] %v1952_v29  ;;  %2053 = vst [vmem:[%s5550_s5 + $0x118] sm:$0xff] %v1953_v22  ;;  %v1973_v31 = vadd.f32 %v5011_v23, %v4862_v33  ;;  %v1974_v7 = vadd.f32 %v5011_v23, %v4866_v16  ;;  %v1975_v36 = vadd.f32 %v5011_v23, %v4870_v35  ;;  %v6225_v16 = vld [vmem:[#allocation4_spill] sm:$0xff]  ;;  %v6236_v22 = vld [vmem:[#allocation15_spill] sm:$0xff] }
 0x398   :  { %2054 = vst [vmem:[%s5550_s5 + $0x120] sm:$0xff] %v1954_v41  ;;  %2055 = vst [vmem:[%s5550_s5 + $0x128] sm:$0xff] %v1955_v8  ;;  %v1976_v33 = vadd.f32 %v5011_v23, %v6223_v32  ;;  %v1977_v5 = vadd.f32 %v5011_v23, %v6224_v61  ;;  %v1978_v35 = vadd.f32 %v5011_v23, %v6225_v16  ;;  %v6237_v8 = vld [vmem:[#allocation16_spill] sm:$0xff] }
 0x399   :  { %2056 = vst [vmem:[%s5550_s5 + $0x130] sm:$0xff] %v1956_v2  ;;  %2057 = vst [vmem:[%s5550_s5 + $0x138] sm:$0xff] %v1957_v4  ;;  %v1979_v46 = vadd.f32 %v5011_v23, %v6226_v38  ;;  %v1980_v19 = vadd.f32 %v5011_v23, %v6227_v28  ;;  %v1981_v52 = vadd.f32 %v5011_v23, %v6228_v55  ;;  %v6238_v4 = vld [vmem:[#allocation17_spill] sm:$0xff] }
 0x39a   :  { %2058 = vst [vmem:[%s5550_s5 + $0x140] sm:$0xff] %v1958_v12  ;;  %2059 = vst [vmem:[%s5550_s5 + $0x148] sm:$0xff] %v1959_v48  ;;  %v1982_v42 = vadd.f32 %v5011_v23, %v6229_v37  ;;  %v1983_v43 = vadd.f32 %v5011_v23, %v6230_v62  ;;  %v1984_v57 = vadd.f32 %v5011_v23, %v6231_v51  ;;  %v6239_v48 = vld [vmem:[#allocation18_spill] sm:$0xff] }
 0x39b   :  { %2060 = vst [vmem:[%s5550_s5 + $0x150] sm:$0xff] %v1960_v20  ;;  %2061 = vst [vmem:[%s5550_s5 + $0x158] sm:$0xff] %v1961_v14  ;;  %v1985_v59 = vadd.f32 %v5011_v23, %v6232_v3  ;;  %v1986_v1 = vadd.f32 %v5011_v23, %v6233_v45  ;;  %v1987_v24 = vadd.f32 %v5011_v23, %v4918_v53 }
 0x39c   :  { %2062 = vst [vmem:[%s5550_s5 + $0x160] sm:$0xff] %v1962_v63  ;;  %2063 = vst [vmem:[%s5550_s5 + $0x168] sm:$0xff] %v1963_v18  ;;  %v1988_v34 = vadd.f32 %v5011_v23, %v4922_v15  ;;  %v1989_v10 = vadd.f32 %v5011_v23, %v4926_v47  ;;  %v1990_v53 = vadd.f32 %v5011_v23, %v4930_v13 }
 0x39d   :  { %2064 = vst [vmem:[%s5550_s5 + $0x170] sm:$0xff] %v1964_v6  ;;  %2065 = vst [vmem:[%s5550_s5 + $0x178] sm:$0xff] %v1965_v25  ;;  %v1991_v15 = vadd.f32 %v5011_v23, %v4934_v27  ;;  %v1992_v47 = vadd.f32 %v5011_v23, %v4938_v17  ;;  %v1993_v29 = vadd.f32 %v5011_v23, %v4942_v40  ;;  %v6241_v6 = vld [vmem:[#allocation20_spill] sm:$0xff] }
 0x39e   :  { %2066 = vst [vmem:[%s5550_s5 + $0x180] sm:$0xff] %v1966_v39  ;;  %2067 = vst [vmem:[%s5550_s5 + $0x188] sm:$0xff] %v1967_v26  ;;  %v1994_v13 = vadd.f32 %v5011_v23, %v4946_v21  ;;  %v1995_v27 = vadd.f32 %v5011_v23, %v4950_v60  ;;  %v1996_v17 = vadd.f32 %v5011_v23, %v4954_v49  ;;  %v6234_v21 = vld [vmem:[#allocation13_spill] sm:$0xff]  ;;  %v6235_v49 = vld [vmem:[#allocation14_spill] sm:$0xff] }
 0x39f   :  { %2068 = vst [vmem:[%s5550_s5 + $0x190] sm:$0xff] %v1968_v44  ;;  %2069 = vst [vmem:[%s5550_s5 + $0x198] sm:$0xff] %v1969_v30  ;;  %v1997_v40 = vadd.f32 %v5011_v23, %v4958_v11  ;;  %v1998_v60 = vadd.f32 %v5011_v23, %v6234_v21  ;;  %v1999_v11 = vadd.f32 %v5011_v23, %v6235_v49  ;;  %v6242_v39 = vld [vmem:[#allocation21_spill] sm:$0xff]  ;;  %v6244_v30 = vld [vmem:[#allocation23_spill] sm:$0xff] }
 0x3a0   :  { %2070 = vst [vmem:[%s5550_s5 + $0x1a0] sm:$0xff] %v1970_v56  ;;  %2071 = vst [vmem:[%s5550_s5 + $0x1a8] sm:$0xff] %v1971_v0  ;;  %v2000_v41 = vadd.f32 %v5011_v23, %v6236_v22  ;;  %v2001_v2 = vadd.f32 %v5011_v23, %v6237_v8  ;;  %v2002_v12 = vadd.f32 %v5011_v23, %v6238_v4  ;;  %v6245_v0 = vld [vmem:[#allocation24_spill] sm:$0xff] }
 0x3a1   :  { %2072 = vst [vmem:[%s5550_s5 + $0x1b0] sm:$0xff] %v1972_v50  ;;  %2073 = vst [vmem:[%s5550_s5 + $0x1b8] sm:$0xff] %v1973_v31  ;;  %v2003_v20 = vadd.f32 %v5011_v23, %v6239_v48  ;;  %v2004_v14 = vadd.f32 %v5011_v23, %v4986_v58  ;;  %v2005_v63 = vadd.f32 %v5011_v23, %v4990_v9  ;;  %v6240_v9 = vld [vmem:[#allocation19_spill] sm:$0xff]  ;;  %v6246_v31 = vld [vmem:[#allocation25_spill] sm:$0xff] }
 0x3a2   :  { %2074 = vst [vmem:[%s5550_s5 + $0x1c0] sm:$0xff] %v1974_v7  ;;  %2075 = vst [vmem:[%s5550_s5 + $0x1c8] sm:$0xff] %v1975_v36  ;;  %v2006_v58 = vadd.f32 %v5011_v23, %v4994_v54  ;;  %v2007_v18 = vadd.f32 %v5011_v23, %v6240_v9  ;;  %v2008_v25 = vadd.f32 %v5011_v23, %v6241_v6  ;;  %v6243_v54 = vld [vmem:[#allocation22_spill] sm:$0xff] }
 0x3a3   :  { %2076 = vst [vmem:[%s5550_s5 + $0x1d0] sm:$0xff] %v1976_v33  ;;  %2077 = vst [vmem:[%s5550_s5 + $0x1d8] sm:$0xff] %v1977_v5  ;;  %v2009_v26 = vadd.f32 %v5011_v23, %v6242_v39  ;;  %v2010_v44 = vadd.f32 %v5011_v23, %v6243_v54  ;;  %v2011_v56 = vadd.f32 %v5011_v23, %v6244_v30  ;;  %v6247_v36 = vld [vmem:[#allocation26_spill] sm:$0xff]  ;;  %v6248_v33 = vld [vmem:[#allocation27_spill] sm:$0xff] }
 0x3a4   :  { %2078 = vst [vmem:[%s5550_s5 + $0x1e0] sm:$0xff] %v1978_v35  ;;  %2079 = vst [vmem:[%s5550_s5 + $0x1e8] sm:$0xff] %v1979_v46  ;;  %v2012_v50 = vadd.f32 %v5011_v23, %v6245_v0  ;;  %v2013_v7 = vadd.f32 %v5011_v23, %v6246_v31  ;;  %v2014_v32 = vadd.f32 %v5011_v23, %v6247_v36  ;;  %v6249_v5 = vld [vmem:[#allocation28_spill] sm:$0xff]  ;;  %v6250_v35 = vld [vmem:[#allocation29_spill] sm:$0xff] }
 0x3a5   :  { %2080 = vst [vmem:[%s5550_s5 + $0x1f0] sm:$0xff] %v1980_v19  ;;  %2081 = vst [vmem:[%s5550_s5 + $0x1f8] sm:$0xff] %v1981_v52  ;;  %v2015_v61 = vadd.f32 %v5011_v23, %v6248_v33  ;;  %v2016_v16 = vadd.f32 %v5011_v23, %v6249_v5  ;;  %v2017_v38 = vadd.f32 %v5011_v23, %v6250_v35 }
 0x3a6   :  { %2082 = vst [vmem:[%s5550_s5 + $0x200] sm:$0xff] %v1982_v42  ;;  %2083 = vst [vmem:[%s5550_s5 + $0x208] sm:$0xff] %v1983_v43 }
 0x3a7   :  { %2084 = vst [vmem:[%s5550_s5 + $0x210] sm:$0xff] %v1984_v57  ;;  %2085 = vst [vmem:[%s5550_s5 + $0x218] sm:$0xff] %v1985_v59 }
 0x3a8   :  { %2086 = vst [vmem:[%s5550_s5 + $0x220] sm:$0xff] %v1986_v1  ;;  %2087 = vst [vmem:[%s5550_s5 + $0x228] sm:$0xff] %v1987_v24 }
 0x3a9   :  { %2088 = vst [vmem:[%s5550_s5 + $0x230] sm:$0xff] %v1988_v34  ;;  %2089 = vst [vmem:[%s5550_s5 + $0x238] sm:$0xff] %v1989_v10 }
 0x3aa   :  { %2090 = vst [vmem:[%s5550_s5 + $0x240] sm:$0xff] %v1990_v53  ;;  %2091 = vst [vmem:[%s5550_s5 + $0x248] sm:$0xff] %v1991_v15 }
 0x3ab   :  { %2092 = vst [vmem:[%s5550_s5 + $0x250] sm:$0xff] %v1992_v47  ;;  %2093 = vst [vmem:[%s5550_s5 + $0x258] sm:$0xff] %v1993_v29 }
 0x3ac   :  { %2094 = vst [vmem:[%s5550_s5 + $0x260] sm:$0xff] %v1994_v13  ;;  %2095 = vst [vmem:[%s5550_s5 + $0x268] sm:$0xff] %v1995_v27 }
 0x3ad   :  { %2096 = vst [vmem:[%s5550_s5 + $0x270] sm:$0xff] %v1996_v17  ;;  %2097 = vst [vmem:[%s5550_s5 + $0x278] sm:$0xff] %v1997_v40 }
 0x3ae   :  { %2098 = vst [vmem:[%s5550_s5 + $0x280] sm:$0xff] %v1998_v60  ;;  %2099 = vst [vmem:[%s5550_s5 + $0x288] sm:$0xff] %v1999_v11 }
 0x3af   :  { %2100 = vst [vmem:[%s5550_s5 + $0x290] sm:$0xff] %v2000_v41  ;;  %2101 = vst [vmem:[%s5550_s5 + $0x298] sm:$0xff] %v2001_v2 }
 0x3b0   :  { %2102 = vst [vmem:[%s5550_s5 + $0x2a0] sm:$0xff] %v2002_v12  ;;  %2103 = vst [vmem:[%s5550_s5 + $0x2a8] sm:$0xff] %v2003_v20 }
 0x3b1   :  { %2104 = vst [vmem:[%s5550_s5 + $0x2b0] sm:$0xff] %v2004_v14  ;;  %2105 = vst [vmem:[%s5550_s5 + $0x2b8] sm:$0xff] %v2005_v63 }
 0x3b2   :  { %2106 = vst [vmem:[%s5550_s5 + $0x2c0] sm:$0xff] %v2006_v58  ;;  %2107 = vst [vmem:[%s5550_s5 + $0x2c8] sm:$0xff] %v2007_v18 }
 0x3b3   :  { %2108 = vst [vmem:[%s5550_s5 + $0x2d0] sm:$0xff] %v2008_v25  ;;  %2109 = vst [vmem:[%s5550_s5 + $0x2d8] sm:$0xff] %v2009_v26 }
 0x3b4   :  { %2110 = vst [vmem:[%s5550_s5 + $0x2e0] sm:$0xff] %v2010_v44  ;;  %2111 = vst [vmem:[%s5550_s5 + $0x2e8] sm:$0xff] %v2011_v56 }
 0x3b5   :  { %2112 = vst [vmem:[%s5550_s5 + $0x2f0] sm:$0xff] %v2012_v50  ;;  %2113 = vst [vmem:[%s5550_s5 + $0x2f8] sm:$0xff] %v2013_v7 }
 0x3b6   :  { %2114 = vst [vmem:[%s5550_s5 + $0x300] sm:$0xff] %v2014_v32  ;;  %2115 = vst [vmem:[%s5550_s5 + $0x308] sm:$0xff] %v2015_v61 }
 0x3b7   :  { %2116 = vst [vmem:[%s5550_s5 + $0x310] sm:$0xff] %v2016_v16  ;;  %2117 = vst [vmem:[%s5550_s5 + $0x318] sm:$0xff] %v2017_v38 }

// kernel: net_forward.5
= control target key start
LH: loop header
LB: loop body
LE: loop exit
PB: predicated region body
PF: predicated region fallthrough
CT: control target
= control target key end

     0   :  { %s2054_s1 = inlined_call_operand.vmem [shape: bf16[512,128], index: 1, kind: input, shape index: {}]   ;;  %s2055_s0 = inlined_call_operand.vmem [shape: bf16[168,512], index: 0, kind: input, shape index: {}]   ;;  %s2056_s2 = inlined_call_operand.vmem [shape: f32[1,128], index: 2, kind: input, shape index: {}]   ;;  %s2057_s3 = inlined_call_operand.vmem [shape: f32[1,128], index: 3, kind: input, shape index: {}]   ;;  %s2058_s4 = inlined_call_operand.vmem [shape: f32[1,128], index: 4, kind: input, shape index: {}]   ;;  %s2059_s5 = inlined_call_operand.vmem [shape: f32[168,128], index: 5, kind: output, shape index: {}]  }
   0x1   :  { %v1373_v0 = vld [vmem:[%s2054_s1 + $0x40] sm:$0xff]   ;;  %v1377_v4 = vld [vmem:[%s2054_s1 + $0x48] sm:$0xff]   ;;  %v1381_v8 = vld [vmem:[%s2054_s1 + $0x50] sm:$0xff]  }
   0x2   :  { %v1374_v1 = vld [vmem:[%s2054_s1 + $0xc0] sm:$0xff]   ;;  %1208 = vmatprep.subr.bf16.mxu0 %v1373_v0  ;;  %v1378_v5 = vld [vmem:[%s2054_s1 + $0xc8] sm:$0xff]   ;;  %v1382_v9 = vld [vmem:[%s2054_s1 + $0xd0] sm:$0xff]  }
   0x3   :  { %v1375_v2 = vld [vmem:[%s2054_s1] sm:$0xff]   ;;  %1290 = vmatprep.subr.bf16.mxu1 %v1374_v1  ;;  %v1379_v6 = vld [vmem:[%s2054_s1 + $0x8] sm:$0xff]   ;;  %v1383_v10 = vld [vmem:[%s2054_s1 + $0x10] sm:$0xff]  }
   0x4   :  { %v1376_v3 = vld [vmem:[%s2054_s1 + $0x80] sm:$0xff]   ;;  %1209 = vmatpush3.bf16.msra.mxu0 %v1375_v2  ;;  %v1380_v7 = vld [vmem:[%s2054_s1 + $0x88] sm:$0xff]   ;;  %v1384_v11 = vld [vmem:[%s2054_s1 + $0x90] sm:$0xff]  }
   0x5   :  { %1291 = vmatpush3.bf16.msra.mxu1 %v1376_v3  ;;  %1210 = vmatprep.subr.bf16.mxu0 %v1377_v4  ;;  %v1385_v12 = vld [vmem:[%s2054_s1 + $0x58] sm:$0xff]   ;;  %v1389_v16 = vld [vmem:[%s2054_s1 + $0x60] sm:$0xff]   ;;  %v1393_v20 = vld [vmem:[%s2054_s1 + $0x68] sm:$0xff]  }
   0x6   :  { %1292 = vmatprep.subr.bf16.mxu1 %v1378_v5  ;;  %v1386_v13 = vld [vmem:[%s2054_s1 + $0xd8] sm:$0xff]   ;;  %v1390_v17 = vld [vmem:[%s2054_s1 + $0xe0] sm:$0xff]   ;;  %v1394_v21 = vld [vmem:[%s2054_s1 + $0xe8] sm:$0xff]  }
   0x7   :  { %v1387_v14 = vld [vmem:[%s2054_s1 + $0x18] sm:$0xff]   ;;  %v1391_v18 = vld [vmem:[%s2054_s1 + $0x20] sm:$0xff]   ;;  %v1395_v22 = vld [vmem:[%s2054_s1 + $0x28] sm:$0xff]  }
   0x8   :  { %1211 = vmatpush3.bf16.msra.mxu0 %v1379_v6  ;;  %v1388_v15 = vld [vmem:[%s2054_s1 + $0x98] sm:$0xff]   ;;  %v1392_v19 = vld [vmem:[%s2054_s1 + $0xa0] sm:$0xff]   ;;  %v1396_v23 = vld [vmem:[%s2054_s1 + $0xa8] sm:$0xff]  }
   0x9   :  { %1293 = vmatpush3.bf16.msra.mxu1 %v1380_v7  ;;  %1212 = vmatprep.subr.bf16.mxu0 %v1381_v8  ;;  %v1397_v24 = vld [vmem:[%s2054_s1 + $0x70] sm:$0xff]   ;;  %v1401_v28 = vld [vmem:[%s2054_s1 + $0x78] sm:$0xff]   ;;  %v61_v6 = vld [vmem:[%s2055_s0 + $0x140] sm:$0xff] }
   0xa   :  { %1294 = vmatprep.subr.bf16.mxu1 %v1382_v9  ;;  %v1398_v25 = vld [vmem:[%s2054_s1 + $0xf0] sm:$0xff]   ;;  %v1402_v29 = vld [vmem:[%s2054_s1 + $0xf8] sm:$0xff]   ;;  %v62_v7 = vld [vmem:[%s2055_s0 + $0x148] sm:$0xff] }
   0xb   :  { %v1399_v26 = vld [vmem:[%s2054_s1 + $0x30] sm:$0xff]   ;;  %v1403_v30 = vld [vmem:[%s2054_s1 + $0x38] sm:$0xff]  }
   0xc   :  { %1213 = vmatpush3.bf16.msra.mxu0 %v1383_v10  ;;  %v1400_v27 = vld [vmem:[%s2054_s1 + $0xb0] sm:$0xff]   ;;  %v1404_v31 = vld [vmem:[%s2054_s1 + $0xb8] sm:$0xff]   ;;  %v1170_v10 = vcombine.high %v61_v6, %v61_v6 }
   0xd   :  { %1295 = vmatpush3.bf16.msra.mxu1 %v1384_v11  ;;  %1214 = vmatprep.subr.bf16.mxu0 %v1385_v12  ;;  %v1405_v32 = vld [vmem:[%s2055_s0] ss:$16 sps:$4 sm:$0xff]   ;;  %v1407_v33 = vld [vmem:[%s2055_s0 + $0x4] ss:$16 sps:$4 sm:$0xff]   ;;  %v1408_v34 = vld [vmem:[%s2055_s0 + $0x8] ss:$16 sps:$4 sm:$0xff]   ;;  %v1172_v11 = vcombine.high %v62_v7, %v62_v7  ;;  %v1169_v12 = vcombine.low %v61_v6, %v61_v6 }
   0xe   :  { %1296 = vmatprep.subr.bf16.mxu1 %v1386_v13  ;;  %v1410_v35 = vld [vmem:[%s2055_s0 + $0xc] ss:$16 sps:$4 sm:$0xff]   ;;  %572 = vmatprep.mubr.bf16.mxu0 %v1407_v33  ;;  %v1411_v36 = vld [vmem:[%s2055_s0 + $0x24] ss:$16 sps:$4 sm:$0xff]   ;;  %v1415_v38 = vld [vmem:[%s2055_s0 + $0x20] ss:$16 sps:$4 sm:$0xff]   ;;  %v1171_v13 = vcombine.low %v62_v7, %v62_v7 }
   0xf   :  { %692 = vmatprep.mubr.bf16.mxu1 %v1410_v35  ;;  %v1413_v37 = vld [vmem:[%s2055_s0 + $0x2c] ss:$16 sps:$4 sm:$0xff]   ;;  %v1416_v39 = vld [vmem:[%s2055_s0 + $0x28] ss:$16 sps:$4 sm:$0xff]   ;;  %v1417_v40 = vld [vmem:[%s2055_s0 + $0x44] ss:$16 sps:$4 sm:$0xff]  }
  0x10   :  { %1215 = vmatpush3.bf16.msra.mxu0 %v1387_v14  ;;  %v1419_v41 = vld [vmem:[%s2055_s0 + $0x4c] ss:$16 sps:$4 sm:$0xff]   ;;  %v1421_v42 = vld [vmem:[%s2055_s0 + $0x40] ss:$16 sps:$4 sm:$0xff]   ;;  %v1422_v43 = vld [vmem:[%s2055_s0 + $0x48] ss:$16 sps:$4 sm:$0xff]  }
  0x11   :  { %1297 = vmatpush3.bf16.msra.mxu1 %v1388_v15  ;;  %1216 = vmatprep.subr.bf16.mxu0 %v1389_v16  ;;  %v1423_v44 = vld [vmem:[%s2055_s0 + $0x64] ss:$16 sps:$4 sm:$0xff]   ;;  %v1425_v45 = vld [vmem:[%s2055_s0 + $0x6c] ss:$16 sps:$4 sm:$0xff]   ;;  %v1427_v46 = vld [vmem:[%s2055_s0 + $0x60] ss:$16 sps:$4 sm:$0xff]  }
  0x12   :  { %1298 = vmatprep.subr.bf16.mxu1 %v1390_v17  ;;  %v1428_v47 = vld [vmem:[%s2055_s0 + $0x68] ss:$16 sps:$4 sm:$0xff]   ;;  %v1429_v48 = vld [vmem:[%s2055_s0 + $0x84] ss:$16 sps:$4 sm:$0xff]   ;;  %v1431_v49 = vld [vmem:[%s2055_s0 + $0x8c] ss:$16 sps:$4 sm:$0xff]  }
  0x13   :  { %v1433_v50 = vld [vmem:[%s2055_s0 + $0x80] ss:$16 sps:$4 sm:$0xff]   ;;  %v1434_v51 = vld [vmem:[%s2055_s0 + $0x88] ss:$16 sps:$4 sm:$0xff]   ;;  %v1435_v52 = vld [vmem:[%s2055_s0 + $0xa4] ss:$16 sps:$4 sm:$0xff]  }
  0x14   :  { %1217 = vmatpush3.bf16.msra.mxu0 %v1391_v18  ;;  %v1437_v53 = vld [vmem:[%s2055_s0 + $0xac] ss:$16 sps:$4 sm:$0xff]   ;;  %v1439_v54 = vld [vmem:[%s2055_s0 + $0xa0] ss:$16 sps:$4 sm:$0xff]   ;;  %v1440_v55 = vld [vmem:[%s2055_s0 + $0xa8] ss:$16 sps:$4 sm:$0xff]  }
  0x15   :  { %1299 = vmatpush3.bf16.msra.mxu1 %v1392_v19  ;;  %1218 = vmatprep.subr.bf16.mxu0 %v1393_v20  ;;  %v1441_v56 = vld [vmem:[%s2055_s0 + $0xc4] ss:$16 sps:$4 sm:$0xff]   ;;  %v1443_v57 = vld [vmem:[%s2055_s0 + $0xcc] ss:$16 sps:$4 sm:$0xff]   ;;  %v1445_v58 = vld [vmem:[%s2055_s0 + $0xc0] ss:$16 sps:$4 sm:$0xff]  }
  0x16   :  { %1300 = vmatprep.subr.bf16.mxu1 %v1394_v21  ;;  %v1446_v59 = vld [vmem:[%s2055_s0 + $0xc8] ss:$16 sps:$4 sm:$0xff]   ;;  %v1447_v60 = vld [vmem:[%s2055_s0 + $0xe4] ss:$16 sps:$4 sm:$0xff]   ;;  %v1449_v61 = vld [vmem:[%s2055_s0 + $0xec] ss:$16 sps:$4 sm:$0xff]  }
  0x17   :  { %v1451_v62 = vld [vmem:[%s2055_s0 + $0xe0] ss:$16 sps:$4 sm:$0xff]   ;;  %v1452_v63 = vld [vmem:[%s2055_s0 + $0xe8] ss:$16 sps:$4 sm:$0xff]   ;;  %v1453_v0 = vld [vmem:[%s2055_s0 + $0x104] ss:$16 sps:$4 sm:$0xff]  }
  0x18   :  { %1219 = vmatpush3.bf16.msra.mxu0 %v1395_v22  ;;  %v1455_v1 = vld [vmem:[%s2055_s0 + $0x10c] ss:$16 sps:$4 sm:$0xff]   ;;  %v1457_v2 = vld [vmem:[%s2055_s0 + $0x100] ss:$16 sps:$4 sm:$0xff]   ;;  %v1458_v3 = vld [vmem:[%s2055_s0 + $0x108] ss:$16 sps:$4 sm:$0xff]  }
  0x19   :  { %1301 = vmatpush3.bf16.msra.mxu1 %v1396_v23  ;;  %1220 = vmatprep.subr.bf16.mxu0 %v1397_v24  ;;  %v1459_v4 = vld [vmem:[%s2055_s0 + $0x124] ss:$16 sps:$4 sm:$0xff]   ;;  %v1461_v5 = vld [vmem:[%s2055_s0 + $0x12c] ss:$16 sps:$4 sm:$0xff]   ;;  %v1463_v8 = vld [vmem:[%s2055_s0 + $0x120] ss:$16 sps:$4 sm:$0xff]  }
  0x1a   :  { %1302 = vmatprep.subr.bf16.mxu1 %v1398_v25  ;;  %v1464_v9 = vld [vmem:[%s2055_s0 + $0x128] ss:$16 sps:$4 sm:$0xff]   ;;  %v1727_v16 = vld [vmem:[%s2056_s2] ss:$0 sm:$0xff] }
  0x1c   :  { %1221 = vmatpush3.bf16.msra.mxu0 %v1399_v26 }
  0x1d   :  { %1303 = vmatpush3.bf16.msra.mxu1 %v1400_v27  ;;  %1222 = vmatprep.subr.bf16.mxu0 %v1401_v28 }
  0x1e   :  { %1304 = vmatprep.subr.bf16.mxu1 %v1402_v29 }
  0x20   :  { %1223 = vmatpush3.bf16.msra.mxu0 %v1403_v30 }
  0x21   :  { %1305 = vmatpush3.bf16.msra.mxu1 %v1404_v31 }
  0x23   :  { %573 = vmatmul.mubr.bf16.vlgmr.msra.gmra.mrb[0].mxu0 %v1405_v32 }
  0x24   :  { %693 = vmatmul.mubr.bf16.vlgmr.msra.gmra.mrb[0].mxu1 %v1408_v34  ;;  %580 = vmatprep.mubr.bf16.mxu0 %v1411_v36 }
  0x25   :  { %700 = vmatprep.mubr.bf16.mxu1 %v1413_v37 }
  0x2b   :  { %581 = vmatmul.mubr.bf16.gmra.mrb[4].mxu0 %v1415_v38 }
  0x2c   :  { %701 = vmatmul.mubr.bf16.gmra.mrb[4].mxu1 %v1416_v39  ;;  %588 = vmatprep.mubr.bf16.mxu0 %v1417_v40 }
  0x2d   :  { %708 = vmatprep.mubr.bf16.mxu1 %v1419_v41 }
  0x33   :  { %589 = vmatmul.mubr.bf16.gmra.mrb[8].mxu0 %v1421_v42 }
  0x34   :  { %709 = vmatmul.mubr.bf16.gmra.mrb[8].mxu1 %v1422_v43  ;;  %596 = vmatprep.mubr.bf16.mxu0 %v1423_v44 }
  0x35   :  { %716 = vmatprep.mubr.bf16.mxu1 %v1425_v45 }
  0x3b   :  { %597 = vmatmul.mubr.bf16.gmra.mrb[12].mxu0 %v1427_v46 }
  0x3c   :  { %717 = vmatmul.mubr.bf16.gmra.mrb[12].mxu1 %v1428_v47  ;;  %604 = vmatprep.mubr.bf16.mxu0 %v1429_v48 }
  0x3d   :  { %724 = vmatprep.mubr.bf16.mxu1 %v1431_v49 }
  0x43   :  { %605 = vmatmul.mubr.bf16.gmra.mrb[16].mxu0 %v1433_v50 }
  0x44   :  { %725 = vmatmul.mubr.bf16.gmra.mrb[16].mxu1 %v1434_v51  ;;  %612 = vmatprep.mubr.bf16.mxu0 %v1435_v52 }
  0x45   :  { %732 = vmatprep.mubr.bf16.mxu1 %v1437_v53 }
  0x4b   :  { %613 = vmatmul.mubr.bf16.gmra.mrb[20].mxu0 %v1439_v54 }
  0x4c   :  { %733 = vmatmul.mubr.bf16.gmra.mrb[20].mxu1 %v1440_v55  ;;  %620 = vmatprep.mubr.bf16.mxu0 %v1441_v56 }
  0x4d   :  { %740 = vmatprep.mubr.bf16.mxu1 %v1443_v57 }
  0x53   :  { %621 = vmatmul.mubr.bf16.gmra.mrb[24].mxu0 %v1445_v58 }
  0x54   :  { %741 = vmatmul.mubr.bf16.gmra.mrb[24].mxu1 %v1446_v59  ;;  %628 = vmatprep.mubr.bf16.mxu0 %v1447_v60 }
  0x55   :  { %748 = vmatprep.mubr.bf16.mxu1 %v1449_v61 }
  0x5b   :  { %629 = vmatmul.mubr.bf16.gmra.mrb[28].mxu0 %v1451_v62 }
  0x5c   :  { %749 = vmatmul.mubr.bf16.gmra.mrb[28].mxu1 %v1452_v63  ;;  %636 = vmatprep.mubr.bf16.mxu0 %v1453_v0 }
  0x5d   :  { %756 = vmatprep.mubr.bf16.mxu1 %v1455_v1 }
  0x63   :  { %637 = vmatmul.mubr.bf16.gmra.mrb[32].mxu0 %v1457_v2 }
  0x64   :  { %757 = vmatmul.mubr.bf16.gmra.mrb[32].mxu1 %v1458_v3  ;;  %644 = vmatprep.mubr.bf16.mxu0 %v1459_v4 }
  0x65   :  { %764 = vmatprep.mubr.bf16.mxu1 %v1461_v5 }
  0x6b   :  { %645 = vmatmul.mubr.bf16.gmra.mrb[36].mxu0 %v1463_v8 }
  0x6c   :  { %765 = vmatmul.mubr.bf16.gmra.mrb[36].mxu1 %v1464_v9  ;;  %652 = vmatprep.mubr.bf16.mxu0 %v1170_v10 }
  0x6d   :  { %772 = vmatprep.mubr.bf16.mxu1 %v1172_v11 }
  0x73   :  { %653 = vmatmul.mubr.bf16.gmra.mrb[40].mxu0 %v1169_v12 }
  0x74   :  { %773 = vmatmul.mubr.bf16.gmra.mrb[40].mxu1 %v1171_v13 }
  0xf6   :  { %v1224_v14 = vpop.f32.mrb[0].mxu0 }
  0xf7   :  { %v1306_v15 = vpop.f32.mrb[0].mxu1  ;;  %v1225_v17 = vpop.f32.mrb[1].mxu0 }
  0xf8   :  { %v1226_v18 = vadd.f32 %v1225_v17, %v1224_v14  ;;  %v1307_v19 = vpop.f32.mrb[1].mxu1  ;;  %v1227_v20 = vpop.f32.mrb[2].mxu0 }
  0xf9   :  { %v1308_v21 = vadd.f32 %v1307_v19, %v1306_v15  ;;  %v1309_v22 = vpop.f32.mrb[2].mxu1  ;;  %v1228_v23 = vpop.f32.mrb[3].mxu0 }
  0xfa   :  { %v575_v24 = vadd.f32 %v1226_v18, %v1727_v16  ;;  %v1229_v25 = vadd.f32 %v1228_v23, %v1227_v20  ;;  %v1310_v26 = vpop.f32.mrb[3].mxu1 }
  0xfb   :  { %v1311_v27 = vadd.f32 %v1310_v26, %v1309_v22 }
  0xfc   :  { %v1730_v28 = vadd.f32 %v1308_v21, %v575_v24  ;;  %v578_v29 = vadd.f32 %v1229_v25, %v1727_v16 }
  0xfe   :  { %v1733_v30 = vadd.f32 %v1311_v27, %v578_v29  ;;  %v1230_v31 = vpop.f32.mrb[4].mxu0  ;;  %v780_v34 = vmax.f32 %v1730_v28, 0.0 }
  0xff   :  { %v1312_v32 = vpop.f32.mrb[4].mxu1  ;;  %v1231_v33 = vpop.f32.mrb[5].mxu0 }
 0x100   :  { %v781_v35 = vmax.f32 %v1733_v30, 0.0  ;;  %v1232_v36 = vadd.f32 %v1231_v33, %v1230_v31  ;;  %v1313_v37 = vpop.f32.mrb[5].mxu1  ;;  %v1233_v38 = vpop.f32.mrb[6].mxu0 }
 0x101   :  { %v1314_v39 = vadd.f32 %v1313_v37, %v1312_v32  ;;  %v1315_v40 = vpop.f32.mrb[6].mxu1  ;;  %v1234_v41 = vpop.f32.mrb[7].mxu0 }
 0x102   :  { %v907_v42 = vadd.f32 %v781_v35, %v780_v34  ;;  %v583_v43 = vadd.f32 %v1232_v36, %v1727_v16  ;;  %v1235_v44 = vadd.f32 %v1234_v41, %v1233_v38  ;;  %v1316_v45 = vpop.f32.mrb[7].mxu1 }
 0x103   :  { %v1317_v46 = vadd.f32 %v1316_v45, %v1315_v40 }
 0x104   :  { %v1742_v47 = vadd.f32 %v1314_v39, %v583_v43  ;;  %v586_v48 = vadd.f32 %v1235_v44, %v1727_v16 }
 0x106   :  { %v782_v49 = vmax.f32 %v1742_v47, 0.0  ;;  %v1746_v50 = vadd.f32 %v1317_v46, %v586_v48  ;;  %v1236_v51 = vpop.f32.mrb[8].mxu0 }
 0x107   :  { %v1318_v52 = vpop.f32.mrb[8].mxu1  ;;  %v1237_v53 = vpop.f32.mrb[9].mxu0 }
 0x108   :  { %v908_v54 = vadd.f32 %v907_v42, %v782_v49  ;;  %v783_v55 = vmax.f32 %v1746_v50, 0.0  ;;  %v1238_v56 = vadd.f32 %v1237_v53, %v1236_v51  ;;  %v1319_v57 = vpop.f32.mrb[9].mxu1  ;;  %v1239_v58 = vpop.f32.mrb[10].mxu0 }
 0x109   :  { %v1320_v59 = vadd.f32 %v1319_v57, %v1318_v52  ;;  %v1321_v60 = vpop.f32.mrb[10].mxu1  ;;  %v1240_v61 = vpop.f32.mrb[11].mxu0 }
 0x10a   :  { %v909_v62 = vadd.f32 %v908_v54, %v783_v55  ;;  %v591_v63 = vadd.f32 %v1238_v56, %v1727_v16  ;;  %v1241_v0 = vadd.f32 %v1240_v61, %v1239_v58  ;;  %v1322_v1 = vpop.f32.mrb[11].mxu1 }
 0x10b   :  { %v1323_v2 = vadd.f32 %v1322_v1, %v1321_v60 }
 0x10c   :  { %v1754_v3 = vadd.f32 %v1320_v59, %v591_v63  ;;  %v594_v4 = vadd.f32 %v1241_v0, %v1727_v16 }
 0x10e   :  { %v784_v5 = vmax.f32 %v1754_v3, 0.0  ;;  %v1758_v6 = vadd.f32 %v1323_v2, %v594_v4  ;;  %v1242_v7 = vpop.f32.mrb[12].mxu0 }
 0x10f   :  { %v1324_v8 = vpop.f32.mrb[12].mxu1  ;;  %v1243_v9 = vpop.f32.mrb[13].mxu0 }
 0x110   :  { %v910_v10 = vadd.f32 %v909_v62, %v784_v5  ;;  %v785_v11 = vmax.f32 %v1758_v6, 0.0  ;;  %v1244_v12 = vadd.f32 %v1243_v9, %v1242_v7  ;;  %v1325_v13 = vpop.f32.mrb[13].mxu1  ;;  %v1245_v14 = vpop.f32.mrb[14].mxu0 }
 0x111   :  { %v1326_v15 = vadd.f32 %v1325_v13, %v1324_v8  ;;  %v1327_v17 = vpop.f32.mrb[14].mxu1  ;;  %v1246_v18 = vpop.f32.mrb[15].mxu0 }
 0x112   :  { %v911_v19 = vadd.f32 %v910_v10, %v785_v11  ;;  %v599_v20 = vadd.f32 %v1244_v12, %v1727_v16  ;;  %v1247_v21 = vadd.f32 %v1246_v18, %v1245_v14  ;;  %v1328_v22 = vpop.f32.mrb[15].mxu1 }
 0x113   :  { %v1329_v23 = vadd.f32 %v1328_v22, %v1327_v17 }
 0x114   :  { %v1766_v24 = vadd.f32 %v1326_v15, %v599_v20  ;;  %v602_v25 = vadd.f32 %v1247_v21, %v1727_v16 }
 0x116   :  { %v786_v26 = vmax.f32 %v1766_v24, 0.0  ;;  %v1770_v27 = vadd.f32 %v1329_v23, %v602_v25  ;;  %v1248_v29 = vpop.f32.mrb[16].mxu0 }
 0x117   :  { %v1330_v31 = vpop.f32.mrb[16].mxu1  ;;  %v1249_v32 = vpop.f32.mrb[17].mxu0 }
 0x118   :  { %v912_v33 = vadd.f32 %v911_v19, %v786_v26  ;;  %v787_v36 = vmax.f32 %v1770_v27, 0.0  ;;  %v1250_v37 = vadd.f32 %v1249_v32, %v1248_v29  ;;  %v1331_v38 = vpop.f32.mrb[17].mxu1  ;;  %v1251_v39 = vpop.f32.mrb[18].mxu0 }
 0x119   :  { %v1332_v40 = vadd.f32 %v1331_v38, %v1330_v31  ;;  %v1333_v41 = vpop.f32.mrb[18].mxu1  ;;  %v1252_v42 = vpop.f32.mrb[19].mxu0 }
 0x11a   :  { %v913_v43 = vadd.f32 %v912_v33, %v787_v36  ;;  %v607_v44 = vadd.f32 %v1250_v37, %v1727_v16  ;;  %v1253_v45 = vadd.f32 %v1252_v42, %v1251_v39  ;;  %v1334_v46 = vpop.f32.mrb[19].mxu1 }
 0x11b   :  { %v1335_v48 = vadd.f32 %v1334_v46, %v1333_v41 }
 0x11c   :  { %v1778_v51 = vadd.f32 %v1332_v40, %v607_v44  ;;  %v610_v52 = vadd.f32 %v1253_v45, %v1727_v16 }
 0x11e   :  { %v788_v53 = vmax.f32 %v1778_v51, 0.0  ;;  %v1782_v54 = vadd.f32 %v1335_v48, %v610_v52  ;;  %v1254_v56 = vpop.f32.mrb[20].mxu0 }
 0x11f   :  { %v1336_v57 = vpop.f32.mrb[20].mxu1  ;;  %v1255_v58 = vpop.f32.mrb[21].mxu0 }
 0x120   :  { %v914_v59 = vadd.f32 %v913_v43, %v788_v53  ;;  %v789_v60 = vmax.f32 %v1782_v54, 0.0  ;;  %v1256_v61 = vadd.f32 %v1255_v58, %v1254_v56  ;;  %v1337_v62 = vpop.f32.mrb[21].mxu1  ;;  %v1257_v63 = vpop.f32.mrb[22].mxu0 }
 0x121   :  { %v1338_v0 = vadd.f32 %v1337_v62, %v1336_v57  ;;  %v1339_v1 = vpop.f32.mrb[22].mxu1  ;;  %v1258_v2 = vpop.f32.mrb[23].mxu0 }
 0x122   :  { %v915_v4 = vadd.f32 %v914_v59, %v789_v60  ;;  %v615_v7 = vadd.f32 %v1256_v61, %v1727_v16  ;;  %v1259_v8 = vadd.f32 %v1258_v2, %v1257_v63  ;;  %v1340_v9 = vpop.f32.mrb[23].mxu1 }
 0x123   :  { %v1341_v10 = vadd.f32 %v1340_v9, %v1339_v1 }
 0x124   :  { %v1790_v12 = vadd.f32 %v1338_v0, %v615_v7  ;;  %v618_v13 = vadd.f32 %v1259_v8, %v1727_v16 }
 0x126   :  { %v790_v14 = vmax.f32 %v1790_v12, 0.0  ;;  %v1794_v15 = vadd.f32 %v1341_v10, %v618_v13  ;;  %v1260_v17 = vpop.f32.mrb[24].mxu0 }
 0x127   :  { %v1342_v18 = vpop.f32.mrb[24].mxu1  ;;  %v1261_v19 = vpop.f32.mrb[25].mxu0 }
 0x128   :  { %v916_v20 = vadd.f32 %v915_v4, %v790_v14  ;;  %v791_v21 = vmax.f32 %v1794_v15, 0.0  ;;  %v1262_v22 = vadd.f32 %v1261_v19, %v1260_v17  ;;  %v1343_v23 = vpop.f32.mrb[25].mxu1  ;;  %v1263_v25 = vpop.f32.mrb[26].mxu0 }
 0x129   :  { %v1344_v29 = vadd.f32 %v1343_v23, %v1342_v18  ;;  %v1345_v31 = vpop.f32.mrb[26].mxu1  ;;  %v1264_v32 = vpop.f32.mrb[27].mxu0 }
 0x12a   :  { %v917_v33 = vadd.f32 %v916_v20, %v791_v21  ;;  %v623_v37 = vadd.f32 %v1262_v22, %v1727_v16  ;;  %v1265_v38 = vadd.f32 %v1264_v32, %v1263_v25  ;;  %v1346_v39 = vpop.f32.mrb[27].mxu1 }
 0x12b   :  { %v1347_v40 = vadd.f32 %v1346_v39, %v1345_v31 }
 0x12c   :  { %v1802_v41 = vadd.f32 %v1344_v29, %v623_v37  ;;  %v626_v42 = vadd.f32 %v1265_v38, %v1727_v16 }
 0x12e   :  { %v792_v43 = vmax.f32 %v1802_v41, 0.0  ;;  %v1806_v44 = vadd.f32 %v1347_v40, %v626_v42  ;;  %v1266_v45 = vpop.f32.mrb[28].mxu0 }
 0x12f   :  { %v1348_v46 = vpop.f32.mrb[28].mxu1  ;;  %v1267_v48 = vpop.f32.mrb[29].mxu0 }
 0x130   :  { %v918_v52 = vadd.f32 %v917_v33, %v792_v43  ;;  %v793_v56 = vmax.f32 %v1806_v44, 0.0  ;;  %v1268_v57 = vadd.f32 %v1267_v48, %v1266_v45  ;;  %v1349_v58 = vpop.f32.mrb[29].mxu1  ;;  %v1269_v59 = vpop.f32.mrb[30].mxu0 }
 0x131   :  { %v1350_v61 = vadd.f32 %v1349_v58, %v1348_v46  ;;  %v1351_v62 = vpop.f32.mrb[30].mxu1  ;;  %v1270_v63 = vpop.f32.mrb[31].mxu0  ;;  %v801_v58 = vlaneseq }
 0x132   :  { %v919_v0 = vadd.f32 %v918_v52, %v793_v56  ;;  %v631_v1 = vadd.f32 %v1268_v57, %v1727_v16  ;;  %v1271_v2 = vadd.f32 %v1270_v63, %v1269_v59  ;;  %v1352_v4 = vpop.f32.mrb[31].mxu1 }
 0x133   :  { %v1353_v7 = vadd.f32 %v1352_v4, %v1351_v62 }
 0x134   :  { %v1814_v8 = vadd.f32 %v1350_v61, %v631_v1  ;;  %v634_v9 = vadd.f32 %v1271_v2, %v1727_v16 }
 0x136   :  { %v794_v10 = vmax.f32 %v1814_v8, 0.0  ;;  %v1818_v13 = vadd.f32 %v1353_v7, %v634_v9  ;;  %v1272_v17 = vpop.f32.mrb[32].mxu0 }
 0x137   :  { %v1354_v18 = vpop.f32.mrb[32].mxu1  ;;  %v1273_v19 = vpop.f32.mrb[33].mxu0 }
 0x138   :  { %v920_v20 = vadd.f32 %v919_v0, %v794_v10  ;;  %v795_v22 = vmax.f32 %v1818_v13, 0.0  ;;  %v1274_v23 = vadd.f32 %v1273_v19, %v1272_v17  ;;  %v1355_v25 = vpop.f32.mrb[33].mxu1  ;;  %v1275_v29 = vpop.f32.mrb[34].mxu0 }
 0x139   :  { %v1356_v31 = vadd.f32 %v1355_v25, %v1354_v18  ;;  %v1357_v32 = vpop.f32.mrb[34].mxu1  ;;  %v1276_v33 = vpop.f32.mrb[35].mxu0 }
 0x13a   :  { %v921_v37 = vadd.f32 %v920_v20, %v795_v22  ;;  %v639_v38 = vadd.f32 %v1274_v23, %v1727_v16  ;;  %v1277_v39 = vadd.f32 %v1276_v33, %v1275_v29  ;;  %v1358_v40 = vpop.f32.mrb[35].mxu1  ;;  %v802_v23 = vshrl.u32 %v801_v58, 7 }
 0x13b   :  { %v1359_v42 = vadd.f32 %v1358_v40, %v1357_v32 }
 0x13c   :  { %v1826_v45 = vadd.f32 %v1356_v31, %v639_v38  ;;  %v642_v46 = vadd.f32 %v1277_v39, %v1727_v16  ;;  %v822_v38 = vadd.s32 160, %v802_v23 }
 0x13e   :  { %v796_v48 = vmax.f32 %v1826_v45, 0.0  ;;  %v1830_v52 = vadd.f32 %v1359_v42, %v642_v46  ;;  %v1278_v57 = vpop.f32.mrb[36].mxu0  ;;  %vm843_vm0 = vcmp.lt.s32.totalorder %v822_v38, 162 }
 0x13f   :  { %v1360_v59 = vpop.f32.mrb[36].mxu1  ;;  %v1279_v61 = vpop.f32.mrb[37].mxu0 }
 0x140   :  { %v922_v62 = vadd.f32 %v921_v37, %v796_v48  ;;  %v797_v63 = vmax.f32 %v1830_v52, 0.0  ;;  %v1280_v0 = vadd.f32 %v1279_v61, %v1278_v57  ;;  %v1361_v1 = vpop.f32.mrb[37].mxu1  ;;  %v1281_v2 = vpop.f32.mrb[38].mxu0 }
 0x141   :  { %v1362_v4 = vadd.f32 %v1361_v1, %v1360_v59  ;;  %v1363_v7 = vpop.f32.mrb[38].mxu1  ;;  %v1282_v9 = vpop.f32.mrb[39].mxu0 }
 0x142   :  { %v923_v17 = vadd.f32 %v922_v62, %v797_v63  ;;  %v647_v18 = vadd.f32 %v1280_v0, %v1727_v16  ;;  %v1283_v19 = vadd.f32 %v1282_v9, %v1281_v2  ;;  %v1364_v20 = vpop.f32.mrb[39].mxu1  ;;  %v1471_v9 = vmov 0.0  }
 0x143   :  { %v1365_v25 = vadd.f32 %v1364_v20, %v1363_v7 }
 0x144   :  { %v767_v29 = vadd.f32 %v1362_v4, %v647_v18  ;;  %v650_v31 = vadd.f32 %v1283_v19, %v1727_v16  ;;  %v1840_v18 = vsel %vm843_vm0, 1.0, %v1471_v9 }
 0x146   :  { %v798_v32 = vmax.f32 %v767_v29, 0.0  ;;  %v770_v33 = vadd.f32 %v1365_v25, %v650_v31  ;;  %v1284_v37 = vpop.f32.mrb[40].mxu0 }
 0x147   :  { %v1366_v39 = vpop.f32.mrb[40].mxu1  ;;  %v1285_v40 = vpop.f32.mrb[41].mxu0 }
 0x148   :  { %v924_v42 = vadd.f32 %v923_v17, %v798_v32  ;;  %v799_v46 = vmax.f32 %v770_v33, 0.0  ;;  %v1286_v57 = vadd.f32 %v1285_v40, %v1284_v37  ;;  %v1367_v59 = vpop.f32.mrb[41].mxu1  ;;  %v1287_v61 = vpop.f32.mrb[42].mxu0 }
 0x149   :  { %v1368_v62 = vadd.f32 %v1367_v59, %v1366_v39  ;;  %v1369_v0 = vpop.f32.mrb[42].mxu1  ;;  %v1288_v1 = vpop.f32.mrb[43].mxu0 }
 0x14a   :  { %v925_v2 = vadd.f32 %v924_v42, %v799_v46  ;;  %v655_v58 = vadd.f32 %v1286_v57, %v1727_v16  ;;  %v1370_v4 = vpop.f32.mrb[43].mxu1 }
 0x14c   :  { %v775_v7 = vadd.f32 %v1368_v62, %v655_v58 }
 0x14e   :  { %v800_v19 = vmax.f32 %v775_v7, 0.0 }
 0x150   :  { %v906_v20 = vmul.f32 %v1840_v18, %v800_v19 }
 0x152   :  { %v926_v17 = vadd.f32 %v925_v2, %v906_v20 }
 0x154   :  { %v927_v23 = vrot.slane %v926_v17, 4 }
 0x156   :  { %v928_v25 = vadd.f32 %v927_v23, %v926_v17 }
 0x158   :  { %v929_v29 = vrot.slane %v928_v25, 2 }
 0x15a   :  { %v930_v31 = vadd.f32 %v929_v29, %v928_v25 }
 0x15c   :  { %v931_v33 = vrot.slane %v930_v31, 1 }
 0x15e   :  { %v932_v37 = vadd.f32 %v931_v33, %v930_v31 }
 0x160   :  { %v933_v39 = vmul.f32 0.0061728396, %v932_v37 }
 0x162   :  { %v1845_v16 = vsub.f32 %v780_v34, %v933_v39  ;;  %v1849_v38 = vsub.f32 %v781_v35, %v933_v39  ;;  %v1853_v40 = vsub.f32 %v782_v49, %v933_v39  ;;  %v1857_v42 = vsub.f32 %v783_v55, %v933_v39 }
 0x163   :  { %v1861_v57 = vsub.f32 %v784_v5, %v933_v39  ;;  %v1865_v28 = vsub.f32 %v785_v11, %v933_v39  ;;  %v1869_v30 = vsub.f32 %v786_v26, %v933_v39  ;;  %v1873_v34 = vsub.f32 %v787_v36, %v933_v39 }
 0x164   :  { %v1877_v35 = vsub.f32 %v788_v53, %v933_v39  ;;  %v1881_v47 = vsub.f32 %v789_v60, %v933_v39  ;;  %v1885_v49 = vsub.f32 %v790_v14, %v933_v39  ;;  %v1889_v50 = vsub.f32 %v791_v21, %v933_v39 }
 0x165   :  { %v1893_v55 = vsub.f32 %v792_v43, %v933_v39  ;;  %v1897_v3 = vsub.f32 %v793_v56, %v933_v39  ;;  %v1901_v5 = vsub.f32 %v794_v10, %v933_v39  ;;  %v1905_v6 = vsub.f32 %v795_v22, %v933_v39 }
 0x166   :  { %v1909_v11 = vsub.f32 %v796_v48, %v933_v39  ;;  %v1913_v24 = vsub.f32 %v797_v63, %v933_v39  ;;  %v1915_v26 = vsub.f32 %v798_v32, %v933_v39  ;;  %v1917_v27 = vsub.f32 %v799_v46, %v933_v39 }
 0x167   :  { %v1919_v36 = vsub.f32 %v800_v19, %v933_v39  ;;  %v955_v51 = vmul.f32 %v1845_v16, %v1845_v16  ;;  %v956_v53 = vmul.f32 %v1849_v38, %v1849_v38  ;;  %v957_v54 = vmul.f32 %v1853_v40, %v1853_v40 }
 0x168   :  { %v958_v12 = vmul.f32 %v1857_v42, %v1857_v42  ;;  %v959_v15 = vmul.f32 %v1861_v57, %v1861_v57  ;;  %v960_v41 = vmul.f32 %v1865_v28, %v1865_v28  ;;  %v961_v44 = vmul.f32 %v1869_v30, %v1869_v30 }
 0x169   :  { %v997_v60 = vadd.f32 %v956_v53, %v955_v51  ;;  %v962_v8 = vmul.f32 %v1873_v34, %v1873_v34  ;;  %v963_v13 = vmul.f32 %v1877_v35, %v1877_v35  ;;  %v964_v45 = vmul.f32 %v1881_v47, %v1881_v47 }
 0x16a   :  { %v965_v52 = vmul.f32 %v1885_v49, %v1885_v49  ;;  %v966_v32 = vmul.f32 %v1889_v50, %v1889_v50  ;;  %v967_v59 = vmul.f32 %v1893_v55, %v1893_v55  ;;  %v968_v62 = vmul.f32 %v1897_v3, %v1897_v3 }
 0x16b   :  { %v998_v14 = vadd.f32 %v997_v60, %v957_v54  ;;  %v969_v1 = vmul.f32 %v1901_v5, %v1901_v5  ;;  %v970_v58 = vmul.f32 %v1905_v6, %v1905_v6  ;;  %v971_v7 = vmul.f32 %v1909_v11, %v1909_v11 }
 0x16c   :  { %v972_v19 = vmul.f32 %v1913_v24, %v1913_v24  ;;  %v973_v17 = vmul.f32 %v1915_v26, %v1915_v26  ;;  %v975_v23 = vmul.f32 %v1919_v36, %v1919_v36  ;;  %v974_v29 = vmul.f32 %v1917_v27, %v1917_v27 }
 0x16d   :  { %v999_v21 = vadd.f32 %v998_v14, %v958_v12 }
 0x16e   :  { %v996_v33 = vmul.f32 %v1840_v18, %v975_v23 }
 0x16f   :  { %v1000_v43 = vadd.f32 %v999_v21, %v959_v15 }
 0x171   :  { %v1001_v56 = vadd.f32 %v1000_v43, %v960_v41 }
 0x173   :  { %v1002_v10 = vadd.f32 %v1001_v56, %v961_v44 }
 0x175   :  { %v1003_v22 = vadd.f32 %v1002_v10, %v962_v8 }
 0x177   :  { %v1004_v48 = vadd.f32 %v1003_v22, %v963_v13 }
 0x179   :  { %v1005_v63 = vadd.f32 %v1004_v48, %v964_v45 }
 0x17b   :  { %v1006_v46 = vadd.f32 %v1005_v63, %v965_v52 }
 0x17d   :  { %v1007_v61 = vadd.f32 %v1006_v46, %v966_v32 }
 0x17f   :  { %v1008_v0 = vadd.f32 %v1007_v61, %v967_v59 }
 0x181   :  { %v1009_v2 = vadd.f32 %v1008_v0, %v968_v62 }
 0x183   :  { %v1010_v4 = vadd.f32 %v1009_v2, %v969_v1 }
 0x185   :  { %v1011_v9 = vadd.f32 %v1010_v4, %v970_v58 }
 0x187   :  { %v1012_v20 = vadd.f32 %v1011_v9, %v971_v7 }
 0x189   :  { %v1013_v25 = vadd.f32 %v1012_v20, %v972_v19 }
 0x18b   :  { %v1014_v31 = vadd.f32 %v1013_v25, %v973_v17 }
 0x18d   :  { %v1015_v37 = vadd.f32 %v1014_v31, %v974_v29 }
 0x18f   :  { %v1016_v39 = vadd.f32 %v1015_v37, %v996_v33 }
 0x191   :  { %v1017_v51 = vrot.slane %v1016_v39, 4 }
 0x193   :  { %v1018_v53 = vadd.f32 %v1017_v51, %v1016_v39 }
 0x195   :  { %v1019_v54 = vrot.slane %v1018_v53, 2 }
 0x197   :  { %v1020_v60 = vadd.f32 %v1019_v54, %v1018_v53 }
 0x199   :  { %v1021_v12 = vrot.slane %v1020_v60, 1 }
 0x19b   :  { %v1022_v14 = vadd.f32 %v1021_v12, %v1020_v60 }
 0x19d   :  { %v1023_v15 = vmul.f32 0.0061728396, %v1022_v14 }
 0x19f   :  { %v1024_v21 = vadd.f32 1e-05, %v1023_v15 }
 0x1a1   :  { %1469 = vrsqrt.f32 %v1024_v21 }
 0x1ab   :  { %v1470_v41 = vpop.eup %1469 }
 0x1ac   :  { %v1026_v43 = vmul.f32 %v1470_v41, %v1845_v16  ;;  %v1027_v44 = vmul.f32 %v1470_v41, %v1849_v38  ;;  %v1028_v56 = vmul.f32 %v1470_v41, %v1853_v40  ;;  %v1029_v18 = vmul.f32 %v1470_v41, %v1857_v42  ;;  %v1206_v40 = vld [vmem:[%s2057_s3] ss:$0 sm:$0xff] }
 0x1ad   :  { %v1030_v8 = vmul.f32 %v1470_v41, %v1861_v57  ;;  %v1031_v10 = vmul.f32 %v1470_v41, %v1865_v28  ;;  %v1032_v13 = vmul.f32 %v1470_v41, %v1869_v30  ;;  %v1033_v22 = vmul.f32 %v1470_v41, %v1873_v34 }
 0x1ae   :  { %v1034_v45 = vmul.f32 %v1470_v41, %v1877_v35  ;;  %v1035_v48 = vmul.f32 %v1470_v41, %v1881_v47  ;;  %v1036_v16 = vmul.f32 %v1470_v41, %v1885_v49  ;;  %v1037_v38 = vmul.f32 %v1470_v41, %v1889_v50 }
 0x1af   :  { %v1038_v42 = vmul.f32 %v1470_v41, %v1893_v55  ;;  %v1039_v57 = vmul.f32 %v1470_v41, %v1897_v3  ;;  %v1040_v28 = vmul.f32 %v1470_v41, %v1901_v5  ;;  %v1041_v30 = vmul.f32 %v1470_v41, %v1905_v6 }
 0x1b0   :  { %v1042_v34 = vmul.f32 %v1470_v41, %v1909_v11  ;;  %v1043_v35 = vmul.f32 %v1470_v41, %v1913_v24  ;;  %v1044_v47 = vmul.f32 %v1470_v41, %v1915_v26  ;;  %v1045_v49 = vmul.f32 %v1470_v41, %v1917_v27  ;;  %v1207_v11 = vld [vmem:[%s2058_s4] ss:$0 sm:$0xff] }
 0x1b1   :  { %v1046_v50 = vmul.f32 %v1470_v41, %v1919_v36  ;;  %v1054_v52 = vmul.f32 %v1206_v40, %v1026_v43  ;;  %v1055_v63 = vmul.f32 %v1206_v40, %v1027_v44  ;;  %v1056_v32 = vmul.f32 %v1206_v40, %v1028_v56 }
 0x1b2   :  { %v1057_v55 = vmul.f32 %v1206_v40, %v1029_v18  ;;  %v1058_v46 = vmul.f32 %v1206_v40, %v1030_v8  ;;  %v1059_v3 = vmul.f32 %v1206_v40, %v1031_v10  ;;  %v1060_v59 = vmul.f32 %v1206_v40, %v1032_v13 }
 0x1b3   :  { %v1061_v5 = vmul.f32 %v1206_v40, %v1033_v22  ;;  %v1062_v61 = vmul.f32 %v1206_v40, %v1034_v45  ;;  %v1063_v6 = vmul.f32 %v1206_v40, %v1035_v48  ;;  %v1064_v62 = vmul.f32 %v1206_v40, %v1036_v16 }
 0x1b4   :  { %v1065_v24 = vmul.f32 %v1206_v40, %v1037_v38  ;;  %v1066_v26 = vmul.f32 %v1206_v40, %v1038_v42  ;;  %v1067_v27 = vmul.f32 %v1206_v40, %v1039_v57  ;;  %v1068_v0 = vmul.f32 %v1206_v40, %v1040_v28 }
 0x1b5   :  { %v1069_v36 = vmul.f32 %v1206_v40, %v1041_v30  ;;  %v1070_v1 = vmul.f32 %v1206_v40, %v1042_v34  ;;  %v1071_v2 = vmul.f32 %v1206_v40, %v1043_v35  ;;  %v1072_v58 = vmul.f32 %v1206_v40, %v1044_v47 }
 0x1b6   :  { %v1073_v4 = vmul.f32 %v1206_v40, %v1045_v49  ;;  %v1074_v7 = vmul.f32 %v1206_v40, %v1046_v50  ;;  %v1082_v9 = vadd.f32 %v1207_v11, %v1054_v52  ;;  %v1083_v19 = vadd.f32 %v1207_v11, %v1055_v63 }
 0x1b7   :  { %v1084_v20 = vadd.f32 %v1207_v11, %v1056_v32  ;;  %v1085_v17 = vadd.f32 %v1207_v11, %v1057_v55  ;;  %v1086_v23 = vadd.f32 %v1207_v11, %v1058_v46  ;;  %v1087_v25 = vadd.f32 %v1207_v11, %v1059_v3 }
 0x1b8   :  { %v1088_v29 = vadd.f32 %v1207_v11, %v1060_v59  ;;  %v1089_v31 = vadd.f32 %v1207_v11, %v1061_v5  ;;  %v1090_v33 = vadd.f32 %v1207_v11, %v1062_v61  ;;  %v1091_v37 = vadd.f32 %v1207_v11, %v1063_v6  ;;  %1103 = vst [vmem:[%s2059_s5] sm:$0xff] %v1082_v9 }
 0x1b9   :  { %1104 = vst [vmem:[%s2059_s5 + $0x8] sm:$0xff] %v1083_v19  ;;  %v1092_v39 = vadd.f32 %v1207_v11, %v1064_v62  ;;  %v1093_v51 = vadd.f32 %v1207_v11, %v1065_v24  ;;  %v1094_v53 = vadd.f32 %v1207_v11, %v1066_v26  ;;  %v1095_v54 = vadd.f32 %v1207_v11, %v1067_v27 }
 0x1ba   :  { %1105 = vst [vmem:[%s2059_s5 + $0x10] sm:$0xff] %v1084_v20  ;;  %1106 = vst [vmem:[%s2059_s5 + $0x18] sm:$0xff] %v1085_v17  ;;  %v1096_v60 = vadd.f32 %v1207_v11, %v1068_v0  ;;  %v1097_v12 = vadd.f32 %v1207_v11, %v1069_v36  ;;  %v1098_v14 = vadd.f32 %v1207_v11, %v1070_v1 }
 0x1bb   :  { %1107 = vst [vmem:[%s2059_s5 + $0x20] sm:$0xff] %v1086_v23  ;;  %1108 = vst [vmem:[%s2059_s5 + $0x28] sm:$0xff] %v1087_v25  ;;  %v1099_v15 = vadd.f32 %v1207_v11, %v1071_v2  ;;  %v1100_v21 = vadd.f32 %v1207_v11, %v1072_v58  ;;  %v1101_v41 = vadd.f32 %v1207_v11, %v1073_v4 }
 0x1bc   :  { %1109 = vst [vmem:[%s2059_s5 + $0x30] sm:$0xff] %v1088_v29  ;;  %1110 = vst [vmem:[%s2059_s5 + $0x38] sm:$0xff] %v1089_v31  ;;  %v1102_v43 = vadd.f32 %v1207_v11, %v1074_v7 }
 0x1bd   :  { %1111 = vst [vmem:[%s2059_s5 + $0x40] sm:$0xff] %v1090_v33  ;;  %1112 = vst [vmem:[%s2059_s5 + $0x48] sm:$0xff] %v1091_v37 }
 0x1be   :  { %1113 = vst [vmem:[%s2059_s5 + $0x50] sm:$0xff] %v1092_v39  ;;  %1114 = vst [vmem:[%s2059_s5 + $0x58] sm:$0xff] %v1093_v51 }
 0x1bf   :  { %1115 = vst [vmem:[%s2059_s5 + $0x60] sm:$0xff] %v1094_v53  ;;  %1116 = vst [vmem:[%s2059_s5 + $0x68] sm:$0xff] %v1095_v54 }
 0x1c0   :  { %1117 = vst [vmem:[%s2059_s5 + $0x70] sm:$0xff] %v1096_v60  ;;  %1118 = vst [vmem:[%s2059_s5 + $0x78] sm:$0xff] %v1097_v12 }
 0x1c1   :  { %1119 = vst [vmem:[%s2059_s5 + $0x80] sm:$0xff] %v1098_v14  ;;  %1120 = vst [vmem:[%s2059_s5 + $0x88] sm:$0xff] %v1099_v15 }
 0x1c2   :  { %1121 = vst [vmem:[%s2059_s5 + $0x90] sm:$0xff] %v1100_v21  ;;  %1122 = vst [vmem:[%s2059_s5 + $0x98] sm:$0xff] %v1101_v41 }
 0x1c3   :  { %1123 = vst [vmem:[%s2059_s5 + $0xa0] sm:$0xff] %v1102_v43 }

// kernel: net_forward.6
= control target key start
LH: loop header
LB: loop body
LE: loop exit
PB: predicated region body
PF: predicated region fallthrough
CT: control target
= control target key end

     0   :  { %v1376_v34 = vmov 0.0   ;;  %vm1377_vm0 = vmmov 0   ;;  %vm522_vm1 = vcmask 523264   ;;  %s1761_s1 = inlined_call_operand.vmem [shape: bf16[576,128], index: 1, kind: input, shape index: {}]   ;;  %s1762_s0 = inlined_call_operand.vmem [shape: bf16[104,576], index: 0, kind: input, shape index: {}]   ;;  %s1763_s2 = inlined_call_operand.vmem [shape: f32[1,128], index: 2, kind: input, shape index: {}]   ;;  %s1764_s3 = inlined_call_operand.vmem [shape: f32[1,128], index: 3, kind: input, shape index: {}]   ;;  %s1765_s4 = inlined_call_operand.vmem [shape: f32[1,128], index: 4, kind: input, shape index: {}]   ;;  %s1766_s5 = inlined_call_operand.vmem [shape: f32[104,128], index: 5, kind: output, shape index: {}]  }
   0x1   :  { %v1291_v0 = vld [vmem:[%s1761_s1 + $0x40] sm:$0xff]   ;;  %v1295_v4 = vld [vmem:[%s1761_s1 + $0x48] sm:$0xff]   ;;  %v1299_v8 = vld [vmem:[%s1761_s1 + $0x50] sm:$0xff]  }
   0x2   :  { %v1292_v1 = vld [vmem:[%s1761_s1 + $0xc0] sm:$0xff]   ;;  %1118 = vmatprep.subr.bf16.mxu0 %v1291_v0  ;;  %v1296_v5 = vld [vmem:[%s1761_s1 + $0xc8] sm:$0xff]   ;;  %v1300_v9 = vld [vmem:[%s1761_s1 + $0xd0] sm:$0xff]  }
   0x3   :  { %v1293_v2 = vld [vmem:[%s1761_s1] sm:$0xff]   ;;  %1176 = vmatprep.subr.bf16.mxu1 %v1292_v1  ;;  %v1297_v6 = vld [vmem:[%s1761_s1 + $0x8] sm:$0xff]   ;;  %v1301_v10 = vld [vmem:[%s1761_s1 + $0x10] sm:$0xff]  }
   0x4   :  { %v1294_v3 = vld [vmem:[%s1761_s1 + $0x80] sm:$0xff]   ;;  %1119 = vmatpush3.bf16.msra.mxu0 %v1293_v2  ;;  %v1298_v7 = vld [vmem:[%s1761_s1 + $0x88] sm:$0xff]   ;;  %v1302_v11 = vld [vmem:[%s1761_s1 + $0x90] sm:$0xff]  }
   0x5   :  { %1177 = vmatpush3.bf16.msra.mxu1 %v1294_v3  ;;  %1120 = vmatprep.subr.bf16.mxu0 %v1295_v4  ;;  %v1303_v12 = vld [vmem:[%s1761_s1 + $0x58] sm:$0xff]   ;;  %v1307_v16 = vld [vmem:[%s1761_s1 + $0x60] sm:$0xff]   ;;  %v1311_v20 = vld [vmem:[%s1761_s1 + $0x68] sm:$0xff]  }
   0x6   :  { %1178 = vmatprep.subr.bf16.mxu1 %v1296_v5  ;;  %v1304_v13 = vld [vmem:[%s1761_s1 + $0xd8] sm:$0xff]   ;;  %v1308_v17 = vld [vmem:[%s1761_s1 + $0xe0] sm:$0xff]   ;;  %v1312_v21 = vld [vmem:[%s1761_s1 + $0xe8] sm:$0xff]  }
   0x7   :  { %v1305_v14 = vld [vmem:[%s1761_s1 + $0x18] sm:$0xff]   ;;  %v1309_v18 = vld [vmem:[%s1761_s1 + $0x20] sm:$0xff]   ;;  %v1313_v22 = vld [vmem:[%s1761_s1 + $0x28] sm:$0xff]  }
   0x8   :  { %1121 = vmatpush3.bf16.msra.mxu0 %v1297_v6  ;;  %v1306_v15 = vld [vmem:[%s1761_s1 + $0x98] sm:$0xff]   ;;  %v1310_v19 = vld [vmem:[%s1761_s1 + $0xa0] sm:$0xff]   ;;  %v1314_v23 = vld [vmem:[%s1761_s1 + $0xa8] sm:$0xff]  }
   0x9   :  { %1179 = vmatpush3.bf16.msra.mxu1 %v1298_v7  ;;  %1122 = vmatprep.subr.bf16.mxu0 %v1299_v8  ;;  %v1315_v24 = vld [vmem:[%s1761_s1 + $0x70] sm:$0xff]   ;;  %v1319_v28 = vld [vmem:[%s1761_s1 + $0x78] sm:$0xff]   ;;  %v1328_v36 = vld [vmem:[%s1762_s0 + $0xc] ss:$20 sps:$4 sm:$0xff]  }
   0xa   :  { %1180 = vmatprep.subr.bf16.mxu1 %v1300_v9  ;;  %v1316_v25 = vld [vmem:[%s1761_s1 + $0xf0] sm:$0xff]   ;;  %v1320_v29 = vld [vmem:[%s1761_s1 + $0xf8] sm:$0xff]   ;;  %v1329_v37 = vld [vmem:[%s1761_s1 + $0x100] sm:$0xff]   ;;  %664 = vmatprep.mubr.bf16.mxu1 %v1328_v36 }
   0xb   :  { %v1317_v26 = vld [vmem:[%s1761_s1 + $0x30] sm:$0xff]   ;;  %v1321_v30 = vld [vmem:[%s1761_s1 + $0x38] sm:$0xff]   ;;  %v1330_v38 = vld [vmem:[%s1762_s0 + $0x2c] ss:$20 sps:$4 sm:$0xff]  }
   0xc   :  { %1123 = vmatpush3.bf16.msra.mxu0 %v1301_v10  ;;  %v1318_v27 = vld [vmem:[%s1761_s1 + $0xb0] sm:$0xff]   ;;  %v1322_v31 = vld [vmem:[%s1761_s1 + $0xb8] sm:$0xff]   ;;  %v1340_v43 = vld [vmem:[%s1761_s1 + $0x108] sm:$0xff]  }
   0xd   :  { %1181 = vmatpush3.bf16.msra.mxu1 %v1302_v11  ;;  %1124 = vmatprep.subr.bf16.mxu0 %v1303_v12  ;;  %v1323_v32 = vld [vmem:[%s1762_s0] ss:$20 sps:$4 sm:$0xff]   ;;  %v1325_v33 = vld [vmem:[%s1762_s0 + $0x4] ss:$20 sps:$4 sm:$0xff]   ;;  %v1326_v35 = vld [vmem:[%s1762_s0 + $0x8] ss:$20 sps:$4 sm:$0xff]  }
   0xe   :  { %1182 = vmatprep.subr.bf16.mxu1 %v1304_v13  ;;  %576 = vmatprep.mubr.bf16.mxu0 %v1325_v33  ;;  %v1332_v39 = vld [vmem:[%s1762_s0 + $0x34] ss:$20 sps:$4 sm:$0xff]   ;;  %v1335_v41 = vld [vmem:[%s1762_s0 + $0x30] ss:$20 sps:$4 sm:$0xff]   ;;  %v1342_v47 = vld [vmem:[%s1762_s0 + $0x58] ss:$20 sps:$4 sm:$0xff]  }
   0xf   :  { %v1334_v40 = vld [vmem:[%s1762_s0 + $0x28] ss:$20 sps:$4 sm:$0xff]   ;;  %v1349_v45 = vld [vmem:[%s1761_s1 + $0x110] sm:$0xff]   ;;  %v1345_v49 = vld [vmem:[%s1762_s0 + $0x84] ss:$20 sps:$4 sm:$0xff]  }
  0x10   :  { %1125 = vmatpush3.bf16.msra.mxu0 %v1305_v14  ;;  %v1336_v42 = vld [vmem:[%s1762_s0 + $0x54] ss:$20 sps:$4 sm:$0xff]   ;;  %v1338_v44 = vld [vmem:[%s1762_s0 + $0x5c] ss:$20 sps:$4 sm:$0xff]   ;;  %v1347_v51 = vld [vmem:[%s1762_s0 + $0x78] ss:$20 sps:$4 sm:$0xff]  }
  0x11   :  { %1183 = vmatpush3.bf16.msra.mxu1 %v1306_v15  ;;  %1126 = vmatprep.subr.bf16.mxu0 %v1307_v16  ;;  %v1341_v46 = vld [vmem:[%s1762_s0 + $0x50] ss:$20 sps:$4 sm:$0xff]   ;;  %v1362_v50 = vld [vmem:[%s1761_s1 + $0x118] sm:$0xff]   ;;  %v1348_v52 = vld [vmem:[%s1762_s0 + $0x80] ss:$20 sps:$4 sm:$0xff]  }
  0x12   :  { %1184 = vmatprep.subr.bf16.mxu1 %v1308_v17  ;;  %v1343_v48 = vld [vmem:[%s1762_s0 + $0x7c] ss:$20 sps:$4 sm:$0xff]   ;;  %v1350_v53 = vld [vmem:[%s1762_s0 + $0xa4] ss:$20 sps:$4 sm:$0xff]   ;;  %v1352_v54 = vld [vmem:[%s1762_s0 + $0xac] ss:$20 sps:$4 sm:$0xff]  }
  0x13   :  { %v1354_v55 = vld [vmem:[%s1762_s0 + $0xa0] ss:$20 sps:$4 sm:$0xff]   ;;  %v1355_v56 = vld [vmem:[%s1762_s0 + $0xa8] ss:$20 sps:$4 sm:$0xff]   ;;  %v1361_v62 = vld [vmem:[%s1762_s0 + $0xd0] ss:$20 sps:$4 sm:$0xff]  }
  0x14   :  { %1127 = vmatpush3.bf16.msra.mxu0 %v1309_v18  ;;  %v1356_v57 = vld [vmem:[%s1762_s0 + $0xcc] ss:$20 sps:$4 sm:$0xff]   ;;  %v1358_v58 = vld [vmem:[%s1762_s0 + $0xd4] ss:$20 sps:$4 sm:$0xff]   ;;  %v58_v60 = vld [vmem:[%s1762_s0 + $0xf8] sm:$0xff] }
  0x15   :  { %1185 = vmatpush3.bf16.msra.mxu1 %v1310_v19  ;;  %1128 = vmatprep.subr.bf16.mxu0 %v1311_v20  ;;  %v57_v59 = vld [vmem:[%s1762_s0 + $0xf0] sm:$0xff]  ;;  %v1360_v61 = vld [vmem:[%s1762_s0 + $0xc8] ss:$20 sps:$4 sm:$0xff]   ;;  %v1070_v0 = vcombine.high %v58_v60, %v58_v60  ;;  %v1069_v2 = vcombine.low %v58_v60, %v58_v60  ;;  %v1369_v5 = vld [vmem:[%s1762_s0 + $0x38] ss:$20 sps:$4 sm:$0xff]  }
  0x16   :  { %1186 = vmatprep.subr.bf16.mxu1 %v1312_v21  ;;  %v1068_v63 = vcombine.high %v57_v59, %v57_v59  ;;  %v1067_v1 = vcombine.low %v57_v59, %v57_v59  ;;  %v1367_v3 = vld [vmem:[%s1762_s0 + $0x10] ss:$20 sps:$4 sm:$0xff]   ;;  %v1370_v6 = vld [vmem:[%s1762_s0 + $0xd8] ss:$20 sps:$4 sm:$0xff]   ;;  %v1371_v7 = vld [vmem:[%s1762_s0 + $0x60] ss:$20 sps:$4 sm:$0xff]  }
  0x17   :  { %v1368_v4 = vld [vmem:[%s1762_s0 + $0xb0] ss:$20 sps:$4 sm:$0xff]   ;;  %v1372_v8 = vld [vmem:[%s1762_s0 + $0x100] ss:$0 sps:$4 sm:$0xff]   ;;  %v1373_v9 = vld [vmem:[%s1762_s0 + $0x88] ss:$20 sps:$4 sm:$0xff]  }
  0x18   :  { %1129 = vmatpush3.bf16.msra.mxu0 %v1313_v22  ;;  %v1647_v11 = vld [vmem:[%s1763_s2] ss:$0 sm:$0xff] }
  0x19   :  { %1187 = vmatpush3.bf16.msra.mxu1 %v1314_v23  ;;  %1130 = vmatprep.subr.bf16.mxu0 %v1315_v24 }
  0x1a   :  { %1188 = vmatprep.subr.bf16.mxu1 %v1316_v25 }
  0x1c   :  { %1131 = vmatpush3.bf16.msra.mxu0 %v1317_v26 }
  0x1d   :  { %1189 = vmatpush3.bf16.msra.mxu1 %v1318_v27  ;;  %1132 = vmatprep.subr.bf16.mxu0 %v1319_v28 }
  0x1e   :  { %1190 = vmatprep.subr.bf16.mxu1 %v1320_v29 }
  0x20   :  { %1133 = vmatpush3.bf16.msra.mxu0 %v1321_v30 }
  0x21   :  { %1191 = vmatpush3.bf16.msra.mxu1 %v1322_v31  ;;  %1245 = vmatprep.subr.bf16.mxu0 %v1376_v34 }
  0x22   :  { %1281 = vmatprep.subr.bf16.mxu1 %v1376_v34 }
  0x23   :  { %577 = vmatmul.mubr.bf16.vlgmr.msra.gmra.mrb[0].mxu0 %v1323_v32 }
  0x24   :  { %665 = vmatmul.mubr.bf16.vlgmr.msra.gmra.mrb[0].mxu1 %v1326_v35  ;;  %1246 = vmatpush3.bf16.msra.mxu0 %v1329_v37 }
  0x25   :  { %584 = vmatprep.mubr.bf16.mxu0 %v1330_v38  ;;  %1247 = vmatprep.subr.bf16.mxu0 %v1376_v34 }
  0x26   :  { %672 = vmatprep.mubr.bf16.mxu1 %v1332_v39  ;;  %1285 = vmatpush3.bf16.msra.mxu1 %v1329_v37 }
  0x27   :  { %1282 = vmatprep.subr.bf16.mxu1 %v1376_v34 }
  0x28   :  { %1248 = vmatpush3.bf16.msra.mxu0 %v1340_v43 }
  0x29   :  { %1249 = vmatprep.subr.bf16.mxu0 %v1376_v34 }
  0x2a   :  { %1286 = vmatpush3.bf16.msra.mxu1 %v1340_v43 }
  0x2b   :  { %585 = vmatmul.mubr.bf16.gmra.mrb[4].mxu0 %v1334_v40  ;;  %1283 = vmatprep.subr.bf16.mxu1 %v1376_v34 }
  0x2c   :  { %673 = vmatmul.mubr.bf16.gmra.mrb[4].mxu1 %v1335_v41  ;;  %592 = vmatprep.mubr.bf16.mxu0 %v1336_v42 }
  0x2d   :  { %680 = vmatprep.mubr.bf16.mxu1 %v1338_v44  ;;  %1250 = vmatpush3.bf16.msra.mxu0 %v1349_v45 }
  0x2e   :  { %1287 = vmatpush3.bf16.msra.mxu1 %v1349_v45  ;;  %1251 = vmatprep.subr.bf16.mxu0 %v1376_v34 }
  0x2f   :  { %1284 = vmatprep.subr.bf16.mxu1 %v1376_v34 }
  0x31   :  { %1252 = vmatpush3.bf16.msra.mxu0 %v1362_v50 }
  0x32   :  { %1288 = vmatpush3.bf16.msra.mxu1 %v1362_v50 }
  0x33   :  { %593 = vmatmul.mubr.bf16.gmra.mrb[8].mxu0 %v1341_v46 }
  0x34   :  { %681 = vmatmul.mubr.bf16.gmra.mrb[8].mxu1 %v1342_v47  ;;  %600 = vmatprep.mubr.bf16.mxu0 %v1343_v48 }
  0x35   :  { %688 = vmatprep.mubr.bf16.mxu1 %v1345_v49 }
  0x3b   :  { %601 = vmatmul.mubr.bf16.gmra.mrb[12].mxu0 %v1347_v51 }
  0x3c   :  { %689 = vmatmul.mubr.bf16.gmra.mrb[12].mxu1 %v1348_v52  ;;  %608 = vmatprep.mubr.bf16.mxu0 %v1350_v53 }
  0x3d   :  { %696 = vmatprep.mubr.bf16.mxu1 %v1352_v54 }
  0x43   :  { %609 = vmatmul.mubr.bf16.gmra.mrb[16].mxu0 %v1354_v55 }
  0x44   :  { %697 = vmatmul.mubr.bf16.gmra.mrb[16].mxu1 %v1355_v56  ;;  %616 = vmatprep.mubr.bf16.mxu0 %v1356_v57 }
  0x45   :  { %704 = vmatprep.mubr.bf16.mxu1 %v1358_v58 }
  0x4b   :  { %617 = vmatmul.mubr.bf16.gmra.mrb[20].mxu0 %v1360_v61 }
  0x4c   :  { %705 = vmatmul.mubr.bf16.gmra.mrb[20].mxu1 %v1361_v62  ;;  %624 = vmatprep.mubr.bf16.mxu0 %v1068_v63 }
  0x4d   :  { %712 = vmatprep.mubr.bf16.mxu1 %v1070_v0 }
  0x53   :  { %625 = vmatmul.mubr.bf16.gmra.mrb[24].mxu0 %v1067_v1 }
  0x54   :  { %713 = vmatmul.mubr.bf16.gmra.mrb[24].mxu1 %v1069_v2  ;;  %1253 = vmatprep.mubr.msk.bf16.mxu0 %vm1377_vm0, %v1376_v34 }
  0x55   :  { %1269 = vmatprep.mubr.msk.bf16.mxu1 %vm1377_vm0, %v1376_v34 }
  0x5b   :  { %1254 = vmatmul.mubr.msk.bf16.vlgmr.msra.gmra.mrb[28].mxu0 %vm522_vm1, %v1367_v3 }
  0x5c   :  { %1270 = vmatmul.mubr.msk.bf16.vlgmr.msra.gmra.mrb[28].mxu1 %vm522_vm1, %v1368_v4  ;;  %1257 = vmatprep.mubr.msk.bf16.mxu0 %vm1377_vm0, %v1376_v34 }
  0x5d   :  { %1273 = vmatprep.mubr.msk.bf16.mxu1 %vm1377_vm0, %v1376_v34 }
  0x63   :  { %1258 = vmatmul.mubr.msk.bf16.gmra.mrb[32].mxu0 %vm522_vm1, %v1369_v5 }
  0x64   :  { %1274 = vmatmul.mubr.msk.bf16.gmra.mrb[32].mxu1 %vm522_vm1, %v1370_v6  ;;  %1261 = vmatprep.mubr.msk.bf16.mxu0 %vm1377_vm0, %v1376_v34 }
  0x65   :  { %1277 = vmatprep.mubr.msk.bf16.mxu1 %vm1377_vm0, %v1376_v34 }
  0x6b   :  { %1262 = vmatmul.mubr.msk.bf16.gmra.mrb[36].mxu0 %vm522_vm1, %v1371_v7 }
  0x6c   :  { %1278 = vmatmul.mubr.msk.bf16.gmra.mrb[36].mxu1 %vm522_vm1, %v1372_v8  ;;  %1265 = vmatprep.mubr.msk.bf16.mxu0 %vm1377_vm0, %v1376_v34 }
  0x73   :  { %1266 = vmatmul.mubr.msk.bf16.gmra.mrb[40].mxu0 %vm522_vm1, %v1373_v9 }
  0xf6   :  { %v1134_v10 = vpop.f32.mrb[0].mxu0 }
  0xf7   :  { %v1135_v12 = vpop.f32.mrb[1].mxu0  ;;  %v1192_v13 = vpop.f32.mrb[0].mxu1 }
  0xf8   :  { %v1136_v14 = vadd.f32 %v1135_v12, %v1134_v10  ;;  %v1137_v15 = vpop.f32.mrb[2].mxu0  ;;  %v1193_v16 = vpop.f32.mrb[1].mxu1 }
  0xf9   :  { %v1138_v17 = vpop.f32.mrb[3].mxu0  ;;  %v1194_v18 = vadd.f32 %v1193_v16, %v1192_v13  ;;  %v1195_v19 = vpop.f32.mrb[2].mxu1 }
  0xfa   :  { %v579_v20 = vadd.f32 %v1136_v14, %v1647_v11  ;;  %v1139_v21 = vadd.f32 %v1138_v17, %v1137_v15  ;;  %v1196_v22 = vpop.f32.mrb[3].mxu1 }
  0xfb   :  { %v1197_v23 = vadd.f32 %v1196_v22, %v1195_v19 }
  0xfc   :  { %v582_v24 = vadd.f32 %v1139_v21, %v1647_v11  ;;  %v1651_v25 = vadd.f32 %v1194_v18, %v579_v20 }
  0xfe   :  { %v1140_v26 = vpop.f32.mrb[4].mxu0  ;;  %v1653_v27 = vadd.f32 %v1197_v23, %v582_v24 }
  0xff   :  { %v1141_v28 = vpop.f32.mrb[5].mxu0  ;;  %v1198_v29 = vpop.f32.mrb[4].mxu1 }
 0x100   :  { %v1142_v30 = vadd.f32 %v1141_v28, %v1140_v26  ;;  %v1143_v31 = vpop.f32.mrb[6].mxu0  ;;  %v1199_v32 = vpop.f32.mrb[5].mxu1 }
 0x101   :  { %v1144_v33 = vpop.f32.mrb[7].mxu0  ;;  %v1200_v35 = vadd.f32 %v1199_v32, %v1198_v29  ;;  %v1201_v36 = vpop.f32.mrb[6].mxu1 }
 0x102   :  { %v587_v37 = vadd.f32 %v1142_v30, %v1647_v11  ;;  %v1145_v38 = vadd.f32 %v1144_v33, %v1143_v31  ;;  %v1202_v39 = vpop.f32.mrb[7].mxu1 }
 0x103   :  { %v1203_v40 = vadd.f32 %v1202_v39, %v1201_v36 }
 0x104   :  { %v590_v41 = vadd.f32 %v1145_v38, %v1647_v11  ;;  %v1657_v42 = vadd.f32 %v1200_v35, %v587_v37 }
 0x106   :  { %v1146_v43 = vpop.f32.mrb[8].mxu0  ;;  %v1659_v44 = vadd.f32 %v1203_v40, %v590_v41 }
 0x107   :  { %v1147_v45 = vpop.f32.mrb[9].mxu0  ;;  %v1204_v46 = vpop.f32.mrb[8].mxu1 }
 0x108   :  { %v1148_v47 = vadd.f32 %v1147_v45, %v1146_v43  ;;  %v1149_v48 = vpop.f32.mrb[10].mxu0  ;;  %v1205_v49 = vpop.f32.mrb[9].mxu1 }
 0x109   :  { %v1150_v50 = vpop.f32.mrb[11].mxu0  ;;  %v1206_v51 = vadd.f32 %v1205_v49, %v1204_v46  ;;  %v1207_v52 = vpop.f32.mrb[10].mxu1 }
 0x10a   :  { %v595_v53 = vadd.f32 %v1148_v47, %v1647_v11  ;;  %v1151_v54 = vadd.f32 %v1150_v50, %v1149_v48  ;;  %v1208_v55 = vpop.f32.mrb[11].mxu1 }
 0x10b   :  { %v1209_v56 = vadd.f32 %v1208_v55, %v1207_v52 }
 0x10c   :  { %v598_v57 = vadd.f32 %v1151_v54, %v1647_v11  ;;  %v1663_v58 = vadd.f32 %v1206_v51, %v595_v53 }
 0x10e   :  { %v1152_v59 = vpop.f32.mrb[12].mxu0  ;;  %v1665_v60 = vadd.f32 %v1209_v56, %v598_v57 }
 0x10f   :  { %v1153_v61 = vpop.f32.mrb[13].mxu0  ;;  %v1210_v62 = vpop.f32.mrb[12].mxu1 }
 0x110   :  { %v1154_v63 = vadd.f32 %v1153_v61, %v1152_v59  ;;  %v1155_v0 = vpop.f32.mrb[14].mxu0  ;;  %v1211_v1 = vpop.f32.mrb[13].mxu1 }
 0x111   :  { %v1156_v2 = vpop.f32.mrb[15].mxu0  ;;  %v1212_v3 = vadd.f32 %v1211_v1, %v1210_v62  ;;  %v1213_v4 = vpop.f32.mrb[14].mxu1 }
 0x112   :  { %v603_v5 = vadd.f32 %v1154_v63, %v1647_v11  ;;  %v1157_v6 = vadd.f32 %v1156_v2, %v1155_v0  ;;  %v1214_v7 = vpop.f32.mrb[15].mxu1 }
 0x113   :  { %v1215_v8 = vadd.f32 %v1214_v7, %v1213_v4 }
 0x114   :  { %v606_v9 = vadd.f32 %v1157_v6, %v1647_v11  ;;  %v1669_v10 = vadd.f32 %v1212_v3, %v603_v5 }
 0x116   :  { %v1158_v12 = vpop.f32.mrb[16].mxu0  ;;  %v1671_v13 = vadd.f32 %v1215_v8, %v606_v9 }
 0x117   :  { %v1159_v14 = vpop.f32.mrb[17].mxu0  ;;  %v1216_v15 = vpop.f32.mrb[16].mxu1 }
 0x118   :  { %v1160_v16 = vadd.f32 %v1159_v14, %v1158_v12  ;;  %v1161_v17 = vpop.f32.mrb[18].mxu0  ;;  %v1217_v18 = vpop.f32.mrb[17].mxu1 }
 0x119   :  { %v1162_v19 = vpop.f32.mrb[19].mxu0  ;;  %v1218_v20 = vadd.f32 %v1217_v18, %v1216_v15  ;;  %v1219_v21 = vpop.f32.mrb[18].mxu1 }
 0x11a   :  { %v611_v22 = vadd.f32 %v1160_v16, %v1647_v11  ;;  %v1163_v23 = vadd.f32 %v1162_v19, %v1161_v17  ;;  %v1220_v24 = vpop.f32.mrb[19].mxu1 }
 0x11b   :  { %v1221_v26 = vadd.f32 %v1220_v24, %v1219_v21 }
 0x11c   :  { %v614_v28 = vadd.f32 %v1163_v23, %v1647_v11  ;;  %v699_v29 = vadd.f32 %v1218_v20, %v611_v22 }
 0x11e   :  { %v1164_v30 = vpop.f32.mrb[20].mxu0  ;;  %v702_v31 = vadd.f32 %v1221_v26, %v614_v28 }
 0x11f   :  { %v1165_v32 = vpop.f32.mrb[21].mxu0  ;;  %v1222_v33 = vpop.f32.mrb[20].mxu1 }
 0x120   :  { %v1166_v35 = vadd.f32 %v1165_v32, %v1164_v30  ;;  %v1167_v36 = vpop.f32.mrb[22].mxu0  ;;  %v1223_v37 = vpop.f32.mrb[21].mxu1 }
 0x121   :  { %v1168_v38 = vpop.f32.mrb[23].mxu0  ;;  %v1224_v39 = vadd.f32 %v1223_v37, %v1222_v33  ;;  %v1225_v40 = vpop.f32.mrb[22].mxu1 }
 0x122   :  { %v619_v41 = vadd.f32 %v1166_v35, %v1647_v11  ;;  %v1169_v43 = vadd.f32 %v1168_v38, %v1167_v36  ;;  %v1226_v45 = vpop.f32.mrb[23].mxu1 }
 0x123   :  { %v1227_v46 = vadd.f32 %v1226_v45, %v1225_v40 }
 0x124   :  { %v622_v47 = vadd.f32 %v1169_v43, %v1647_v11  ;;  %v707_v48 = vadd.f32 %v1224_v39, %v619_v41 }
 0x126   :  { %v1170_v49 = vpop.f32.mrb[24].mxu0  ;;  %v710_v50 = vadd.f32 %v1227_v46, %v622_v47  ;;  %v821_v47 = vlaneseq }
 0x127   :  { %v1171_v51 = vpop.f32.mrb[25].mxu0  ;;  %v1228_v52 = vpop.f32.mrb[24].mxu1 }
 0x128   :  { %v1172_v53 = vadd.f32 %v1171_v51, %v1170_v49  ;;  %v1173_v54 = vpop.f32.mrb[26].mxu0  ;;  %v1229_v55 = vpop.f32.mrb[25].mxu1  ;;  %v822_v51 = vshrl.u32 %v821_v47, 7 }
 0x129   :  { %v1174_v56 = vpop.f32.mrb[27].mxu0  ;;  %v1230_v57 = vadd.f32 %v1229_v55, %v1228_v52  ;;  %v1231_v59 = vpop.f32.mrb[26].mxu1 }
 0x12a   :  { %v627_v61 = vadd.f32 %v1172_v53, %v1647_v11  ;;  %v1232_v62 = vpop.f32.mrb[27].mxu1 }
 0x12c   :  { %v715_v63 = vadd.f32 %v1230_v57, %v627_v61  ;;  %v834_v57 = vadd.s32 96, %v822_v51 }
 0x12e   :  { %v754_v0 = vpop.f32.mrb[28].mxu0  ;;  %vm847_vm2 = vcmp.lt.s32.totalorder %v834_v57, 98 }
 0x12f   :  { %v1679_v1 = vadd.f32 %v754_v0, %v1651_v25  ;;  %v786_v2 = vpop.f32.mrb[28].mxu1  ;;  %v1255_v3 = vpop.f32.mrb[29].mxu0 }
 0x130   :  { %v1681_v4 = vadd.f32 %v786_v2, %v699_v29  ;;  %v1271_v5 = vpop.f32.mrb[29].mxu1  ;;  %v757_v6 = vpop.f32.mrb[30].mxu0 }
 0x131   :  { %v1684_v7 = vadd.f32 %v757_v6, %v1653_v27  ;;  %v789_v8 = vpop.f32.mrb[30].mxu1  ;;  %v1256_v9 = vpop.f32.mrb[31].mxu0  ;;  %v808_v14 = vmax.f32 %v1679_v1, 0.0  ;;  %v1115_v5 = vsel %vm847_vm2, 1.0, %v1376_v34 }
 0x132   :  { %v1686_v12 = vadd.f32 %v789_v8, %v702_v31  ;;  %v1272_v11 = vpop.f32.mrb[31].mxu1  ;;  %v816_v61 = vmax.f32 %v1681_v4, 0.0 }
 0x133   :  { %v809_v15 = vmax.f32 %v1684_v7, 0.0 }
 0x135   :  { %v887_v25 = vadd.f32 %v809_v15, %v808_v14 }
 0x136   :  { %v762_v16 = vpop.f32.mrb[32].mxu0 }
 0x137   :  { %v1695_v17 = vadd.f32 %v762_v16, %v1657_v42  ;;  %v794_v27 = vpop.f32.mrb[32].mxu1  ;;  %v1259_v18 = vpop.f32.mrb[33].mxu0 }
 0x138   :  { %v1697_v19 = vadd.f32 %v794_v27, %v707_v48  ;;  %v1275_v20 = vpop.f32.mrb[33].mxu1  ;;  %v765_v21 = vpop.f32.mrb[34].mxu0 }
 0x139   :  { %v810_v22 = vmax.f32 %v1695_v17, 0.0  ;;  %v766_v23 = vadd.f32 %v765_v21, %v1659_v44  ;;  %v797_v24 = vpop.f32.mrb[34].mxu1  ;;  %v1260_v26 = vpop.f32.mrb[35].mxu0 }
 0x13a   :  { %v1701_v28 = vadd.f32 %v797_v24, %v710_v50  ;;  %v1276_v29 = vpop.f32.mrb[35].mxu1  ;;  %v818_v2 = vmax.f32 %v1697_v19, 0.0 }
 0x13b   :  { %v888_v30 = vadd.f32 %v887_v25, %v810_v22  ;;  %v811_v31 = vmax.f32 %v766_v23, 0.0 }
 0x13c   :  { %v819_v6 = vmax.f32 %v1701_v28, 0.0 }
 0x13d   :  { %v889_v32 = vadd.f32 %v888_v30, %v811_v31 }
 0x13e   :  { %v770_v42 = vpop.f32.mrb[36].mxu0 }
 0x13f   :  { %v771_v33 = vadd.f32 %v770_v42, %v1663_v58  ;;  %v802_v35 = vpop.f32.mrb[36].mxu1  ;;  %v1263_v36 = vpop.f32.mrb[37].mxu0 }
 0x140   :  { %v803_v37 = vadd.f32 %v802_v35, %v715_v63  ;;  %v773_v38 = vpop.f32.mrb[38].mxu0  ;;  %v1279_v39 = vpop.f32.mrb[37].mxu1  ;;  %v817_v63 = vmax.f32 %v1686_v12, 0.0 }
 0x141   :  { %v812_v40 = vmax.f32 %v771_v33, 0.0  ;;  %v774_v41 = vadd.f32 %v773_v38, %v1665_v60  ;;  %v1264_v44 = vpop.f32.mrb[39].mxu0  ;;  %v805_v43 = vpop.f32.mrb[38].mxu1 }
 0x142   :  { %v1280_v45 = vpop.f32.mrb[39].mxu1  ;;  %v820_v3 = vmax.f32 %v803_v37, 0.0 }
 0x143   :  { %v890_v46 = vadd.f32 %v889_v32, %v812_v40  ;;  %v813_v48 = vmax.f32 %v774_v41, 0.0 }
 0x144   :  { %v886_v8 = vmul.f32 %v1115_v5, %v820_v3 }
 0x145   :  { %v891_v49 = vadd.f32 %v890_v46, %v813_v48 }
 0x146   :  { %v778_v50 = vpop.f32.mrb[40].mxu0 }
 0x147   :  { %v779_v52 = vadd.f32 %v778_v50, %v1669_v10  ;;  %v1267_v58 = vpop.f32.mrb[41].mxu0 }
 0x148   :  { %v781_v53 = vpop.f32.mrb[42].mxu0 }
 0x149   :  { %v814_v54 = vmax.f32 %v779_v52, 0.0  ;;  %v782_v55 = vadd.f32 %v781_v53, %v1671_v13  ;;  %v1268_v56 = vpop.f32.mrb[43].mxu0 }
 0x14b   :  { %v892_v59 = vadd.f32 %v891_v49, %v814_v54  ;;  %v815_v60 = vmax.f32 %v782_v55, 0.0 }
 0x14d   :  { %v893_v62 = vadd.f32 %v892_v59, %v815_v60 }
 0x14f   :  { %v894_v0 = vadd.f32 %v893_v62, %v816_v61 }
 0x151   :  { %v895_v10 = vadd.f32 %v894_v0, %v817_v63 }
 0x153   :  { %v896_v13 = vadd.f32 %v895_v10, %v818_v2 }
 0x155   :  { %v897_v9 = vadd.f32 %v896_v13, %v819_v6 }
 0x157   :  { %v898_v11 = vadd.f32 %v897_v9, %v886_v8 }
 0x159   :  { %v899_v25 = vrot.slane %v898_v11, 4 }
 0x15b   :  { %v900_v16 = vadd.f32 %v899_v25, %v898_v11 }
 0x15d   :  { %v901_v4 = vrot.slane %v900_v16, 2 }
 0x15f   :  { %v902_v17 = vadd.f32 %v901_v4, %v900_v16 }
 0x161   :  { %v903_v27 = vrot.slane %v902_v17, 1 }
 0x163   :  { %v904_v12 = vadd.f32 %v903_v27, %v902_v17 }
 0x165   :  { %v905_v18 = vmul.f32 0.010204081, %v904_v12 }
 0x167   :  { %v906_v19 = vsub.f32 %v808_v14, %v905_v18  ;;  %v907_v20 = vsub.f32 %v809_v15, %v905_v18  ;;  %v908_v34 = vsub.f32 %v810_v22, %v905_v18  ;;  %v909_v21 = vsub.f32 %v811_v31, %v905_v18 }
 0x168   :  { %v910_v23 = vsub.f32 %v812_v40, %v905_v18  ;;  %v911_v24 = vsub.f32 %v813_v48, %v905_v18  ;;  %v912_v26 = vsub.f32 %v814_v54, %v905_v18  ;;  %v913_v28 = vsub.f32 %v815_v60, %v905_v18 }
 0x169   :  { %v914_v29 = vsub.f32 %v816_v61, %v905_v18  ;;  %v915_v30 = vsub.f32 %v817_v63, %v905_v18  ;;  %v916_v32 = vsub.f32 %v818_v2, %v905_v18  ;;  %v917_v42 = vsub.f32 %v819_v6, %v905_v18 }
 0x16a   :  { %v918_v33 = vsub.f32 %v820_v3, %v905_v18  ;;  %v919_v35 = vmul.f32 %v906_v19, %v906_v19  ;;  %v920_v36 = vmul.f32 %v907_v20, %v907_v20  ;;  %v921_v37 = vmul.f32 %v908_v34, %v908_v34 }
 0x16b   :  { %v922_v1 = vmul.f32 %v909_v21, %v909_v21  ;;  %v923_v39 = vmul.f32 %v910_v23, %v910_v23  ;;  %v924_v15 = vmul.f32 %v911_v24, %v911_v24  ;;  %v925_v31 = vmul.f32 %v912_v26, %v912_v26 }
 0x16c   :  { %v945_v38 = vadd.f32 %v920_v36, %v919_v35  ;;  %v926_v41 = vmul.f32 %v913_v28, %v913_v28  ;;  %v927_v43 = vmul.f32 %v914_v29, %v914_v29  ;;  %v928_v46 = vmul.f32 %v915_v30, %v915_v30 }
 0x16d   :  { %v929_v48 = vmul.f32 %v916_v32, %v916_v32  ;;  %v931_v49 = vmul.f32 %v918_v33, %v918_v33  ;;  %v930_v51 = vmul.f32 %v917_v42, %v917_v42 }
 0x16e   :  { %v946_v14 = vadd.f32 %v945_v38, %v921_v37 }
 0x16f   :  { %v944_v58 = vmul.f32 %v1115_v5, %v931_v49  ;;  %v1116_v5 = vld [vmem:[%s1764_s3] ss:$0 sm:$0xff] }
 0x170   :  { %v947_v7 = vadd.f32 %v946_v14, %v922_v1 }
 0x172   :  { %v948_v22 = vadd.f32 %v947_v7, %v923_v39 }
 0x174   :  { %v949_v40 = vadd.f32 %v948_v22, %v924_v15 }
 0x176   :  { %v950_v44 = vadd.f32 %v949_v40, %v925_v31 }
 0x178   :  { %v951_v45 = vadd.f32 %v950_v44, %v926_v41 }
 0x17a   :  { %v952_v47 = vadd.f32 %v951_v45, %v927_v43 }
 0x17c   :  { %v953_v50 = vadd.f32 %v952_v47, %v928_v46 }
 0x17e   :  { %v954_v52 = vadd.f32 %v953_v50, %v929_v48 }
 0x180   :  { %v955_v53 = vadd.f32 %v954_v52, %v930_v51 }
 0x182   :  { %v956_v54 = vadd.f32 %v955_v53, %v944_v58 }
 0x184   :  { %v957_v55 = vrot.slane %v956_v54, 4 }
 0x186   :  { %v958_v56 = vadd.f32 %v957_v55, %v956_v54 }
 0x188   :  { %v959_v57 = vrot.slane %v958_v56, 2 }
 0x18a   :  { %v960_v59 = vadd.f32 %v959_v57, %v958_v56 }
 0x18c   :  { %v961_v60 = vrot.slane %v960_v59, 1 }
 0x18e   :  { %v962_v61 = vadd.f32 %v961_v60, %v960_v59 }
 0x190   :  { %v963_v62 = vmul.f32 0.010204081, %v962_v61 }
 0x192   :  { %v964_v63 = vadd.f32 1e-05, %v963_v62 }
 0x194   :  { %1374 = vrsqrt.f32 %v964_v63 }
 0x19e   :  { %v1375_v0 = vpop.eup %1374 }
 0x19f   :  { %v966_v2 = vmul.f32 %v1375_v0, %v906_v19  ;;  %v967_v3 = vmul.f32 %v1375_v0, %v907_v20  ;;  %v968_v10 = vmul.f32 %v1375_v0, %v908_v34  ;;  %v969_v6 = vmul.f32 %v1375_v0, %v909_v21  ;;  %v1117_v19 = vld [vmem:[%s1765_s4] ss:$0 sm:$0xff] }
 0x1a0   :  { %v970_v13 = vmul.f32 %v1375_v0, %v910_v23  ;;  %v971_v8 = vmul.f32 %v1375_v0, %v911_v24  ;;  %v972_v9 = vmul.f32 %v1375_v0, %v912_v26  ;;  %v973_v11 = vmul.f32 %v1375_v0, %v913_v28 }
 0x1a1   :  { %v974_v25 = vmul.f32 %v1375_v0, %v914_v29  ;;  %v975_v16 = vmul.f32 %v1375_v0, %v915_v30  ;;  %v976_v4 = vmul.f32 %v1375_v0, %v916_v32  ;;  %v977_v17 = vmul.f32 %v1375_v0, %v917_v42 }
 0x1a2   :  { %v978_v27 = vmul.f32 %v1375_v0, %v918_v33  ;;  %v986_v12 = vmul.f32 %v1116_v5, %v966_v2  ;;  %v987_v18 = vmul.f32 %v1116_v5, %v967_v3  ;;  %v988_v35 = vmul.f32 %v1116_v5, %v968_v10 }
 0x1a3   :  { %v989_v20 = vmul.f32 %v1116_v5, %v969_v6  ;;  %v990_v34 = vmul.f32 %v1116_v5, %v970_v13  ;;  %v991_v21 = vmul.f32 %v1116_v5, %v971_v8  ;;  %v992_v36 = vmul.f32 %v1116_v5, %v972_v9 }
 0x1a4   :  { %v993_v23 = vmul.f32 %v1116_v5, %v973_v11  ;;  %v994_v24 = vmul.f32 %v1116_v5, %v974_v25  ;;  %v995_v26 = vmul.f32 %v1116_v5, %v975_v16  ;;  %v996_v28 = vmul.f32 %v1116_v5, %v976_v4 }
 0x1a5   :  { %v997_v29 = vmul.f32 %v1116_v5, %v977_v17  ;;  %v998_v30 = vmul.f32 %v1116_v5, %v978_v27  ;;  %v1006_v32 = vadd.f32 %v1117_v19, %v986_v12  ;;  %v1007_v42 = vadd.f32 %v1117_v19, %v987_v18 }
 0x1a6   :  { %v1008_v33 = vadd.f32 %v1117_v19, %v988_v35  ;;  %v1009_v37 = vadd.f32 %v1117_v19, %v989_v20  ;;  %v1010_v38 = vadd.f32 %v1117_v19, %v990_v34  ;;  %v1011_v1 = vadd.f32 %v1117_v19, %v991_v21 }
 0x1a7   :  { %v1012_v14 = vadd.f32 %v1117_v19, %v992_v36  ;;  %v1013_v39 = vadd.f32 %v1117_v19, %v993_v23  ;;  %v1014_v7 = vadd.f32 %v1117_v19, %v994_v24  ;;  %v1015_v15 = vadd.f32 %v1117_v19, %v995_v26  ;;  %1019 = vst [vmem:[%s1766_s5] sm:$0xff] %v1006_v32 }
 0x1a8   :  { %1020 = vst [vmem:[%s1766_s5 + $0x8] sm:$0xff] %v1007_v42  ;;  %v1016_v22 = vadd.f32 %v1117_v19, %v996_v28  ;;  %v1017_v31 = vadd.f32 %v1117_v19, %v997_v29  ;;  %v1018_v40 = vadd.f32 %v1117_v19, %v998_v30  ;;  %1021 = vst [vmem:[%s1766_s5 + $0x10] sm:$0xff] %v1008_v33 }
 0x1a9   :  { %1022 = vst [vmem:[%s1766_s5 + $0x18] sm:$0xff] %v1009_v37  ;;  %1023 = vst [vmem:[%s1766_s5 + $0x20] sm:$0xff] %v1010_v38 }
 0x1aa   :  { %1024 = vst [vmem:[%s1766_s5 + $0x28] sm:$0xff] %v1011_v1  ;;  %1025 = vst [vmem:[%s1766_s5 + $0x30] sm:$0xff] %v1012_v14 }
 0x1ab   :  { %1026 = vst [vmem:[%s1766_s5 + $0x38] sm:$0xff] %v1013_v39  ;;  %1027 = vst [vmem:[%s1766_s5 + $0x40] sm:$0xff] %v1014_v7 }
 0x1ac   :  { %1028 = vst [vmem:[%s1766_s5 + $0x48] sm:$0xff] %v1015_v15  ;;  %1029 = vst [vmem:[%s1766_s5 + $0x50] sm:$0xff] %v1016_v22 }
 0x1ad   :  { %1030 = vst [vmem:[%s1766_s5 + $0x58] sm:$0xff] %v1017_v31  ;;  %1031 = vst [vmem:[%s1766_s5 + $0x60] sm:$0xff] %v1018_v40 }

// kernel: net_forward.7
= control target key start
LH: loop header
LB: loop body
LE: loop exit
PB: predicated region body
PF: predicated region fallthrough
CT: control target
= control target key end

     0   :  { %vm4853_vm0 = vcmask 523264   ;;  %vm6415_vm2 = vcmask 48128   ;;  %s11306_s1 = inlined_call_operand.vmem [shape: bf16[3136,512], index: 1, kind: input, shape index: {}]   ;;  %s11307_s0 = inlined_call_operand.vmem [shape: bf16[8,3136], index: 0, kind: input, shape index: {}]   ;;  %s11308_s5 = inlined_call_operand.vmem [shape: bf16[512,6], index: 5, kind: input, shape index: {}]   ;;  %s11309_s2 = inlined_call_operand.vmem [shape: f32[1,512], index: 2, kind: input, shape index: {}]   ;;  %s11310_s3 = inlined_call_operand.vmem [shape: f32[1,512], index: 3, kind: input, shape index: {}]   ;;  %s11311_s4 = inlined_call_operand.vmem [shape: f32[1,512], index: 4, kind: input, shape index: {}]   ;;  %s11312_s6 = inlined_call_operand.vmem [shape: f32[1,6], index: 6, kind: input, shape index: {}]   ;;  %s11313_s7 = inlined_call_operand.vmem [shape: f32[8,6], index: 7, kind: output, shape index: {}]  }
   0x1   :  { %v7423_v0 = vld [vmem:[%s11306_s1 + $0x4] ss:$16 sps:$4 sm:$0xff]   ;;  %v7425_v1 = vld [vmem:[%s11306_s1 + $0xc] ss:$16 sps:$4 sm:$0xff]   ;;  %v7427_v2 = vld [vmem:[%s11306_s1] ss:$16 sps:$4 sm:$0xff]  }
   0x2   :  { %4857 = vmatprep.subr.bf16.mxu0 %v7423_v0  ;;  %v7428_v3 = vld [vmem:[%s11306_s1 + $0x8] ss:$16 sps:$4 sm:$0xff]   ;;  %5390 = vmatprep.subr.bf16.mxu1 %v7425_v1  ;;  %v7429_v4 = vld [vmem:[%s11306_s1 + $0x24] ss:$16 sps:$4 sm:$0xff]   ;;  %v7431_v5 = vld [vmem:[%s11306_s1 + $0x2c] ss:$16 sps:$4 sm:$0xff]  }
   0x3   :  { %4858 = vmatpush1.bf16.msra.mxu0 %v7427_v2  ;;  %5391 = vmatpush1.bf16.msra.mxu1 %v7428_v3  ;;  %v7433_v6 = vld [vmem:[%s11306_s1 + $0x20] ss:$16 sps:$4 sm:$0xff]   ;;  %v7434_v7 = vld [vmem:[%s11306_s1 + $0x28] ss:$16 sps:$4 sm:$0xff]   ;;  %v7435_v8 = vld [vmem:[%s11306_s1 + $0x44] ss:$16 sps:$4 sm:$0xff]  }
   0x4   :  { %4859 = vmatprep.subr.bf16.mxu0 %v7429_v4  ;;  %5392 = vmatprep.subr.bf16.mxu1 %v7431_v5  ;;  %v7437_v9 = vld [vmem:[%s11306_s1 + $0x4c] ss:$16 sps:$4 sm:$0xff]   ;;  %v7439_v10 = vld [vmem:[%s11306_s1 + $0x40] ss:$16 sps:$4 sm:$0xff]   ;;  %v7440_v11 = vld [vmem:[%s11306_s1 + $0x48] ss:$16 sps:$4 sm:$0xff]  }
   0x5   :  { %v7441_v12 = vld [vmem:[%s11306_s1 + $0x64] ss:$16 sps:$4 sm:$0xff]   ;;  %v7443_v13 = vld [vmem:[%s11306_s1 + $0x6c] ss:$16 sps:$4 sm:$0xff]   ;;  %v7445_v14 = vld [vmem:[%s11306_s1 + $0x60] ss:$16 sps:$4 sm:$0xff]  }
   0x6   :  { %v7446_v15 = vld [vmem:[%s11306_s1 + $0x68] ss:$16 sps:$4 sm:$0xff]   ;;  %v7447_v16 = vld [vmem:[%s11306_s1 + $0x84] ss:$16 sps:$4 sm:$0xff]   ;;  %v7449_v17 = vld [vmem:[%s11306_s1 + $0x8c] ss:$16 sps:$4 sm:$0xff]  }
   0x7   :  { %4860 = vmatpush1.bf16.msra.mxu0 %v7433_v6  ;;  %5393 = vmatpush1.bf16.msra.mxu1 %v7434_v7  ;;  %v7451_v18 = vld [vmem:[%s11306_s1 + $0x80] ss:$16 sps:$4 sm:$0xff]   ;;  %v7452_v19 = vld [vmem:[%s11306_s1 + $0x88] ss:$16 sps:$4 sm:$0xff]   ;;  %v7453_v20 = vld [vmem:[%s11306_s1 + $0xa4] ss:$16 sps:$4 sm:$0xff]  }
   0x8   :  { %4861 = vmatprep.subr.bf16.mxu0 %v7435_v8  ;;  %5394 = vmatprep.subr.bf16.mxu1 %v7437_v9  ;;  %v7455_v21 = vld [vmem:[%s11306_s1 + $0xac] ss:$16 sps:$4 sm:$0xff]   ;;  %v7457_v22 = vld [vmem:[%s11306_s1 + $0xa0] ss:$16 sps:$4 sm:$0xff]   ;;  %v7458_v23 = vld [vmem:[%s11306_s1 + $0xa8] ss:$16 sps:$4 sm:$0xff]  }
   0x9   :  { %v7459_v24 = vld [vmem:[%s11306_s1 + $0xc4] ss:$16 sps:$4 sm:$0xff]   ;;  %v7461_v25 = vld [vmem:[%s11306_s1 + $0xcc] ss:$16 sps:$4 sm:$0xff]   ;;  %v7463_v26 = vld [vmem:[%s11306_s1 + $0xc0] ss:$16 sps:$4 sm:$0xff]  }
   0xa   :  { %v7464_v27 = vld [vmem:[%s11306_s1 + $0xc8] ss:$16 sps:$4 sm:$0xff]   ;;  %v7465_v28 = vld [vmem:[%s11306_s1 + $0xe4] ss:$16 sps:$4 sm:$0xff]   ;;  %v7467_v29 = vld [vmem:[%s11306_s1 + $0xec] ss:$16 sps:$4 sm:$0xff]  }
   0xb   :  { %4862 = vmatpush1.bf16.msra.mxu0 %v7439_v10  ;;  %5395 = vmatpush1.bf16.msra.mxu1 %v7440_v11  ;;  %v7469_v30 = vld [vmem:[%s11306_s1 + $0xe0] ss:$16 sps:$4 sm:$0xff]   ;;  %v7470_v31 = vld [vmem:[%s11306_s1 + $0xe8] ss:$16 sps:$4 sm:$0xff]   ;;  %v7471_v32 = vld [vmem:[%s11306_s1 + $0x104] ss:$16 sps:$4 sm:$0xff]  }
   0xc   :  { %4863 = vmatprep.subr.bf16.mxu0 %v7441_v12  ;;  %5396 = vmatprep.subr.bf16.mxu1 %v7443_v13  ;;  %v7473_v33 = vld [vmem:[%s11306_s1 + $0x10c] ss:$16 sps:$4 sm:$0xff]   ;;  %v7475_v34 = vld [vmem:[%s11306_s1 + $0x100] ss:$16 sps:$4 sm:$0xff]   ;;  %v7476_v35 = vld [vmem:[%s11306_s1 + $0x108] ss:$16 sps:$4 sm:$0xff]  }
   0xd   :  { %v7477_v36 = vld [vmem:[%s11306_s1 + $0x124] ss:$16 sps:$4 sm:$0xff]   ;;  %v7479_v37 = vld [vmem:[%s11306_s1 + $0x12c] ss:$16 sps:$4 sm:$0xff]   ;;  %v7481_v38 = vld [vmem:[%s11306_s1 + $0x120] ss:$16 sps:$4 sm:$0xff]  }
   0xe   :  { %v7482_v39 = vld [vmem:[%s11306_s1 + $0x128] ss:$16 sps:$4 sm:$0xff]   ;;  %v7483_v40 = vld [vmem:[%s11306_s1 + $0x144] ss:$16 sps:$4 sm:$0xff]   ;;  %v7485_v41 = vld [vmem:[%s11306_s1 + $0x14c] ss:$16 sps:$4 sm:$0xff]  }
   0xf   :  { %4864 = vmatpush1.bf16.msra.mxu0 %v7445_v14  ;;  %5397 = vmatpush1.bf16.msra.mxu1 %v7446_v15  ;;  %v7487_v42 = vld [vmem:[%s11306_s1 + $0x140] ss:$16 sps:$4 sm:$0xff]   ;;  %v7488_v43 = vld [vmem:[%s11306_s1 + $0x148] ss:$16 sps:$4 sm:$0xff]   ;;  %v7489_v44 = vld [vmem:[%s11306_s1 + $0x164] ss:$16 sps:$4 sm:$0xff]  }
  0x10   :  { %4865 = vmatprep.subr.bf16.mxu0 %v7447_v16  ;;  %5398 = vmatprep.subr.bf16.mxu1 %v7449_v17  ;;  %v7491_v45 = vld [vmem:[%s11306_s1 + $0x16c] ss:$16 sps:$4 sm:$0xff]   ;;  %v27_v46 = vld [vmem:[%s11307_s0] sm:$0xff]  ;;  %v7494_v49 = vld [vmem:[%s11306_s1 + $0x168] ss:$16 sps:$4 sm:$0xff]  }
  0x11   :  { %v7493_v47 = vld [vmem:[%s11306_s1 + $0x160] ss:$16 sps:$4 sm:$0xff]   ;;  %v6433_v48 = vcombine.high %v27_v46, %v27_v46  ;;  %v7495_v50 = vld [vmem:[%s11306_s1 + $0x184] ss:$16 sps:$4 sm:$0xff]   ;;  %v7497_v51 = vld [vmem:[%s11306_s1 + $0x18c] ss:$16 sps:$4 sm:$0xff]   ;;  %v6432_v4 = vcombine.low %v27_v46, %v27_v46 }
  0x12   :  { %v7499_v52 = vld [vmem:[%s11306_s1 + $0x180] ss:$16 sps:$4 sm:$0xff]   ;;  %v7500_v53 = vld [vmem:[%s11306_s1 + $0x188] ss:$16 sps:$4 sm:$0xff]   ;;  %v7501_v54 = vld [vmem:[%s11306_s1 + $0x1a4] ss:$16 sps:$4 sm:$0xff]  }
  0x13   :  { %4866 = vmatpush1.bf16.msra.mxu0 %v7451_v18  ;;  %5399 = vmatpush1.bf16.msra.mxu1 %v7452_v19  ;;  %v7503_v55 = vld [vmem:[%s11306_s1 + $0x1ac] ss:$16 sps:$4 sm:$0xff]   ;;  %v7505_v56 = vld [vmem:[%s11306_s1 + $0x1a0] ss:$16 sps:$4 sm:$0xff]   ;;  %v7506_v57 = vld [vmem:[%s11306_s1 + $0x1a8] ss:$16 sps:$4 sm:$0xff]  }
  0x14   :  { %4867 = vmatprep.subr.bf16.mxu0 %v7453_v20  ;;  %5400 = vmatprep.subr.bf16.mxu1 %v7455_v21  ;;  %v7507_v58 = vld [vmem:[%s11306_s1 + $0x1c4] ss:$16 sps:$4 sm:$0xff]   ;;  %v7509_v59 = vld [vmem:[%s11306_s1 + $0x1cc] ss:$16 sps:$4 sm:$0xff]   ;;  %v7511_v60 = vld [vmem:[%s11306_s1 + $0x1c0] ss:$16 sps:$4 sm:$0xff]  }
  0x15   :  { %4889 = vmatprep.mubr.bf16.mxu0 %v6433_v48  ;;  %5422 = vmatprep.mubr.bf16.mxu1 %v6433_v48  ;;  %v7512_v61 = vld [vmem:[%s11306_s1 + $0x1c8] ss:$16 sps:$4 sm:$0xff]   ;;  %v7513_v62 = vld [vmem:[%s11306_s1 + $0x1e4] ss:$16 sps:$4 sm:$0xff]   ;;  %v7515_v63 = vld [vmem:[%s11306_s1 + $0x1ec] ss:$16 sps:$4 sm:$0xff]  }
  0x16   :  { %v7517_v0 = vld [vmem:[%s11306_s1 + $0x1e0] ss:$16 sps:$4 sm:$0xff]   ;;  %v7518_v1 = vld [vmem:[%s11306_s1 + $0x1e8] ss:$16 sps:$4 sm:$0xff]   ;;  %v7523_v2 = vld [vmem:[%s11306_s1 + $0x204] ss:$16 sps:$4 sm:$0xff]  }
  0x17   :  { %4868 = vmatpush1.bf16.msra.mxu0 %v7457_v22  ;;  %5401 = vmatpush1.bf16.msra.mxu1 %v7458_v23  ;;  %v7526_v3 = vld [vmem:[%s11306_s1 + $0x20c] ss:$16 sps:$4 sm:$0xff]   ;;  %v7521_v5 = vld [vmem:[%s11306_s1 + $0x200] ss:$16 sps:$4 sm:$0xff]   ;;  %v7524_v6 = vld [vmem:[%s11306_s1 + $0x208] ss:$16 sps:$4 sm:$0xff]  }
  0x18   :  { %4869 = vmatprep.subr.bf16.mxu0 %v7459_v24  ;;  %5402 = vmatprep.subr.bf16.mxu1 %v7461_v25  ;;  %v7529_v7 = vld [vmem:[%s11306_s1 + $0x224] ss:$16 sps:$4 sm:$0xff]   ;;  %v7532_v8 = vld [vmem:[%s11306_s1 + $0x22c] ss:$16 sps:$4 sm:$0xff]   ;;  %v7527_v9 = vld [vmem:[%s11306_s1 + $0x220] ss:$16 sps:$4 sm:$0xff]  }
  0x19   :  { %v7530_v10 = vld [vmem:[%s11306_s1 + $0x228] ss:$16 sps:$4 sm:$0xff]   ;;  %v7535_v11 = vld [vmem:[%s11306_s1 + $0x244] ss:$16 sps:$4 sm:$0xff]   ;;  %v7538_v12 = vld [vmem:[%s11306_s1 + $0x24c] ss:$16 sps:$4 sm:$0xff]  }
  0x1a   :  { %v7533_v13 = vld [vmem:[%s11306_s1 + $0x240] ss:$16 sps:$4 sm:$0xff]   ;;  %v7536_v14 = vld [vmem:[%s11306_s1 + $0x248] ss:$16 sps:$4 sm:$0xff]   ;;  %v7541_v15 = vld [vmem:[%s11306_s1 + $0x264] ss:$16 sps:$4 sm:$0xff]  }
  0x1b   :  { %4870 = vmatpush1.bf16.msra.mxu0 %v7463_v26  ;;  %5403 = vmatpush1.bf16.msra.mxu1 %v7464_v27  ;;  %v7544_v16 = vld [vmem:[%s11306_s1 + $0x26c] ss:$16 sps:$4 sm:$0xff]   ;;  %v7539_v17 = vld [vmem:[%s11306_s1 + $0x260] ss:$16 sps:$4 sm:$0xff]   ;;  %v7542_v18 = vld [vmem:[%s11306_s1 + $0x268] ss:$16 sps:$4 sm:$0xff]  }
  0x1c   :  { %4871 = vmatprep.subr.bf16.mxu0 %v7465_v28  ;;  %5404 = vmatprep.subr.bf16.mxu1 %v7467_v29  ;;  %v7547_v19 = vld [vmem:[%s11306_s1 + $0x284] ss:$16 sps:$4 sm:$0xff]   ;;  %v7550_v20 = vld [vmem:[%s11306_s1 + $0x28c] ss:$16 sps:$4 sm:$0xff]   ;;  %v7545_v21 = vld [vmem:[%s11306_s1 + $0x280] ss:$16 sps:$4 sm:$0xff]  }
  0x1d   :  { %v7548_v22 = vld [vmem:[%s11306_s1 + $0x288] ss:$16 sps:$4 sm:$0xff]   ;;  %v7553_v23 = vld [vmem:[%s11306_s1 + $0x2a4] ss:$16 sps:$4 sm:$0xff]   ;;  %v7556_v24 = vld [vmem:[%s11306_s1 + $0x2ac] ss:$16 sps:$4 sm:$0xff]  }
  0x1e   :  { %v7551_v25 = vld [vmem:[%s11306_s1 + $0x2a0] ss:$16 sps:$4 sm:$0xff]   ;;  %v7554_v26 = vld [vmem:[%s11306_s1 + $0x2a8] ss:$16 sps:$4 sm:$0xff]   ;;  %v7559_v27 = vld [vmem:[%s11306_s1 + $0x2c4] ss:$16 sps:$4 sm:$0xff]  }
  0x1f   :  { %4872 = vmatpush1.bf16.msra.mxu0 %v7469_v30  ;;  %5405 = vmatpush1.bf16.msra.mxu1 %v7470_v31  ;;  %v7562_v28 = vld [vmem:[%s11306_s1 + $0x2cc] ss:$16 sps:$4 sm:$0xff]   ;;  %v7557_v31 = vld [vmem:[%s11306_s1 + $0x2c0] ss:$16 sps:$4 sm:$0xff]   ;;  %v7584_v48 = vld [vmem:[%s11306_s1 + $0x348] ss:$16 sps:$4 sm:$0xff]  }
  0x20   :  { %4873 = vmatprep.subr.bf16.mxu0 %v7471_v32  ;;  %5406 = vmatprep.subr.bf16.mxu1 %v7473_v33  ;;  %v8986_v29 = vld [vmem:[%s11307_s0 + $0x8] sm:$0xff]  ;;  %v7565_v33 = vld [vmem:[%s11306_s1 + $0x2e4] ss:$16 sps:$4 sm:$0xff]  }
  0x21   :  { %v6435_v30 = vcombine.high %v8986_v29, %v8986_v29  ;;  %v7560_v32 = vld [vmem:[%s11306_s1 + $0x2c8] ss:$16 sps:$4 sm:$0xff]   ;;  %v7586_v46 = vld [vmem:[%s11306_s1 + $0x34c] ss:$16 sps:$4 sm:$0xff]  }
  0x23   :  { %4874 = vmatpush1.bf16.msra.mxu0 %v7475_v34  ;;  %5407 = vmatpush1.bf16.msra.mxu1 %v7476_v35  ;;  %v7568_v34 = vld [vmem:[%s11306_s1 + $0x2ec] ss:$16 sps:$4 sm:$0xff]   ;;  %v7563_v35 = vld [vmem:[%s11306_s1 + $0x2e0] ss:$16 sps:$4 sm:$0xff]  }
  0x24   :  { %4875 = vmatprep.subr.bf16.mxu0 %v7477_v36  ;;  %5408 = vmatprep.subr.bf16.mxu1 %v7479_v37  ;;  %v7566_v36 = vld [vmem:[%s11306_s1 + $0x2e8] ss:$16 sps:$4 sm:$0xff]   ;;  %v7571_v37 = vld [vmem:[%s11306_s1 + $0x304] ss:$16 sps:$4 sm:$0xff]  }
  0x27   :  { %4876 = vmatpush1.bf16.msra.mxu0 %v7481_v38  ;;  %5409 = vmatpush1.bf16.msra.mxu1 %v7482_v39  ;;  %v7574_v38 = vld [vmem:[%s11306_s1 + $0x30c] ss:$16 sps:$4 sm:$0xff]   ;;  %v7569_v39 = vld [vmem:[%s11306_s1 + $0x300] ss:$16 sps:$4 sm:$0xff]  }
  0x28   :  { %4877 = vmatprep.subr.bf16.mxu0 %v7483_v40  ;;  %5410 = vmatprep.subr.bf16.mxu1 %v7485_v41  ;;  %v7572_v40 = vld [vmem:[%s11306_s1 + $0x308] ss:$16 sps:$4 sm:$0xff]   ;;  %v7577_v41 = vld [vmem:[%s11306_s1 + $0x324] ss:$16 sps:$4 sm:$0xff]  }
  0x2b   :  { %4878 = vmatpush1.bf16.msra.mxu0 %v7487_v42  ;;  %5411 = vmatpush1.bf16.msra.mxu1 %v7488_v43  ;;  %v7580_v42 = vld [vmem:[%s11306_s1 + $0x32c] ss:$16 sps:$4 sm:$0xff]   ;;  %v7575_v43 = vld [vmem:[%s11306_s1 + $0x320] ss:$16 sps:$4 sm:$0xff]  }
  0x2c   :  { %4879 = vmatprep.subr.bf16.mxu0 %v7489_v44  ;;  %5412 = vmatprep.subr.bf16.mxu1 %v7491_v45  ;;  %v7578_v44 = vld [vmem:[%s11306_s1 + $0x328] ss:$16 sps:$4 sm:$0xff]   ;;  %v7583_v45 = vld [vmem:[%s11306_s1 + $0x344] ss:$16 sps:$4 sm:$0xff]  }
  0x2f   :  { %4880 = vmatpush1.bf16.msra.mxu0 %v7493_v47  ;;  %5413 = vmatpush1.bf16.msra.mxu1 %v7494_v49  ;;  %v7581_v47 = vld [vmem:[%s11306_s1 + $0x340] ss:$16 sps:$4 sm:$0xff]   ;;  %v7589_v49 = vld [vmem:[%s11306_s1 + $0x364] ss:$16 sps:$4 sm:$0xff]  }
  0x30   :  { %4881 = vmatprep.subr.bf16.mxu0 %v7495_v50  ;;  %5414 = vmatprep.subr.bf16.mxu1 %v7497_v51  ;;  %v7592_v50 = vld [vmem:[%s11306_s1 + $0x36c] ss:$16 sps:$4 sm:$0xff]   ;;  %v7587_v51 = vld [vmem:[%s11306_s1 + $0x360] ss:$16 sps:$4 sm:$0xff]  }
  0x33   :  { %4882 = vmatpush1.bf16.msra.mxu0 %v7499_v52  ;;  %5415 = vmatpush1.bf16.msra.mxu1 %v7500_v53  ;;  %v7590_v52 = vld [vmem:[%s11306_s1 + $0x368] ss:$16 sps:$4 sm:$0xff]   ;;  %v7595_v53 = vld [vmem:[%s11306_s1 + $0x384] ss:$16 sps:$4 sm:$0xff]  }
  0x34   :  { %4883 = vmatprep.subr.bf16.mxu0 %v7501_v54  ;;  %5416 = vmatprep.subr.bf16.mxu1 %v7503_v55  ;;  %v7598_v54 = vld [vmem:[%s11306_s1 + $0x38c] ss:$16 sps:$4 sm:$0xff]   ;;  %v7593_v55 = vld [vmem:[%s11306_s1 + $0x380] ss:$16 sps:$4 sm:$0xff]  }
  0x37   :  { %4884 = vmatpush1.bf16.msra.mxu0 %v7505_v56  ;;  %5417 = vmatpush1.bf16.msra.mxu1 %v7506_v57  ;;  %v7596_v56 = vld [vmem:[%s11306_s1 + $0x388] ss:$16 sps:$4 sm:$0xff]   ;;  %v7601_v57 = vld [vmem:[%s11306_s1 + $0x3a4] ss:$16 sps:$4 sm:$0xff]  }
  0x38   :  { %4885 = vmatprep.subr.bf16.mxu0 %v7507_v58  ;;  %5418 = vmatprep.subr.bf16.mxu1 %v7509_v59  ;;  %v7604_v58 = vld [vmem:[%s11306_s1 + $0x3ac] ss:$16 sps:$4 sm:$0xff]   ;;  %v7599_v59 = vld [vmem:[%s11306_s1 + $0x3a0] ss:$16 sps:$4 sm:$0xff]  }
  0x3b   :  { %4886 = vmatpush1.bf16.msra.mxu0 %v7511_v60  ;;  %5419 = vmatpush1.bf16.msra.mxu1 %v7512_v61  ;;  %v7602_v60 = vld [vmem:[%s11306_s1 + $0x3a8] ss:$16 sps:$4 sm:$0xff]   ;;  %v7607_v61 = vld [vmem:[%s11306_s1 + $0x3c4] ss:$16 sps:$4 sm:$0xff]  }
  0x3c   :  { %4887 = vmatprep.subr.bf16.mxu0 %v7513_v62  ;;  %5420 = vmatprep.subr.bf16.mxu1 %v7515_v63  ;;  %v7610_v62 = vld [vmem:[%s11306_s1 + $0x3cc] ss:$16 sps:$4 sm:$0xff]   ;;  %v7605_v63 = vld [vmem:[%s11306_s1 + $0x3c0] ss:$16 sps:$4 sm:$0xff]  }
  0x3f   :  { %4888 = vmatpush1.bf16.msra.mxu0 %v7517_v0  ;;  %5421 = vmatpush1.bf16.msra.mxu1 %v7518_v1  ;;  %v7608_v0 = vld [vmem:[%s11306_s1 + $0x3c8] ss:$16 sps:$4 sm:$0xff]   ;;  %v7613_v1 = vld [vmem:[%s11306_s1 + $0x3e4] ss:$16 sps:$4 sm:$0xff]  }
  0x40   :  { %4898 = vmatprep.subr.bf16.mxu0 %v7523_v2  ;;  %5431 = vmatprep.subr.bf16.mxu1 %v7526_v3  ;;  %v7616_v2 = vld [vmem:[%s11306_s1 + $0x3ec] ss:$16 sps:$4 sm:$0xff]   ;;  %v7611_v3 = vld [vmem:[%s11306_s1 + $0x3e0] ss:$16 sps:$4 sm:$0xff]  }
  0x42   :  { %4890 = vmatmul.mubr.bf16.vlgmr.msra.gmra.mrb[0].mxu0 %v6432_v4  ;;  %5423 = vmatmul.mubr.bf16.vlgmr.msra.gmra.mrb[0].mxu1 %v6432_v4  ;;  %v7614_v4 = vld [vmem:[%s11306_s1 + $0x3e8] ss:$16 sps:$4 sm:$0xff]  }
  0x43   :  { %4899 = vmatpush1.bf16.msra.mxu0 %v7521_v5  ;;  %5432 = vmatpush1.bf16.msra.mxu1 %v7524_v6  ;;  %v7621_v5 = vld [vmem:[%s11306_s1 + $0x404] ss:$16 sps:$4 sm:$0xff]   ;;  %v7624_v6 = vld [vmem:[%s11306_s1 + $0x40c] ss:$16 sps:$4 sm:$0xff]  }
  0x44   :  { %4900 = vmatprep.subr.bf16.mxu0 %v7529_v7  ;;  %5433 = vmatprep.subr.bf16.mxu1 %v7532_v8  ;;  %v6434_v7 = vcombine.low %v8986_v29, %v8986_v29  ;;  %v7619_v8 = vld [vmem:[%s11306_s1 + $0x400] ss:$16 sps:$4 sm:$0xff]   ;;  %v7654_v29 = vld [vmem:[%s11306_s1 + $0x4ac] ss:$16 sps:$4 sm:$0xff]  }
  0x45   :  { %4930 = vmatprep.mubr.bf16.mxu0 %v6435_v30  ;;  %5463 = vmatprep.mubr.bf16.mxu1 %v6435_v30  ;;  %v7649_v30 = vld [vmem:[%s11306_s1 + $0x4a0] ss:$16 sps:$4 sm:$0xff]  }
  0x47   :  { %4901 = vmatpush1.bf16.msra.mxu0 %v7527_v9  ;;  %5434 = vmatpush1.bf16.msra.mxu1 %v7530_v10  ;;  %v7622_v9 = vld [vmem:[%s11306_s1 + $0x408] ss:$16 sps:$4 sm:$0xff]   ;;  %v7627_v10 = vld [vmem:[%s11306_s1 + $0x424] ss:$16 sps:$4 sm:$0xff]  }
  0x48   :  { %4902 = vmatprep.subr.bf16.mxu0 %v7535_v11  ;;  %5435 = vmatprep.subr.bf16.mxu1 %v7538_v12  ;;  %v9124_v11 = vld [vmem:[%s11307_s0 + $0x10] sm:$0xff]  ;;  %v7630_v12 = vld [vmem:[%s11306_s1 + $0x42c] ss:$16 sps:$4 sm:$0xff]  }
  0x4b   :  { %4903 = vmatpush1.bf16.msra.mxu0 %v7533_v13  ;;  %5436 = vmatpush1.bf16.msra.mxu1 %v7536_v14  ;;  %v6437_v13 = vcombine.high %v9124_v11, %v9124_v11  ;;  %v7625_v14 = vld [vmem:[%s11306_s1 + $0x420] ss:$16 sps:$4 sm:$0xff]  }
  0x4c   :  { %4904 = vmatprep.subr.bf16.mxu0 %v7541_v15  ;;  %5437 = vmatprep.subr.bf16.mxu1 %v7544_v16  ;;  %v7628_v15 = vld [vmem:[%s11306_s1 + $0x428] ss:$16 sps:$4 sm:$0xff]   ;;  %v7633_v16 = vld [vmem:[%s11306_s1 + $0x444] ss:$16 sps:$4 sm:$0xff]  }
  0x4f   :  { %4905 = vmatpush1.bf16.msra.mxu0 %v7539_v17  ;;  %5438 = vmatpush1.bf16.msra.mxu1 %v7542_v18  ;;  %v7636_v17 = vld [vmem:[%s11306_s1 + $0x44c] ss:$16 sps:$4 sm:$0xff]   ;;  %v7631_v18 = vld [vmem:[%s11306_s1 + $0x440] ss:$16 sps:$4 sm:$0xff]  }
  0x50   :  { %4906 = vmatprep.subr.bf16.mxu0 %v7547_v19  ;;  %5439 = vmatprep.subr.bf16.mxu1 %v7550_v20  ;;  %v7634_v19 = vld [vmem:[%s11306_s1 + $0x448] ss:$16 sps:$4 sm:$0xff]   ;;  %v7639_v20 = vld [vmem:[%s11306_s1 + $0x464] ss:$16 sps:$4 sm:$0xff]  }
  0x53   :  { %4907 = vmatpush1.bf16.msra.mxu0 %v7545_v21  ;;  %5440 = vmatpush1.bf16.msra.mxu1 %v7548_v22  ;;  %v7642_v21 = vld [vmem:[%s11306_s1 + $0x46c] ss:$16 sps:$4 sm:$0xff]   ;;  %v7637_v22 = vld [vmem:[%s11306_s1 + $0x460] ss:$16 sps:$4 sm:$0xff]  }
  0x54   :  { %4908 = vmatprep.subr.bf16.mxu0 %v7553_v23  ;;  %5441 = vmatprep.subr.bf16.mxu1 %v7556_v24  ;;  %v7640_v23 = vld [vmem:[%s11306_s1 + $0x468] ss:$16 sps:$4 sm:$0xff]   ;;  %v7645_v24 = vld [vmem:[%s11306_s1 + $0x484] ss:$16 sps:$4 sm:$0xff]  }
  0x57   :  { %4909 = vmatpush1.bf16.msra.mxu0 %v7551_v25  ;;  %5442 = vmatpush1.bf16.msra.mxu1 %v7554_v26  ;;  %v7648_v25 = vld [vmem:[%s11306_s1 + $0x48c] ss:$16 sps:$4 sm:$0xff]   ;;  %v7643_v26 = vld [vmem:[%s11306_s1 + $0x480] ss:$16 sps:$4 sm:$0xff]  }
  0x58   :  { %4910 = vmatprep.subr.bf16.mxu0 %v7559_v27  ;;  %5443 = vmatprep.subr.bf16.mxu1 %v7562_v28  ;;  %v7646_v27 = vld [vmem:[%s11306_s1 + $0x488] ss:$16 sps:$4 sm:$0xff]   ;;  %v7651_v28 = vld [vmem:[%s11306_s1 + $0x4a4] ss:$16 sps:$4 sm:$0xff]  }
  0x5b   :  { %4911 = vmatpush1.bf16.msra.mxu0 %v7557_v31  ;;  %5444 = vmatpush1.bf16.msra.mxu1 %v7560_v32  ;;  %v7652_v31 = vld [vmem:[%s11306_s1 + $0x4a8] ss:$16 sps:$4 sm:$0xff]   ;;  %v7657_v32 = vld [vmem:[%s11306_s1 + $0x4c4] ss:$16 sps:$4 sm:$0xff]  }
  0x5c   :  { %4912 = vmatprep.subr.bf16.mxu0 %v7565_v33  ;;  %5445 = vmatprep.subr.bf16.mxu1 %v7568_v34  ;;  %v7660_v33 = vld [vmem:[%s11306_s1 + $0x4cc] ss:$16 sps:$4 sm:$0xff]   ;;  %v7655_v34 = vld [vmem:[%s11306_s1 + $0x4c0] ss:$16 sps:$4 sm:$0xff]  }
  0x5f   :  { %4913 = vmatpush1.bf16.msra.mxu0 %v7563_v35  ;;  %5446 = vmatpush1.bf16.msra.mxu1 %v7566_v36  ;;  %v7658_v35 = vld [vmem:[%s11306_s1 + $0x4c8] ss:$16 sps:$4 sm:$0xff]   ;;  %v7663_v36 = vld [vmem:[%s11306_s1 + $0x4e4] ss:$16 sps:$4 sm:$0xff]  }
  0x60   :  { %4914 = vmatprep.subr.bf16.mxu0 %v7571_v37  ;;  %5447 = vmatprep.subr.bf16.mxu1 %v7574_v38  ;;  %v7666_v37 = vld [vmem:[%s11306_s1 + $0x4ec] ss:$16 sps:$4 sm:$0xff]   ;;  %v7661_v38 = vld [vmem:[%s11306_s1 + $0x4e0] ss:$16 sps:$4 sm:$0xff]  }
  0x63   :  { %4915 = vmatpush1.bf16.msra.mxu0 %v7569_v39  ;;  %5448 = vmatpush1.bf16.msra.mxu1 %v7572_v40  ;;  %v7664_v39 = vld [vmem:[%s11306_s1 + $0x4e8] ss:$16 sps:$4 sm:$0xff]   ;;  %v7669_v40 = vld [vmem:[%s11306_s1 + $0x504] ss:$16 sps:$4 sm:$0xff]  }
  0x64   :  { %4916 = vmatprep.subr.bf16.mxu0 %v7577_v41  ;;  %5449 = vmatprep.subr.bf16.mxu1 %v7580_v42  ;;  %v7672_v41 = vld [vmem:[%s11306_s1 + $0x50c] ss:$16 sps:$4 sm:$0xff]   ;;  %v7667_v42 = vld [vmem:[%s11306_s1 + $0x500] ss:$16 sps:$4 sm:$0xff]  }
  0x67   :  { %4917 = vmatpush1.bf16.msra.mxu0 %v7575_v43  ;;  %5450 = vmatpush1.bf16.msra.mxu1 %v7578_v44  ;;  %v7670_v43 = vld [vmem:[%s11306_s1 + $0x508] ss:$16 sps:$4 sm:$0xff]   ;;  %v7675_v44 = vld [vmem:[%s11306_s1 + $0x524] ss:$16 sps:$4 sm:$0xff]  }
  0x68   :  { %4918 = vmatprep.subr.bf16.mxu0 %v7583_v45  ;;  %5451 = vmatprep.subr.bf16.mxu1 %v7586_v46  ;;  %v7678_v45 = vld [vmem:[%s11306_s1 + $0x52c] ss:$16 sps:$4 sm:$0xff]   ;;  %v7673_v46 = vld [vmem:[%s11306_s1 + $0x520] ss:$16 sps:$4 sm:$0xff]  }
  0x6b   :  { %4919 = vmatpush1.bf16.msra.mxu0 %v7581_v47  ;;  %5452 = vmatpush1.bf16.msra.mxu1 %v7584_v48  ;;  %v7676_v47 = vld [vmem:[%s11306_s1 + $0x528] ss:$16 sps:$4 sm:$0xff]   ;;  %v7681_v48 = vld [vmem:[%s11306_s1 + $0x544] ss:$16 sps:$4 sm:$0xff]  }
  0x6c   :  { %4920 = vmatprep.subr.bf16.mxu0 %v7589_v49  ;;  %5453 = vmatprep.subr.bf16.mxu1 %v7592_v50  ;;  %v7684_v49 = vld [vmem:[%s11306_s1 + $0x54c] ss:$16 sps:$4 sm:$0xff]   ;;  %v7679_v50 = vld [vmem:[%s11306_s1 + $0x540] ss:$16 sps:$4 sm:$0xff]  }
  0x6f   :  { %4921 = vmatpush1.bf16.msra.mxu0 %v7587_v51  ;;  %5454 = vmatpush1.bf16.msra.mxu1 %v7590_v52  ;;  %v7682_v51 = vld [vmem:[%s11306_s1 + $0x548] ss:$16 sps:$4 sm:$0xff]   ;;  %v7687_v52 = vld [vmem:[%s11306_s1 + $0x564] ss:$16 sps:$4 sm:$0xff]  }
  0x70   :  { %4922 = vmatprep.subr.bf16.mxu0 %v7595_v53  ;;  %5455 = vmatprep.subr.bf16.mxu1 %v7598_v54  ;;  %v7690_v53 = vld [vmem:[%s11306_s1 + $0x56c] ss:$16 sps:$4 sm:$0xff]   ;;  %v7685_v54 = vld [vmem:[%s11306_s1 + $0x560] ss:$16 sps:$4 sm:$0xff]  }
  0x73   :  { %4923 = vmatpush1.bf16.msra.mxu0 %v7593_v55  ;;  %5456 = vmatpush1.bf16.msra.mxu1 %v7596_v56  ;;  %v7688_v55 = vld [vmem:[%s11306_s1 + $0x568] ss:$16 sps:$4 sm:$0xff]   ;;  %v7693_v56 = vld [vmem:[%s11306_s1 + $0x584] ss:$16 sps:$4 sm:$0xff]  }
  0x74   :  { %4924 = vmatprep.subr.bf16.mxu0 %v7601_v57  ;;  %5457 = vmatprep.subr.bf16.mxu1 %v7604_v58  ;;  %v7696_v57 = vld [vmem:[%s11306_s1 + $0x58c] ss:$16 sps:$4 sm:$0xff]   ;;  %v7691_v58 = vld [vmem:[%s11306_s1 + $0x580] ss:$16 sps:$4 sm:$0xff]  }
  0x77   :  { %4925 = vmatpush1.bf16.msra.mxu0 %v7599_v59  ;;  %5458 = vmatpush1.bf16.msra.mxu1 %v7602_v60  ;;  %v7694_v59 = vld [vmem:[%s11306_s1 + $0x588] ss:$16 sps:$4 sm:$0xff]   ;;  %v7699_v60 = vld [vmem:[%s11306_s1 + $0x5a4] ss:$16 sps:$4 sm:$0xff]  }
  0x78   :  { %4926 = vmatprep.subr.bf16.mxu0 %v7607_v61  ;;  %5459 = vmatprep.subr.bf16.mxu1 %v7610_v62  ;;  %v7702_v61 = vld [vmem:[%s11306_s1 + $0x5ac] ss:$16 sps:$4 sm:$0xff]   ;;  %v7697_v62 = vld [vmem:[%s11306_s1 + $0x5a0] ss:$16 sps:$4 sm:$0xff]  }
  0x7b   :  { %4927 = vmatpush1.bf16.msra.mxu0 %v7605_v63  ;;  %5460 = vmatpush1.bf16.msra.mxu1 %v7608_v0  ;;  %v7700_v63 = vld [vmem:[%s11306_s1 + $0x5a8] ss:$16 sps:$4 sm:$0xff]   ;;  %v7705_v0 = vld [vmem:[%s11306_s1 + $0x5c4] ss:$16 sps:$4 sm:$0xff]  }
  0x7c   :  { %4928 = vmatprep.subr.bf16.mxu0 %v7613_v1  ;;  %5461 = vmatprep.subr.bf16.mxu1 %v7616_v2  ;;  %v7708_v1 = vld [vmem:[%s11306_s1 + $0x5cc] ss:$16 sps:$4 sm:$0xff]   ;;  %v7703_v2 = vld [vmem:[%s11306_s1 + $0x5c0] ss:$16 sps:$4 sm:$0xff]  }
  0x7f   :  { %4929 = vmatpush1.bf16.msra.mxu0 %v7611_v3  ;;  %5462 = vmatpush1.bf16.msra.mxu1 %v7614_v4  ;;  %v7706_v3 = vld [vmem:[%s11306_s1 + $0x5c8] ss:$16 sps:$4 sm:$0xff]   ;;  %v7711_v4 = vld [vmem:[%s11306_s1 + $0x5e4] ss:$16 sps:$4 sm:$0xff]  }
  0x80   :  { %4939 = vmatprep.subr.bf16.mxu0 %v7621_v5  ;;  %5472 = vmatprep.subr.bf16.mxu1 %v7624_v6  ;;  %v7714_v5 = vld [vmem:[%s11306_s1 + $0x5ec] ss:$16 sps:$4 sm:$0xff]   ;;  %v7709_v6 = vld [vmem:[%s11306_s1 + $0x5e0] ss:$16 sps:$4 sm:$0xff]  }
  0x82   :  { %4931 = vmatmul.mubr.bf16.vlgmr.msra.gmra.mrb[0].mxu0 %v6434_v7  ;;  %5464 = vmatmul.mubr.bf16.vlgmr.msra.gmra.mrb[0].mxu1 %v6434_v7  ;;  %v7712_v7 = vld [vmem:[%s11306_s1 + $0x5e8] ss:$16 sps:$4 sm:$0xff]  }
  0x83   :  { %4940 = vmatpush1.bf16.msra.mxu0 %v7619_v8  ;;  %5473 = vmatpush1.bf16.msra.mxu1 %v7622_v9  ;;  %v7719_v8 = vld [vmem:[%s11306_s1 + $0x604] ss:$16 sps:$4 sm:$0xff]   ;;  %v7722_v9 = vld [vmem:[%s11306_s1 + $0x60c] ss:$16 sps:$4 sm:$0xff]  }
  0x84   :  { %4941 = vmatprep.subr.bf16.mxu0 %v7627_v10  ;;  %5474 = vmatprep.subr.bf16.mxu1 %v7630_v12  ;;  %v7717_v10 = vld [vmem:[%s11306_s1 + $0x600] ss:$16 sps:$4 sm:$0xff]   ;;  %v6436_v12 = vcombine.low %v9124_v11, %v9124_v11  ;;  %v7728_v11 = vld [vmem:[%s11306_s1 + $0x62c] ss:$16 sps:$4 sm:$0xff]  }
  0x85   :  { %4971 = vmatprep.mubr.bf16.mxu0 %v6437_v13  ;;  %5504 = vmatprep.mubr.bf16.mxu1 %v6437_v13  ;;  %v7720_v13 = vld [vmem:[%s11306_s1 + $0x608] ss:$16 sps:$4 sm:$0xff]  }
  0x87   :  { %4942 = vmatpush1.bf16.msra.mxu0 %v7625_v14  ;;  %5475 = vmatpush1.bf16.msra.mxu1 %v7628_v15  ;;  %v9322_v14 = vld [vmem:[%s11307_s0 + $0x18] sm:$0xff]  ;;  %v7725_v15 = vld [vmem:[%s11306_s1 + $0x624] ss:$16 sps:$4 sm:$0xff]  }
  0x88   :  { %4943 = vmatprep.subr.bf16.mxu0 %v7633_v16  ;;  %5476 = vmatprep.subr.bf16.mxu1 %v7636_v17  ;;  %v6439_v16 = vcombine.high %v9322_v14, %v9322_v14  ;;  %v7723_v17 = vld [vmem:[%s11306_s1 + $0x620] ss:$16 sps:$4 sm:$0xff]  }
  0x8b   :  { %4944 = vmatpush1.bf16.msra.mxu0 %v7631_v18  ;;  %5477 = vmatpush1.bf16.msra.mxu1 %v7634_v19  ;;  %v7726_v18 = vld [vmem:[%s11306_s1 + $0x628] ss:$16 sps:$4 sm:$0xff]   ;;  %v7731_v19 = vld [vmem:[%s11306_s1 + $0x644] ss:$16 sps:$4 sm:$0xff]  }
  0x8c   :  { %4945 = vmatprep.subr.bf16.mxu0 %v7639_v20  ;;  %5478 = vmatprep.subr.bf16.mxu1 %v7642_v21  ;;  %v7734_v20 = vld [vmem:[%s11306_s1 + $0x64c] ss:$16 sps:$4 sm:$0xff]   ;;  %v7729_v21 = vld [vmem:[%s11306_s1 + $0x640] ss:$16 sps:$4 sm:$0xff]  }
  0x8f   :  { %4946 = vmatpush1.bf16.msra.mxu0 %v7637_v22  ;;  %5479 = vmatpush1.bf16.msra.mxu1 %v7640_v23  ;;  %v7732_v22 = vld [vmem:[%s11306_s1 + $0x648] ss:$16 sps:$4 sm:$0xff]   ;;  %v7737_v23 = vld [vmem:[%s11306_s1 + $0x664] ss:$16 sps:$4 sm:$0xff]  }
  0x90   :  { %4947 = vmatprep.subr.bf16.mxu0 %v7645_v24  ;;  %5480 = vmatprep.subr.bf16.mxu1 %v7648_v25  ;;  %v7740_v24 = vld [vmem:[%s11306_s1 + $0x66c] ss:$16 sps:$4 sm:$0xff]   ;;  %v7735_v25 = vld [vmem:[%s11306_s1 + $0x660] ss:$16 sps:$4 sm:$0xff]  }
  0x93   :  { %4948 = vmatpush1.bf16.msra.mxu0 %v7643_v26  ;;  %5481 = vmatpush1.bf16.msra.mxu1 %v7646_v27  ;;  %v7738_v26 = vld [vmem:[%s11306_s1 + $0x668] ss:$16 sps:$4 sm:$0xff]   ;;  %v7743_v27 = vld [vmem:[%s11306_s1 + $0x684] ss:$16 sps:$4 sm:$0xff]  }
  0x94   :  { %4949 = vmatprep.subr.bf16.mxu0 %v7651_v28  ;;  %5482 = vmatprep.subr.bf16.mxu1 %v7654_v29  ;;  %v7746_v28 = vld [vmem:[%s11306_s1 + $0x68c] ss:$16 sps:$4 sm:$0xff]   ;;  %v7741_v29 = vld [vmem:[%s11306_s1 + $0x680] ss:$16 sps:$4 sm:$0xff]  }
  0x97   :  { %4950 = vmatpush1.bf16.msra.mxu0 %v7649_v30  ;;  %5483 = vmatpush1.bf16.msra.mxu1 %v7652_v31  ;;  %v7744_v30 = vld [vmem:[%s11306_s1 + $0x688] ss:$16 sps:$4 sm:$0xff]   ;;  %v7749_v31 = vld [vmem:[%s11306_s1 + $0x6a4] ss:$16 sps:$4 sm:$0xff]  }
  0x98   :  { %4951 = vmatprep.subr.bf16.mxu0 %v7657_v32  ;;  %5484 = vmatprep.subr.bf16.mxu1 %v7660_v33  ;;  %v7752_v32 = vld [vmem:[%s11306_s1 + $0x6ac] ss:$16 sps:$4 sm:$0xff]   ;;  %v7747_v33 = vld [vmem:[%s11306_s1 + $0x6a0] ss:$16 sps:$4 sm:$0xff]  }
  0x9b   :  { %4952 = vmatpush1.bf16.msra.mxu0 %v7655_v34  ;;  %5485 = vmatpush1.bf16.msra.mxu1 %v7658_v35  ;;  %v7750_v34 = vld [vmem:[%s11306_s1 + $0x6a8] ss:$16 sps:$4 sm:$0xff]   ;;  %v7755_v35 = vld [vmem:[%s11306_s1 + $0x6c4] ss:$16 sps:$4 sm:$0xff]  }
  0x9c   :  { %4953 = vmatprep.subr.bf16.mxu0 %v7663_v36  ;;  %5486 = vmatprep.subr.bf16.mxu1 %v7666_v37  ;;  %v7758_v36 = vld [vmem:[%s11306_s1 + $0x6cc] ss:$16 sps:$4 sm:$0xff]   ;;  %v7753_v37 = vld [vmem:[%s11306_s1 + $0x6c0] ss:$16 sps:$4 sm:$0xff]  }
  0x9f   :  { %4954 = vmatpush1.bf16.msra.mxu0 %v7661_v38  ;;  %5487 = vmatpush1.bf16.msra.mxu1 %v7664_v39  ;;  %v7756_v38 = vld [vmem:[%s11306_s1 + $0x6c8] ss:$16 sps:$4 sm:$0xff]   ;;  %v7761_v39 = vld [vmem:[%s11306_s1 + $0x6e4] ss:$16 sps:$4 sm:$0xff]  }
  0xa0   :  { %4955 = vmatprep.subr.bf16.mxu0 %v7669_v40  ;;  %5488 = vmatprep.subr.bf16.mxu1 %v7672_v41  ;;  %v7764_v40 = vld [vmem:[%s11306_s1 + $0x6ec] ss:$16 sps:$4 sm:$0xff]   ;;  %v7759_v41 = vld [vmem:[%s11306_s1 + $0x6e0] ss:$16 sps:$4 sm:$0xff]  }
  0xa3   :  { %4956 = vmatpush1.bf16.msra.mxu0 %v7667_v42  ;;  %5489 = vmatpush1.bf16.msra.mxu1 %v7670_v43  ;;  %v7762_v42 = vld [vmem:[%s11306_s1 + $0x6e8] ss:$16 sps:$4 sm:$0xff]   ;;  %v7767_v43 = vld [vmem:[%s11306_s1 + $0x704] ss:$16 sps:$4 sm:$0xff]  }
  0xa4   :  { %4957 = vmatprep.subr.bf16.mxu0 %v7675_v44  ;;  %5490 = vmatprep.subr.bf16.mxu1 %v7678_v45  ;;  %v7770_v44 = vld [vmem:[%s11306_s1 + $0x70c] ss:$16 sps:$4 sm:$0xff]   ;;  %v7765_v45 = vld [vmem:[%s11306_s1 + $0x700] ss:$16 sps:$4 sm:$0xff]  }
  0xa7   :  { %4958 = vmatpush1.bf16.msra.mxu0 %v7673_v46  ;;  %5491 = vmatpush1.bf16.msra.mxu1 %v7676_v47  ;;  %v7768_v46 = vld [vmem:[%s11306_s1 + $0x708] ss:$16 sps:$4 sm:$0xff]   ;;  %v7773_v47 = vld [vmem:[%s11306_s1 + $0x724] ss:$16 sps:$4 sm:$0xff]  }
  0xa8   :  { %4959 = vmatprep.subr.bf16.mxu0 %v7681_v48  ;;  %5492 = vmatprep.subr.bf16.mxu1 %v7684_v49  ;;  %v7776_v48 = vld [vmem:[%s11306_s1 + $0x72c] ss:$16 sps:$4 sm:$0xff]   ;;  %v7771_v49 = vld [vmem:[%s11306_s1 + $0x720] ss:$16 sps:$4 sm:$0xff]  }
  0xab   :  { %4960 = vmatpush1.bf16.msra.mxu0 %v7679_v50  ;;  %5493 = vmatpush1.bf16.msra.mxu1 %v7682_v51  ;;  %v7774_v50 = vld [vmem:[%s11306_s1 + $0x728] ss:$16 sps:$4 sm:$0xff]   ;;  %v7779_v51 = vld [vmem:[%s11306_s1 + $0x744] ss:$16 sps:$4 sm:$0xff]  }
  0xac   :  { %4961 = vmatprep.subr.bf16.mxu0 %v7687_v52  ;;  %5494 = vmatprep.subr.bf16.mxu1 %v7690_v53  ;;  %v7782_v52 = vld [vmem:[%s11306_s1 + $0x74c] ss:$16 sps:$4 sm:$0xff]   ;;  %v7777_v53 = vld [vmem:[%s11306_s1 + $0x740] ss:$16 sps:$4 sm:$0xff]  }
  0xaf   :  { %4962 = vmatpush1.bf16.msra.mxu0 %v7685_v54  ;;  %5495 = vmatpush1.bf16.msra.mxu1 %v7688_v55  ;;  %v7780_v54 = vld [vmem:[%s11306_s1 + $0x748] ss:$16 sps:$4 sm:$0xff]   ;;  %v7785_v55 = vld [vmem:[%s11306_s1 + $0x764] ss:$16 sps:$4 sm:$0xff]  }
  0xb0   :  { %4963 = vmatprep.subr.bf16.mxu0 %v7693_v56  ;;  %5496 = vmatprep.subr.bf16.mxu1 %v7696_v57  ;;  %v7788_v56 = vld [vmem:[%s11306_s1 + $0x76c] ss:$16 sps:$4 sm:$0xff]   ;;  %v7783_v57 = vld [vmem:[%s11306_s1 + $0x760] ss:$16 sps:$4 sm:$0xff]  }
  0xb3   :  { %4964 = vmatpush1.bf16.msra.mxu0 %v7691_v58  ;;  %5497 = vmatpush1.bf16.msra.mxu1 %v7694_v59  ;;  %v7786_v58 = vld [vmem:[%s11306_s1 + $0x768] ss:$16 sps:$4 sm:$0xff]   ;;  %v7791_v59 = vld [vmem:[%s11306_s1 + $0x784] ss:$16 sps:$4 sm:$0xff]  }
  0xb4   :  { %4965 = vmatprep.subr.bf16.mxu0 %v7699_v60  ;;  %5498 = vmatprep.subr.bf16.mxu1 %v7702_v61  ;;  %v7794_v60 = vld [vmem:[%s11306_s1 + $0x78c] ss:$16 sps:$4 sm:$0xff]   ;;  %v7789_v61 = vld [vmem:[%s11306_s1 + $0x780] ss:$16 sps:$4 sm:$0xff]  }
  0xb7   :  { %4966 = vmatpush1.bf16.msra.mxu0 %v7697_v62  ;;  %5499 = vmatpush1.bf16.msra.mxu1 %v7700_v63  ;;  %v7792_v62 = vld [vmem:[%s11306_s1 + $0x788] ss:$16 sps:$4 sm:$0xff]   ;;  %v7797_v63 = vld [vmem:[%s11306_s1 + $0x7a4] ss:$16 sps:$4 sm:$0xff]  }
  0xb8   :  { %4967 = vmatprep.subr.bf16.mxu0 %v7705_v0  ;;  %5500 = vmatprep.subr.bf16.mxu1 %v7708_v1  ;;  %v7800_v0 = vld [vmem:[%s11306_s1 + $0x7ac] ss:$16 sps:$4 sm:$0xff]   ;;  %v7795_v1 = vld [vmem:[%s11306_s1 + $0x7a0] ss:$16 sps:$4 sm:$0xff]  }
  0xbb   :  { %4968 = vmatpush1.bf16.msra.mxu0 %v7703_v2  ;;  %5501 = vmatpush1.bf16.msra.mxu1 %v7706_v3  ;;  %v7798_v2 = vld [vmem:[%s11306_s1 + $0x7a8] ss:$16 sps:$4 sm:$0xff]   ;;  %v7803_v3 = vld [vmem:[%s11306_s1 + $0x7c4] ss:$16 sps:$4 sm:$0xff]  }
  0xbc   :  { %4969 = vmatprep.subr.bf16.mxu0 %v7711_v4  ;;  %5502 = vmatprep.subr.bf16.mxu1 %v7714_v5  ;;  %v7806_v4 = vld [vmem:[%s11306_s1 + $0x7cc] ss:$16 sps:$4 sm:$0xff]   ;;  %v7801_v5 = vld [vmem:[%s11306_s1 + $0x7c0] ss:$16 sps:$4 sm:$0xff]  }
  0xbf   :  { %4970 = vmatpush1.bf16.msra.mxu0 %v7709_v6  ;;  %5503 = vmatpush1.bf16.msra.mxu1 %v7712_v7  ;;  %v7804_v6 = vld [vmem:[%s11306_s1 + $0x7c8] ss:$16 sps:$4 sm:$0xff]   ;;  %v7809_v7 = vld [vmem:[%s11306_s1 + $0x7e4] ss:$16 sps:$4 sm:$0xff]  }
  0xc0   :  { %4980 = vmatprep.subr.bf16.mxu0 %v7719_v8  ;;  %5513 = vmatprep.subr.bf16.mxu1 %v7722_v9  ;;  %v7812_v8 = vld [vmem:[%s11306_s1 + $0x7ec] ss:$16 sps:$4 sm:$0xff]   ;;  %v7807_v9 = vld [vmem:[%s11306_s1 + $0x7e0] ss:$16 sps:$4 sm:$0xff]  }
  0xc2   :  { %4972 = vmatmul.mubr.bf16.vlgmr.msra.gmra.mrb[0].mxu0 %v6436_v12  ;;  %5505 = vmatmul.mubr.bf16.vlgmr.msra.gmra.mrb[0].mxu1 %v6436_v12  ;;  %v7817_v12 = vld [vmem:[%s11306_s1 + $0x804] ss:$16 sps:$4 sm:$0xff]  }
  0xc3   :  { %4981 = vmatpush1.bf16.msra.mxu0 %v7717_v10  ;;  %5514 = vmatpush1.bf16.msra.mxu1 %v7720_v13  ;;  %v7810_v10 = vld [vmem:[%s11306_s1 + $0x7e8] ss:$16 sps:$4 sm:$0xff]   ;;  %v7820_v13 = vld [vmem:[%s11306_s1 + $0x80c] ss:$16 sps:$4 sm:$0xff]  }
  0xc4   :  { %4982 = vmatprep.subr.bf16.mxu0 %v7725_v15  ;;  %5515 = vmatprep.subr.bf16.mxu1 %v7728_v11  ;;  %v7815_v15 = vld [vmem:[%s11306_s1 + $0x800] ss:$16 sps:$4 sm:$0xff]   ;;  %v6438_v11 = vcombine.low %v9322_v14, %v9322_v14  ;;  %v7826_v14 = vld [vmem:[%s11306_s1 + $0x82c] ss:$16 sps:$4 sm:$0xff]  }
  0xc5   :  { %5012 = vmatprep.mubr.bf16.mxu0 %v6439_v16  ;;  %5545 = vmatprep.mubr.bf16.mxu1 %v6439_v16  ;;  %v9520_v16 = vld [vmem:[%s11307_s0 + $0x20] sm:$0xff] }
  0xc7   :  { %4983 = vmatpush1.bf16.msra.mxu0 %v7723_v17  ;;  %5516 = vmatpush1.bf16.msra.mxu1 %v7726_v18  ;;  %v7818_v17 = vld [vmem:[%s11306_s1 + $0x808] ss:$16 sps:$4 sm:$0xff]   ;;  %v7823_v18 = vld [vmem:[%s11306_s1 + $0x824] ss:$16 sps:$4 sm:$0xff]  }
  0xc8   :  { %4984 = vmatprep.subr.bf16.mxu0 %v7731_v19  ;;  %5517 = vmatprep.subr.bf16.mxu1 %v7734_v20  ;;  %v6441_v19 = vcombine.high %v9520_v16, %v9520_v16  ;;  %v7821_v20 = vld [vmem:[%s11306_s1 + $0x820] ss:$16 sps:$4 sm:$0xff]  }
  0xcb   :  { %4985 = vmatpush1.bf16.msra.mxu0 %v7729_v21  ;;  %5518 = vmatpush1.bf16.msra.mxu1 %v7732_v22  ;;  %v7824_v21 = vld [vmem:[%s11306_s1 + $0x828] ss:$16 sps:$4 sm:$0xff]   ;;  %v7829_v22 = vld [vmem:[%s11306_s1 + $0x844] ss:$16 sps:$4 sm:$0xff]  }
  0xcc   :  { %4986 = vmatprep.subr.bf16.mxu0 %v7737_v23  ;;  %5519 = vmatprep.subr.bf16.mxu1 %v7740_v24  ;;  %v7832_v23 = vld [vmem:[%s11306_s1 + $0x84c] ss:$16 sps:$4 sm:$0xff]   ;;  %v7827_v24 = vld [vmem:[%s11306_s1 + $0x840] ss:$16 sps:$4 sm:$0xff]  }
  0xcf   :  { %4987 = vmatpush1.bf16.msra.mxu0 %v7735_v25  ;;  %5520 = vmatpush1.bf16.msra.mxu1 %v7738_v26  ;;  %v7830_v25 = vld [vmem:[%s11306_s1 + $0x848] ss:$16 sps:$4 sm:$0xff]   ;;  %v7835_v26 = vld [vmem:[%s11306_s1 + $0x864] ss:$16 sps:$4 sm:$0xff]  }
  0xd0   :  { %4988 = vmatprep.subr.bf16.mxu0 %v7743_v27  ;;  %5521 = vmatprep.subr.bf16.mxu1 %v7746_v28  ;;  %v7838_v27 = vld [vmem:[%s11306_s1 + $0x86c] ss:$16 sps:$4 sm:$0xff]   ;;  %v7833_v28 = vld [vmem:[%s11306_s1 + $0x860] ss:$16 sps:$4 sm:$0xff]  }
  0xd3   :  { %4989 = vmatpush1.bf16.msra.mxu0 %v7741_v29  ;;  %5522 = vmatpush1.bf16.msra.mxu1 %v7744_v30  ;;  %v7836_v29 = vld [vmem:[%s11306_s1 + $0x868] ss:$16 sps:$4 sm:$0xff]   ;;  %v7841_v30 = vld [vmem:[%s11306_s1 + $0x884] ss:$16 sps:$4 sm:$0xff]  }
  0xd4   :  { %4990 = vmatprep.subr.bf16.mxu0 %v7749_v31  ;;  %5523 = vmatprep.subr.bf16.mxu1 %v7752_v32  ;;  %v7844_v31 = vld [vmem:[%s11306_s1 + $0x88c] ss:$16 sps:$4 sm:$0xff]   ;;  %v7839_v32 = vld [vmem:[%s11306_s1 + $0x880] ss:$16 sps:$4 sm:$0xff]  }
  0xd7   :  { %4991 = vmatpush1.bf16.msra.mxu0 %v7747_v33  ;;  %5524 = vmatpush1.bf16.msra.mxu1 %v7750_v34  ;;  %v7842_v33 = vld [vmem:[%s11306_s1 + $0x888] ss:$16 sps:$4 sm:$0xff]   ;;  %v7847_v34 = vld [vmem:[%s11306_s1 + $0x8a4] ss:$16 sps:$4 sm:$0xff]  }
  0xd8   :  { %4992 = vmatprep.subr.bf16.mxu0 %v7755_v35  ;;  %5525 = vmatprep.subr.bf16.mxu1 %v7758_v36  ;;  %v7850_v35 = vld [vmem:[%s11306_s1 + $0x8ac] ss:$16 sps:$4 sm:$0xff]   ;;  %v7845_v36 = vld [vmem:[%s11306_s1 + $0x8a0] ss:$16 sps:$4 sm:$0xff]  }
  0xdb   :  { %4993 = vmatpush1.bf16.msra.mxu0 %v7753_v37  ;;  %5526 = vmatpush1.bf16.msra.mxu1 %v7756_v38  ;;  %v7848_v37 = vld [vmem:[%s11306_s1 + $0x8a8] ss:$16 sps:$4 sm:$0xff]   ;;  %v7853_v38 = vld [vmem:[%s11306_s1 + $0x8c4] ss:$16 sps:$4 sm:$0xff]  }
  0xdc   :  { %4994 = vmatprep.subr.bf16.mxu0 %v7761_v39  ;;  %5527 = vmatprep.subr.bf16.mxu1 %v7764_v40  ;;  %v7856_v39 = vld [vmem:[%s11306_s1 + $0x8cc] ss:$16 sps:$4 sm:$0xff]   ;;  %v7851_v40 = vld [vmem:[%s11306_s1 + $0x8c0] ss:$16 sps:$4 sm:$0xff]  }
  0xdf   :  { %4995 = vmatpush1.bf16.msra.mxu0 %v7759_v41  ;;  %5528 = vmatpush1.bf16.msra.mxu1 %v7762_v42  ;;  %v7854_v41 = vld [vmem:[%s11306_s1 + $0x8c8] ss:$16 sps:$4 sm:$0xff]   ;;  %v7859_v42 = vld [vmem:[%s11306_s1 + $0x8e4] ss:$16 sps:$4 sm:$0xff]  }
  0xe0   :  { %4996 = vmatprep.subr.bf16.mxu0 %v7767_v43  ;;  %5529 = vmatprep.subr.bf16.mxu1 %v7770_v44  ;;  %v7862_v43 = vld [vmem:[%s11306_s1 + $0x8ec] ss:$16 sps:$4 sm:$0xff]   ;;  %v7857_v44 = vld [vmem:[%s11306_s1 + $0x8e0] ss:$16 sps:$4 sm:$0xff]  }
  0xe3   :  { %4997 = vmatpush1.bf16.msra.mxu0 %v7765_v45  ;;  %5530 = vmatpush1.bf16.msra.mxu1 %v7768_v46  ;;  %v7860_v45 = vld [vmem:[%s11306_s1 + $0x8e8] ss:$16 sps:$4 sm:$0xff]   ;;  %v7865_v46 = vld [vmem:[%s11306_s1 + $0x904] ss:$16 sps:$4 sm:$0xff]  }
  0xe4   :  { %4998 = vmatprep.subr.bf16.mxu0 %v7773_v47  ;;  %5531 = vmatprep.subr.bf16.mxu1 %v7776_v48  ;;  %v7868_v47 = vld [vmem:[%s11306_s1 + $0x90c] ss:$16 sps:$4 sm:$0xff]   ;;  %v7863_v48 = vld [vmem:[%s11306_s1 + $0x900] ss:$16 sps:$4 sm:$0xff]  }
  0xe7   :  { %4999 = vmatpush1.bf16.msra.mxu0 %v7771_v49  ;;  %5532 = vmatpush1.bf16.msra.mxu1 %v7774_v50  ;;  %v7866_v49 = vld [vmem:[%s11306_s1 + $0x908] ss:$16 sps:$4 sm:$0xff]   ;;  %v7871_v50 = vld [vmem:[%s11306_s1 + $0x924] ss:$16 sps:$4 sm:$0xff]  }
  0xe8   :  { %5000 = vmatprep.subr.bf16.mxu0 %v7779_v51  ;;  %5533 = vmatprep.subr.bf16.mxu1 %v7782_v52  ;;  %v7874_v51 = vld [vmem:[%s11306_s1 + $0x92c] ss:$16 sps:$4 sm:$0xff]   ;;  %v7869_v52 = vld [vmem:[%s11306_s1 + $0x920] ss:$16 sps:$4 sm:$0xff]  }
  0xeb   :  { %5001 = vmatpush1.bf16.msra.mxu0 %v7777_v53  ;;  %5534 = vmatpush1.bf16.msra.mxu1 %v7780_v54  ;;  %v7872_v53 = vld [vmem:[%s11306_s1 + $0x928] ss:$16 sps:$4 sm:$0xff]   ;;  %v7877_v54 = vld [vmem:[%s11306_s1 + $0x944] ss:$16 sps:$4 sm:$0xff]  }
  0xec   :  { %5002 = vmatprep.subr.bf16.mxu0 %v7785_v55  ;;  %5535 = vmatprep.subr.bf16.mxu1 %v7788_v56  ;;  %v7880_v55 = vld [vmem:[%s11306_s1 + $0x94c] ss:$16 sps:$4 sm:$0xff]   ;;  %v7875_v56 = vld [vmem:[%s11306_s1 + $0x940] ss:$16 sps:$4 sm:$0xff]  }
  0xef   :  { %5003 = vmatpush1.bf16.msra.mxu0 %v7783_v57  ;;  %5536 = vmatpush1.bf16.msra.mxu1 %v7786_v58  ;;  %v7878_v57 = vld [vmem:[%s11306_s1 + $0x948] ss:$16 sps:$4 sm:$0xff]   ;;  %v7883_v58 = vld [vmem:[%s11306_s1 + $0x964] ss:$16 sps:$4 sm:$0xff]  }
  0xf0   :  { %5004 = vmatprep.subr.bf16.mxu0 %v7791_v59  ;;  %5537 = vmatprep.subr.bf16.mxu1 %v7794_v60  ;;  %v7886_v59 = vld [vmem:[%s11306_s1 + $0x96c] ss:$16 sps:$4 sm:$0xff]   ;;  %v7881_v60 = vld [vmem:[%s11306_s1 + $0x960] ss:$16 sps:$4 sm:$0xff]  }
  0xf3   :  { %5005 = vmatpush1.bf16.msra.mxu0 %v7789_v61  ;;  %5538 = vmatpush1.bf16.msra.mxu1 %v7792_v62  ;;  %v7884_v61 = vld [vmem:[%s11306_s1 + $0x968] ss:$16 sps:$4 sm:$0xff]   ;;  %v7889_v62 = vld [vmem:[%s11306_s1 + $0x984] ss:$16 sps:$4 sm:$0xff]  }
  0xf4   :  { %5006 = vmatprep.subr.bf16.mxu0 %v7797_v63  ;;  %5539 = vmatprep.subr.bf16.mxu1 %v7800_v0  ;;  %v7892_v63 = vld [vmem:[%s11306_s1 + $0x98c] ss:$16 sps:$4 sm:$0xff]   ;;  %v7887_v0 = vld [vmem:[%s11306_s1 + $0x980] ss:$16 sps:$4 sm:$0xff]  }
  0xf7   :  { %5007 = vmatpush1.bf16.msra.mxu0 %v7795_v1  ;;  %5540 = vmatpush1.bf16.msra.mxu1 %v7798_v2  ;;  %v7890_v1 = vld [vmem:[%s11306_s1 + $0x988] ss:$16 sps:$4 sm:$0xff]   ;;  %v7895_v2 = vld [vmem:[%s11306_s1 + $0x9a4] ss:$16 sps:$4 sm:$0xff]  }
  0xf8   :  { %5008 = vmatprep.subr.bf16.mxu0 %v7803_v3  ;;  %5541 = vmatprep.subr.bf16.mxu1 %v7806_v4  ;;  %v7898_v3 = vld [vmem:[%s11306_s1 + $0x9ac] ss:$16 sps:$4 sm:$0xff]   ;;  %v7893_v4 = vld [vmem:[%s11306_s1 + $0x9a0] ss:$16 sps:$4 sm:$0xff]  }
  0xfb   :  { %5009 = vmatpush1.bf16.msra.mxu0 %v7801_v5  ;;  %5542 = vmatpush1.bf16.msra.mxu1 %v7804_v6  ;;  %v7896_v5 = vld [vmem:[%s11306_s1 + $0x9a8] ss:$16 sps:$4 sm:$0xff]   ;;  %v7901_v6 = vld [vmem:[%s11306_s1 + $0x9c4] ss:$16 sps:$4 sm:$0xff]  }
  0xfc   :  { %5010 = vmatprep.subr.bf16.mxu0 %v7809_v7  ;;  %5543 = vmatprep.subr.bf16.mxu1 %v7812_v8  ;;  %v7904_v7 = vld [vmem:[%s11306_s1 + $0x9cc] ss:$16 sps:$4 sm:$0xff]   ;;  %v7899_v8 = vld [vmem:[%s11306_s1 + $0x9c0] ss:$16 sps:$4 sm:$0xff]  }
  0xff   :  { %5011 = vmatpush1.bf16.msra.mxu0 %v7807_v9  ;;  %5544 = vmatpush1.bf16.msra.mxu1 %v7810_v10  ;;  %v7902_v9 = vld [vmem:[%s11306_s1 + $0x9c8] ss:$16 sps:$4 sm:$0xff]   ;;  %v7907_v10 = vld [vmem:[%s11306_s1 + $0x9e4] ss:$16 sps:$4 sm:$0xff]  }
 0x100   :  { %5021 = vmatprep.subr.bf16.mxu0 %v7817_v12  ;;  %5554 = vmatprep.subr.bf16.mxu1 %v7820_v13  ;;  %v7910_v12 = vld [vmem:[%s11306_s1 + $0x9ec] ss:$16 sps:$4 sm:$0xff]   ;;  %v7905_v13 = vld [vmem:[%s11306_s1 + $0x9e0] ss:$16 sps:$4 sm:$0xff]  }
 0x102   :  { %5013 = vmatmul.mubr.bf16.vlgmr.msra.gmra.mrb[0].mxu0 %v6438_v11  ;;  %5546 = vmatmul.mubr.bf16.vlgmr.msra.gmra.mrb[0].mxu1 %v6438_v11  ;;  %v7915_v11 = vld [vmem:[%s11306_s1 + $0xa04] ss:$16 sps:$4 sm:$0xff]  }
 0x103   :  { %5022 = vmatpush1.bf16.msra.mxu0 %v7815_v15  ;;  %5555 = vmatpush1.bf16.msra.mxu1 %v7818_v17  ;;  %v7908_v15 = vld [vmem:[%s11306_s1 + $0x9e8] ss:$16 sps:$4 sm:$0xff]   ;;  %v7918_v17 = vld [vmem:[%s11306_s1 + $0xa0c] ss:$16 sps:$4 sm:$0xff]  }
 0x104   :  { %5023 = vmatprep.subr.bf16.mxu0 %v7823_v18  ;;  %5556 = vmatprep.subr.bf16.mxu1 %v7826_v14  ;;  %v9716_v18 = vld [vmem:[%s11307_s0 + $0x28] sm:$0xff]  ;;  %v6440_v14 = vcombine.low %v9520_v16, %v9520_v16 }
 0x105   :  { %5053 = vmatprep.mubr.bf16.mxu0 %v6441_v19  ;;  %5586 = vmatprep.mubr.bf16.mxu1 %v6441_v19  ;;  %v7913_v19 = vld [vmem:[%s11306_s1 + $0xa00] ss:$16 sps:$4 sm:$0xff]   ;;  %v7924_v16 = vld [vmem:[%s11306_s1 + $0xa2c] ss:$16 sps:$4 sm:$0xff]  }
 0x107   :  { %5024 = vmatpush1.bf16.msra.mxu0 %v7821_v20  ;;  %5557 = vmatpush1.bf16.msra.mxu1 %v7824_v21  ;;  %v7916_v20 = vld [vmem:[%s11306_s1 + $0xa08] ss:$16 sps:$4 sm:$0xff]   ;;  %v7921_v21 = vld [vmem:[%s11306_s1 + $0xa24] ss:$16 sps:$4 sm:$0xff]  }
 0x108   :  { %5025 = vmatprep.subr.bf16.mxu0 %v7829_v22  ;;  %5558 = vmatprep.subr.bf16.mxu1 %v7832_v23  ;;  %v6443_v22 = vcombine.high %v9716_v18, %v9716_v18  ;;  %v7919_v23 = vld [vmem:[%s11306_s1 + $0xa20] ss:$16 sps:$4 sm:$0xff]  }
 0x10b   :  { %5026 = vmatpush1.bf16.msra.mxu0 %v7827_v24  ;;  %5559 = vmatpush1.bf16.msra.mxu1 %v7830_v25  ;;  %v7922_v24 = vld [vmem:[%s11306_s1 + $0xa28] ss:$16 sps:$4 sm:$0xff]   ;;  %v7927_v25 = vld [vmem:[%s11306_s1 + $0xa44] ss:$16 sps:$4 sm:$0xff]  }
 0x10c   :  { %5027 = vmatprep.subr.bf16.mxu0 %v7835_v26  ;;  %5560 = vmatprep.subr.bf16.mxu1 %v7838_v27  ;;  %v7930_v26 = vld [vmem:[%s11306_s1 + $0xa4c] ss:$16 sps:$4 sm:$0xff]   ;;  %v7925_v27 = vld [vmem:[%s11306_s1 + $0xa40] ss:$16 sps:$4 sm:$0xff]  }
 0x10f   :  { %5028 = vmatpush1.bf16.msra.mxu0 %v7833_v28  ;;  %5561 = vmatpush1.bf16.msra.mxu1 %v7836_v29  ;;  %v7928_v28 = vld [vmem:[%s11306_s1 + $0xa48] ss:$16 sps:$4 sm:$0xff]   ;;  %v7933_v29 = vld [vmem:[%s11306_s1 + $0xa64] ss:$16 sps:$4 sm:$0xff]  }
 0x110   :  { %5029 = vmatprep.subr.bf16.mxu0 %v7841_v30  ;;  %5562 = vmatprep.subr.bf16.mxu1 %v7844_v31  ;;  %v7936_v30 = vld [vmem:[%s11306_s1 + $0xa6c] ss:$16 sps:$4 sm:$0xff]   ;;  %v7931_v31 = vld [vmem:[%s11306_s1 + $0xa60] ss:$16 sps:$4 sm:$0xff]  }
 0x113   :  { %5030 = vmatpush1.bf16.msra.mxu0 %v7839_v32  ;;  %5563 = vmatpush1.bf16.msra.mxu1 %v7842_v33  ;;  %v7934_v32 = vld [vmem:[%s11306_s1 + $0xa68] ss:$16 sps:$4 sm:$0xff]   ;;  %v7939_v33 = vld [vmem:[%s11306_s1 + $0xa84] ss:$16 sps:$4 sm:$0xff]  }
 0x114   :  { %5031 = vmatprep.subr.bf16.mxu0 %v7847_v34  ;;  %5564 = vmatprep.subr.bf16.mxu1 %v7850_v35  ;;  %v7942_v34 = vld [vmem:[%s11306_s1 + $0xa8c] ss:$16 sps:$4 sm:$0xff]   ;;  %v7937_v35 = vld [vmem:[%s11306_s1 + $0xa80] ss:$16 sps:$4 sm:$0xff]  }
 0x117   :  { %5032 = vmatpush1.bf16.msra.mxu0 %v7845_v36  ;;  %5565 = vmatpush1.bf16.msra.mxu1 %v7848_v37  ;;  %v7940_v36 = vld [vmem:[%s11306_s1 + $0xa88] ss:$16 sps:$4 sm:$0xff]   ;;  %v7945_v37 = vld [vmem:[%s11306_s1 + $0xaa4] ss:$16 sps:$4 sm:$0xff]  }
 0x118   :  { %5033 = vmatprep.subr.bf16.mxu0 %v7853_v38  ;;  %5566 = vmatprep.subr.bf16.mxu1 %v7856_v39  ;;  %v7948_v38 = vld [vmem:[%s11306_s1 + $0xaac] ss:$16 sps:$4 sm:$0xff]   ;;  %v7943_v39 = vld [vmem:[%s11306_s1 + $0xaa0] ss:$16 sps:$4 sm:$0xff]  }
 0x11b   :  { %5034 = vmatpush1.bf16.msra.mxu0 %v7851_v40  ;;  %5567 = vmatpush1.bf16.msra.mxu1 %v7854_v41  ;;  %v7946_v40 = vld [vmem:[%s11306_s1 + $0xaa8] ss:$16 sps:$4 sm:$0xff]   ;;  %v7951_v41 = vld [vmem:[%s11306_s1 + $0xac4] ss:$16 sps:$4 sm:$0xff]  }
 0x11c   :  { %5035 = vmatprep.subr.bf16.mxu0 %v7859_v42  ;;  %5568 = vmatprep.subr.bf16.mxu1 %v7862_v43  ;;  %v7954_v42 = vld [vmem:[%s11306_s1 + $0xacc] ss:$16 sps:$4 sm:$0xff]   ;;  %v7949_v43 = vld [vmem:[%s11306_s1 + $0xac0] ss:$16 sps:$4 sm:$0xff]  }
 0x11f   :  { %5036 = vmatpush1.bf16.msra.mxu0 %v7857_v44  ;;  %5569 = vmatpush1.bf16.msra.mxu1 %v7860_v45  ;;  %v7952_v44 = vld [vmem:[%s11306_s1 + $0xac8] ss:$16 sps:$4 sm:$0xff]   ;;  %v7957_v45 = vld [vmem:[%s11306_s1 + $0xae4] ss:$16 sps:$4 sm:$0xff]  }
 0x120   :  { %5037 = vmatprep.subr.bf16.mxu0 %v7865_v46  ;;  %5570 = vmatprep.subr.bf16.mxu1 %v7868_v47  ;;  %v7960_v46 = vld [vmem:[%s11306_s1 + $0xaec] ss:$16 sps:$4 sm:$0xff]   ;;  %v7955_v47 = vld [vmem:[%s11306_s1 + $0xae0] ss:$16 sps:$4 sm:$0xff]  }
 0x123   :  { %5038 = vmatpush1.bf16.msra.mxu0 %v7863_v48  ;;  %5571 = vmatpush1.bf16.msra.mxu1 %v7866_v49  ;;  %v7958_v48 = vld [vmem:[%s11306_s1 + $0xae8] ss:$16 sps:$4 sm:$0xff]   ;;  %v7963_v49 = vld [vmem:[%s11306_s1 + $0xb04] ss:$16 sps:$4 sm:$0xff]  }
 0x124   :  { %5039 = vmatprep.subr.bf16.mxu0 %v7871_v50  ;;  %5572 = vmatprep.subr.bf16.mxu1 %v7874_v51  ;;  %v7966_v50 = vld [vmem:[%s11306_s1 + $0xb0c] ss:$16 sps:$4 sm:$0xff]   ;;  %v7961_v51 = vld [vmem:[%s11306_s1 + $0xb00] ss:$16 sps:$4 sm:$0xff]  }
 0x127   :  { %5040 = vmatpush1.bf16.msra.mxu0 %v7869_v52  ;;  %5573 = vmatpush1.bf16.msra.mxu1 %v7872_v53  ;;  %v7964_v52 = vld [vmem:[%s11306_s1 + $0xb08] ss:$16 sps:$4 sm:$0xff]   ;;  %v7969_v53 = vld [vmem:[%s11306_s1 + $0xb24] ss:$16 sps:$4 sm:$0xff]  }
 0x128   :  { %5041 = vmatprep.subr.bf16.mxu0 %v7877_v54  ;;  %5574 = vmatprep.subr.bf16.mxu1 %v7880_v55  ;;  %v7972_v54 = vld [vmem:[%s11306_s1 + $0xb2c] ss:$16 sps:$4 sm:$0xff]   ;;  %v7967_v55 = vld [vmem:[%s11306_s1 + $0xb20] ss:$16 sps:$4 sm:$0xff]  }
 0x12b   :  { %5042 = vmatpush1.bf16.msra.mxu0 %v7875_v56  ;;  %5575 = vmatpush1.bf16.msra.mxu1 %v7878_v57  ;;  %v7970_v56 = vld [vmem:[%s11306_s1 + $0xb28] ss:$16 sps:$4 sm:$0xff]   ;;  %v7975_v57 = vld [vmem:[%s11306_s1 + $0xb44] ss:$16 sps:$4 sm:$0xff]  }
 0x12c   :  { %5043 = vmatprep.subr.bf16.mxu0 %v7883_v58  ;;  %5576 = vmatprep.subr.bf16.mxu1 %v7886_v59  ;;  %v7978_v58 = vld [vmem:[%s11306_s1 + $0xb4c] ss:$16 sps:$4 sm:$0xff]   ;;  %v7973_v59 = vld [vmem:[%s11306_s1 + $0xb40] ss:$16 sps:$4 sm:$0xff]  }
 0x12f   :  { %5044 = vmatpush1.bf16.msra.mxu0 %v7881_v60  ;;  %5577 = vmatpush1.bf16.msra.mxu1 %v7884_v61  ;;  %v7976_v60 = vld [vmem:[%s11306_s1 + $0xb48] ss:$16 sps:$4 sm:$0xff]   ;;  %v7981_v61 = vld [vmem:[%s11306_s1 + $0xb64] ss:$16 sps:$4 sm:$0xff]  }
 0x130   :  { %5045 = vmatprep.subr.bf16.mxu0 %v7889_v62  ;;  %5578 = vmatprep.subr.bf16.mxu1 %v7892_v63  ;;  %v7984_v62 = vld [vmem:[%s11306_s1 + $0xb6c] ss:$16 sps:$4 sm:$0xff]   ;;  %v7979_v63 = vld [vmem:[%s11306_s1 + $0xb60] ss:$16 sps:$4 sm:$0xff]  }
 0x133   :  { %5046 = vmatpush1.bf16.msra.mxu0 %v7887_v0  ;;  %5579 = vmatpush1.bf16.msra.mxu1 %v7890_v1  ;;  %v7982_v0 = vld [vmem:[%s11306_s1 + $0xb68] ss:$16 sps:$4 sm:$0xff]   ;;  %v7987_v1 = vld [vmem:[%s11306_s1 + $0xb84] ss:$16 sps:$4 sm:$0xff]  }
 0x134   :  { %5047 = vmatprep.subr.bf16.mxu0 %v7895_v2  ;;  %5580 = vmatprep.subr.bf16.mxu1 %v7898_v3  ;;  %v7990_v2 = vld [vmem:[%s11306_s1 + $0xb8c] ss:$16 sps:$4 sm:$0xff]   ;;  %v7985_v3 = vld [vmem:[%s11306_s1 + $0xb80] ss:$16 sps:$4 sm:$0xff]  }
 0x137   :  { %5048 = vmatpush1.bf16.msra.mxu0 %v7893_v4  ;;  %5581 = vmatpush1.bf16.msra.mxu1 %v7896_v5  ;;  %v7988_v4 = vld [vmem:[%s11306_s1 + $0xb88] ss:$16 sps:$4 sm:$0xff]   ;;  %v7993_v5 = vld [vmem:[%s11306_s1 + $0xba4] ss:$16 sps:$4 sm:$0xff]  }
 0x138   :  { %5049 = vmatprep.subr.bf16.mxu0 %v7901_v6  ;;  %5582 = vmatprep.subr.bf16.mxu1 %v7904_v7  ;;  %v7996_v6 = vld [vmem:[%s11306_s1 + $0xbac] ss:$16 sps:$4 sm:$0xff]   ;;  %v7991_v7 = vld [vmem:[%s11306_s1 + $0xba0] ss:$16 sps:$4 sm:$0xff]  }
 0x13b   :  { %5050 = vmatpush1.bf16.msra.mxu0 %v7899_v8  ;;  %5583 = vmatpush1.bf16.msra.mxu1 %v7902_v9  ;;  %v7994_v8 = vld [vmem:[%s11306_s1 + $0xba8] ss:$16 sps:$4 sm:$0xff]   ;;  %v7999_v9 = vld [vmem:[%s11306_s1 + $0xbc4] ss:$16 sps:$4 sm:$0xff]  }
 0x13c   :  { %5051 = vmatprep.subr.bf16.mxu0 %v7907_v10  ;;  %5584 = vmatprep.subr.bf16.mxu1 %v7910_v12  ;;  %v8002_v10 = vld [vmem:[%s11306_s1 + $0xbcc] ss:$16 sps:$4 sm:$0xff]   ;;  %v7997_v12 = vld [vmem:[%s11306_s1 + $0xbc0] ss:$16 sps:$4 sm:$0xff]  }
 0x13f   :  { %5052 = vmatpush1.bf16.msra.mxu0 %v7905_v13  ;;  %5585 = vmatpush1.bf16.msra.mxu1 %v7908_v15  ;;  %v8000_v13 = vld [vmem:[%s11306_s1 + $0xbc8] ss:$16 sps:$4 sm:$0xff]   ;;  %v8005_v15 = vld [vmem:[%s11306_s1 + $0xbe4] ss:$16 sps:$4 sm:$0xff]  }
 0x140   :  { %5062 = vmatprep.subr.bf16.mxu0 %v7915_v11  ;;  %5595 = vmatprep.subr.bf16.mxu1 %v7918_v17  ;;  %v8008_v11 = vld [vmem:[%s11306_s1 + $0xbec] ss:$16 sps:$4 sm:$0xff]   ;;  %v8003_v17 = vld [vmem:[%s11306_s1 + $0xbe0] ss:$16 sps:$4 sm:$0xff]  }
 0x142   :  { %5054 = vmatmul.mubr.bf16.vlgmr.msra.gmra.mrb[0].mxu0 %v6440_v14  ;;  %5587 = vmatmul.mubr.bf16.vlgmr.msra.gmra.mrb[0].mxu1 %v6440_v14  ;;  %v8006_v14 = vld [vmem:[%s11306_s1 + $0xbe8] ss:$16 sps:$4 sm:$0xff]  }
 0x143   :  { %5063 = vmatpush1.bf16.msra.mxu0 %v7913_v19  ;;  %5596 = vmatpush1.bf16.msra.mxu1 %v7916_v20  ;;  %v8013_v19 = vld [vmem:[%s11306_s1 + $0xc04] ss:$16 sps:$4 sm:$0xff]   ;;  %v8016_v20 = vld [vmem:[%s11306_s1 + $0xc0c] ss:$16 sps:$4 sm:$0xff]  }
 0x144   :  { %5064 = vmatprep.subr.bf16.mxu0 %v7921_v21  ;;  %5597 = vmatprep.subr.bf16.mxu1 %v7924_v16  ;;  %v9917_v21 = vld [vmem:[%s11307_s0 + $0x30] sm:$0xff]  ;;  %v6442_v16 = vcombine.low %v9716_v18, %v9716_v18  ;;  %v8022_v18 = vld [vmem:[%s11306_s1 + $0xc2c] ss:$16 sps:$4 sm:$0xff]  }
 0x145   :  { %5094 = vmatprep.mubr.bf16.mxu0 %v6443_v22  ;;  %5627 = vmatprep.mubr.bf16.mxu1 %v6443_v22  ;;  %v8011_v22 = vld [vmem:[%s11306_s1 + $0xc00] ss:$16 sps:$4 sm:$0xff]  }
 0x147   :  { %5065 = vmatpush1.bf16.msra.mxu0 %v7919_v23  ;;  %5598 = vmatpush1.bf16.msra.mxu1 %v7922_v24  ;;  %v8014_v23 = vld [vmem:[%s11306_s1 + $0xc08] ss:$16 sps:$4 sm:$0xff]   ;;  %v8019_v24 = vld [vmem:[%s11306_s1 + $0xc24] ss:$16 sps:$4 sm:$0xff]  }
 0x148   :  { %5066 = vmatprep.subr.bf16.mxu0 %v7927_v25  ;;  %5599 = vmatprep.subr.bf16.mxu1 %v7930_v26  ;;  %v6445_v25 = vcombine.high %v9917_v21, %v9917_v21  ;;  %v8017_v26 = vld [vmem:[%s11306_s1 + $0xc20] ss:$16 sps:$4 sm:$0xff]  }
 0x14b   :  { %5067 = vmatpush1.bf16.msra.mxu0 %v7925_v27  ;;  %5600 = vmatpush1.bf16.msra.mxu1 %v7928_v28  ;;  %v8020_v27 = vld [vmem:[%s11306_s1 + $0xc28] ss:$16 sps:$4 sm:$0xff]   ;;  %v8025_v28 = vld [vmem:[%s11306_s1 + $0xc44] ss:$16 sps:$4 sm:$0xff]  }
 0x14c   :  { %5068 = vmatprep.subr.bf16.mxu0 %v7933_v29  ;;  %5601 = vmatprep.subr.bf16.mxu1 %v7936_v30  ;;  %v8028_v29 = vld [vmem:[%s11306_s1 + $0xc4c] ss:$16 sps:$4 sm:$0xff]   ;;  %v8023_v30 = vld [vmem:[%s11306_s1 + $0xc40] ss:$16 sps:$4 sm:$0xff]  }
 0x14f   :  { %5069 = vmatpush1.bf16.msra.mxu0 %v7931_v31  ;;  %5602 = vmatpush1.bf16.msra.mxu1 %v7934_v32  ;;  %v8026_v31 = vld [vmem:[%s11306_s1 + $0xc48] ss:$16 sps:$4 sm:$0xff]   ;;  %v8031_v32 = vld [vmem:[%s11306_s1 + $0xc64] ss:$16 sps:$4 sm:$0xff]  }
 0x150   :  { %5070 = vmatprep.subr.bf16.mxu0 %v7939_v33  ;;  %5603 = vmatprep.subr.bf16.mxu1 %v7942_v34  ;;  %v8034_v33 = vld [vmem:[%s11306_s1 + $0xc6c] ss:$16 sps:$4 sm:$0xff]   ;;  %v8029_v34 = vld [vmem:[%s11306_s1 + $0xc60] ss:$16 sps:$4 sm:$0xff]  }
 0x153   :  { %5071 = vmatpush1.bf16.msra.mxu0 %v7937_v35  ;;  %5604 = vmatpush1.bf16.msra.mxu1 %v7940_v36  ;;  %v8032_v35 = vld [vmem:[%s11306_s1 + $0xc68] ss:$16 sps:$4 sm:$0xff]   ;;  %v8037_v36 = vld [vmem:[%s11306_s1 + $0xc84] ss:$16 sps:$4 sm:$0xff]  }
 0x154   :  { %5072 = vmatprep.subr.bf16.mxu0 %v7945_v37  ;;  %5605 = vmatprep.subr.bf16.mxu1 %v7948_v38  ;;  %v8040_v37 = vld [vmem:[%s11306_s1 + $0xc8c] ss:$16 sps:$4 sm:$0xff]   ;;  %v8035_v38 = vld [vmem:[%s11306_s1 + $0xc80] ss:$16 sps:$4 sm:$0xff]  }
 0x157   :  { %5073 = vmatpush1.bf16.msra.mxu0 %v7943_v39  ;;  %5606 = vmatpush1.bf16.msra.mxu1 %v7946_v40  ;;  %v8038_v39 = vld [vmem:[%s11306_s1 + $0xc88] ss:$16 sps:$4 sm:$0xff]   ;;  %v8043_v40 = vld [vmem:[%s11306_s1 + $0xca4] ss:$16 sps:$4 sm:$0xff]  }
 0x158   :  { %5074 = vmatprep.subr.bf16.mxu0 %v7951_v41  ;;  %5607 = vmatprep.subr.bf16.mxu1 %v7954_v42  ;;  %v8046_v41 = vld [vmem:[%s11306_s1 + $0xcac] ss:$16 sps:$4 sm:$0xff]   ;;  %v8041_v42 = vld [vmem:[%s11306_s1 + $0xca0] ss:$16 sps:$4 sm:$0xff]  }
 0x15b   :  { %5075 = vmatpush1.bf16.msra.mxu0 %v7949_v43  ;;  %5608 = vmatpush1.bf16.msra.mxu1 %v7952_v44  ;;  %v8044_v43 = vld [vmem:[%s11306_s1 + $0xca8] ss:$16 sps:$4 sm:$0xff]   ;;  %v8049_v44 = vld [vmem:[%s11306_s1 + $0xcc4] ss:$16 sps:$4 sm:$0xff]  }
 0x15c   :  { %5076 = vmatprep.subr.bf16.mxu0 %v7957_v45  ;;  %5609 = vmatprep.subr.bf16.mxu1 %v7960_v46  ;;  %v8052_v45 = vld [vmem:[%s11306_s1 + $0xccc] ss:$16 sps:$4 sm:$0xff]   ;;  %v8047_v46 = vld [vmem:[%s11306_s1 + $0xcc0] ss:$16 sps:$4 sm:$0xff]  }
 0x15f   :  { %5077 = vmatpush1.bf16.msra.mxu0 %v7955_v47  ;;  %5610 = vmatpush1.bf16.msra.mxu1 %v7958_v48  ;;  %v8050_v47 = vld [vmem:[%s11306_s1 + $0xcc8] ss:$16 sps:$4 sm:$0xff]   ;;  %v8055_v48 = vld [vmem:[%s11306_s1 + $0xce4] ss:$16 sps:$4 sm:$0xff]  }
 0x160   :  { %5078 = vmatprep.subr.bf16.mxu0 %v7963_v49  ;;  %5611 = vmatprep.subr.bf16.mxu1 %v7966_v50  ;;  %v8058_v49 = vld [vmem:[%s11306_s1 + $0xcec] ss:$16 sps:$4 sm:$0xff]   ;;  %v8053_v50 = vld [vmem:[%s11306_s1 + $0xce0] ss:$16 sps:$4 sm:$0xff]  }
 0x163   :  { %5079 = vmatpush1.bf16.msra.mxu0 %v7961_v51  ;;  %5612 = vmatpush1.bf16.msra.mxu1 %v7964_v52  ;;  %v8056_v51 = vld [vmem:[%s11306_s1 + $0xce8] ss:$16 sps:$4 sm:$0xff]   ;;  %v8061_v52 = vld [vmem:[%s11306_s1 + $0xd04] ss:$16 sps:$4 sm:$0xff]  }
 0x164   :  { %5080 = vmatprep.subr.bf16.mxu0 %v7969_v53  ;;  %5613 = vmatprep.subr.bf16.mxu1 %v7972_v54  ;;  %v8064_v53 = vld [vmem:[%s11306_s1 + $0xd0c] ss:$16 sps:$4 sm:$0xff]   ;;  %v8059_v54 = vld [vmem:[%s11306_s1 + $0xd00] ss:$16 sps:$4 sm:$0xff]  }
 0x167   :  { %5081 = vmatpush1.bf16.msra.mxu0 %v7967_v55  ;;  %5614 = vmatpush1.bf16.msra.mxu1 %v7970_v56  ;;  %v8062_v55 = vld [vmem:[%s11306_s1 + $0xd08] ss:$16 sps:$4 sm:$0xff]   ;;  %v8067_v56 = vld [vmem:[%s11306_s1 + $0xd24] ss:$16 sps:$4 sm:$0xff]  }
 0x168   :  { %5082 = vmatprep.subr.bf16.mxu0 %v7975_v57  ;;  %5615 = vmatprep.subr.bf16.mxu1 %v7978_v58  ;;  %v8070_v57 = vld [vmem:[%s11306_s1 + $0xd2c] ss:$16 sps:$4 sm:$0xff]   ;;  %v8065_v58 = vld [vmem:[%s11306_s1 + $0xd20] ss:$16 sps:$4 sm:$0xff]  }
 0x16b   :  { %5083 = vmatpush1.bf16.msra.mxu0 %v7973_v59  ;;  %5616 = vmatpush1.bf16.msra.mxu1 %v7976_v60  ;;  %v8068_v59 = vld [vmem:[%s11306_s1 + $0xd28] ss:$16 sps:$4 sm:$0xff]   ;;  %v8073_v60 = vld [vmem:[%s11306_s1 + $0xd44] ss:$16 sps:$4 sm:$0xff]  }
 0x16c   :  { %5084 = vmatprep.subr.bf16.mxu0 %v7981_v61  ;;  %5617 = vmatprep.subr.bf16.mxu1 %v7984_v62  ;;  %v8076_v61 = vld [vmem:[%s11306_s1 + $0xd4c] ss:$16 sps:$4 sm:$0xff]   ;;  %v8071_v62 = vld [vmem:[%s11306_s1 + $0xd40] ss:$16 sps:$4 sm:$0xff]  }
 0x16f   :  { %5085 = vmatpush1.bf16.msra.mxu0 %v7979_v63  ;;  %5618 = vmatpush1.bf16.msra.mxu1 %v7982_v0  ;;  %v8074_v63 = vld [vmem:[%s11306_s1 + $0xd48] ss:$16 sps:$4 sm:$0xff]   ;;  %v8079_v0 = vld [vmem:[%s11306_s1 + $0xd64] ss:$16 sps:$4 sm:$0xff]  }
 0x170   :  { %5086 = vmatprep.subr.bf16.mxu0 %v7987_v1  ;;  %5619 = vmatprep.subr.bf16.mxu1 %v7990_v2  ;;  %v8082_v1 = vld [vmem:[%s11306_s1 + $0xd6c] ss:$16 sps:$4 sm:$0xff]   ;;  %v8077_v2 = vld [vmem:[%s11306_s1 + $0xd60] ss:$16 sps:$4 sm:$0xff]  }
 0x173   :  { %5087 = vmatpush1.bf16.msra.mxu0 %v7985_v3  ;;  %5620 = vmatpush1.bf16.msra.mxu1 %v7988_v4  ;;  %v8080_v3 = vld [vmem:[%s11306_s1 + $0xd68] ss:$16 sps:$4 sm:$0xff]   ;;  %v8085_v4 = vld [vmem:[%s11306_s1 + $0xd84] ss:$16 sps:$4 sm:$0xff]  }
 0x174   :  { %5088 = vmatprep.subr.bf16.mxu0 %v7993_v5  ;;  %5621 = vmatprep.subr.bf16.mxu1 %v7996_v6  ;;  %v8088_v5 = vld [vmem:[%s11306_s1 + $0xd8c] ss:$16 sps:$4 sm:$0xff]   ;;  %v8083_v6 = vld [vmem:[%s11306_s1 + $0xd80] ss:$16 sps:$4 sm:$0xff]  }
 0x177   :  { %5089 = vmatpush1.bf16.msra.mxu0 %v7991_v7  ;;  %5622 = vmatpush1.bf16.msra.mxu1 %v7994_v8  ;;  %v8086_v7 = vld [vmem:[%s11306_s1 + $0xd88] ss:$16 sps:$4 sm:$0xff]   ;;  %v8091_v8 = vld [vmem:[%s11306_s1 + $0xda4] ss:$16 sps:$4 sm:$0xff]  }
 0x178   :  { %5090 = vmatprep.subr.bf16.mxu0 %v7999_v9  ;;  %5623 = vmatprep.subr.bf16.mxu1 %v8002_v10  ;;  %v8094_v9 = vld [vmem:[%s11306_s1 + $0xdac] ss:$16 sps:$4 sm:$0xff]   ;;  %v8089_v10 = vld [vmem:[%s11306_s1 + $0xda0] ss:$16 sps:$4 sm:$0xff]  }
 0x17b   :  { %5091 = vmatpush1.bf16.msra.mxu0 %v7997_v12  ;;  %5624 = vmatpush1.bf16.msra.mxu1 %v8000_v13  ;;  %v8092_v12 = vld [vmem:[%s11306_s1 + $0xda8] ss:$16 sps:$4 sm:$0xff]   ;;  %v8097_v13 = vld [vmem:[%s11306_s1 + $0xdc4] ss:$16 sps:$4 sm:$0xff]  }
 0x17c   :  { %5092 = vmatprep.subr.bf16.mxu0 %v8005_v15  ;;  %5625 = vmatprep.subr.bf16.mxu1 %v8008_v11  ;;  %v8100_v15 = vld [vmem:[%s11306_s1 + $0xdcc] ss:$16 sps:$4 sm:$0xff]   ;;  %v8095_v11 = vld [vmem:[%s11306_s1 + $0xdc0] ss:$16 sps:$4 sm:$0xff]  }
 0x17f   :  { %5093 = vmatpush1.bf16.msra.mxu0 %v8003_v17  ;;  %5626 = vmatpush1.bf16.msra.mxu1 %v8006_v14  ;;  %v8098_v17 = vld [vmem:[%s11306_s1 + $0xdc8] ss:$16 sps:$4 sm:$0xff]   ;;  %v8103_v14 = vld [vmem:[%s11306_s1 + $0xde4] ss:$16 sps:$4 sm:$0xff]  }
 0x180   :  { %5103 = vmatprep.subr.bf16.mxu0 %v8013_v19  ;;  %5636 = vmatprep.subr.bf16.mxu1 %v8016_v20  ;;  %v8106_v19 = vld [vmem:[%s11306_s1 + $0xdec] ss:$16 sps:$4 sm:$0xff]   ;;  %v8101_v20 = vld [vmem:[%s11306_s1 + $0xde0] ss:$16 sps:$4 sm:$0xff]  }
 0x182   :  { %5095 = vmatmul.mubr.bf16.vlgmr.msra.gmra.mrb[0].mxu0 %v6442_v16  ;;  %5628 = vmatmul.mubr.bf16.vlgmr.msra.gmra.mrb[0].mxu1 %v6442_v16  ;;  %v8104_v16 = vld [vmem:[%s11306_s1 + $0xde8] ss:$16 sps:$4 sm:$0xff]  }
 0x183   :  { %5104 = vmatpush1.bf16.msra.mxu0 %v8011_v22  ;;  %5637 = vmatpush1.bf16.msra.mxu1 %v8014_v23  ;;  %v8111_v22 = vld [vmem:[%s11306_s1 + $0xe04] ss:$16 sps:$4 sm:$0xff]   ;;  %v8114_v23 = vld [vmem:[%s11306_s1 + $0xe0c] ss:$16 sps:$4 sm:$0xff]  }
 0x184   :  { %5105 = vmatprep.subr.bf16.mxu0 %v8019_v24  ;;  %5638 = vmatprep.subr.bf16.mxu1 %v8022_v18  ;;  %v10118_v24 = vld [vmem:[%s11307_s0 + $0x38] sm:$0xff]  ;;  %v6444_v18 = vcombine.low %v9917_v21, %v9917_v21 }
 0x185   :  { %5135 = vmatprep.mubr.bf16.mxu0 %v6445_v25  ;;  %5668 = vmatprep.mubr.bf16.mxu1 %v6445_v25  ;;  %v8109_v25 = vld [vmem:[%s11306_s1 + $0xe00] ss:$16 sps:$4 sm:$0xff]   ;;  %v8120_v21 = vld [vmem:[%s11306_s1 + $0xe2c] ss:$16 sps:$4 sm:$0xff]  }
 0x187   :  { %5106 = vmatpush1.bf16.msra.mxu0 %v8017_v26  ;;  %5639 = vmatpush1.bf16.msra.mxu1 %v8020_v27  ;;  %v8112_v26 = vld [vmem:[%s11306_s1 + $0xe08] ss:$16 sps:$4 sm:$0xff]   ;;  %v8117_v27 = vld [vmem:[%s11306_s1 + $0xe24] ss:$16 sps:$4 sm:$0xff]  }
 0x188   :  { %5107 = vmatprep.subr.bf16.mxu0 %v8025_v28  ;;  %5640 = vmatprep.subr.bf16.mxu1 %v8028_v29  ;;  %v6447_v28 = vcombine.high %v10118_v24, %v10118_v24  ;;  %v8115_v29 = vld [vmem:[%s11306_s1 + $0xe20] ss:$16 sps:$4 sm:$0xff]  }
 0x18b   :  { %5108 = vmatpush1.bf16.msra.mxu0 %v8023_v30  ;;  %5641 = vmatpush1.bf16.msra.mxu1 %v8026_v31  ;;  %v8118_v30 = vld [vmem:[%s11306_s1 + $0xe28] ss:$16 sps:$4 sm:$0xff]   ;;  %v8123_v31 = vld [vmem:[%s11306_s1 + $0xe44] ss:$16 sps:$4 sm:$0xff]  }
 0x18c   :  { %5109 = vmatprep.subr.bf16.mxu0 %v8031_v32  ;;  %5642 = vmatprep.subr.bf16.mxu1 %v8034_v33  ;;  %v8126_v32 = vld [vmem:[%s11306_s1 + $0xe4c] ss:$16 sps:$4 sm:$0xff]   ;;  %v8121_v33 = vld [vmem:[%s11306_s1 + $0xe40] ss:$16 sps:$4 sm:$0xff]  }
 0x18f   :  { %5110 = vmatpush1.bf16.msra.mxu0 %v8029_v34  ;;  %5643 = vmatpush1.bf16.msra.mxu1 %v8032_v35  ;;  %v8124_v34 = vld [vmem:[%s11306_s1 + $0xe48] ss:$16 sps:$4 sm:$0xff]   ;;  %v8129_v35 = vld [vmem:[%s11306_s1 + $0xe64] ss:$16 sps:$4 sm:$0xff]  }
 0x190   :  { %5111 = vmatprep.subr.bf16.mxu0 %v8037_v36  ;;  %5644 = vmatprep.subr.bf16.mxu1 %v8040_v37  ;;  %v8132_v36 = vld [vmem:[%s11306_s1 + $0xe6c] ss:$16 sps:$4 sm:$0xff]   ;;  %v8127_v37 = vld [vmem:[%s11306_s1 + $0xe60] ss:$16 sps:$4 sm:$0xff]  }
 0x193   :  { %5112 = vmatpush1.bf16.msra.mxu0 %v8035_v38  ;;  %5645 = vmatpush1.bf16.msra.mxu1 %v8038_v39  ;;  %v8130_v38 = vld [vmem:[%s11306_s1 + $0xe68] ss:$16 sps:$4 sm:$0xff]   ;;  %v8135_v39 = vld [vmem:[%s11306_s1 + $0xe84] ss:$16 sps:$4 sm:$0xff]  }
 0x194   :  { %5113 = vmatprep.subr.bf16.mxu0 %v8043_v40  ;;  %5646 = vmatprep.subr.bf16.mxu1 %v8046_v41  ;;  %v8138_v40 = vld [vmem:[%s11306_s1 + $0xe8c] ss:$16 sps:$4 sm:$0xff]   ;;  %v8133_v41 = vld [vmem:[%s11306_s1 + $0xe80] ss:$16 sps:$4 sm:$0xff]  }
 0x197   :  { %5114 = vmatpush1.bf16.msra.mxu0 %v8041_v42  ;;  %5647 = vmatpush1.bf16.msra.mxu1 %v8044_v43  ;;  %v8136_v42 = vld [vmem:[%s11306_s1 + $0xe88] ss:$16 sps:$4 sm:$0xff]   ;;  %v8141_v43 = vld [vmem:[%s11306_s1 + $0xea4] ss:$16 sps:$4 sm:$0xff]  }
 0x198   :  { %5115 = vmatprep.subr.bf16.mxu0 %v8049_v44  ;;  %5648 = vmatprep.subr.bf16.mxu1 %v8052_v45  ;;  %v8144_v44 = vld [vmem:[%s11306_s1 + $0xeac] ss:$16 sps:$4 sm:$0xff]   ;;  %v8139_v45 = vld [vmem:[%s11306_s1 + $0xea0] ss:$16 sps:$4 sm:$0xff]  }
 0x19b   :  { %5116 = vmatpush1.bf16.msra.mxu0 %v8047_v46  ;;  %5649 = vmatpush1.bf16.msra.mxu1 %v8050_v47  ;;  %v8142_v46 = vld [vmem:[%s11306_s1 + $0xea8] ss:$16 sps:$4 sm:$0xff]   ;;  %v8147_v47 = vld [vmem:[%s11306_s1 + $0xec4] ss:$16 sps:$4 sm:$0xff]  }
 0x19c   :  { %5117 = vmatprep.subr.bf16.mxu0 %v8055_v48  ;;  %5650 = vmatprep.subr.bf16.mxu1 %v8058_v49  ;;  %v8150_v48 = vld [vmem:[%s11306_s1 + $0xecc] ss:$16 sps:$4 sm:$0xff]   ;;  %v8145_v49 = vld [vmem:[%s11306_s1 + $0xec0] ss:$16 sps:$4 sm:$0xff]  }
 0x19f   :  { %5118 = vmatpush1.bf16.msra.mxu0 %v8053_v50  ;;  %5651 = vmatpush1.bf16.msra.mxu1 %v8056_v51  ;;  %v8148_v50 = vld [vmem:[%s11306_s1 + $0xec8] ss:$16 sps:$4 sm:$0xff]   ;;  %v8153_v51 = vld [vmem:[%s11306_s1 + $0xee4] ss:$16 sps:$4 sm:$0xff]  }
 0x1a0   :  { %5119 = vmatprep.subr.bf16.mxu0 %v8061_v52  ;;  %5652 = vmatprep.subr.bf16.mxu1 %v8064_v53  ;;  %v8156_v52 = vld [vmem:[%s11306_s1 + $0xeec] ss:$16 sps:$4 sm:$0xff]   ;;  %v8151_v53 = vld [vmem:[%s11306_s1 + $0xee0] ss:$16 sps:$4 sm:$0xff]  }
 0x1a3   :  { %5120 = vmatpush1.bf16.msra.mxu0 %v8059_v54  ;;  %5653 = vmatpush1.bf16.msra.mxu1 %v8062_v55  ;;  %v8154_v54 = vld [vmem:[%s11306_s1 + $0xee8] ss:$16 sps:$4 sm:$0xff]   ;;  %v8159_v55 = vld [vmem:[%s11306_s1 + $0xf04] ss:$16 sps:$4 sm:$0xff]  }
 0x1a4   :  { %5121 = vmatprep.subr.bf16.mxu0 %v8067_v56  ;;  %5654 = vmatprep.subr.bf16.mxu1 %v8070_v57  ;;  %v8162_v56 = vld [vmem:[%s11306_s1 + $0xf0c] ss:$16 sps:$4 sm:$0xff]   ;;  %v8157_v57 = vld [vmem:[%s11306_s1 + $0xf00] ss:$16 sps:$4 sm:$0xff]  }
 0x1a7   :  { %5122 = vmatpush1.bf16.msra.mxu0 %v8065_v58  ;;  %5655 = vmatpush1.bf16.msra.mxu1 %v8068_v59  ;;  %v8160_v58 = vld [vmem:[%s11306_s1 + $0xf08] ss:$16 sps:$4 sm:$0xff]   ;;  %v8165_v59 = vld [vmem:[%s11306_s1 + $0xf24] ss:$16 sps:$4 sm:$0xff]  }
 0x1a8   :  { %5123 = vmatprep.subr.bf16.mxu0 %v8073_v60  ;;  %5656 = vmatprep.subr.bf16.mxu1 %v8076_v61  ;;  %v8168_v60 = vld [vmem:[%s11306_s1 + $0xf2c] ss:$16 sps:$4 sm:$0xff]   ;;  %v8163_v61 = vld [vmem:[%s11306_s1 + $0xf20] ss:$16 sps:$4 sm:$0xff]  }
 0x1ab   :  { %5124 = vmatpush1.bf16.msra.mxu0 %v8071_v62  ;;  %5657 = vmatpush1.bf16.msra.mxu1 %v8074_v63  ;;  %v8166_v62 = vld [vmem:[%s11306_s1 + $0xf28] ss:$16 sps:$4 sm:$0xff]   ;;  %v8171_v63 = vld [vmem:[%s11306_s1 + $0xf44] ss:$16 sps:$4 sm:$0xff]  }
 0x1ac   :  { %5125 = vmatprep.subr.bf16.mxu0 %v8079_v0  ;;  %5658 = vmatprep.subr.bf16.mxu1 %v8082_v1  ;;  %v8174_v0 = vld [vmem:[%s11306_s1 + $0xf4c] ss:$16 sps:$4 sm:$0xff]   ;;  %v8169_v1 = vld [vmem:[%s11306_s1 + $0xf40] ss:$16 sps:$4 sm:$0xff]  }
 0x1af   :  { %5126 = vmatpush1.bf16.msra.mxu0 %v8077_v2  ;;  %5659 = vmatpush1.bf16.msra.mxu1 %v8080_v3  ;;  %v8172_v2 = vld [vmem:[%s11306_s1 + $0xf48] ss:$16 sps:$4 sm:$0xff]   ;;  %v8177_v3 = vld [vmem:[%s11306_s1 + $0xf64] ss:$16 sps:$4 sm:$0xff]  }
 0x1b0   :  { %5127 = vmatprep.subr.bf16.mxu0 %v8085_v4  ;;  %5660 = vmatprep.subr.bf16.mxu1 %v8088_v5  ;;  %v8180_v4 = vld [vmem:[%s11306_s1 + $0xf6c] ss:$16 sps:$4 sm:$0xff]   ;;  %v8175_v5 = vld [vmem:[%s11306_s1 + $0xf60] ss:$16 sps:$4 sm:$0xff]  }
 0x1b3   :  { %5128 = vmatpush1.bf16.msra.mxu0 %v8083_v6  ;;  %5661 = vmatpush1.bf16.msra.mxu1 %v8086_v7  ;;  %v8178_v6 = vld [vmem:[%s11306_s1 + $0xf68] ss:$16 sps:$4 sm:$0xff]   ;;  %v8183_v7 = vld [vmem:[%s11306_s1 + $0xf84] ss:$16 sps:$4 sm:$0xff]  }
 0x1b4   :  { %5129 = vmatprep.subr.bf16.mxu0 %v8091_v8  ;;  %5662 = vmatprep.subr.bf16.mxu1 %v8094_v9  ;;  %v8186_v8 = vld [vmem:[%s11306_s1 + $0xf8c] ss:$16 sps:$4 sm:$0xff]   ;;  %v8181_v9 = vld [vmem:[%s11306_s1 + $0xf80] ss:$16 sps:$4 sm:$0xff]  }
 0x1b7   :  { %5130 = vmatpush1.bf16.msra.mxu0 %v8089_v10  ;;  %5663 = vmatpush1.bf16.msra.mxu1 %v8092_v12  ;;  %v8184_v10 = vld [vmem:[%s11306_s1 + $0xf88] ss:$16 sps:$4 sm:$0xff]   ;;  %v8189_v12 = vld [vmem:[%s11306_s1 + $0xfa4] ss:$16 sps:$4 sm:$0xff]  }
 0x1b8   :  { %5131 = vmatprep.subr.bf16.mxu0 %v8097_v13  ;;  %5664 = vmatprep.subr.bf16.mxu1 %v8100_v15  ;;  %v8192_v13 = vld [vmem:[%s11306_s1 + $0xfac] ss:$16 sps:$4 sm:$0xff]   ;;  %v8187_v15 = vld [vmem:[%s11306_s1 + $0xfa0] ss:$16 sps:$4 sm:$0xff]  }
 0x1bb   :  { %5132 = vmatpush1.bf16.msra.mxu0 %v8095_v11  ;;  %5665 = vmatpush1.bf16.msra.mxu1 %v8098_v17  ;;  %v8190_v11 = vld [vmem:[%s11306_s1 + $0xfa8] ss:$16 sps:$4 sm:$0xff]   ;;  %v8195_v17 = vld [vmem:[%s11306_s1 + $0xfc4] ss:$16 sps:$4 sm:$0xff]  }
 0x1bc   :  { %5133 = vmatprep.subr.bf16.mxu0 %v8103_v14  ;;  %5666 = vmatprep.subr.bf16.mxu1 %v8106_v19  ;;  %v8198_v14 = vld [vmem:[%s11306_s1 + $0xfcc] ss:$16 sps:$4 sm:$0xff]   ;;  %v8193_v19 = vld [vmem:[%s11306_s1 + $0xfc0] ss:$16 sps:$4 sm:$0xff]  }
 0x1bf   :  { %5134 = vmatpush1.bf16.msra.mxu0 %v8101_v20  ;;  %5667 = vmatpush1.bf16.msra.mxu1 %v8104_v16  ;;  %v8196_v20 = vld [vmem:[%s11306_s1 + $0xfc8] ss:$16 sps:$4 sm:$0xff]   ;;  %v8201_v16 = vld [vmem:[%s11306_s1 + $0xfe4] ss:$16 sps:$4 sm:$0xff]  }
 0x1c0   :  { %5144 = vmatprep.subr.bf16.mxu0 %v8111_v22  ;;  %5677 = vmatprep.subr.bf16.mxu1 %v8114_v23  ;;  %v8204_v22 = vld [vmem:[%s11306_s1 + $0xfec] ss:$16 sps:$4 sm:$0xff]   ;;  %v8199_v23 = vld [vmem:[%s11306_s1 + $0xfe0] ss:$16 sps:$4 sm:$0xff]  }
 0x1c2   :  { %5136 = vmatmul.mubr.bf16.vlgmr.msra.gmra.mrb[0].mxu0 %v6444_v18  ;;  %5669 = vmatmul.mubr.bf16.vlgmr.msra.gmra.mrb[0].mxu1 %v6444_v18  ;;  %v8202_v18 = vld [vmem:[%s11306_s1 + $0xfe8] ss:$16 sps:$4 sm:$0xff]  }
 0x1c3   :  { %5145 = vmatpush1.bf16.msra.mxu0 %v8109_v25  ;;  %5678 = vmatpush1.bf16.msra.mxu1 %v8112_v26  ;;  %v8209_v25 = vld [vmem:[%s11306_s1 + $0x1004] ss:$16 sps:$4 sm:$0xff]   ;;  %v8212_v26 = vld [vmem:[%s11306_s1 + $0x100c] ss:$16 sps:$4 sm:$0xff]  }
 0x1c4   :  { %5146 = vmatprep.subr.bf16.mxu0 %v8117_v27  ;;  %5679 = vmatprep.subr.bf16.mxu1 %v8120_v21  ;;  %v6446_v27 = vcombine.low %v10118_v24, %v10118_v24  ;;  %v10321_v21 = vld [vmem:[%s11307_s0 + $0x40] sm:$0xff] }
 0x1c5   :  { %5176 = vmatprep.mubr.bf16.mxu0 %v6447_v28  ;;  %5709 = vmatprep.mubr.bf16.mxu1 %v6447_v28  ;;  %v8207_v28 = vld [vmem:[%s11306_s1 + $0x1000] ss:$16 sps:$4 sm:$0xff]   ;;  %v8215_v24 = vld [vmem:[%s11306_s1 + $0x1024] ss:$16 sps:$4 sm:$0xff]  }
 0x1c7   :  { %5147 = vmatpush1.bf16.msra.mxu0 %v8115_v29  ;;  %5680 = vmatpush1.bf16.msra.mxu1 %v8118_v30  ;;  %v8210_v29 = vld [vmem:[%s11306_s1 + $0x1008] ss:$16 sps:$4 sm:$0xff]   ;;  %v8218_v30 = vld [vmem:[%s11306_s1 + $0x102c] ss:$16 sps:$4 sm:$0xff]  }
 0x1c8   :  { %5148 = vmatprep.subr.bf16.mxu0 %v8123_v31  ;;  %5681 = vmatprep.subr.bf16.mxu1 %v8126_v32  ;;  %v6449_v31 = vcombine.high %v10321_v21, %v10321_v21  ;;  %v8213_v32 = vld [vmem:[%s11306_s1 + $0x1020] ss:$16 sps:$4 sm:$0xff]  }
 0x1cb   :  { %5149 = vmatpush1.bf16.msra.mxu0 %v8121_v33  ;;  %5682 = vmatpush1.bf16.msra.mxu1 %v8124_v34  ;;  %v8216_v33 = vld [vmem:[%s11306_s1 + $0x1028] ss:$16 sps:$4 sm:$0xff]   ;;  %v8221_v34 = vld [vmem:[%s11306_s1 + $0x1044] ss:$16 sps:$4 sm:$0xff]  }
 0x1cc   :  { %5150 = vmatprep.subr.bf16.mxu0 %v8129_v35  ;;  %5683 = vmatprep.subr.bf16.mxu1 %v8132_v36  ;;  %v8224_v35 = vld [vmem:[%s11306_s1 + $0x104c] ss:$16 sps:$4 sm:$0xff]   ;;  %v8219_v36 = vld [vmem:[%s11306_s1 + $0x1040] ss:$16 sps:$4 sm:$0xff]  }
 0x1cf   :  { %5151 = vmatpush1.bf16.msra.mxu0 %v8127_v37  ;;  %5684 = vmatpush1.bf16.msra.mxu1 %v8130_v38  ;;  %v8222_v37 = vld [vmem:[%s11306_s1 + $0x1048] ss:$16 sps:$4 sm:$0xff]   ;;  %v8227_v38 = vld [vmem:[%s11306_s1 + $0x1064] ss:$16 sps:$4 sm:$0xff]  }
 0x1d0   :  { %5152 = vmatprep.subr.bf16.mxu0 %v8135_v39  ;;  %5685 = vmatprep.subr.bf16.mxu1 %v8138_v40  ;;  %v8230_v39 = vld [vmem:[%s11306_s1 + $0x106c] ss:$16 sps:$4 sm:$0xff]   ;;  %v8225_v40 = vld [vmem:[%s11306_s1 + $0x1060] ss:$16 sps:$4 sm:$0xff]  }
 0x1d3   :  { %5153 = vmatpush1.bf16.msra.mxu0 %v8133_v41  ;;  %5686 = vmatpush1.bf16.msra.mxu1 %v8136_v42  ;;  %v8228_v41 = vld [vmem:[%s11306_s1 + $0x1068] ss:$16 sps:$4 sm:$0xff]   ;;  %v8233_v42 = vld [vmem:[%s11306_s1 + $0x1084] ss:$16 sps:$4 sm:$0xff]  }
 0x1d4   :  { %5154 = vmatprep.subr.bf16.mxu0 %v8141_v43  ;;  %5687 = vmatprep.subr.bf16.mxu1 %v8144_v44  ;;  %v8236_v43 = vld [vmem:[%s11306_s1 + $0x108c] ss:$16 sps:$4 sm:$0xff]   ;;  %v8231_v44 = vld [vmem:[%s11306_s1 + $0x1080] ss:$16 sps:$4 sm:$0xff]  }
 0x1d7   :  { %5155 = vmatpush1.bf16.msra.mxu0 %v8139_v45  ;;  %5688 = vmatpush1.bf16.msra.mxu1 %v8142_v46  ;;  %v8234_v45 = vld [vmem:[%s11306_s1 + $0x1088] ss:$16 sps:$4 sm:$0xff]   ;;  %v8239_v46 = vld [vmem:[%s11306_s1 + $0x10a4] ss:$16 sps:$4 sm:$0xff]  }
 0x1d8   :  { %5156 = vmatprep.subr.bf16.mxu0 %v8147_v47  ;;  %5689 = vmatprep.subr.bf16.mxu1 %v8150_v48  ;;  %v8242_v47 = vld [vmem:[%s11306_s1 + $0x10ac] ss:$16 sps:$4 sm:$0xff]   ;;  %v8237_v48 = vld [vmem:[%s11306_s1 + $0x10a0] ss:$16 sps:$4 sm:$0xff]  }
 0x1db   :  { %5157 = vmatpush1.bf16.msra.mxu0 %v8145_v49  ;;  %5690 = vmatpush1.bf16.msra.mxu1 %v8148_v50  ;;  %v8240_v49 = vld [vmem:[%s11306_s1 + $0x10a8] ss:$16 sps:$4 sm:$0xff]   ;;  %v8245_v50 = vld [vmem:[%s11306_s1 + $0x10c4] ss:$16 sps:$4 sm:$0xff]  }
 0x1dc   :  { %5158 = vmatprep.subr.bf16.mxu0 %v8153_v51  ;;  %5691 = vmatprep.subr.bf16.mxu1 %v8156_v52  ;;  %v8248_v51 = vld [vmem:[%s11306_s1 + $0x10cc] ss:$16 sps:$4 sm:$0xff]   ;;  %v8243_v52 = vld [vmem:[%s11306_s1 + $0x10c0] ss:$16 sps:$4 sm:$0xff]  }
 0x1df   :  { %5159 = vmatpush1.bf16.msra.mxu0 %v8151_v53  ;;  %5692 = vmatpush1.bf16.msra.mxu1 %v8154_v54  ;;  %v8246_v53 = vld [vmem:[%s11306_s1 + $0x10c8] ss:$16 sps:$4 sm:$0xff]   ;;  %v8251_v54 = vld [vmem:[%s11306_s1 + $0x10e4] ss:$16 sps:$4 sm:$0xff]  }
 0x1e0   :  { %5160 = vmatprep.subr.bf16.mxu0 %v8159_v55  ;;  %5693 = vmatprep.subr.bf16.mxu1 %v8162_v56  ;;  %v8254_v55 = vld [vmem:[%s11306_s1 + $0x10ec] ss:$16 sps:$4 sm:$0xff]   ;;  %v8249_v56 = vld [vmem:[%s11306_s1 + $0x10e0] ss:$16 sps:$4 sm:$0xff]  }
 0x1e3   :  { %5161 = vmatpush1.bf16.msra.mxu0 %v8157_v57  ;;  %5694 = vmatpush1.bf16.msra.mxu1 %v8160_v58  ;;  %v8252_v57 = vld [vmem:[%s11306_s1 + $0x10e8] ss:$16 sps:$4 sm:$0xff]   ;;  %v8257_v58 = vld [vmem:[%s11306_s1 + $0x1104] ss:$16 sps:$4 sm:$0xff]  }
 0x1e4   :  { %5162 = vmatprep.subr.bf16.mxu0 %v8165_v59  ;;  %5695 = vmatprep.subr.bf16.mxu1 %v8168_v60  ;;  %v8260_v59 = vld [vmem:[%s11306_s1 + $0x110c] ss:$16 sps:$4 sm:$0xff]   ;;  %v8255_v60 = vld [vmem:[%s11306_s1 + $0x1100] ss:$16 sps:$4 sm:$0xff]  }
 0x1e7   :  { %5163 = vmatpush1.bf16.msra.mxu0 %v8163_v61  ;;  %5696 = vmatpush1.bf16.msra.mxu1 %v8166_v62  ;;  %v8258_v61 = vld [vmem:[%s11306_s1 + $0x1108] ss:$16 sps:$4 sm:$0xff]   ;;  %v8263_v62 = vld [vmem:[%s11306_s1 + $0x1124] ss:$16 sps:$4 sm:$0xff]  }
 0x1e8   :  { %5164 = vmatprep.subr.bf16.mxu0 %v8171_v63  ;;  %5697 = vmatprep.subr.bf16.mxu1 %v8174_v0  ;;  %v8266_v63 = vld [vmem:[%s11306_s1 + $0x112c] ss:$16 sps:$4 sm:$0xff]   ;;  %v8261_v0 = vld [vmem:[%s11306_s1 + $0x1120] ss:$16 sps:$4 sm:$0xff]  }
 0x1eb   :  { %5165 = vmatpush1.bf16.msra.mxu0 %v8169_v1  ;;  %5698 = vmatpush1.bf16.msra.mxu1 %v8172_v2  ;;  %v8264_v1 = vld [vmem:[%s11306_s1 + $0x1128] ss:$16 sps:$4 sm:$0xff]   ;;  %v8269_v2 = vld [vmem:[%s11306_s1 + $0x1144] ss:$16 sps:$4 sm:$0xff]  }
 0x1ec   :  { %5166 = vmatprep.subr.bf16.mxu0 %v8177_v3  ;;  %5699 = vmatprep.subr.bf16.mxu1 %v8180_v4  ;;  %v8272_v3 = vld [vmem:[%s11306_s1 + $0x114c] ss:$16 sps:$4 sm:$0xff]   ;;  %v8267_v4 = vld [vmem:[%s11306_s1 + $0x1140] ss:$16 sps:$4 sm:$0xff]  }
 0x1ef   :  { %5167 = vmatpush1.bf16.msra.mxu0 %v8175_v5  ;;  %5700 = vmatpush1.bf16.msra.mxu1 %v8178_v6  ;;  %v8270_v5 = vld [vmem:[%s11306_s1 + $0x1148] ss:$16 sps:$4 sm:$0xff]   ;;  %v8275_v6 = vld [vmem:[%s11306_s1 + $0x1164] ss:$16 sps:$4 sm:$0xff]  }
 0x1f0   :  { %5168 = vmatprep.subr.bf16.mxu0 %v8183_v7  ;;  %5701 = vmatprep.subr.bf16.mxu1 %v8186_v8  ;;  %v8278_v7 = vld [vmem:[%s11306_s1 + $0x116c] ss:$16 sps:$4 sm:$0xff]   ;;  %v8273_v8 = vld [vmem:[%s11306_s1 + $0x1160] ss:$16 sps:$4 sm:$0xff]  }
 0x1f3   :  { %5169 = vmatpush1.bf16.msra.mxu0 %v8181_v9  ;;  %5702 = vmatpush1.bf16.msra.mxu1 %v8184_v10  ;;  %v8276_v9 = vld [vmem:[%s11306_s1 + $0x1168] ss:$16 sps:$4 sm:$0xff]   ;;  %v8281_v10 = vld [vmem:[%s11306_s1 + $0x1184] ss:$16 sps:$4 sm:$0xff]  }
 0x1f4   :  { %5170 = vmatprep.subr.bf16.mxu0 %v8189_v12  ;;  %5703 = vmatprep.subr.bf16.mxu1 %v8192_v13  ;;  %v8284_v12 = vld [vmem:[%s11306_s1 + $0x118c] ss:$16 sps:$4 sm:$0xff]   ;;  %v8279_v13 = vld [vmem:[%s11306_s1 + $0x1180] ss:$16 sps:$4 sm:$0xff]  }
 0x1f7   :  { %5171 = vmatpush1.bf16.msra.mxu0 %v8187_v15  ;;  %5704 = vmatpush1.bf16.msra.mxu1 %v8190_v11  ;;  %v8282_v15 = vld [vmem:[%s11306_s1 + $0x1188] ss:$16 sps:$4 sm:$0xff]   ;;  %v8287_v11 = vld [vmem:[%s11306_s1 + $0x11a4] ss:$16 sps:$4 sm:$0xff]  }
 0x1f8   :  { %5172 = vmatprep.subr.bf16.mxu0 %v8195_v17  ;;  %5705 = vmatprep.subr.bf16.mxu1 %v8198_v14  ;;  %v8290_v17 = vld [vmem:[%s11306_s1 + $0x11ac] ss:$16 sps:$4 sm:$0xff]   ;;  %v8285_v14 = vld [vmem:[%s11306_s1 + $0x11a0] ss:$16 sps:$4 sm:$0xff]  }
 0x1fb   :  { %5173 = vmatpush1.bf16.msra.mxu0 %v8193_v19  ;;  %5706 = vmatpush1.bf16.msra.mxu1 %v8196_v20  ;;  %v8288_v19 = vld [vmem:[%s11306_s1 + $0x11a8] ss:$16 sps:$4 sm:$0xff]   ;;  %v8293_v20 = vld [vmem:[%s11306_s1 + $0x11c4] ss:$16 sps:$4 sm:$0xff]  }
 0x1fc   :  { %5174 = vmatprep.subr.bf16.mxu0 %v8201_v16  ;;  %5707 = vmatprep.subr.bf16.mxu1 %v8204_v22  ;;  %v8296_v16 = vld [vmem:[%s11306_s1 + $0x11cc] ss:$16 sps:$4 sm:$0xff]   ;;  %v8291_v22 = vld [vmem:[%s11306_s1 + $0x11c0] ss:$16 sps:$4 sm:$0xff]  }
 0x1ff   :  { %5175 = vmatpush1.bf16.msra.mxu0 %v8199_v23  ;;  %5708 = vmatpush1.bf16.msra.mxu1 %v8202_v18  ;;  %v8294_v23 = vld [vmem:[%s11306_s1 + $0x11c8] ss:$16 sps:$4 sm:$0xff]   ;;  %v8299_v18 = vld [vmem:[%s11306_s1 + $0x11e4] ss:$16 sps:$4 sm:$0xff]  }
 0x200   :  { %5185 = vmatprep.subr.bf16.mxu0 %v8209_v25  ;;  %5718 = vmatprep.subr.bf16.mxu1 %v8212_v26  ;;  %v8302_v25 = vld [vmem:[%s11306_s1 + $0x11ec] ss:$16 sps:$4 sm:$0xff]   ;;  %v8297_v26 = vld [vmem:[%s11306_s1 + $0x11e0] ss:$16 sps:$4 sm:$0xff]  }
 0x202   :  { %5177 = vmatmul.mubr.bf16.vlgmr.msra.gmra.mrb[0].mxu0 %v6446_v27  ;;  %5710 = vmatmul.mubr.bf16.vlgmr.msra.gmra.mrb[0].mxu1 %v6446_v27  ;;  %v8300_v27 = vld [vmem:[%s11306_s1 + $0x11e8] ss:$16 sps:$4 sm:$0xff]  }
 0x203   :  { %5186 = vmatpush1.bf16.msra.mxu0 %v8207_v28  ;;  %5719 = vmatpush1.bf16.msra.mxu1 %v8210_v29  ;;  %v8307_v28 = vld [vmem:[%s11306_s1 + $0x1204] ss:$16 sps:$4 sm:$0xff]   ;;  %v8310_v29 = vld [vmem:[%s11306_s1 + $0x120c] ss:$16 sps:$4 sm:$0xff]  }
 0x204   :  { %5187 = vmatprep.subr.bf16.mxu0 %v8215_v24  ;;  %5720 = vmatprep.subr.bf16.mxu1 %v8218_v30  ;;  %v6448_v24 = vcombine.low %v10321_v21, %v10321_v21  ;;  %v10522_v30 = vld [vmem:[%s11307_s0 + $0x48] sm:$0xff]  ;;  %v8313_v21 = vld [vmem:[%s11306_s1 + $0x1224] ss:$16 sps:$4 sm:$0xff]  }
 0x205   :  { %5217 = vmatprep.mubr.bf16.mxu0 %v6449_v31  ;;  %5750 = vmatprep.mubr.bf16.mxu1 %v6449_v31  ;;  %v8305_v31 = vld [vmem:[%s11306_s1 + $0x1200] ss:$16 sps:$4 sm:$0xff]  }
 0x207   :  { %5188 = vmatpush1.bf16.msra.mxu0 %v8213_v32  ;;  %5721 = vmatpush1.bf16.msra.mxu1 %v8216_v33  ;;  %v8308_v32 = vld [vmem:[%s11306_s1 + $0x1208] ss:$16 sps:$4 sm:$0xff]   ;;  %v8316_v33 = vld [vmem:[%s11306_s1 + $0x122c] ss:$16 sps:$4 sm:$0xff]  }
 0x208   :  { %5189 = vmatprep.subr.bf16.mxu0 %v8221_v34  ;;  %5722 = vmatprep.subr.bf16.mxu1 %v8224_v35  ;;  %v6451_v34 = vcombine.high %v10522_v30, %v10522_v30  ;;  %v8311_v35 = vld [vmem:[%s11306_s1 + $0x1220] ss:$16 sps:$4 sm:$0xff]  }
 0x20b   :  { %5190 = vmatpush1.bf16.msra.mxu0 %v8219_v36  ;;  %5723 = vmatpush1.bf16.msra.mxu1 %v8222_v37  ;;  %v8314_v36 = vld [vmem:[%s11306_s1 + $0x1228] ss:$16 sps:$4 sm:$0xff]   ;;  %v8319_v37 = vld [vmem:[%s11306_s1 + $0x1244] ss:$16 sps:$4 sm:$0xff]  }
 0x20c   :  { %5191 = vmatprep.subr.bf16.mxu0 %v8227_v38  ;;  %5724 = vmatprep.subr.bf16.mxu1 %v8230_v39  ;;  %v8322_v38 = vld [vmem:[%s11306_s1 + $0x124c] ss:$16 sps:$4 sm:$0xff]   ;;  %v8317_v39 = vld [vmem:[%s11306_s1 + $0x1240] ss:$16 sps:$4 sm:$0xff]  }
 0x20f   :  { %5192 = vmatpush1.bf16.msra.mxu0 %v8225_v40  ;;  %5725 = vmatpush1.bf16.msra.mxu1 %v8228_v41  ;;  %v8320_v40 = vld [vmem:[%s11306_s1 + $0x1248] ss:$16 sps:$4 sm:$0xff]   ;;  %v8325_v41 = vld [vmem:[%s11306_s1 + $0x1264] ss:$16 sps:$4 sm:$0xff]  }
 0x210   :  { %5193 = vmatprep.subr.bf16.mxu0 %v8233_v42  ;;  %5726 = vmatprep.subr.bf16.mxu1 %v8236_v43  ;;  %v8328_v42 = vld [vmem:[%s11306_s1 + $0x126c] ss:$16 sps:$4 sm:$0xff]   ;;  %v8323_v43 = vld [vmem:[%s11306_s1 + $0x1260] ss:$16 sps:$4 sm:$0xff]  }
 0x213   :  { %5194 = vmatpush1.bf16.msra.mxu0 %v8231_v44  ;;  %5727 = vmatpush1.bf16.msra.mxu1 %v8234_v45  ;;  %v8326_v44 = vld [vmem:[%s11306_s1 + $0x1268] ss:$16 sps:$4 sm:$0xff]   ;;  %v8331_v45 = vld [vmem:[%s11306_s1 + $0x1284] ss:$16 sps:$4 sm:$0xff]  }
 0x214   :  { %5195 = vmatprep.subr.bf16.mxu0 %v8239_v46  ;;  %5728 = vmatprep.subr.bf16.mxu1 %v8242_v47  ;;  %v8334_v46 = vld [vmem:[%s11306_s1 + $0x128c] ss:$16 sps:$4 sm:$0xff]   ;;  %v8329_v47 = vld [vmem:[%s11306_s1 + $0x1280] ss:$16 sps:$4 sm:$0xff]  }
 0x217   :  { %5196 = vmatpush1.bf16.msra.mxu0 %v8237_v48  ;;  %5729 = vmatpush1.bf16.msra.mxu1 %v8240_v49  ;;  %v8332_v48 = vld [vmem:[%s11306_s1 + $0x1288] ss:$16 sps:$4 sm:$0xff]   ;;  %v8337_v49 = vld [vmem:[%s11306_s1 + $0x12a4] ss:$16 sps:$4 sm:$0xff]  }
 0x218   :  { %5197 = vmatprep.subr.bf16.mxu0 %v8245_v50  ;;  %5730 = vmatprep.subr.bf16.mxu1 %v8248_v51  ;;  %v8340_v50 = vld [vmem:[%s11306_s1 + $0x12ac] ss:$16 sps:$4 sm:$0xff]   ;;  %v8335_v51 = vld [vmem:[%s11306_s1 + $0x12a0] ss:$16 sps:$4 sm:$0xff]  }
 0x21b   :  { %5198 = vmatpush1.bf16.msra.mxu0 %v8243_v52  ;;  %5731 = vmatpush1.bf16.msra.mxu1 %v8246_v53  ;;  %v8338_v52 = vld [vmem:[%s11306_s1 + $0x12a8] ss:$16 sps:$4 sm:$0xff]   ;;  %v8343_v53 = vld [vmem:[%s11306_s1 + $0x12c4] ss:$16 sps:$4 sm:$0xff]  }
 0x21c   :  { %5199 = vmatprep.subr.bf16.mxu0 %v8251_v54  ;;  %5732 = vmatprep.subr.bf16.mxu1 %v8254_v55  ;;  %v8346_v54 = vld [vmem:[%s11306_s1 + $0x12cc] ss:$16 sps:$4 sm:$0xff]   ;;  %v8341_v55 = vld [vmem:[%s11306_s1 + $0x12c0] ss:$16 sps:$4 sm:$0xff]  }
 0x21f   :  { %5200 = vmatpush1.bf16.msra.mxu0 %v8249_v56  ;;  %5733 = vmatpush1.bf16.msra.mxu1 %v8252_v57  ;;  %v8344_v56 = vld [vmem:[%s11306_s1 + $0x12c8] ss:$16 sps:$4 sm:$0xff]   ;;  %v8349_v57 = vld [vmem:[%s11306_s1 + $0x12e4] ss:$16 sps:$4 sm:$0xff]  }
 0x220   :  { %5201 = vmatprep.subr.bf16.mxu0 %v8257_v58  ;;  %5734 = vmatprep.subr.bf16.mxu1 %v8260_v59  ;;  %v8352_v58 = vld [vmem:[%s11306_s1 + $0x12ec] ss:$16 sps:$4 sm:$0xff]   ;;  %v8347_v59 = vld [vmem:[%s11306_s1 + $0x12e0] ss:$16 sps:$4 sm:$0xff]  }
 0x223   :  { %5202 = vmatpush1.bf16.msra.mxu0 %v8255_v60  ;;  %5735 = vmatpush1.bf16.msra.mxu1 %v8258_v61  ;;  %v8350_v60 = vld [vmem:[%s11306_s1 + $0x12e8] ss:$16 sps:$4 sm:$0xff]   ;;  %v8355_v61 = vld [vmem:[%s11306_s1 + $0x1304] ss:$16 sps:$4 sm:$0xff]  }
 0x224   :  { %5203 = vmatprep.subr.bf16.mxu0 %v8263_v62  ;;  %5736 = vmatprep.subr.bf16.mxu1 %v8266_v63  ;;  %v8358_v62 = vld [vmem:[%s11306_s1 + $0x130c] ss:$16 sps:$4 sm:$0xff]   ;;  %v8353_v63 = vld [vmem:[%s11306_s1 + $0x1300] ss:$16 sps:$4 sm:$0xff]  }
 0x227   :  { %5204 = vmatpush1.bf16.msra.mxu0 %v8261_v0  ;;  %5737 = vmatpush1.bf16.msra.mxu1 %v8264_v1  ;;  %v8356_v0 = vld [vmem:[%s11306_s1 + $0x1308] ss:$16 sps:$4 sm:$0xff]   ;;  %v8361_v1 = vld [vmem:[%s11306_s1 + $0x1324] ss:$16 sps:$4 sm:$0xff]  }
 0x228   :  { %5205 = vmatprep.subr.bf16.mxu0 %v8269_v2  ;;  %5738 = vmatprep.subr.bf16.mxu1 %v8272_v3  ;;  %v8364_v2 = vld [vmem:[%s11306_s1 + $0x132c] ss:$16 sps:$4 sm:$0xff]   ;;  %v8359_v3 = vld [vmem:[%s11306_s1 + $0x1320] ss:$16 sps:$4 sm:$0xff]  }
 0x22b   :  { %5206 = vmatpush1.bf16.msra.mxu0 %v8267_v4  ;;  %5739 = vmatpush1.bf16.msra.mxu1 %v8270_v5  ;;  %v8362_v4 = vld [vmem:[%s11306_s1 + $0x1328] ss:$16 sps:$4 sm:$0xff]   ;;  %v8367_v5 = vld [vmem:[%s11306_s1 + $0x1344] ss:$16 sps:$4 sm:$0xff]  }
 0x22c   :  { %5207 = vmatprep.subr.bf16.mxu0 %v8275_v6  ;;  %5740 = vmatprep.subr.bf16.mxu1 %v8278_v7  ;;  %v8370_v6 = vld [vmem:[%s11306_s1 + $0x134c] ss:$16 sps:$4 sm:$0xff]   ;;  %v8365_v7 = vld [vmem:[%s11306_s1 + $0x1340] ss:$16 sps:$4 sm:$0xff]  }
 0x22f   :  { %5208 = vmatpush1.bf16.msra.mxu0 %v8273_v8  ;;  %5741 = vmatpush1.bf16.msra.mxu1 %v8276_v9  ;;  %v8368_v8 = vld [vmem:[%s11306_s1 + $0x1348] ss:$16 sps:$4 sm:$0xff]   ;;  %v8373_v9 = vld [vmem:[%s11306_s1 + $0x1364] ss:$16 sps:$4 sm:$0xff]  }
 0x230   :  { %5209 = vmatprep.subr.bf16.mxu0 %v8281_v10  ;;  %5742 = vmatprep.subr.bf16.mxu1 %v8284_v12  ;;  %v8376_v10 = vld [vmem:[%s11306_s1 + $0x136c] ss:$16 sps:$4 sm:$0xff]   ;;  %v8371_v12 = vld [vmem:[%s11306_s1 + $0x1360] ss:$16 sps:$4 sm:$0xff]  }
 0x233   :  { %5210 = vmatpush1.bf16.msra.mxu0 %v8279_v13  ;;  %5743 = vmatpush1.bf16.msra.mxu1 %v8282_v15  ;;  %v8374_v13 = vld [vmem:[%s11306_s1 + $0x1368] ss:$16 sps:$4 sm:$0xff]   ;;  %v8379_v15 = vld [vmem:[%s11306_s1 + $0x1384] ss:$16 sps:$4 sm:$0xff]  }
 0x234   :  { %5211 = vmatprep.subr.bf16.mxu0 %v8287_v11  ;;  %5744 = vmatprep.subr.bf16.mxu1 %v8290_v17  ;;  %v8382_v11 = vld [vmem:[%s11306_s1 + $0x138c] ss:$16 sps:$4 sm:$0xff]   ;;  %v8377_v17 = vld [vmem:[%s11306_s1 + $0x1380] ss:$16 sps:$4 sm:$0xff]  }
 0x237   :  { %5212 = vmatpush1.bf16.msra.mxu0 %v8285_v14  ;;  %5745 = vmatpush1.bf16.msra.mxu1 %v8288_v19  ;;  %v8380_v14 = vld [vmem:[%s11306_s1 + $0x1388] ss:$16 sps:$4 sm:$0xff]   ;;  %v8385_v19 = vld [vmem:[%s11306_s1 + $0x13a4] ss:$16 sps:$4 sm:$0xff]  }
 0x238   :  { %5213 = vmatprep.subr.bf16.mxu0 %v8293_v20  ;;  %5746 = vmatprep.subr.bf16.mxu1 %v8296_v16  ;;  %v8388_v20 = vld [vmem:[%s11306_s1 + $0x13ac] ss:$16 sps:$4 sm:$0xff]   ;;  %v8383_v16 = vld [vmem:[%s11306_s1 + $0x13a0] ss:$16 sps:$4 sm:$0xff]  }
 0x23b   :  { %5214 = vmatpush1.bf16.msra.mxu0 %v8291_v22  ;;  %5747 = vmatpush1.bf16.msra.mxu1 %v8294_v23  ;;  %v8386_v22 = vld [vmem:[%s11306_s1 + $0x13a8] ss:$16 sps:$4 sm:$0xff]   ;;  %v8391_v23 = vld [vmem:[%s11306_s1 + $0x13c4] ss:$16 sps:$4 sm:$0xff]  }
 0x23c   :  { %5215 = vmatprep.subr.bf16.mxu0 %v8299_v18  ;;  %5748 = vmatprep.subr.bf16.mxu1 %v8302_v25  ;;  %v8394_v18 = vld [vmem:[%s11306_s1 + $0x13cc] ss:$16 sps:$4 sm:$0xff]   ;;  %v8389_v25 = vld [vmem:[%s11306_s1 + $0x13c0] ss:$16 sps:$4 sm:$0xff]  }
 0x23f   :  { %5216 = vmatpush1.bf16.msra.mxu0 %v8297_v26  ;;  %5749 = vmatpush1.bf16.msra.mxu1 %v8300_v27  ;;  %v8392_v26 = vld [vmem:[%s11306_s1 + $0x13c8] ss:$16 sps:$4 sm:$0xff]   ;;  %v8397_v27 = vld [vmem:[%s11306_s1 + $0x13e4] ss:$16 sps:$4 sm:$0xff]  }
 0x240   :  { %5226 = vmatprep.subr.bf16.mxu0 %v8307_v28  ;;  %5759 = vmatprep.subr.bf16.mxu1 %v8310_v29  ;;  %v8400_v28 = vld [vmem:[%s11306_s1 + $0x13ec] ss:$16 sps:$4 sm:$0xff]   ;;  %v8395_v29 = vld [vmem:[%s11306_s1 + $0x13e0] ss:$16 sps:$4 sm:$0xff]  }
 0x242   :  { %5218 = vmatmul.mubr.bf16.vlgmr.msra.gmra.mrb[0].mxu0 %v6448_v24  ;;  %5751 = vmatmul.mubr.bf16.vlgmr.msra.gmra.mrb[0].mxu1 %v6448_v24  ;;  %v8398_v24 = vld [vmem:[%s11306_s1 + $0x13e8] ss:$16 sps:$4 sm:$0xff]  }
 0x243   :  { %5227 = vmatpush1.bf16.msra.mxu0 %v8305_v31  ;;  %5760 = vmatpush1.bf16.msra.mxu1 %v8308_v32  ;;  %v8405_v31 = vld [vmem:[%s11306_s1 + $0x1404] ss:$16 sps:$4 sm:$0xff]   ;;  %v8408_v32 = vld [vmem:[%s11306_s1 + $0x140c] ss:$16 sps:$4 sm:$0xff]  }
 0x244   :  { %5228 = vmatprep.subr.bf16.mxu0 %v8313_v21  ;;  %5761 = vmatprep.subr.bf16.mxu1 %v8316_v33  ;;  %v6450_v21 = vcombine.low %v10522_v30, %v10522_v30  ;;  %v10723_v33 = vld [vmem:[%s11307_s0 + $0x50] sm:$0xff] }
 0x245   :  { %5258 = vmatprep.mubr.bf16.mxu0 %v6451_v34  ;;  %5791 = vmatprep.mubr.bf16.mxu1 %v6451_v34  ;;  %v8403_v34 = vld [vmem:[%s11306_s1 + $0x1400] ss:$16 sps:$4 sm:$0xff]   ;;  %v8411_v30 = vld [vmem:[%s11306_s1 + $0x1424] ss:$16 sps:$4 sm:$0xff]  }
 0x247   :  { %5229 = vmatpush1.bf16.msra.mxu0 %v8311_v35  ;;  %5762 = vmatpush1.bf16.msra.mxu1 %v8314_v36  ;;  %v8406_v35 = vld [vmem:[%s11306_s1 + $0x1408] ss:$16 sps:$4 sm:$0xff]   ;;  %v8414_v36 = vld [vmem:[%s11306_s1 + $0x142c] ss:$16 sps:$4 sm:$0xff]  }
 0x248   :  { %5230 = vmatprep.subr.bf16.mxu0 %v8319_v37  ;;  %5763 = vmatprep.subr.bf16.mxu1 %v8322_v38  ;;  %v6453_v37 = vcombine.high %v10723_v33, %v10723_v33  ;;  %v8409_v38 = vld [vmem:[%s11306_s1 + $0x1420] ss:$16 sps:$4 sm:$0xff]  }
 0x24b   :  { %5231 = vmatpush1.bf16.msra.mxu0 %v8317_v39  ;;  %5764 = vmatpush1.bf16.msra.mxu1 %v8320_v40  ;;  %v8412_v39 = vld [vmem:[%s11306_s1 + $0x1428] ss:$16 sps:$4 sm:$0xff]   ;;  %v8417_v40 = vld [vmem:[%s11306_s1 + $0x1444] ss:$16 sps:$4 sm:$0xff]  }
 0x24c   :  { %5232 = vmatprep.subr.bf16.mxu0 %v8325_v41  ;;  %5765 = vmatprep.subr.bf16.mxu1 %v8328_v42  ;;  %v8420_v41 = vld [vmem:[%s11306_s1 + $0x144c] ss:$16 sps:$4 sm:$0xff]   ;;  %v8415_v42 = vld [vmem:[%s11306_s1 + $0x1440] ss:$16 sps:$4 sm:$0xff]  }
 0x24f   :  { %5233 = vmatpush1.bf16.msra.mxu0 %v8323_v43  ;;  %5766 = vmatpush1.bf16.msra.mxu1 %v8326_v44  ;;  %v8418_v43 = vld [vmem:[%s11306_s1 + $0x1448] ss:$16 sps:$4 sm:$0xff]   ;;  %v8423_v44 = vld [vmem:[%s11306_s1 + $0x1464] ss:$16 sps:$4 sm:$0xff]  }
 0x250   :  { %5234 = vmatprep.subr.bf16.mxu0 %v8331_v45  ;;  %5767 = vmatprep.subr.bf16.mxu1 %v8334_v46  ;;  %v8426_v45 = vld [vmem:[%s11306_s1 + $0x146c] ss:$16 sps:$4 sm:$0xff]   ;;  %v8421_v46 = vld [vmem:[%s11306_s1 + $0x1460] ss:$16 sps:$4 sm:$0xff]  }
 0x253   :  { %5235 = vmatpush1.bf16.msra.mxu0 %v8329_v47  ;;  %5768 = vmatpush1.bf16.msra.mxu1 %v8332_v48  ;;  %v8424_v47 = vld [vmem:[%s11306_s1 + $0x1468] ss:$16 sps:$4 sm:$0xff]   ;;  %v8429_v48 = vld [vmem:[%s11306_s1 + $0x1484] ss:$16 sps:$4 sm:$0xff]  }
 0x254   :  { %5236 = vmatprep.subr.bf16.mxu0 %v8337_v49  ;;  %5769 = vmatprep.subr.bf16.mxu1 %v8340_v50  ;;  %v8432_v49 = vld [vmem:[%s11306_s1 + $0x148c] ss:$16 sps:$4 sm:$0xff]   ;;  %v8427_v50 = vld [vmem:[%s11306_s1 + $0x1480] ss:$16 sps:$4 sm:$0xff]  }
 0x257   :  { %5237 = vmatpush1.bf16.msra.mxu0 %v8335_v51  ;;  %5770 = vmatpush1.bf16.msra.mxu1 %v8338_v52  ;;  %v8430_v51 = vld [vmem:[%s11306_s1 + $0x1488] ss:$16 sps:$4 sm:$0xff]   ;;  %v8435_v52 = vld [vmem:[%s11306_s1 + $0x14a4] ss:$16 sps:$4 sm:$0xff]  }
 0x258   :  { %5238 = vmatprep.subr.bf16.mxu0 %v8343_v53  ;;  %5771 = vmatprep.subr.bf16.mxu1 %v8346_v54  ;;  %v8438_v53 = vld [vmem:[%s11306_s1 + $0x14ac] ss:$16 sps:$4 sm:$0xff]   ;;  %v8433_v54 = vld [vmem:[%s11306_s1 + $0x14a0] ss:$16 sps:$4 sm:$0xff]  }
 0x25b   :  { %5239 = vmatpush1.bf16.msra.mxu0 %v8341_v55  ;;  %5772 = vmatpush1.bf16.msra.mxu1 %v8344_v56  ;;  %v8436_v55 = vld [vmem:[%s11306_s1 + $0x14a8] ss:$16 sps:$4 sm:$0xff]   ;;  %v8441_v56 = vld [vmem:[%s11306_s1 + $0x14c4] ss:$16 sps:$4 sm:$0xff]  }
 0x25c   :  { %5240 = vmatprep.subr.bf16.mxu0 %v8349_v57  ;;  %5773 = vmatprep.subr.bf16.mxu1 %v8352_v58  ;;  %v8444_v57 = vld [vmem:[%s11306_s1 + $0x14cc] ss:$16 sps:$4 sm:$0xff]   ;;  %v8439_v58 = vld [vmem:[%s11306_s1 + $0x14c0] ss:$16 sps:$4 sm:$0xff]  }
 0x25f   :  { %5241 = vmatpush1.bf16.msra.mxu0 %v8347_v59  ;;  %5774 = vmatpush1.bf16.msra.mxu1 %v8350_v60  ;;  %v8442_v59 = vld [vmem:[%s11306_s1 + $0x14c8] ss:$16 sps:$4 sm:$0xff]   ;;  %v8447_v60 = vld [vmem:[%s11306_s1 + $0x14e4] ss:$16 sps:$4 sm:$0xff]  }
 0x260   :  { %5242 = vmatprep.subr.bf16.mxu0 %v8355_v61  ;;  %5775 = vmatprep.subr.bf16.mxu1 %v8358_v62  ;;  %v8450_v61 = vld [vmem:[%s11306_s1 + $0x14ec] ss:$16 sps:$4 sm:$0xff]   ;;  %v8445_v62 = vld [vmem:[%s11306_s1 + $0x14e0] ss:$16 sps:$4 sm:$0xff]  }
 0x263   :  { %5243 = vmatpush1.bf16.msra.mxu0 %v8353_v63  ;;  %5776 = vmatpush1.bf16.msra.mxu1 %v8356_v0  ;;  %v8448_v63 = vld [vmem:[%s11306_s1 + $0x14e8] ss:$16 sps:$4 sm:$0xff]   ;;  %v8453_v0 = vld [vmem:[%s11306_s1 + $0x1504] ss:$16 sps:$4 sm:$0xff]  }
 0x264   :  { %5244 = vmatprep.subr.bf16.mxu0 %v8361_v1  ;;  %5777 = vmatprep.subr.bf16.mxu1 %v8364_v2  ;;  %v8456_v1 = vld [vmem:[%s11306_s1 + $0x150c] ss:$16 sps:$4 sm:$0xff]   ;;  %v8451_v2 = vld [vmem:[%s11306_s1 + $0x1500] ss:$16 sps:$4 sm:$0xff]  }
 0x267   :  { %5245 = vmatpush1.bf16.msra.mxu0 %v8359_v3  ;;  %5778 = vmatpush1.bf16.msra.mxu1 %v8362_v4  ;;  %v8454_v3 = vld [vmem:[%s11306_s1 + $0x1508] ss:$16 sps:$4 sm:$0xff]   ;;  %v8459_v4 = vld [vmem:[%s11306_s1 + $0x1524] ss:$16 sps:$4 sm:$0xff]  }
 0x268   :  { %5246 = vmatprep.subr.bf16.mxu0 %v8367_v5  ;;  %5779 = vmatprep.subr.bf16.mxu1 %v8370_v6  ;;  %v8462_v5 = vld [vmem:[%s11306_s1 + $0x152c] ss:$16 sps:$4 sm:$0xff]   ;;  %v8457_v6 = vld [vmem:[%s11306_s1 + $0x1520] ss:$16 sps:$4 sm:$0xff]  }
 0x26b   :  { %5247 = vmatpush1.bf16.msra.mxu0 %v8365_v7  ;;  %5780 = vmatpush1.bf16.msra.mxu1 %v8368_v8  ;;  %v8460_v7 = vld [vmem:[%s11306_s1 + $0x1528] ss:$16 sps:$4 sm:$0xff]   ;;  %v8465_v8 = vld [vmem:[%s11306_s1 + $0x1544] ss:$16 sps:$4 sm:$0xff]  }
 0x26c   :  { %5248 = vmatprep.subr.bf16.mxu0 %v8373_v9  ;;  %5781 = vmatprep.subr.bf16.mxu1 %v8376_v10  ;;  %v8468_v9 = vld [vmem:[%s11306_s1 + $0x154c] ss:$16 sps:$4 sm:$0xff]   ;;  %v8463_v10 = vld [vmem:[%s11306_s1 + $0x1540] ss:$16 sps:$4 sm:$0xff]  }
 0x26f   :  { %5249 = vmatpush1.bf16.msra.mxu0 %v8371_v12  ;;  %5782 = vmatpush1.bf16.msra.mxu1 %v8374_v13  ;;  %v8466_v12 = vld [vmem:[%s11306_s1 + $0x1548] ss:$16 sps:$4 sm:$0xff]   ;;  %v8471_v13 = vld [vmem:[%s11306_s1 + $0x1564] ss:$16 sps:$4 sm:$0xff]  }
 0x270   :  { %5250 = vmatprep.subr.bf16.mxu0 %v8379_v15  ;;  %5783 = vmatprep.subr.bf16.mxu1 %v8382_v11  ;;  %v8474_v15 = vld [vmem:[%s11306_s1 + $0x156c] ss:$16 sps:$4 sm:$0xff]   ;;  %v8469_v11 = vld [vmem:[%s11306_s1 + $0x1560] ss:$16 sps:$4 sm:$0xff]  }
 0x273   :  { %5251 = vmatpush1.bf16.msra.mxu0 %v8377_v17  ;;  %5784 = vmatpush1.bf16.msra.mxu1 %v8380_v14  ;;  %v8472_v17 = vld [vmem:[%s11306_s1 + $0x1568] ss:$16 sps:$4 sm:$0xff]   ;;  %v8477_v14 = vld [vmem:[%s11306_s1 + $0x1584] ss:$16 sps:$4 sm:$0xff]  }
 0x274   :  { %5252 = vmatprep.subr.bf16.mxu0 %v8385_v19  ;;  %5785 = vmatprep.subr.bf16.mxu1 %v8388_v20  ;;  %v8480_v19 = vld [vmem:[%s11306_s1 + $0x158c] ss:$16 sps:$4 sm:$0xff]   ;;  %v8475_v20 = vld [vmem:[%s11306_s1 + $0x1580] ss:$16 sps:$4 sm:$0xff]  }
 0x277   :  { %5253 = vmatpush1.bf16.msra.mxu0 %v8383_v16  ;;  %5786 = vmatpush1.bf16.msra.mxu1 %v8386_v22  ;;  %v8478_v16 = vld [vmem:[%s11306_s1 + $0x1588] ss:$16 sps:$4 sm:$0xff]   ;;  %v8483_v22 = vld [vmem:[%s11306_s1 + $0x15a4] ss:$16 sps:$4 sm:$0xff]  }
 0x278   :  { %5254 = vmatprep.subr.bf16.mxu0 %v8391_v23  ;;  %5787 = vmatprep.subr.bf16.mxu1 %v8394_v18  ;;  %v8486_v23 = vld [vmem:[%s11306_s1 + $0x15ac] ss:$16 sps:$4 sm:$0xff]   ;;  %v8481_v18 = vld [vmem:[%s11306_s1 + $0x15a0] ss:$16 sps:$4 sm:$0xff]  }
 0x27b   :  { %5255 = vmatpush1.bf16.msra.mxu0 %v8389_v25  ;;  %5788 = vmatpush1.bf16.msra.mxu1 %v8392_v26  ;;  %v8484_v25 = vld [vmem:[%s11306_s1 + $0x15a8] ss:$16 sps:$4 sm:$0xff]   ;;  %v8489_v26 = vld [vmem:[%s11306_s1 + $0x15c4] ss:$16 sps:$4 sm:$0xff]  }
 0x27c   :  { %5256 = vmatprep.subr.bf16.mxu0 %v8397_v27  ;;  %5789 = vmatprep.subr.bf16.mxu1 %v8400_v28  ;;  %v8492_v27 = vld [vmem:[%s11306_s1 + $0x15cc] ss:$16 sps:$4 sm:$0xff]   ;;  %v8487_v28 = vld [vmem:[%s11306_s1 + $0x15c0] ss:$16 sps:$4 sm:$0xff]  }
 0x27f   :  { %5257 = vmatpush1.bf16.msra.mxu0 %v8395_v29  ;;  %5790 = vmatpush1.bf16.msra.mxu1 %v8398_v24  ;;  %v8490_v29 = vld [vmem:[%s11306_s1 + $0x15c8] ss:$16 sps:$4 sm:$0xff]   ;;  %v8495_v24 = vld [vmem:[%s11306_s1 + $0x15e4] ss:$16 sps:$4 sm:$0xff]  }
 0x280   :  { %5267 = vmatprep.subr.bf16.mxu0 %v8405_v31  ;;  %5800 = vmatprep.subr.bf16.mxu1 %v8408_v32  ;;  %v8498_v31 = vld [vmem:[%s11306_s1 + $0x15ec] ss:$16 sps:$4 sm:$0xff]   ;;  %v8493_v32 = vld [vmem:[%s11306_s1 + $0x15e0] ss:$16 sps:$4 sm:$0xff]  }
 0x282   :  { %5259 = vmatmul.mubr.bf16.vlgmr.msra.gmra.mrb[0].mxu0 %v6450_v21  ;;  %5792 = vmatmul.mubr.bf16.vlgmr.msra.gmra.mrb[0].mxu1 %v6450_v21  ;;  %v8496_v21 = vld [vmem:[%s11306_s1 + $0x15e8] ss:$16 sps:$4 sm:$0xff]  }
 0x283   :  { %5268 = vmatpush1.bf16.msra.mxu0 %v8403_v34  ;;  %5801 = vmatpush1.bf16.msra.mxu1 %v8406_v35  ;;  %v8503_v34 = vld [vmem:[%s11306_s1 + $0x1604] ss:$16 sps:$4 sm:$0xff]   ;;  %v8506_v35 = vld [vmem:[%s11306_s1 + $0x160c] ss:$16 sps:$4 sm:$0xff]  }
 0x284   :  { %5269 = vmatprep.subr.bf16.mxu0 %v8411_v30  ;;  %5802 = vmatprep.subr.bf16.mxu1 %v8414_v36  ;;  %v6452_v30 = vcombine.low %v10723_v33, %v10723_v33  ;;  %v10924_v36 = vld [vmem:[%s11307_s0 + $0x58] sm:$0xff]  ;;  %v8509_v33 = vld [vmem:[%s11306_s1 + $0x1624] ss:$16 sps:$4 sm:$0xff]  }
 0x285   :  { %5299 = vmatprep.mubr.bf16.mxu0 %v6453_v37  ;;  %5832 = vmatprep.mubr.bf16.mxu1 %v6453_v37  ;;  %v8501_v37 = vld [vmem:[%s11306_s1 + $0x1600] ss:$16 sps:$4 sm:$0xff]  }
 0x287   :  { %5270 = vmatpush1.bf16.msra.mxu0 %v8409_v38  ;;  %5803 = vmatpush1.bf16.msra.mxu1 %v8412_v39  ;;  %v8504_v38 = vld [vmem:[%s11306_s1 + $0x1608] ss:$16 sps:$4 sm:$0xff]   ;;  %v8512_v39 = vld [vmem:[%s11306_s1 + $0x162c] ss:$16 sps:$4 sm:$0xff]  }
 0x288   :  { %5271 = vmatprep.subr.bf16.mxu0 %v8417_v40  ;;  %5804 = vmatprep.subr.bf16.mxu1 %v8420_v41  ;;  %v6455_v40 = vcombine.high %v10924_v36, %v10924_v36  ;;  %v8507_v41 = vld [vmem:[%s11306_s1 + $0x1620] ss:$16 sps:$4 sm:$0xff]  }
 0x28b   :  { %5272 = vmatpush1.bf16.msra.mxu0 %v8415_v42  ;;  %5805 = vmatpush1.bf16.msra.mxu1 %v8418_v43  ;;  %v8510_v42 = vld [vmem:[%s11306_s1 + $0x1628] ss:$16 sps:$4 sm:$0xff]   ;;  %v8515_v43 = vld [vmem:[%s11306_s1 + $0x1644] ss:$16 sps:$4 sm:$0xff]  }
 0x28c   :  { %5273 = vmatprep.subr.bf16.mxu0 %v8423_v44  ;;  %5806 = vmatprep.subr.bf16.mxu1 %v8426_v45  ;;  %v8518_v44 = vld [vmem:[%s11306_s1 + $0x164c] ss:$16 sps:$4 sm:$0xff]   ;;  %v8513_v45 = vld [vmem:[%s11306_s1 + $0x1640] ss:$16 sps:$4 sm:$0xff]  }
 0x28f   :  { %5274 = vmatpush1.bf16.msra.mxu0 %v8421_v46  ;;  %5807 = vmatpush1.bf16.msra.mxu1 %v8424_v47  ;;  %v8516_v46 = vld [vmem:[%s11306_s1 + $0x1648] ss:$16 sps:$4 sm:$0xff]   ;;  %v8521_v47 = vld [vmem:[%s11306_s1 + $0x1664] ss:$16 sps:$4 sm:$0xff]  }
 0x290   :  { %5275 = vmatprep.subr.bf16.mxu0 %v8429_v48  ;;  %5808 = vmatprep.subr.bf16.mxu1 %v8432_v49  ;;  %v8524_v48 = vld [vmem:[%s11306_s1 + $0x166c] ss:$16 sps:$4 sm:$0xff]   ;;  %v8519_v49 = vld [vmem:[%s11306_s1 + $0x1660] ss:$16 sps:$4 sm:$0xff]  }
 0x293   :  { %5276 = vmatpush1.bf16.msra.mxu0 %v8427_v50  ;;  %5809 = vmatpush1.bf16.msra.mxu1 %v8430_v51  ;;  %v8522_v50 = vld [vmem:[%s11306_s1 + $0x1668] ss:$16 sps:$4 sm:$0xff]   ;;  %v8527_v51 = vld [vmem:[%s11306_s1 + $0x1684] ss:$16 sps:$4 sm:$0xff]  }
 0x294   :  { %5277 = vmatprep.subr.bf16.mxu0 %v8435_v52  ;;  %5810 = vmatprep.subr.bf16.mxu1 %v8438_v53  ;;  %v8530_v52 = vld [vmem:[%s11306_s1 + $0x168c] ss:$16 sps:$4 sm:$0xff]   ;;  %v8525_v53 = vld [vmem:[%s11306_s1 + $0x1680] ss:$16 sps:$4 sm:$0xff]  }
 0x297   :  { %5278 = vmatpush1.bf16.msra.mxu0 %v8433_v54  ;;  %5811 = vmatpush1.bf16.msra.mxu1 %v8436_v55  ;;  %v8528_v54 = vld [vmem:[%s11306_s1 + $0x1688] ss:$16 sps:$4 sm:$0xff]   ;;  %v8533_v55 = vld [vmem:[%s11306_s1 + $0x16a4] ss:$16 sps:$4 sm:$0xff]  }
 0x298   :  { %5279 = vmatprep.subr.bf16.mxu0 %v8441_v56  ;;  %5812 = vmatprep.subr.bf16.mxu1 %v8444_v57  ;;  %v8536_v56 = vld [vmem:[%s11306_s1 + $0x16ac] ss:$16 sps:$4 sm:$0xff]   ;;  %v8531_v57 = vld [vmem:[%s11306_s1 + $0x16a0] ss:$16 sps:$4 sm:$0xff]  }
 0x29b   :  { %5280 = vmatpush1.bf16.msra.mxu0 %v8439_v58  ;;  %5813 = vmatpush1.bf16.msra.mxu1 %v8442_v59  ;;  %v8534_v58 = vld [vmem:[%s11306_s1 + $0x16a8] ss:$16 sps:$4 sm:$0xff]   ;;  %v8539_v59 = vld [vmem:[%s11306_s1 + $0x16c4] ss:$16 sps:$4 sm:$0xff]  }
 0x29c   :  { %5281 = vmatprep.subr.bf16.mxu0 %v8447_v60  ;;  %5814 = vmatprep.subr.bf16.mxu1 %v8450_v61  ;;  %v8542_v60 = vld [vmem:[%s11306_s1 + $0x16cc] ss:$16 sps:$4 sm:$0xff]   ;;  %v8537_v61 = vld [vmem:[%s11306_s1 + $0x16c0] ss:$16 sps:$4 sm:$0xff]  }
 0x29f   :  { %5282 = vmatpush1.bf16.msra.mxu0 %v8445_v62  ;;  %5815 = vmatpush1.bf16.msra.mxu1 %v8448_v63  ;;  %v8540_v62 = vld [vmem:[%s11306_s1 + $0x16c8] ss:$16 sps:$4 sm:$0xff]   ;;  %v8545_v63 = vld [vmem:[%s11306_s1 + $0x16e4] ss:$16 sps:$4 sm:$0xff]  }
 0x2a0   :  { %5283 = vmatprep.subr.bf16.mxu0 %v8453_v0  ;;  %5816 = vmatprep.subr.bf16.mxu1 %v8456_v1  ;;  %v8548_v0 = vld [vmem:[%s11306_s1 + $0x16ec] ss:$16 sps:$4 sm:$0xff]   ;;  %v8543_v1 = vld [vmem:[%s11306_s1 + $0x16e0] ss:$16 sps:$4 sm:$0xff]  }
 0x2a3   :  { %5284 = vmatpush1.bf16.msra.mxu0 %v8451_v2  ;;  %5817 = vmatpush1.bf16.msra.mxu1 %v8454_v3  ;;  %v8546_v2 = vld [vmem:[%s11306_s1 + $0x16e8] ss:$16 sps:$4 sm:$0xff]   ;;  %v8551_v3 = vld [vmem:[%s11306_s1 + $0x1704] ss:$16 sps:$4 sm:$0xff]  }
 0x2a4   :  { %5285 = vmatprep.subr.bf16.mxu0 %v8459_v4  ;;  %5818 = vmatprep.subr.bf16.mxu1 %v8462_v5  ;;  %v8554_v4 = vld [vmem:[%s11306_s1 + $0x170c] ss:$16 sps:$4 sm:$0xff]   ;;  %v8549_v5 = vld [vmem:[%s11306_s1 + $0x1700] ss:$16 sps:$4 sm:$0xff]  }
 0x2a7   :  { %5286 = vmatpush1.bf16.msra.mxu0 %v8457_v6  ;;  %5819 = vmatpush1.bf16.msra.mxu1 %v8460_v7  ;;  %v8552_v6 = vld [vmem:[%s11306_s1 + $0x1708] ss:$16 sps:$4 sm:$0xff]   ;;  %v8557_v7 = vld [vmem:[%s11306_s1 + $0x1724] ss:$16 sps:$4 sm:$0xff]  }
 0x2a8   :  { %5287 = vmatprep.subr.bf16.mxu0 %v8465_v8  ;;  %5820 = vmatprep.subr.bf16.mxu1 %v8468_v9  ;;  %v8560_v8 = vld [vmem:[%s11306_s1 + $0x172c] ss:$16 sps:$4 sm:$0xff]   ;;  %v8555_v9 = vld [vmem:[%s11306_s1 + $0x1720] ss:$16 sps:$4 sm:$0xff]  }
 0x2ab   :  { %5288 = vmatpush1.bf16.msra.mxu0 %v8463_v10  ;;  %5821 = vmatpush1.bf16.msra.mxu1 %v8466_v12  ;;  %v8558_v10 = vld [vmem:[%s11306_s1 + $0x1728] ss:$16 sps:$4 sm:$0xff]   ;;  %v8563_v12 = vld [vmem:[%s11306_s1 + $0x1744] ss:$16 sps:$4 sm:$0xff]  }
 0x2ac   :  { %5289 = vmatprep.subr.bf16.mxu0 %v8471_v13  ;;  %5822 = vmatprep.subr.bf16.mxu1 %v8474_v15  ;;  %v8566_v13 = vld [vmem:[%s11306_s1 + $0x174c] ss:$16 sps:$4 sm:$0xff]   ;;  %v8561_v15 = vld [vmem:[%s11306_s1 + $0x1740] ss:$16 sps:$4 sm:$0xff]  }
 0x2af   :  { %5290 = vmatpush1.bf16.msra.mxu0 %v8469_v11  ;;  %5823 = vmatpush1.bf16.msra.mxu1 %v8472_v17  ;;  %v8564_v11 = vld [vmem:[%s11306_s1 + $0x1748] ss:$16 sps:$4 sm:$0xff]   ;;  %v8569_v17 = vld [vmem:[%s11306_s1 + $0x1764] ss:$16 sps:$4 sm:$0xff]  }
 0x2b0   :  { %5291 = vmatprep.subr.bf16.mxu0 %v8477_v14  ;;  %5824 = vmatprep.subr.bf16.mxu1 %v8480_v19  ;;  %v8572_v14 = vld [vmem:[%s11306_s1 + $0x176c] ss:$16 sps:$4 sm:$0xff]   ;;  %v8567_v19 = vld [vmem:[%s11306_s1 + $0x1760] ss:$16 sps:$4 sm:$0xff]  }
 0x2b3   :  { %5292 = vmatpush1.bf16.msra.mxu0 %v8475_v20  ;;  %5825 = vmatpush1.bf16.msra.mxu1 %v8478_v16  ;;  %v8570_v20 = vld [vmem:[%s11306_s1 + $0x1768] ss:$16 sps:$4 sm:$0xff]   ;;  %v8575_v16 = vld [vmem:[%s11306_s1 + $0x1784] ss:$16 sps:$4 sm:$0xff]  }
 0x2b4   :  { %5293 = vmatprep.subr.bf16.mxu0 %v8483_v22  ;;  %5826 = vmatprep.subr.bf16.mxu1 %v8486_v23  ;;  %v8578_v22 = vld [vmem:[%s11306_s1 + $0x178c] ss:$16 sps:$4 sm:$0xff]   ;;  %v8573_v23 = vld [vmem:[%s11306_s1 + $0x1780] ss:$16 sps:$4 sm:$0xff]  }
 0x2b7   :  { %5294 = vmatpush1.bf16.msra.mxu0 %v8481_v18  ;;  %5827 = vmatpush1.bf16.msra.mxu1 %v8484_v25  ;;  %v8576_v18 = vld [vmem:[%s11306_s1 + $0x1788] ss:$16 sps:$4 sm:$0xff]   ;;  %v8581_v25 = vld [vmem:[%s11306_s1 + $0x17a4] ss:$16 sps:$4 sm:$0xff]  }
 0x2b8   :  { %5295 = vmatprep.subr.bf16.mxu0 %v8489_v26  ;;  %5828 = vmatprep.subr.bf16.mxu1 %v8492_v27  ;;  %v8584_v26 = vld [vmem:[%s11306_s1 + $0x17ac] ss:$16 sps:$4 sm:$0xff]   ;;  %v8579_v27 = vld [vmem:[%s11306_s1 + $0x17a0] ss:$16 sps:$4 sm:$0xff]  }
 0x2bb   :  { %5296 = vmatpush1.bf16.msra.mxu0 %v8487_v28  ;;  %5829 = vmatpush1.bf16.msra.mxu1 %v8490_v29  ;;  %v8582_v28 = vld [vmem:[%s11306_s1 + $0x17a8] ss:$16 sps:$4 sm:$0xff]   ;;  %v8587_v29 = vld [vmem:[%s11306_s1 + $0x17c4] ss:$16 sps:$4 sm:$0xff]  }
 0x2bc   :  { %5297 = vmatprep.subr.bf16.mxu0 %v8495_v24  ;;  %5830 = vmatprep.subr.bf16.mxu1 %v8498_v31  ;;  %v8590_v24 = vld [vmem:[%s11306_s1 + $0x17cc] ss:$16 sps:$4 sm:$0xff]   ;;  %v8585_v31 = vld [vmem:[%s11306_s1 + $0x17c0] ss:$16 sps:$4 sm:$0xff]  }
 0x2bf   :  { %5298 = vmatpush1.bf16.msra.mxu0 %v8493_v32  ;;  %5831 = vmatpush1.bf16.msra.mxu1 %v8496_v21  ;;  %v8588_v32 = vld [vmem:[%s11306_s1 + $0x17c8] ss:$16 sps:$4 sm:$0xff]   ;;  %v8593_v21 = vld [vmem:[%s11306_s1 + $0x17e4] ss:$16 sps:$4 sm:$0xff]  }
 0x2c0   :  { %5308 = vmatprep.subr.bf16.mxu0 %v8503_v34  ;;  %5841 = vmatprep.subr.bf16.mxu1 %v8506_v35  ;;  %v8596_v34 = vld [vmem:[%s11306_s1 + $0x17ec] ss:$16 sps:$4 sm:$0xff]   ;;  %v8591_v35 = vld [vmem:[%s11306_s1 + $0x17e0] ss:$16 sps:$4 sm:$0xff]  }
 0x2c2   :  { %5300 = vmatmul.mubr.bf16.vlgmr.msra.gmra.mrb[0].mxu0 %v6452_v30  ;;  %5833 = vmatmul.mubr.bf16.vlgmr.msra.gmra.mrb[0].mxu1 %v6452_v30  ;;  %v8594_v30 = vld [vmem:[%s11306_s1 + $0x17e8] ss:$16 sps:$4 sm:$0xff]  }
 0x2c3   :  { %5309 = vmatpush1.bf16.msra.mxu0 %v8501_v37  ;;  %5842 = vmatpush1.bf16.msra.mxu1 %v8504_v38  ;;  %v8601_v37 = vld [vmem:[%s11306_s1 + $0x1804] ss:$16 sps:$4 sm:$0xff]   ;;  %v8604_v38 = vld [vmem:[%s11306_s1 + $0x180c] ss:$16 sps:$4 sm:$0xff]  }
 0x2c4   :  { %5310 = vmatprep.subr.bf16.mxu0 %v8509_v33  ;;  %5843 = vmatprep.subr.bf16.mxu1 %v8512_v39  ;;  %v6454_v33 = vcombine.low %v10924_v36, %v10924_v36  ;;  %v8599_v39 = vld [vmem:[%s11306_s1 + $0x1800] ss:$16 sps:$4 sm:$0xff]   ;;  %v8610_v36 = vld [vmem:[%s11306_s1 + $0x182c] ss:$16 sps:$4 sm:$0xff]  }
 0x2c5   :  { %5340 = vmatprep.mubr.bf16.mxu0 %v6455_v40  ;;  %5873 = vmatprep.mubr.bf16.mxu1 %v6455_v40  ;;  %v8602_v40 = vld [vmem:[%s11306_s1 + $0x1808] ss:$16 sps:$4 sm:$0xff]  }
 0x2c7   :  { %5311 = vmatpush1.bf16.msra.mxu0 %v8507_v41  ;;  %5844 = vmatpush1.bf16.msra.mxu1 %v8510_v42  ;;  %v8607_v41 = vld [vmem:[%s11306_s1 + $0x1824] ss:$16 sps:$4 sm:$0xff]   ;;  %v8605_v42 = vld [vmem:[%s11306_s1 + $0x1820] ss:$16 sps:$4 sm:$0xff]  }
 0x2c8   :  { %5312 = vmatprep.subr.bf16.mxu0 %v8515_v43  ;;  %5845 = vmatprep.subr.bf16.mxu1 %v8518_v44  ;;  %v8608_v43 = vld [vmem:[%s11306_s1 + $0x1828] ss:$16 sps:$4 sm:$0xff]   ;;  %v8613_v44 = vld [vmem:[%s11306_s1 + $0x1844] ss:$16 sps:$4 sm:$0xff]  }
 0x2cb   :  { %5313 = vmatpush1.bf16.msra.mxu0 %v8513_v45  ;;  %5846 = vmatpush1.bf16.msra.mxu1 %v8516_v46  ;;  %v8616_v45 = vld [vmem:[%s11306_s1 + $0x184c] ss:$16 sps:$4 sm:$0xff]   ;;  %v8668_v46 = vmov 0  }
 0x2cc   :  { %5314 = vmatprep.subr.bf16.mxu0 %v8521_v47  ;;  %5847 = vmatprep.subr.bf16.mxu1 %v8524_v48  ;;  %v8611_v47 = vld [vmem:[%s11306_s1 + $0x1840] ss:$16 sps:$4 sm:$0xff]   ;;  %v8614_v48 = vld [vmem:[%s11306_s1 + $0x1848] ss:$16 sps:$4 sm:$0xff]  }
 0x2cf   :  { %5315 = vmatpush1.bf16.msra.mxu0 %v8519_v49  ;;  %5848 = vmatpush1.bf16.msra.mxu1 %v8522_v50  ;;  %v8619_v49 = vld [vmem:[%s11306_s1 + $0x1864] ss:$16 sps:$4 sm:$0xff]   ;;  %v8622_v50 = vld [vmem:[%s11306_s1 + $0x186c] ss:$16 sps:$4 sm:$0xff]  }
 0x2d0   :  { %5316 = vmatprep.subr.bf16.mxu0 %v8527_v51  ;;  %5849 = vmatprep.subr.bf16.mxu1 %v8530_v52  ;;  %v8617_v51 = vld [vmem:[%s11306_s1 + $0x1860] ss:$16 sps:$4 sm:$0xff]   ;;  %v8620_v52 = vld [vmem:[%s11306_s1 + $0x1868] ss:$16 sps:$4 sm:$0xff]  }
 0x2d3   :  { %5317 = vmatpush1.bf16.msra.mxu0 %v8525_v53  ;;  %5850 = vmatpush1.bf16.msra.mxu1 %v8528_v54  ;;  %v8623_v53 = vld [vmem:[%s11307_s0 + $0x60] ss:$0 sps:$4 sm:$0xff]  }
 0x2d4   :  { %5318 = vmatprep.subr.bf16.mxu0 %v8533_v55  ;;  %5851 = vmatprep.subr.bf16.mxu1 %v8536_v56  ;;  %v8624_v54 = vld [vmem:[%s11308_s5 + $0x40] sm:$0xff]  }
 0x2d5   :  { %v8625_v55 = vld [vmem:[%s11308_s5 + $0xc0] sm:$0xff]  }
 0x2d6   :  { %v8626_v56 = vld [vmem:[%s11308_s5] sm:$0xff]  }
 0x2d7   :  { %5319 = vmatpush1.bf16.msra.mxu0 %v8531_v57  ;;  %5852 = vmatpush1.bf16.msra.mxu1 %v8534_v58  ;;  %v8627_v57 = vld [vmem:[%s11308_s5 + $0x80] sm:$0xff]   ;;  %v8628_v58 = vld [vmem:[%s11308_s5 + $0x48] sm:$0xff]  }
 0x2d8   :  { %5320 = vmatprep.subr.bf16.mxu0 %v8539_v59  ;;  %5853 = vmatprep.subr.bf16.mxu1 %v8542_v60  ;;  %v8629_v59 = vld [vmem:[%s11308_s5 + $0xc8] sm:$0xff]  }
 0x2d9   :  { %v8630_v60 = vld [vmem:[%s11308_s5 + $0x8] sm:$0xff]  }
 0x2db   :  { %5321 = vmatpush1.bf16.msra.mxu0 %v8537_v61  ;;  %5854 = vmatpush1.bf16.msra.mxu1 %v8540_v62  ;;  %v8631_v61 = vld [vmem:[%s11308_s5 + $0x88] sm:$0xff]   ;;  %v8632_v62 = vld [vmem:[%s11308_s5 + $0x50] sm:$0xff]  }
 0x2dc   :  { %5322 = vmatprep.subr.bf16.mxu0 %v8545_v63  ;;  %5855 = vmatprep.subr.bf16.mxu1 %v8548_v0  ;;  %v8633_v63 = vld [vmem:[%s11308_s5 + $0xd0] sm:$0xff]  }
 0x2dd   :  { %v8634_v0 = vld [vmem:[%s11308_s5 + $0x10] sm:$0xff]  }
 0x2df   :  { %5323 = vmatpush1.bf16.msra.mxu0 %v8543_v1  ;;  %5856 = vmatpush1.bf16.msra.mxu1 %v8546_v2  ;;  %v8635_v1 = vld [vmem:[%s11308_s5 + $0x90] sm:$0xff]   ;;  %v8636_v2 = vld [vmem:[%s11308_s5 + $0x58] sm:$0xff]  }
 0x2e0   :  { %5324 = vmatprep.subr.bf16.mxu0 %v8551_v3  ;;  %5857 = vmatprep.subr.bf16.mxu1 %v8554_v4  ;;  %v8637_v3 = vld [vmem:[%s11308_s5 + $0xd8] sm:$0xff]  }
 0x2e1   :  { %v8638_v4 = vld [vmem:[%s11308_s5 + $0x18] sm:$0xff]  }
 0x2e3   :  { %5325 = vmatpush1.bf16.msra.mxu0 %v8549_v5  ;;  %5858 = vmatpush1.bf16.msra.mxu1 %v8552_v6  ;;  %v8639_v5 = vld [vmem:[%s11308_s5 + $0x98] sm:$0xff]   ;;  %v8640_v6 = vld [vmem:[%s11308_s5 + $0x60] sm:$0xff]  }
 0x2e4   :  { %5326 = vmatprep.subr.bf16.mxu0 %v8557_v7  ;;  %5859 = vmatprep.subr.bf16.mxu1 %v8560_v8  ;;  %v8641_v7 = vld [vmem:[%s11308_s5 + $0xe0] sm:$0xff]  }
 0x2e5   :  { %v8642_v8 = vld [vmem:[%s11308_s5 + $0x20] sm:$0xff]  }
 0x2e7   :  { %5327 = vmatpush1.bf16.msra.mxu0 %v8555_v9  ;;  %5860 = vmatpush1.bf16.msra.mxu1 %v8558_v10  ;;  %v8643_v9 = vld [vmem:[%s11308_s5 + $0xa0] sm:$0xff]   ;;  %v8644_v10 = vld [vmem:[%s11308_s5 + $0x68] sm:$0xff]  }
 0x2e8   :  { %5328 = vmatprep.subr.bf16.mxu0 %v8563_v12  ;;  %5861 = vmatprep.subr.bf16.mxu1 %v8566_v13  ;;  %v8645_v12 = vld [vmem:[%s11308_s5 + $0xe8] sm:$0xff]  }
 0x2e9   :  { %v8646_v13 = vld [vmem:[%s11308_s5 + $0x28] sm:$0xff]  }
 0x2eb   :  { %5329 = vmatpush1.bf16.msra.mxu0 %v8561_v15  ;;  %5862 = vmatpush1.bf16.msra.mxu1 %v8564_v11  ;;  %v8647_v15 = vld [vmem:[%s11308_s5 + $0xa8] sm:$0xff]   ;;  %v8648_v11 = vld [vmem:[%s11308_s5 + $0x70] sm:$0xff]  }
 0x2ec   :  { %5330 = vmatprep.subr.bf16.mxu0 %v8569_v17  ;;  %5863 = vmatprep.subr.bf16.mxu1 %v8572_v14  ;;  %v8649_v17 = vld [vmem:[%s11308_s5 + $0xf0] sm:$0xff]  }
 0x2ed   :  { %v8650_v14 = vld [vmem:[%s11308_s5 + $0x30] sm:$0xff]  }
 0x2ef   :  { %5331 = vmatpush1.bf16.msra.mxu0 %v8567_v19  ;;  %5864 = vmatpush1.bf16.msra.mxu1 %v8570_v20  ;;  %v8651_v19 = vld [vmem:[%s11308_s5 + $0xb0] sm:$0xff]   ;;  %v8652_v20 = vld [vmem:[%s11308_s5 + $0x78] sm:$0xff]  }
 0x2f0   :  { %5332 = vmatprep.subr.bf16.mxu0 %v8575_v16  ;;  %5865 = vmatprep.subr.bf16.mxu1 %v8578_v22  ;;  %v8653_v16 = vld [vmem:[%s11308_s5 + $0xf8] sm:$0xff]  }
 0x2f1   :  { %v8654_v22 = vld [vmem:[%s11308_s5 + $0x38] sm:$0xff]  }
 0x2f3   :  { %5333 = vmatpush1.bf16.msra.mxu0 %v8573_v23  ;;  %5866 = vmatpush1.bf16.msra.mxu1 %v8576_v18  ;;  %v8655_v23 = vld [vmem:[%s11308_s5 + $0xb8] sm:$0xff]   ;;  %v826_v18 = vlaneseq }
 0x2f4   :  { %5334 = vmatprep.subr.bf16.mxu0 %v8581_v25  ;;  %5867 = vmatprep.subr.bf16.mxu1 %v8584_v26 }
 0x2f5   :  { %v827_v25 = vshrl.u32 %v826_v18, 7 }
 0x2f7   :  { %5335 = vmatpush1.bf16.msra.mxu0 %v8579_v27  ;;  %5868 = vmatpush1.bf16.msra.mxu1 %v8582_v28  ;;  %v11263_v26 = vsub.s32 0, %v827_v25  ;;  %v11265_v27 = vsub.s32 2, %v827_v25  ;;  %v824_v28 = vld [vmem:[%s11309_s2] sm:$0xf]  ;;  %vm5929_vm1 = vcmp.lt.s32.totalorder %v827_v25, 2 }
 0x2f8   :  { %5336 = vmatprep.subr.bf16.mxu0 %v8587_v29  ;;  %5869 = vmatprep.subr.bf16.mxu1 %v8590_v24  ;;  %v11270_v29 = vsub.s32 1, %v827_v25  ;;  %v11272_v24 = vsub.s32 3, %v827_v25 }
 0x2fb   :  { %5337 = vmatpush1.bf16.msra.mxu0 %v8585_v31  ;;  %5870 = vmatpush1.bf16.msra.mxu1 %v8588_v32  ;;  %v829_v31 = vrot.slane %v824_v28, %v11263_v26  ;;  %v837_v32 = vrot.slane %v824_v28, %v11265_v27 }
 0x2fc   :  { %5338 = vmatprep.subr.bf16.mxu0 %v8593_v21  ;;  %5871 = vmatprep.subr.bf16.mxu1 %v8596_v34  ;;  %v833_v21 = vrot.slane %v824_v28, %v11270_v29  ;;  %v841_v34 = vrot.slane %v824_v28, %v11272_v24 }
 0x2ff   :  { %5339 = vmatpush1.bf16.msra.mxu0 %v8591_v35  ;;  %5872 = vmatpush1.bf16.msra.mxu1 %v8594_v30 }
 0x300   :  { %5349 = vmatprep.subr.bf16.mxu0 %v8601_v37  ;;  %5882 = vmatprep.subr.bf16.mxu1 %v8604_v38 }
 0x302   :  { %5341 = vmatmul.mubr.bf16.vlgmr.msra.gmra.mrb[0].mxu0 %v6454_v33  ;;  %5874 = vmatmul.mubr.bf16.vlgmr.msra.gmra.mrb[0].mxu1 %v6454_v33 }
 0x303   :  { %5350 = vmatpush1.bf16.msra.mxu0 %v8599_v39  ;;  %5883 = vmatpush1.bf16.msra.mxu1 %v8602_v40  ;;  %v8669_v40 = vmov 0.0  }
 0x304   :  { %5351 = vmatprep.subr.bf16.mxu0 %v8607_v41  ;;  %5884 = vmatprep.subr.bf16.mxu1 %v8610_v36  ;;  %v7243_v41 = vsel %vm5929_vm1, 1.0, %v8669_v40 }
 0x305   :  { %5381 = vmatprep.mubr.bf16.mxu0 %v8668_v46  ;;  %5914 = vmatprep.mubr.bf16.mxu1 %v8668_v46 }
 0x307   :  { %5352 = vmatpush1.bf16.msra.mxu0 %v8605_v42  ;;  %5885 = vmatpush1.bf16.msra.mxu1 %v8608_v43 }
 0x308   :  { %5353 = vmatprep.subr.bf16.mxu0 %v8613_v44  ;;  %5886 = vmatprep.subr.bf16.mxu1 %v8616_v45 }
 0x30b   :  { %5354 = vmatpush1.bf16.msra.mxu0 %v8611_v47  ;;  %5887 = vmatpush1.bf16.msra.mxu1 %v8614_v48 }
 0x30c   :  { %5355 = vmatprep.subr.bf16.mxu0 %v8619_v49  ;;  %5888 = vmatprep.subr.bf16.mxu1 %v8622_v50 }
 0x30f   :  { %5356 = vmatpush1.bf16.msra.mxu0 %v8617_v51  ;;  %5889 = vmatpush1.bf16.msra.mxu1 %v8620_v52 }
 0x310   :  { %7277 = vmatprep.subr.bf16.mxu0 %v8624_v54  ;;  %7299 = vmatprep.subr.bf16.mxu1 %v8625_v55 }
 0x312   :  { %7241 = vmatmul.mubr.msk.bf16.vlgmr.msra.gmra.mrb[0].mxu0 %vm4853_vm0, %v8623_v53  ;;  %7242 = vmatmul.mubr.msk.bf16.vlgmr.msra.gmra.mrb[0].mxu1 %vm4853_vm0, %v8623_v53 }
 0x313   :  { %7278 = vmatpush3.bf16.msra.mxu0 %v8626_v56  ;;  %7300 = vmatpush3.bf16.msra.mxu1 %v8627_v57 }
 0x314   :  { %7279 = vmatprep.subr.bf16.mxu0 %v8628_v58  ;;  %7301 = vmatprep.subr.bf16.mxu1 %v8629_v59 }
 0x317   :  { %7280 = vmatpush3.bf16.msra.mxu0 %v8630_v60  ;;  %7302 = vmatpush3.bf16.msra.mxu1 %v8631_v61 }
 0x318   :  { %7281 = vmatprep.subr.bf16.mxu0 %v8632_v62  ;;  %7303 = vmatprep.subr.bf16.mxu1 %v8633_v63 }
 0x31b   :  { %7282 = vmatpush3.bf16.msra.mxu0 %v8634_v0  ;;  %7304 = vmatpush3.bf16.msra.mxu1 %v8635_v1 }
 0x31c   :  { %7283 = vmatprep.subr.bf16.mxu0 %v8636_v2  ;;  %7305 = vmatprep.subr.bf16.mxu1 %v8637_v3 }
 0x31f   :  { %7284 = vmatpush3.bf16.msra.mxu0 %v8638_v4  ;;  %7306 = vmatpush3.bf16.msra.mxu1 %v8639_v5 }
 0x320   :  { %7285 = vmatprep.subr.bf16.mxu0 %v8640_v6  ;;  %7307 = vmatprep.subr.bf16.mxu1 %v8641_v7 }
 0x323   :  { %7286 = vmatpush3.bf16.msra.mxu0 %v8642_v8  ;;  %7308 = vmatpush3.bf16.msra.mxu1 %v8643_v9 }
 0x324   :  { %7287 = vmatprep.subr.bf16.mxu0 %v8644_v10  ;;  %7309 = vmatprep.subr.bf16.mxu1 %v8645_v12 }
 0x327   :  { %7288 = vmatpush3.bf16.msra.mxu0 %v8646_v13  ;;  %7310 = vmatpush3.bf16.msra.mxu1 %v8647_v15 }
 0x328   :  { %7289 = vmatprep.subr.bf16.mxu0 %v8648_v11  ;;  %7311 = vmatprep.subr.bf16.mxu1 %v8649_v17 }
 0x32b   :  { %7290 = vmatpush3.bf16.msra.mxu0 %v8650_v14  ;;  %7312 = vmatpush3.bf16.msra.mxu1 %v8651_v19 }
 0x32c   :  { %7291 = vmatprep.subr.bf16.mxu0 %v8652_v20  ;;  %7313 = vmatprep.subr.bf16.mxu1 %v8653_v16 }
 0x32f   :  { %7292 = vmatpush3.bf16.msra.mxu0 %v8654_v22  ;;  %7314 = vmatpush3.bf16.msra.mxu1 %v8655_v23 }
 0x3e5   :  { %v5383_v35 = vpop.f32.mrb[0].mxu0  ;;  %v5916_v30 = vpop.f32.mrb[0].mxu1 }
 0x3e6   :  { %v7321_v37 = vadd.f32 %v5383_v35, %v829_v31  ;;  %v7323_v38 = vadd.f32 %v5916_v30, %v837_v32  ;;  %v5385_v33 = vpop.f32.mrb[1].mxu0  ;;  %v5918_v39 = vpop.f32.mrb[1].mxu1 }
 0x3e7   :  { %v7322_v36 = vadd.f32 %v5385_v33, %v833_v21  ;;  %v7324_v42 = vadd.f32 %v5918_v39, %v841_v34  ;;  %v5387_v43 = vpop.f32.mrb[2].mxu0  ;;  %v5920_v44 = vpop.f32.mrb[2].mxu1 }
 0x3e8   :  { %v5923_v45 = vmax.f32 %v7321_v37, 0.0  ;;  %v5925_v46 = vmax.f32 %v7323_v38, 0.0  ;;  %v5388_v47 = vpop.f32.mrb[3].mxu0  ;;  %v5921_v48 = vpop.f32.mrb[3].mxu1 }
 0x3e9   :  { %v5924_v49 = vmax.f32 %v7322_v36, 0.0  ;;  %v5926_v50 = vmax.f32 %v7324_v42, 0.0 }
 0x3ea   :  { %v5932_v51 = vmul.f32 %v7243_v41, %v5923_v45  ;;  %v5934_v52 = vmul.f32 %v7243_v41, %v5925_v46 }
 0x3eb   :  { %v5933_v53 = vmul.f32 %v7243_v41, %v5924_v49  ;;  %v5935_v54 = vmul.f32 %v7243_v41, %v5926_v50 }
 0x3ec   :  { %v5936_v55 = vrot.slane %v5932_v51, 4  ;;  %v5948_v56 = vrot.slane %v5934_v52, 4 }
 0x3ed   :  { %v5942_v57 = vrot.slane %v5933_v53, 4  ;;  %v5954_v58 = vrot.slane %v5935_v54, 4 }
 0x3ee   :  { %v5937_v59 = vadd.f32 %v5936_v55, %v5932_v51  ;;  %v5949_v60 = vadd.f32 %v5948_v56, %v5934_v52 }
 0x3ef   :  { %v5943_v61 = vadd.f32 %v5942_v57, %v5933_v53  ;;  %v5955_v62 = vadd.f32 %v5954_v58, %v5935_v54 }
 0x3f0   :  { %v5938_v63 = vrot.slane %v5937_v59, 2  ;;  %v5950_v0 = vrot.slane %v5949_v60, 2 }
 0x3f1   :  { %v5944_v1 = vrot.slane %v5943_v61, 2  ;;  %v5956_v2 = vrot.slane %v5955_v62, 2 }
 0x3f2   :  { %v5939_v3 = vadd.f32 %v5938_v63, %v5937_v59  ;;  %v5951_v4 = vadd.f32 %v5950_v0, %v5949_v60 }
 0x3f3   :  { %v5945_v5 = vadd.f32 %v5944_v1, %v5943_v61  ;;  %v5957_v6 = vadd.f32 %v5956_v2, %v5955_v62 }
 0x3f4   :  { %v5940_v7 = vrot.slane %v5939_v3, 1  ;;  %v5952_v8 = vrot.slane %v5951_v4, 1 }
 0x3f5   :  { %v5946_v9 = vrot.slane %v5945_v5, 1  ;;  %v5958_v10 = vrot.slane %v5957_v6, 1 }
 0x3f6   :  { %v5941_v12 = vadd.f32 %v5940_v7, %v5939_v3  ;;  %v5953_v13 = vadd.f32 %v5952_v8, %v5951_v4  ;;  %v6016_v3 = vld [vmem:[%s11310_s3] sm:$0xf] }
 0x3f7   :  { %v5947_v15 = vadd.f32 %v5946_v9, %v5945_v5  ;;  %v5959_v11 = vadd.f32 %v5958_v10, %v5957_v6  ;;  %v6021_v4 = vrot.slane %v6016_v3, %v11263_v26  ;;  %v6042_v5 = vld [vmem:[%s11311_s4] sm:$0xf]  ;;  %v6029_v7 = vrot.slane %v6016_v3, %v11265_v27 }
 0x3f8   :  { %v5960_v17 = vmul.f32 0.5, %v5941_v12  ;;  %v5962_v14 = vmul.f32 0.5, %v5953_v13  ;;  %v6025_v10 = vrot.slane %v6016_v3, %v11270_v29 }
 0x3f9   :  { %v5961_v19 = vmul.f32 0.5, %v5947_v15  ;;  %v5963_v20 = vmul.f32 0.5, %v5959_v11  ;;  %v6033_v15 = vrot.slane %v6016_v3, %v11272_v24  ;;  %v6047_v11 = vrot.slane %v6042_v5, %v11263_v26 }
 0x3fa   :  { %v5964_v16 = vsub.f32 %v5923_v45, %v5960_v17  ;;  %v5966_v22 = vsub.f32 %v5925_v46, %v5962_v14 }
 0x3fb   :  { %v5965_v23 = vsub.f32 %v5924_v49, %v5961_v19  ;;  %v11278_v18 = vsub.f32 %v5926_v50, %v5963_v20  ;;  %v6051_v20 = vrot.slane %v6042_v5, %v11270_v29 }
 0x3fc   :  { %v5968_v25 = vmul.f32 %v5964_v16, %v5964_v16  ;;  %v5970_v28 = vmul.f32 %v5966_v22, %v5966_v22 }
 0x3fd   :  { %v5969_v31 = vmul.f32 %v5965_v23, %v5965_v23  ;;  %v5971_v32 = vmul.f32 %v11278_v18, %v11278_v18 }
 0x3fe   :  { %v5972_v21 = vmul.f32 %v7243_v41, %v5968_v25  ;;  %v5974_v34 = vmul.f32 %v7243_v41, %v5970_v28  ;;  %v6055_v25 = vrot.slane %v6042_v5, %v11265_v27 }
 0x3ff   :  { %v5973_v35 = vmul.f32 %v7243_v41, %v5969_v31  ;;  %v5975_v30 = vmul.f32 %v7243_v41, %v5971_v32 }
 0x400   :  { %v5976_v37 = vrot.slane %v5972_v21, 4  ;;  %v5988_v38 = vrot.slane %v5974_v34, 4 }
 0x401   :  { %v5982_v33 = vrot.slane %v5973_v35, 4  ;;  %v5994_v39 = vrot.slane %v5975_v30, 4 }
 0x402   :  { %v5977_v40 = vadd.f32 %v5976_v37, %v5972_v21  ;;  %v5989_v36 = vadd.f32 %v5988_v38, %v5974_v34 }
 0x403   :  { %v5983_v42 = vadd.f32 %v5982_v33, %v5973_v35  ;;  %v5995_v43 = vadd.f32 %v5994_v39, %v5975_v30 }
 0x404   :  { %v5978_v44 = vrot.slane %v5977_v40, 2  ;;  %v5990_v45 = vrot.slane %v5989_v36, 2 }
 0x405   :  { %v5984_v46 = vrot.slane %v5983_v42, 2  ;;  %v5996_v47 = vrot.slane %v5995_v43, 2 }
 0x406   :  { %v5979_v48 = vadd.f32 %v5978_v44, %v5977_v40  ;;  %v5991_v49 = vadd.f32 %v5990_v45, %v5989_v36 }
 0x407   :  { %v5985_v50 = vadd.f32 %v5984_v46, %v5983_v42  ;;  %v5997_v51 = vadd.f32 %v5996_v47, %v5995_v43 }
 0x408   :  { %v5980_v52 = vrot.slane %v5979_v48, 1  ;;  %v5992_v53 = vrot.slane %v5991_v49, 1 }
 0x409   :  { %v5986_v54 = vrot.slane %v5985_v50, 1  ;;  %v5998_v41 = vrot.slane %v5997_v51, 1 }
 0x40a   :  { %v5981_v55 = vadd.f32 %v5980_v52, %v5979_v48  ;;  %v5993_v56 = vadd.f32 %v5992_v53, %v5991_v49 }
 0x40b   :  { %v5987_v57 = vadd.f32 %v5986_v54, %v5985_v50  ;;  %v5999_v58 = vadd.f32 %v5998_v41, %v5997_v51 }
 0x40c   :  { %v6000_v59 = vmul.f32 0.5, %v5981_v55  ;;  %v6002_v60 = vmul.f32 0.5, %v5993_v56 }
 0x40d   :  { %v6001_v61 = vmul.f32 0.5, %v5987_v57  ;;  %v6003_v62 = vmul.f32 0.5, %v5999_v58 }
 0x40e   :  { %v6004_v63 = vadd.f32 1e-05, %v6000_v59  ;;  %v6006_v0 = vadd.f32 1e-05, %v6002_v60 }
 0x40f   :  { %v6005_v1 = vadd.f32 1e-05, %v6001_v61  ;;  %v6007_v2 = vadd.f32 1e-05, %v6003_v62 }
 0x410   :  { %8656 = vrsqrt.f32 %v6004_v63 }
 0x411   :  { %8658 = vrsqrt.f32 %v6006_v0 }
 0x412   :  { %8660 = vrsqrt.f32 %v6005_v1 }
 0x413   :  { %8662 = vrsqrt.f32 %v6007_v2 }
 0x41a   :  { %v8657_v6 = vpop.eup %8656 }
 0x41b   :  { %v8659_v8 = vpop.eup %8658  ;;  %v6012_v9 = vmul.f32 %v8657_v6, %v5964_v16  ;;  %v6059_v16 = vrot.slane %v6042_v5, %v11272_v24  ;;  %v7244_v24 = vld [vmem:[%s11312_s6] ss:$0 sm:$0xff] }
 0x41c   :  { %v8661_v12 = vpop.eup %8660  ;;  %v6014_v13 = vmul.f32 %v8659_v8, %v5966_v22 }
 0x41d   :  { %v8663_v17 = vpop.eup %8662  ;;  %v6038_v14 = vmul.f32 %v6021_v4, %v6012_v9  ;;  %v6013_v19 = vmul.f32 %v8661_v12, %v5965_v23 }
 0x41e   :  { %v6040_v28 = vmul.f32 %v6029_v7, %v6014_v13  ;;  %v6015_v31 = vmul.f32 %v8663_v17, %v11278_v18 }
 0x41f   :  { %v6039_v32 = vmul.f32 %v6025_v10, %v6013_v19  ;;  %v6064_v34 = vadd.f32 %v6047_v11, %v6038_v14 }
 0x420   :  { %v6041_v21 = vmul.f32 %v6033_v15, %v6015_v31  ;;  %v6066_v35 = vadd.f32 %v6055_v25, %v6040_v28 }
 0x421   :  { %v6065_v22 = vadd.f32 %v6051_v20, %v6039_v32  ;;  %v6068_v38 = vpack.c.bf16 %v6064_v34, %v6064_v34 }
 0x422   :  { %v6067_v30 = vadd.f32 %v6059_v16, %v6041_v21  ;;  %v6070_v23 = vpack.c.bf16 %v6066_v35, %v6066_v35 }
 0x423   :  { %v6069_v37 = vpack.c.bf16 %v6065_v22, %v6065_v22 }
 0x424   :  { %v6071_v26 = vpack.c.bf16 %v6067_v30, %v6067_v30 }
 0x425   :  { %6367 = vmatprep.mubr.bf16.mxu0 %v6069_v37 }
 0x426   :  { %6407 = vmatprep.mubr.bf16.mxu1 %v6071_v26  ;;  %6368 = vmatmul.mubr.bf16.vlgmr.msra.gmra.mrb[4].mxu0 %v6068_v38 }
 0x427   :  { %6408 = vmatmul.mubr.bf16.vlgmr.msra.gmra.mrb[4].mxu1 %v6070_v23 }
 0x4f9   :  { %v7293_v27 = vpop.f32.mrb[4].mxu0 }
 0x4fa   :  { %v7315_v29 = vpop.f32.mrb[4].mxu1  ;;  %v7294_v18 = vpop.f32.mrb[5].mxu0 }
 0x4fb   :  { %v7295_v33 = vadd.f32 %v7294_v18, %v7293_v27  ;;  %v7316_v39 = vpop.f32.mrb[5].mxu1  ;;  %v7296_v40 = vpop.f32.mrb[6].mxu0 }
 0x4fc   :  { %v7317_v36 = vadd.f32 %v7316_v39, %v7315_v29  ;;  %v7318_v42 = vpop.f32.mrb[6].mxu1  ;;  %v7297_v43 = vpop.f32.mrb[7].mxu0 }
 0x4fd   :  { %v6370_v44 = vadd.f32 %v7295_v33, %v7244_v24  ;;  %v7319_v45 = vpop.f32.mrb[7].mxu1 }
 0x4ff   :  { %v6410_v46 = vadd.f32 %v7317_v36, %v6370_v44 }
 0x501   :  { %v6416_v47 = vsel %vm6415_vm2, %v6410_v46, -inf }
 0x502   :  { %6417 = vmax.xlane.f32.xlu0 %v6416_v47 }
 0x58f   :  { %v6418_v48 = vpop.xlane.xlu0 %6417 }
 0x590   :  { %v6419_v49 = vsub.f32 %v6410_v46, %v6418_v48 }
 0x592   :  { %v6420_v50 = vmul.f32 1.442695, %v6419_v49 }
 0x594   :  { %8664 = vpow2.f32 %v6420_v50 }
 0x59e   :  { %v8665_v51 = vpop.eup %8664 }
 0x59f   :  { %v6422_v52 = vsel %vm6415_vm2, %v8665_v51, 0.0 }
 0x5a0   :  { %6423 = vadd.xlane.f32.xlu0 %v6422_v52 }
 0x62d   :  { %v6424_v53 = vpop.xlane.xlu0 %6423 }
 0x62e   :  { %8666 = vrcp.f32 %v6424_v53 }
 0x638   :  { %v8667_v54 = vpop.eup %8666 }
 0x639   :  { %v6426_v41 = vmul.f32 %v8667_v54, %v8665_v51 }
 0x63b   :  { %6427 = vst.msk [vmem:[%s11313_s7] sm:$0xff] %vm6415_vm2, %v6426_v41 }

</bundles_post_ra>
